<compile_context>
chip_gen: v7x
topology: tpu7x:2x2x1
jax: 0.10.0
libtpu: 0.0.40
codegen_flags: <defaults>
</compile_context>

<pallas_src>
import numpy as np
import jax
import jax.numpy as jnp
from jax.experimental import pallas as pl
from jax.experimental.pallas import tpu as pltpu

_VMEM = pl.BlockSpec(memory_space=pltpu.MemorySpace.VMEM)
_BN_EPS = 1e-5


# ---------------------------------------------------------------------------
# Pallas kernels
# ---------------------------------------------------------------------------
def _conv_bn_gate_kernel(p_ref, w_ref, s_ref, b_ref, g_ref, o_ref):
    # (M, K) @ (K, C) on the MXU; per-channel affine + per-column gated ReLU on the VPU.
    acc = jnp.dot(p_ref[...], w_ref[...], preferred_element_type=jnp.float32)
    acc = acc * s_ref[...] + b_ref[...]
    acc = jnp.where(g_ref[...] > 0.0, jnp.maximum(acc, 0.0), acc)
    o_ref[...] = acc.astype(o_ref.dtype)


def _conv_bn_res_relu_kernel(p_ref, w_ref, s_ref, b_ref, r_ref, o_ref):
    # conv matmul + BN affine + residual add + ReLU, fully fused.
    acc = jnp.dot(p_ref[...], w_ref[...], preferred_element_type=jnp.float32)
    acc = acc * s_ref[...] + b_ref[...] + r_ref[...]
    o_ref[...] = jnp.maximum(acc, 0.0).astype(o_ref.dtype)


def _conv_bias_pool_kernel(p_ref, w_ref, b_ref, pm_ref, o_ref):
    # conv as matmul, then global-average-pool as a second (tiny) matmul, then +bias.
    acc = jnp.dot(p_ref[...], w_ref[...], preferred_element_type=jnp.float32)   # (M, C)
    pooled = jnp.dot(pm_ref[...], acc, preferred_element_type=jnp.float32)      # (N, C)
    o_ref[...] = (pooled + b_ref[...]).astype(o_ref.dtype)


# ---------------------------------------------------------------------------
# Wrappers (im2col / reshapes stay in plain JAX; matmul + fusion in Pallas)
# ---------------------------------------------------------------------------
def conv_bn_gated(patches, w2d, scale, bias, gate):
    m = patches.shape[0]
    c = w2d.shape[1]
    return pl.pallas_call(
        _conv_bn_gate_kernel,
        out_shape=jax.ShapeDtypeStruct((m, c), jnp.float32),
        in_specs=[_VMEM] * 5,
        out_specs=_VMEM,
    )(patches, w2d, scale.reshape(1, c), bias.reshape(1, c), gate.reshape(1, c))


def conv_bn_residual_relu(patches, w2d, scale, bias, residual):
    m = patches.shape[0]
    c = w2d.shape[1]
    return pl.pallas_call(
        _conv_bn_res_relu_kernel,
        out_shape=jax.ShapeDtypeStruct((m, c), jnp.float32),
        in_specs=[_VMEM] * 5,
        out_specs=_VMEM,
    )(patches, w2d, scale.reshape(1, c), bias.reshape(1, c), residual)


def conv_bias_avgpool(patches, w2d, bias, n_batch, spatial):
    c = w2d.shape[1]
    # Block pooling matrix: pooled[n] = mean over that batch's spatial rows.
    pm = jnp.repeat(jnp.eye(n_batch, dtype=jnp.float32), spatial, axis=1) / float(spatial)
    return pl.pallas_call(
        _conv_bias_pool_kernel,
        out_shape=jax.ShapeDtypeStruct((n_batch, c), jnp.float32),
        in_specs=[_VMEM] * 4,
        out_specs=_VMEM,
    )(patches, w2d, bias.reshape(1, c), pm)


def im2col(x_nhwc, ksize, stride, padding):
    """Extract (kh, kw, cin)-ordered patches; returns ((N*OH*OW, k*k*C), OH, OW)."""
    n, h, w, c = x_nhwc.shape
    xp = jnp.pad(x_nhwc, ((0, 0), (padding, padding), (padding, padding), (0, 0)))
    oh = (h + 2 * padding - ksize) // stride + 1
    ow = (w + 2 * padding - ksize) // stride + 1
    cols = []
    for dy in range(ksize):
        for dx in range(ksize):
            cols.append(
                xp[:, dy: dy + stride * (oh - 1) + 1: stride,
                      dx: dx + stride * (ow - 1) + 1: stride, :]
            )
    p = jnp.concatenate(cols, axis=-1)  # (N, OH, OW, k*k*C), element order = kh,kw,cin
    return p.reshape(n * oh * ow, ksize * ksize * c), oh, ow


# ---------------------------------------------------------------------------
# Parameters (deterministic synthetic init; shapes follow the PyTorch module)
# ---------------------------------------------------------------------------
def _bn_fold(cout):
    # gamma=1, beta=0, running_mean=0, running_var=1  ->  scale, bias
    scale = jnp.full((cout,), 1.0 / np.sqrt(1.0 + _BN_EPS), jnp.float32)
    bias = jnp.zeros((cout,), jnp.float32)
    return scale, bias


def make_block_params(key, cin, cout):
    k1, k2, kd = jax.random.split(key, 3)
    # main conv1: 3x3 stride-2, stored (kh, kw, cin, cout) -> (9*cin, cout) to match im2col
    w1 = (jax.random.normal(k1, (3, 3, cin, cout), jnp.float32) * 0.1).reshape(9 * cin, cout)
    # downsample: 1x1 stride-2 conv (standard ResNet downsample_layer), embedded at the
    # centre tap (kh=1, kw=1) of the 3x3 im2col K-space so it can share conv1's patches.
    wd = jax.random.normal(kd, (cin, cout), jnp.float32) * 0.1
    wd3 = jnp.zeros((9 * cin, cout), jnp.float32).at[4 * cin:5 * cin, :].set(wd)
    s, b = _bn_fold(cout)
    return dict(
        w_fused=jnp.concatenate([w1, wd3], axis=1),                 # (9*cin, 2*cout)
        s_fused=jnp.concatenate([s, s]),
        b_fused=jnp.concatenate([b, b]),
        g_fused=jnp.concatenate([jnp.ones((cout,), jnp.float32),    # ReLU on main path
                                 jnp.zeros((cout,), jnp.float32)]),  # no ReLU on shortcut
        w2=(jax.random.normal(k2, (3, 3, cout, cout), jnp.float32) * 0.1).reshape(9 * cout, cout),
        s2=s, b2=b,
    )


def make_params(key):
    keys = jax.random.split(key, 6)
    return dict(
        block1=make_block_params(keys[0], 1, 4),
        block2=make_block_params(keys[1], 4, 8),
        block3=make_block_params(keys[2], 8, 16),
        block4=make_block_params(keys[3], 16, 32),
        conv1_w=(jax.random.normal(keys[4], (3, 3, 32, 64), jnp.float32) * 0.1).reshape(9 * 32, 64),
        conv1_b=jax.random.normal(keys[5], (64,), jnp.float32) * 0.01,
    )


# ---------------------------------------------------------------------------
# Forward pass
# ---------------------------------------------------------------------------
def residual_block(x_nhwc, p):
    n = x_nhwc.shape[0]
    cout = p["w2"].shape[1]
    # one im2col feeds BOTH the stride-2 main conv and the (embedded 1x1) downsample conv
    cols, oh, ow = im2col(x_nhwc, 3, 2, 1)
    both = conv_bn_gated(cols, p["w_fused"], p["s_fused"], p["b_fused"], p["g_fused"])
    o1 = both[:, :cout].reshape(n, oh, ow, cout)   # relu(bn1(conv1(x)))
    res = both[:, cout:]                           # bn_d(conv_d(x)), no relu
    # conv2 (stride 1, pad 1) + bn2 + residual add + relu, fused
    cols2, oh2, ow2 = im2col(o1, 3, 1, 1)
    o2 = conv_bn_residual_relu(cols2, p["w2"], p["s2"], p["b2"], res)
    return o2.reshape(n, oh2, ow2, cout)


def embedding_map_net_forward(x_nchw, params):
    # NCHW -> NHWC
    x = jnp.transpose(x_nchw, (0, 2, 3, 1)).astype(jnp.float32)
    x = residual_block(x, params["block1"])
    x = residual_block(x, params["block2"])
    x = residual_block(x, params["block3"])
    x = residual_block(x, params["block4"])
    # conv_1 (3x3, stride 2, pad 0, bias) fused with AdaptiveAvgPool2d((1,1))
    n = x.shape[0]
    cols, oh, ow = im2col(x, 3, 2, 0)
    pooled = conv_bias_avgpool(cols, params["conv1_w"], params["conv1_b"], n, oh * ow)
    return pooled.reshape(n, 64, 1, 1)             # NCHW, matches PyTorch output


# ---------------------------------------------------------------------------
if __name__ == "__main__":
    key = jax.random.PRNGKey(0)
    k_param, k_x = jax.random.split(key)
    params = make_params(k_param)

    # Module hardcodes Cin=1; 64x64 spatial so conv_1 (k=3, s=2, pad=0) is valid
    # after the four stride-2 blocks (64 -> 32 -> 16 -> 8 -> 4).
    x = jax.random.normal(k_x, (2, 1, 64, 64), jnp.float32)

    fwd = jax.jit(embedding_map_net_forward)
    out = fwd(x, params)
    out = jax.block_until_ready(out)

    assert out.shape == (2, 64, 1, 1), out.shape
    assert out.dtype == jnp.float32
    assert bool(jnp.all(jnp.isfinite(out)))
    print("KERNEL_OK")
</pallas_src>

<mosaic_0001>
module attributes {stable_mosaic.version = 11 : i64} {
  func.func @_conv_bn_gate_kernel(%arg0: memref<2048x9xf32, #tpu.memory_space<vmem>>, %arg1: memref<9x8xf32, #tpu.memory_space<vmem>>, %arg2: memref<1x8xf32, #tpu.memory_space<vmem>>, %arg3: memref<1x8xf32, #tpu.memory_space<vmem>>, %arg4: memref<1x8xf32, #tpu.memory_space<vmem>>, %arg5: memref<2048x8xf32, #tpu.memory_space<vmem>>) attributes {dimension_semantics = [], scalar_prefetch = 0 : i64, scratch_operands = 0 : i64, tpu.core_type = #tpu.core_type<tc>} {
    %c0 = arith.constant 0 : index
    %c0_0 = arith.constant 0 : index
    %0 = vector.load %arg0[%c0, %c0_0] : memref<2048x9xf32, #tpu.memory_space<vmem>>, vector<2048x9xf32>
    %c0_1 = arith.constant 0 : index
    %c0_2 = arith.constant 0 : index
    %1 = vector.load %arg1[%c0_1, %c0_2] : memref<9x8xf32, #tpu.memory_space<vmem>>, vector<9x8xf32>
    %cst = arith.constant dense<0.000000e+00> : vector<2048x8xf32>
    %2 = tpu.matmul %0, %1, %cst {dimension_numbers = #tpu.dot_dimension_numbers<[1], [0], [0], [1], [0, 0, 1, 1], [], []>} : vector<2048x9xf32>, vector<9x8xf32>, vector<2048x8xf32> -> vector<2048x8xf32>
    %c0_3 = arith.constant 0 : index
    %c0_4 = arith.constant 0 : index
    %3 = vector.load %arg2[%c0_3, %c0_4] : memref<1x8xf32, #tpu.memory_space<vmem>>, vector<1x8xf32>
    %4 = vector.broadcast %3 : vector<1x8xf32> to vector<2048x8xf32>
    %5 = arith.mulf %2, %4 : vector<2048x8xf32>
    %c0_5 = arith.constant 0 : index
    %c0_6 = arith.constant 0 : index
    %6 = vector.load %arg3[%c0_5, %c0_6] : memref<1x8xf32, #tpu.memory_space<vmem>>, vector<1x8xf32>
    %7 = vector.broadcast %6 : vector<1x8xf32> to vector<2048x8xf32>
    %8 = arith.addf %5, %7 : vector<2048x8xf32>
    %c0_7 = arith.constant 0 : index
    %c0_8 = arith.constant 0 : index
    %9 = vector.load %arg4[%c0_7, %c0_8] : memref<1x8xf32, #tpu.memory_space<vmem>>, vector<1x8xf32>
    %cst_9 = arith.constant 0.000000e+00 : f32
    %10 = vector.broadcast %cst_9 : f32 to vector<1x8xf32>
    %11 = arith.cmpf ogt, %9, %10 : vector<1x8xf32>
    %cst_10 = arith.constant 0.000000e+00 : f32
    %12 = vector.broadcast %cst_10 : f32 to vector<2048x8xf32>
    %13 = arith.maximumf %8, %12 : vector<2048x8xf32>
    %14 = vector.shape_cast %11 : vector<1x8xi1> to vector<1x8xi1>
    %15 = vector.broadcast %14 : vector<1x8xi1> to vector<2048x8xi1>
    %16 = arith.select %15, %13, %8 : vector<2048x8xi1>, vector<2048x8xf32>
    %c0_11 = arith.constant 0 : index
    %c0_12 = arith.constant 0 : index
    %17 = vector.load %arg5[%c0_11, %c0_12] : memref<2048x8xf32, #tpu.memory_space<vmem>>, vector<2048x8xf32>
    tpu.vector_store %arg5[%c0_11, %c0_12], %16 {strides = array<i32>} : memref<2048x8xf32, #tpu.memory_space<vmem>>, vector<2048x8xf32>,
    return
  }
}

module attributes {stable_mosaic.version = 11 : i64} {
  func.func @_conv_bn_res_relu_kernel(%arg0: memref<2048x36xf32, #tpu.memory_space<vmem>>, %arg1: memref<36x4xf32, #tpu.memory_space<vmem>>, %arg2: memref<1x4xf32, #tpu.memory_space<vmem>>, %arg3: memref<1x4xf32, #tpu.memory_space<vmem>>, %arg4: memref<2048x4xf32, #tpu.memory_space<vmem>>, %arg5: memref<2048x4xf32, #tpu.memory_space<vmem>>) attributes {dimension_semantics = [], scalar_prefetch = 0 : i64, scratch_operands = 0 : i64, tpu.core_type = #tpu.core_type<tc>} {
    %c0 = arith.constant 0 : index
    %c0_0 = arith.constant 0 : index
    %0 = vector.load %arg0[%c0, %c0_0] : memref<2048x36xf32, #tpu.memory_space<vmem>>, vector<2048x36xf32>
    %c0_1 = arith.constant 0 : index
    %c0_2 = arith.constant 0 : index
    %1 = vector.load %arg1[%c0_1, %c0_2] : memref<36x4xf32, #tpu.memory_space<vmem>>, vector<36x4xf32>
    %cst = arith.constant dense<0.000000e+00> : vector<2048x4xf32>
    %2 = tpu.matmul %0, %1, %cst {dimension_numbers = #tpu.dot_dimension_numbers<[1], [0], [0], [1], [0, 0, 1, 1], [], []>} : vector<2048x36xf32>, vector<36x4xf32>, vector<2048x4xf32> -> vector<2048x4xf32>
    %c0_3 = arith.constant 0 : index
    %c0_4 = arith.constant 0 : index
    %3 = vector.load %arg2[%c0_3, %c0_4] : memref<1x4xf32, #tpu.memory_space<vmem>>, vector<1x4xf32>
    %4 = vector.broadcast %3 : vector<1x4xf32> to vector<2048x4xf32>
    %5 = arith.mulf %2, %4 : vector<2048x4xf32>
    %c0_5 = arith.constant 0 : index
    %c0_6 = arith.constant 0 : index
    %6 = vector.load %arg3[%c0_5, %c0_6] : memref<1x4xf32, #tpu.memory_space<vmem>>, vector<1x4xf32>
    %7 = vector.broadcast %6 : vector<1x4xf32> to vector<2048x4xf32>
    %8 = arith.addf %5, %7 : vector<2048x4xf32>
    %c0_7 = arith.constant 0 : index
    %c0_8 = arith.constant 0 : index
    %9 = vector.load %arg4[%c0_7, %c0_8] : memref<2048x4xf32, #tpu.memory_space<vmem>>, vector<2048x4xf32>
    %10 = arith.addf %8, %9 : vector<2048x4xf32>
    %cst_9 = arith.constant 0.000000e+00 : f32
    %11 = vector.broadcast %cst_9 : f32 to vector<2048x4xf32>
    %12 = arith.maximumf %10, %11 : vector<2048x4xf32>
    %c0_10 = arith.constant 0 : index
    %c0_11 = arith.constant 0 : index
    %13 = vector.load %arg5[%c0_10, %c0_11] : memref<2048x4xf32, #tpu.memory_space<vmem>>, vector<2048x4xf32>
    tpu.vector_store %arg5[%c0_10, %c0_11], %12 {strides = array<i32>} : memref<2048x4xf32, #tpu.memory_space<vmem>>, vector<2048x4xf32>,
    return
  }
}

module attributes {stable_mosaic.version = 11 : i64} {
  func.func @_conv_bn_gate_kernel(%arg0: memref<512x36xf32, #tpu.memory_space<vmem>>, %arg1: memref<36x16xf32, #tpu.memory_space<vmem>>, %arg2: memref<1x16xf32, #tpu.memory_space<vmem>>, %arg3: memref<1x16xf32, #tpu.memory_space<vmem>>, %arg4: memref<1x16xf32, #tpu.memory_space<vmem>>, %arg5: memref<512x16xf32, #tpu.memory_space<vmem>>) attributes {dimension_semantics = [], scalar_prefetch = 0 : i64, scratch_operands = 0 : i64, tpu.core_type = #tpu.core_type<tc>} {
    %c0 = arith.constant 0 : index
    %c0_0 = arith.constant 0 : index
    %0 = vector.load %arg0[%c0, %c0_0] : memref<512x36xf32, #tpu.memory_space<vmem>>, vector<512x36xf32>
    %c0_1 = arith.constant 0 : index
    %c0_2 = arith.constant 0 : index
    %1 = vector.load %arg1[%c0_1, %c0_2] : memref<36x16xf32, #tpu.memory_space<vmem>>, vector<36x16xf32>
    %cst = arith.constant dense<0.000000e+00> : vector<512x16xf32>
    %2 = tpu.matmul %0, %1, %cst {dimension_numbers = #tpu.dot_dimension_numbers<[1], [0], [0], [1], [0, 0, 1, 1], [], []>} : vector<512x36xf32>, vector<36x16xf32>, vector<512x16xf32> -> vector<512x16xf32>
    %c0_3 = arith.constant 0 : index
    %c0_4 = arith.constant 0 : index
    %3 = vector.load %arg2[%c0_3, %c0_4] : memref<1x16xf32, #tpu.memory_space<vmem>>, vector<1x16xf32>
    %4 = vector.broadcast %3 : vector<1x16xf32> to vector<512x16xf32>
    %5 = arith.mulf %2, %4 : vector<512x16xf32>
    %c0_5 = arith.constant 0 : index
    %c0_6 = arith.constant 0 : index
    %6 = vector.load %arg3[%c0_5, %c0_6] : memref<1x16xf32, #tpu.memory_space<vmem>>, vector<1x16xf32>
    %7 = vector.broadcast %6 : vector<1x16xf32> to vector<512x16xf32>
    %8 = arith.addf %5, %7 : vector<512x16xf32>
    %c0_7 = arith.constant 0 : index
    %c0_8 = arith.constant 0 : index
    %9 = vector.load %arg4[%c0_7, %c0_8] : memref<1x16xf32, #tpu.memory_space<vmem>>, vector<1x16xf32>
    %cst_9 = arith.constant 0.000000e+00 : f32
    %10 = vector.broadcast %cst_9 : f32 to vector<1x16xf32>
    %11 = arith.cmpf ogt, %9, %10 : vector<1x16xf32>
    %cst_10 = arith.constant 0.000000e+00 : f32
    %12 = vector.broadcast %cst_10 : f32 to vector<512x16xf32>
    %13 = arith.maximumf %8, %12 : vector<512x16xf32>
    %14 = vector.shape_cast %11 : vector<1x16xi1> to vector<1x16xi1>
    %15 = vector.broadcast %14 : vector<1x16xi1> to vector<512x16xi1>
    %16 = arith.select %15, %13, %8 : vector<512x16xi1>, vector<512x16xf32>
    %c0_11 = arith.constant 0 : index
    %c0_12 = arith.constant 0 : index
    %17 = vector.load %arg5[%c0_11, %c0_12] : memref<512x16xf32, #tpu.memory_space<vmem>>, vector<512x16xf32>
    tpu.vector_store %arg5[%c0_11, %c0_12], %16 {strides = array<i32>} : memref<512x16xf32, #tpu.memory_space<vmem>>, vector<512x16xf32>,
    return
  }
}

module attributes {stable_mosaic.version = 11 : i64} {
  func.func @_conv_bn_res_relu_kernel(%arg0: memref<512x72xf32, #tpu.memory_space<vmem>>, %arg1: memref<72x8xf32, #tpu.memory_space<vmem>>, %arg2: memref<1x8xf32, #tpu.memory_space<vmem>>, %arg3: memref<1x8xf32, #tpu.memory_space<vmem>>, %arg4: memref<512x8xf32, #tpu.memory_space<vmem>>, %arg5: memref<512x8xf32, #tpu.memory_space<vmem>>) attributes {dimension_semantics = [], scalar_prefetch = 0 : i64, scratch_operands = 0 : i64, tpu.core_type = #tpu.core_type<tc>} {
    %c0 = arith.constant 0 : index
    %c0_0 = arith.constant 0 : index
    %0 = vector.load %arg0[%c0, %c0_0] : memref<512x72xf32, #tpu.memory_space<vmem>>, vector<512x72xf32>
    %c0_1 = arith.constant 0 : index
    %c0_2 = arith.constant 0 : index
    %1 = vector.load %arg1[%c0_1, %c0_2] : memref<72x8xf32, #tpu.memory_space<vmem>>, vector<72x8xf32>
    %cst = arith.constant dense<0.000000e+00> : vector<512x8xf32>
    %2 = tpu.matmul %0, %1, %cst {dimension_numbers = #tpu.dot_dimension_numbers<[1], [0], [0], [1], [0, 0, 1, 1], [], []>} : vector<512x72xf32>, vector<72x8xf32>, vector<512x8xf32> -> vector<512x8xf32>
    %c0_3 = arith.constant 0 : index
    %c0_4 = arith.constant 0 : index
    %3 = vector.load %arg2[%c0_3, %c0_4] : memref<1x8xf32, #tpu.memory_space<vmem>>, vector<1x8xf32>
    %4 = vector.broadcast %3 : vector<1x8xf32> to vector<512x8xf32>
    %5 = arith.mulf %2, %4 : vector<512x8xf32>
    %c0_5 = arith.constant 0 : index
    %c0_6 = arith.constant 0 : index
    %6 = vector.load %arg3[%c0_5, %c0_6] : memref<1x8xf32, #tpu.memory_space<vmem>>, vector<1x8xf32>
    %7 = vector.broadcast %6 : vector<1x8xf32> to vector<512x8xf32>
    %8 = arith.addf %5, %7 : vector<512x8xf32>
    %c0_7 = arith.constant 0 : index
    %c0_8 = arith.constant 0 : index
    %9 = vector.load %arg4[%c0_7, %c0_8] : memref<512x8xf32, #tpu.memory_space<vmem>>, vector<512x8xf32>
    %10 = arith.addf %8, %9 : vector<512x8xf32>
    %cst_9 = arith.constant 0.000000e+00 : f32
    %11 = vector.broadcast %cst_9 : f32 to vector<512x8xf32>
    %12 = arith.maximumf %10, %11 : vector<512x8xf32>
    %c0_10 = arith.constant 0 : index
    %c0_11 = arith.constant 0 : index
    %13 = vector.load %arg5[%c0_10, %c0_11] : memref<512x8xf32, #tpu.memory_space<vmem>>, vector<512x8xf32>
    tpu.vector_store %arg5[%c0_10, %c0_11], %12 {strides = array<i32>} : memref<512x8xf32, #tpu.memory_space<vmem>>, vector<512x8xf32>,
    return
  }
}

module attributes {stable_mosaic.version = 11 : i64} {
  func.func @_conv_bn_gate_kernel(%arg0: memref<128x72xf32, #tpu.memory_space<vmem>>, %arg1: memref<72x32xf32, #tpu.memory_space<vmem>>, %arg2: memref<1x32xf32, #tpu.memory_space<vmem>>, %arg3: memref<1x32xf32, #tpu.memory_space<vmem>>, %arg4: memref<1x32xf32, #tpu.memory_space<vmem>>, %arg5: memref<128x32xf32, #tpu.memory_space<vmem>>) attributes {dimension_semantics = [], scalar_prefetch = 0 : i64, scratch_operands = 0 : i64, tpu.core_type = #tpu.core_type<tc>} {
    %c0 = arith.constant 0 : index
    %c0_0 = arith.constant 0 : index
    %0 = vector.load %arg0[%c0, %c0_0] : memref<128x72xf32, #tpu.memory_space<vmem>>, vector<128x72xf32>
    %c0_1 = arith.constant 0 : index
    %c0_2 = arith.constant 0 : index
    %1 = vector.load %arg1[%c0_1, %c0_2] : memref<72x32xf32, #tpu.memory_space<vmem>>, vector<72x32xf32>
    %cst = arith.constant dense<0.000000e+00> : vector<128x32xf32>
    %2 = tpu.matmul %0, %1, %cst {dimension_numbers = #tpu.dot_dimension_numbers<[1], [0], [0], [1], [0, 0, 1, 1], [], []>} : vector<128x72xf32>, vector<72x32xf32>, vector<128x32xf32> -> vector<128x32xf32>
    %c0_3 = arith.constant 0 : index
    %c0_4 = arith.constant 0 : index
    %3 = vector.load %arg2[%c0_3, %c0_4] : memref<1x32xf32, #tpu.memory_space<vmem>>, vector<1x32xf32>
    %4 = vector.broadcast %3 : vector<1x32xf32> to vector<128x32xf32>
    %5 = arith.mulf %2, %4 : vector<128x32xf32>
    %c0_5 = arith.constant 0 : index
    %c0_6 = arith.constant 0 : index
    %6 = vector.load %arg3[%c0_5, %c0_6] : memref<1x32xf32, #tpu.memory_space<vmem>>, vector<1x32xf32>
    %7 = vector.broadcast %6 : vector<1x32xf32> to vector<128x32xf32>
    %8 = arith.addf %5, %7 : vector<128x32xf32>
    %c0_7 = arith.constant 0 : index
    %c0_8 = arith.constant 0 : index
    %9 = vector.load %arg4[%c0_7, %c0_8] : memref<1x32xf32, #tpu.memory_space<vmem>>, vector<1x32xf32>
    %cst_9 = arith.constant 0.000000e+00 : f32
    %10 = vector.broadcast %cst_9 : f32 to vector<1x32xf32>
    %11 = arith.cmpf ogt, %9, %10 : vector<1x32xf32>
    %cst_10 = arith.constant 0.000000e+00 : f32
    %12 = vector.broadcast %cst_10 : f32 to vector<128x32xf32>
    %13 = arith.maximumf %8, %12 : vector<128x32xf32>
    %14 = vector.shape_cast %11 : vector<1x32xi1> to vector<1x32xi1>
    %15 = vector.broadcast %14 : vector<1x32xi1> to vector<128x32xi1>
    %16 = arith.select %15, %13, %8 : vector<128x32xi1>, vector<128x32xf32>
    %c0_11 = arith.constant 0 : index
    %c0_12 = arith.constant 0 : index
    %17 = vector.load %arg5[%c0_11, %c0_12] : memref<128x32xf32, #tpu.memory_space<vmem>>, vector<128x32xf32>
    tpu.vector_store %arg5[%c0_11, %c0_12], %16 {strides = array<i32>} : memref<128x32xf32, #tpu.memory_space<vmem>>, vector<128x32xf32>,
    return
  }
}

module attributes {stable_mosaic.version = 11 : i64} {
  func.func @_conv_bn_res_relu_kernel(%arg0: memref<128x144xf32, #tpu.memory_space<vmem>>, %arg1: memref<144x16xf32, #tpu.memory_space<vmem>>, %arg2: memref<1x16xf32, #tpu.memory_space<vmem>>, %arg3: memref<1x16xf32, #tpu.memory_space<vmem>>, %arg4: memref<128x16xf32, #tpu.memory_space<vmem>>, %arg5: memref<128x16xf32, #tpu.memory_space<vmem>>) attributes {dimension_semantics = [], scalar_prefetch = 0 : i64, scratch_operands = 0 : i64, tpu.core_type = #tpu.core_type<tc>} {
    %c0 = arith.constant 0 : index
    %c0_0 = arith.constant 0 : index
    %0 = vector.load %arg0[%c0, %c0_0] : memref<128x144xf32, #tpu.memory_space<vmem>>, vector<128x144xf32>
    %c0_1 = arith.constant 0 : index
    %c0_2 = arith.constant 0 : index
    %1 = vector.load %arg1[%c0_1, %c0_2] : memref<144x16xf32, #tpu.memory_space<vmem>>, vector<144x16xf32>
    %cst = arith.constant dense<0.000000e+00> : vector<128x16xf32>
    %2 = tpu.matmul %0, %1, %cst {dimension_numbers = #tpu.dot_dimension_numbers<[1], [0], [0], [1], [0, 0, 1, 1], [], []>} : vector<128x144xf32>, vector<144x16xf32>, vector<128x16xf32> -> vector<128x16xf32>
    %c0_3 = arith.constant 0 : index
    %c0_4 = arith.constant 0 : index
    %3 = vector.load %arg2[%c0_3, %c0_4] : memref<1x16xf32, #tpu.memory_space<vmem>>, vector<1x16xf32>
    %4 = vector.broadcast %3 : vector<1x16xf32> to vector<128x16xf32>
    %5 = arith.mulf %2, %4 : vector<128x16xf32>
    %c0_5 = arith.constant 0 : index
    %c0_6 = arith.constant 0 : index
    %6 = vector.load %arg3[%c0_5, %c0_6] : memref<1x16xf32, #tpu.memory_space<vmem>>, vector<1x16xf32>
    %7 = vector.broadcast %6 : vector<1x16xf32> to vector<128x16xf32>
    %8 = arith.addf %5, %7 : vector<128x16xf32>
    %c0_7 = arith.constant 0 : index
    %c0_8 = arith.constant 0 : index
    %9 = vector.load %arg4[%c0_7, %c0_8] : memref<128x16xf32, #tpu.memory_space<vmem>>, vector<128x16xf32>
    %10 = arith.addf %8, %9 : vector<128x16xf32>
    %cst_9 = arith.constant 0.000000e+00 : f32
    %11 = vector.broadcast %cst_9 : f32 to vector<128x16xf32>
    %12 = arith.maximumf %10, %11 : vector<128x16xf32>
    %c0_10 = arith.constant 0 : index
    %c0_11 = arith.constant 0 : index
    %13 = vector.load %arg5[%c0_10, %c0_11] : memref<128x16xf32, #tpu.memory_space<vmem>>, vector<128x16xf32>
    tpu.vector_store %arg5[%c0_10, %c0_11], %12 {strides = array<i32>} : memref<128x16xf32, #tpu.memory_space<vmem>>, vector<128x16xf32>,
    return
  }
}

module attributes {stable_mosaic.version = 11 : i64} {
  func.func @_conv_bn_gate_kernel(%arg0: memref<32x144xf32, #tpu.memory_space<vmem>>, %arg1: memref<144x64xf32, #tpu.memory_space<vmem>>, %arg2: memref<1x64xf32, #tpu.memory_space<vmem>>, %arg3: memref<1x64xf32, #tpu.memory_space<vmem>>, %arg4: memref<1x64xf32, #tpu.memory_space<vmem>>, %arg5: memref<32x64xf32, #tpu.memory_space<vmem>>) attributes {dimension_semantics = [], scalar_prefetch = 0 : i64, scratch_operands = 0 : i64, tpu.core_type = #tpu.core_type<tc>} {
    %c0 = arith.constant 0 : index
    %c0_0 = arith.constant 0 : index
    %0 = vector.load %arg0[%c0, %c0_0] : memref<32x144xf32, #tpu.memory_space<vmem>>, vector<32x144xf32>
    %c0_1 = arith.constant 0 : index
    %c0_2 = arith.constant 0 : index
    %1 = vector.load %arg1[%c0_1, %c0_2] : memref<144x64xf32, #tpu.memory_space<vmem>>, vector<144x64xf32>
    %cst = arith.constant dense<0.000000e+00> : vector<32x64xf32>
    %2 = tpu.matmul %0, %1, %cst {dimension_numbers = #tpu.dot_dimension_numbers<[1], [0], [0], [1], [0, 0, 1, 1], [], []>} : vector<32x144xf32>, vector<144x64xf32>, vector<32x64xf32> -> vector<32x64xf32>
    %c0_3 = arith.constant 0 : index
    %c0_4 = arith.constant 0 : index
    %3 = vector.load %arg2[%c0_3, %c0_4] : memref<1x64xf32, #tpu.memory_space<vmem>>, vector<1x64xf32>
    %4 = vector.broadcast %3 : vector<1x64xf32> to vector<32x64xf32>
    %5 = arith.mulf %2, %4 : vector<32x64xf32>
    %c0_5 = arith.constant 0 : index
    %c0_6 = arith.constant 0 : index
    %6 = vector.load %arg3[%c0_5, %c0_6] : memref<1x64xf32, #tpu.memory_space<vmem>>, vector<1x64xf32>
    %7 = vector.broadcast %6 : vector<1x64xf32> to vector<32x64xf32>
    %8 = arith.addf %5, %7 : vector<32x64xf32>
    %c0_7 = arith.constant 0 : index
    %c0_8 = arith.constant 0 : index
    %9 = vector.load %arg4[%c0_7, %c0_8] : memref<1x64xf32, #tpu.memory_space<vmem>>, vector<1x64xf32>
    %cst_9 = arith.constant 0.000000e+00 : f32
    %10 = vector.broadcast %cst_9 : f32 to vector<1x64xf32>
    %11 = arith.cmpf ogt, %9, %10 : vector<1x64xf32>
    %cst_10 = arith.constant 0.000000e+00 : f32
    %12 = vector.broadcast %cst_10 : f32 to vector<32x64xf32>
    %13 = arith.maximumf %8, %12 : vector<32x64xf32>
    %14 = vector.shape_cast %11 : vector<1x64xi1> to vector<1x64xi1>
    %15 = vector.broadcast %14 : vector<1x64xi1> to vector<32x64xi1>
    %16 = arith.select %15, %13, %8 : vector<32x64xi1>, vector<32x64xf32>
    %c0_11 = arith.constant 0 : index
    %c0_12 = arith.constant 0 : index
    %17 = vector.load %arg5[%c0_11, %c0_12] : memref<32x64xf32, #tpu.memory_space<vmem>>, vector<32x64xf32>
    tpu.vector_store %arg5[%c0_11, %c0_12], %16 {strides = array<i32>} : memref<32x64xf32, #tpu.memory_space<vmem>>, vector<32x64xf32>,
    return
  }
}

module attributes {stable_mosaic.version = 11 : i64} {
  func.func @_conv_bn_res_relu_kernel(%arg0: memref<32x288xf32, #tpu.memory_space<vmem>>, %arg1: memref<288x32xf32, #tpu.memory_space<vmem>>, %arg2: memref<1x32xf32, #tpu.memory_space<vmem>>, %arg3: memref<1x32xf32, #tpu.memory_space<vmem>>, %arg4: memref<32x32xf32, #tpu.memory_space<vmem>>, %arg5: memref<32x32xf32, #tpu.memory_space<vmem>>) attributes {dimension_semantics = [], scalar_prefetch = 0 : i64, scratch_operands = 0 : i64, tpu.core_type = #tpu.core_type<tc>} {
    %c0 = arith.constant 0 : index
    %c0_0 = arith.constant 0 : index
    %0 = vector.load %arg0[%c0, %c0_0] : memref<32x288xf32, #tpu.memory_space<vmem>>, vector<32x288xf32>
    %c0_1 = arith.constant 0 : index
    %c0_2 = arith.constant 0 : index
    %1 = vector.load %arg1[%c0_1, %c0_2] : memref<288x32xf32, #tpu.memory_space<vmem>>, vector<288x32xf32>
    %cst = arith.constant dense<0.000000e+00> : vector<32x32xf32>
    %2 = tpu.matmul %0, %1, %cst {dimension_numbers = #tpu.dot_dimension_numbers<[1], [0], [0], [1], [0, 0, 1, 1], [], []>} : vector<32x288xf32>, vector<288x32xf32>, vector<32x32xf32> -> vector<32x32xf32>
    %c0_3 = arith.constant 0 : index
    %c0_4 = arith.constant 0 : index
    %3 = vector.load %arg2[%c0_3, %c0_4] : memref<1x32xf32, #tpu.memory_space<vmem>>, vector<1x32xf32>
    %4 = vector.broadcast %3 : vector<1x32xf32> to vector<32x32xf32>
    %5 = arith.mulf %2, %4 : vector<32x32xf32>
    %c0_5 = arith.constant 0 : index
    %c0_6 = arith.constant 0 : index
    %6 = vector.load %arg3[%c0_5, %c0_6] : memref<1x32xf32, #tpu.memory_space<vmem>>, vector<1x32xf32>
    %7 = vector.broadcast %6 : vector<1x32xf32> to vector<32x32xf32>
    %8 = arith.addf %5, %7 : vector<32x32xf32>
    %c0_7 = arith.constant 0 : index
    %c0_8 = arith.constant 0 : index
    %9 = vector.load %arg4[%c0_7, %c0_8] : memref<32x32xf32, #tpu.memory_space<vmem>>, vector<32x32xf32>
    %10 = arith.addf %8, %9 : vector<32x32xf32>
    %cst_9 = arith.constant 0.000000e+00 : f32
    %11 = vector.broadcast %cst_9 : f32 to vector<32x32xf32>
    %12 = arith.maximumf %10, %11 : vector<32x32xf32>
    %c0_10 = arith.constant 0 : index
    %c0_11 = arith.constant 0 : index
    %13 = vector.load %arg5[%c0_10, %c0_11] : memref<32x32xf32, #tpu.memory_space<vmem>>, vector<32x32xf32>
    tpu.vector_store %arg5[%c0_10, %c0_11], %12 {strides = array<i32>} : memref<32x32xf32, #tpu.memory_space<vmem>>, vector<32x32xf32>,
    return
  }
}

module attributes {stable_mosaic.version = 11 : i64} {
  func.func @_conv_bias_pool_kernel(%arg0: memref<2x288xf32, #tpu.memory_space<vmem>>, %arg1: memref<288x64xf32, #tpu.memory_space<vmem>>, %arg2: memref<1x64xf32, #tpu.memory_space<vmem>>, %arg3: memref<2x2xf32, #tpu.memory_space<vmem>>, %arg4: memref<2x64xf32, #tpu.memory_space<vmem>>) attributes {dimension_semantics = [], scalar_prefetch = 0 : i64, scratch_operands = 0 : i64, tpu.core_type = #tpu.core_type<tc>} {
    %c0 = arith.constant 0 : index
    %c0_0 = arith.constant 0 : index
    %0 = vector.load %arg0[%c0, %c0_0] : memref<2x288xf32, #tpu.memory_space<vmem>>, vector<2x288xf32>
    %c0_1 = arith.constant 0 : index
    %c0_2 = arith.constant 0 : index
    %1 = vector.load %arg1[%c0_1, %c0_2] : memref<288x64xf32, #tpu.memory_space<vmem>>, vector<288x64xf32>
    %cst = arith.constant dense<0.000000e+00> : vector<2x64xf32>
    %2 = tpu.matmul %0, %1, %cst {dimension_numbers = #tpu.dot_dimension_numbers<[1], [0], [0], [1], [0, 0, 1, 1], [], []>} : vector<2x288xf32>, vector<288x64xf32>, vector<2x64xf32> -> vector<2x64xf32>
    %c0_3 = arith.constant 0 : index
    %c0_4 = arith.constant 0 : index
    %3 = vector.load %arg3[%c0_3, %c0_4] : memref<2x2xf32, #tpu.memory_space<vmem>>, vector<2x2xf32>
    %cst_5 = arith.constant dense<0.000000e+00> : vector<2x64xf32>
    %4 = tpu.matmul %3, %2, %cst_5 {dimension_numbers = #tpu.dot_dimension_numbers<[1], [0], [0], [1], [0, 0, 1, 1], [], []>} : vector<2x2xf32>, vector<2x64xf32>, vector<2x64xf32> -> vector<2x64xf32>
    %c0_6 = arith.constant 0 : index
    %c0_7 = arith.constant 0 : index
    %5 = vector.load %arg2[%c0_6, %c0_7] : memref<1x64xf32, #tpu.memory_space<vmem>>, vector<1x64xf32>
    %6 = vector.broadcast %5 : vector<1x64xf32> to vector<2x64xf32>
    %7 = arith.addf %4, %6 : vector<2x64xf32>
    %c0_8 = arith.constant 0 : index
    %c0_9 = arith.constant 0 : index
    %8 = vector.load %arg4[%c0_8, %c0_9] : memref<2x64xf32, #tpu.memory_space<vmem>>, vector<2x64xf32>
    tpu.vector_store %arg4[%c0_8, %c0_9], %7 {strides = array<i32>} : memref<2x64xf32, #tpu.memory_space<vmem>>, vector<2x64xf32>,
    return
  }
}

</mosaic_0001>

<bundles_post_ra>
// kernel: embedding_map_net_forward.9
= control target key start
LH: loop header
LB: loop body
LE: loop exit
PB: predicated region body
PF: predicated region fallthrough
CT: control target
= control target key end

     0   :  { %vm1047_vm0 = vcmask 1040384   ;;  %vm278_vm1 = vcmask 72704   ;;  %vm4624_vm2 = vmmov 1   ;;  %vm3442_vm6 = vcmask 64512   ;;  %s7760_s1 = inlined_call_operand.vmem [shape: f32[9,8], index: 1, kind: input, shape index: {}]   ;;  %s7761_s0 = inlined_call_operand.vmem [shape: f32[2048,9], index: 0, kind: input, shape index: {}]   ;;  %s7762_s4 = inlined_call_operand.vmem [shape: f32[1,8], index: 4, kind: input, shape index: {}]   ;;  %s7763_s2 = inlined_call_operand.vmem [shape: f32[1,8], index: 2, kind: input, shape index: {}]   ;;  %s7764_s3 = inlined_call_operand.vmem [shape: f32[1,8], index: 3, kind: input, shape index: {}]   ;;  %s7765_s5 = inlined_call_operand.vmem [shape: f32[2048,8], index: 5, kind: output, shape index: {}]  }
   0x1   :  { %v276_v0 = vld [vmem:[%s7760_s1] sm:$0xff]  ;;  %v277_v1 = vld [vmem:[%s7760_s1 + $0x8] sm:$0x1]  ;;  %vm4609_vm3 = vmpackc.low %vm1047_vm0, %vm4624_vm2 }
   0x2   :  { %v4608_v2 = vpack.c.bf16 %v277_v1, %v276_v0  ;;  %v20_v3 = vld [vmem:[%s7761_s0] sm:$0xff]  ;;  %v21_v5 = vld [vmem:[%s7761_s0 + $0x8] sm:$0xff]  ;;  %v22_v7 = vld [vmem:[%s7761_s0 + $0x10] sm:$0xff] }
   0x3   :  { %v148_v4 = vld [vmem:[%s7761_s0 + $0x400] sm:$0xff]  ;;  %4224 = vmatprep.mubr.msk.f32.mxu0 %vm278_vm1, %v20_v3  ;;  %v149_v6 = vld [vmem:[%s7761_s0 + $0x408] sm:$0xff]  ;;  %v150_v8 = vld [vmem:[%s7761_s0 + $0x410] sm:$0xff] }
   0x4   :  { %4416 = vmatprep.mubr.msk.f32.mxu1 %vm278_vm1, %v148_v4  ;;  %4610 = vmatprep.subr.msk.bf16.mxu0 %vm4609_vm3, %v4608_v2  ;;  %v23_v9 = vld [vmem:[%s7761_s0 + $0x18] sm:$0xff]  ;;  %v24_v11 = vld [vmem:[%s7761_s0 + $0x20] sm:$0xff]  ;;  %v25_v13 = vld [vmem:[%s7761_s0 + $0x28] sm:$0xff] }
   0x5   :  { %4614 = vmatprep.subr.msk.bf16.mxu1 %vm4609_vm3, %v4608_v2  ;;  %4613 = vmatpush3.bf16.msk.msra.mxu0 %vm4609_vm3, %v4608_v2  ;;  %v151_v10 = vld [vmem:[%s7761_s0 + $0x418] sm:$0xff]  ;;  %v152_v12 = vld [vmem:[%s7761_s0 + $0x420] sm:$0xff]  ;;  %v153_v14 = vld [vmem:[%s7761_s0 + $0x428] sm:$0xff] }
   0x6   :  { %4615 = vmatpush3.bf16.msk.msra.mxu1 %vm4609_vm3, %v4608_v2  ;;  %v26_v15 = vld [vmem:[%s7761_s0 + $0x30] sm:$0xff]  ;;  %v27_v17 = vld [vmem:[%s7761_s0 + $0x38] sm:$0xff]  ;;  %v28_v19 = vld [vmem:[%s7761_s0 + $0x40] sm:$0xff] }
   0x7   :  { %v154_v16 = vld [vmem:[%s7761_s0 + $0x430] sm:$0xff]  ;;  %v155_v18 = vld [vmem:[%s7761_s0 + $0x438] sm:$0xff]  ;;  %v156_v20 = vld [vmem:[%s7761_s0 + $0x440] sm:$0xff] }
   0x8   :  { %4225 = vmatmul.mubr.msk.f32.vlgmr.msra.gmra.mrb[0].mxu0 %vm278_vm1, %v21_v5  ;;  %v29_v21 = vld [vmem:[%s7761_s0 + $0x48] sm:$0xff]  ;;  %v30_v23 = vld [vmem:[%s7761_s0 + $0x50] sm:$0xff]  ;;  %v31_v25 = vld [vmem:[%s7761_s0 + $0x58] sm:$0xff] }
   0x9   :  { %4417 = vmatmul.mubr.msk.f32.vlgmr.msra.gmra.mrb[0].mxu1 %vm278_vm1, %v149_v6  ;;  %4227 = vmatprep.mubr.msk.f32.mxu0 %vm278_vm1, %v22_v7  ;;  %v157_v22 = vld [vmem:[%s7761_s0 + $0x448] sm:$0xff]  ;;  %v158_v24 = vld [vmem:[%s7761_s0 + $0x450] sm:$0xff]  ;;  %v159_v26 = vld [vmem:[%s7761_s0 + $0x458] sm:$0xff] }
   0xa   :  { %4419 = vmatprep.mubr.msk.f32.mxu1 %vm278_vm1, %v150_v8  ;;  %v32_v27 = vld [vmem:[%s7761_s0 + $0x60] sm:$0xff]  ;;  %v33_v29 = vld [vmem:[%s7761_s0 + $0x68] sm:$0xff]  ;;  %v34_v31 = vld [vmem:[%s7761_s0 + $0x70] sm:$0xff] }
   0xb   :  { %v160_v28 = vld [vmem:[%s7761_s0 + $0x460] sm:$0xff]  ;;  %v161_v30 = vld [vmem:[%s7761_s0 + $0x468] sm:$0xff]  ;;  %v162_v32 = vld [vmem:[%s7761_s0 + $0x470] sm:$0xff] }
   0xc   :  { %4228 = vmatmul.mubr.msk.f32.gmra.mrb[2].mxu0 %vm278_vm1, %v23_v9  ;;  %v35_v33 = vld [vmem:[%s7761_s0 + $0x78] sm:$0xff]  ;;  %v36_v35 = vld [vmem:[%s7761_s0 + $0x80] sm:$0xff]  ;;  %v37_v37 = vld [vmem:[%s7761_s0 + $0x88] sm:$0xff] }
   0xd   :  { %4420 = vmatmul.mubr.msk.f32.gmra.mrb[2].mxu1 %vm278_vm1, %v151_v10  ;;  %4230 = vmatprep.mubr.msk.f32.mxu0 %vm278_vm1, %v24_v11  ;;  %v163_v34 = vld [vmem:[%s7761_s0 + $0x478] sm:$0xff]  ;;  %v164_v36 = vld [vmem:[%s7761_s0 + $0x480] sm:$0xff]  ;;  %v165_v38 = vld [vmem:[%s7761_s0 + $0x488] sm:$0xff] }
   0xe   :  { %4422 = vmatprep.mubr.msk.f32.mxu1 %vm278_vm1, %v152_v12  ;;  %v38_v39 = vld [vmem:[%s7761_s0 + $0x90] sm:$0xff]  ;;  %v39_v41 = vld [vmem:[%s7761_s0 + $0x98] sm:$0xff]  ;;  %v40_v43 = vld [vmem:[%s7761_s0 + $0xa0] sm:$0xff] }
   0xf   :  { %v166_v40 = vld [vmem:[%s7761_s0 + $0x490] sm:$0xff]  ;;  %v167_v42 = vld [vmem:[%s7761_s0 + $0x498] sm:$0xff]  ;;  %v168_v44 = vld [vmem:[%s7761_s0 + $0x4a0] sm:$0xff] }
  0x10   :  { %4231 = vmatmul.mubr.msk.f32.gmra.mrb[4].mxu0 %vm278_vm1, %v25_v13  ;;  %v41_v45 = vld [vmem:[%s7761_s0 + $0xa8] sm:$0xff]  ;;  %v42_v47 = vld [vmem:[%s7761_s0 + $0xb0] sm:$0xff]  ;;  %v43_v49 = vld [vmem:[%s7761_s0 + $0xb8] sm:$0xff] }
  0x11   :  { %4423 = vmatmul.mubr.msk.f32.gmra.mrb[4].mxu1 %vm278_vm1, %v153_v14  ;;  %4233 = vmatprep.mubr.msk.f32.mxu0 %vm278_vm1, %v26_v15  ;;  %v169_v46 = vld [vmem:[%s7761_s0 + $0x4a8] sm:$0xff]  ;;  %v170_v48 = vld [vmem:[%s7761_s0 + $0x4b0] sm:$0xff]  ;;  %v171_v50 = vld [vmem:[%s7761_s0 + $0x4b8] sm:$0xff] }
  0x12   :  { %4425 = vmatprep.mubr.msk.f32.mxu1 %vm278_vm1, %v154_v16  ;;  %v44_v51 = vld [vmem:[%s7761_s0 + $0xc0] sm:$0xff]  ;;  %v45_v53 = vld [vmem:[%s7761_s0 + $0xc8] sm:$0xff]  ;;  %v46_v55 = vld [vmem:[%s7761_s0 + $0xd0] sm:$0xff] }
  0x13   :  { %v172_v52 = vld [vmem:[%s7761_s0 + $0x4c0] sm:$0xff]  ;;  %v173_v54 = vld [vmem:[%s7761_s0 + $0x4c8] sm:$0xff]  ;;  %v174_v56 = vld [vmem:[%s7761_s0 + $0x4d0] sm:$0xff] }
  0x14   :  { %4234 = vmatmul.mubr.msk.f32.gmra.mrb[6].mxu0 %vm278_vm1, %v27_v17  ;;  %v47_v57 = vld [vmem:[%s7761_s0 + $0xd8] sm:$0xff]  ;;  %v48_v59 = vld [vmem:[%s7761_s0 + $0xe0] sm:$0xff]  ;;  %v49_v61 = vld [vmem:[%s7761_s0 + $0xe8] sm:$0xff] }
  0x15   :  { %4426 = vmatmul.mubr.msk.f32.gmra.mrb[6].mxu1 %vm278_vm1, %v155_v18  ;;  %4236 = vmatprep.mubr.msk.f32.mxu0 %vm278_vm1, %v28_v19  ;;  %v175_v58 = vld [vmem:[%s7761_s0 + $0x4d8] sm:$0xff]  ;;  %v176_v60 = vld [vmem:[%s7761_s0 + $0x4e0] sm:$0xff]  ;;  %v177_v62 = vld [vmem:[%s7761_s0 + $0x4e8] sm:$0xff] }
  0x16   :  { %4428 = vmatprep.mubr.msk.f32.mxu1 %vm278_vm1, %v156_v20  ;;  %v50_v63 = vld [vmem:[%s7761_s0 + $0xf0] sm:$0xff]  ;;  %v51_v1 = vld [vmem:[%s7761_s0 + $0xf8] sm:$0xff]  ;;  %v52_v3 = vld [vmem:[%s7761_s0 + $0x100] sm:$0xff] }
  0x17   :  { %v178_v0 = vld [vmem:[%s7761_s0 + $0x4f0] sm:$0xff]  ;;  %v179_v2 = vld [vmem:[%s7761_s0 + $0x4f8] sm:$0xff]  ;;  %v180_v4 = vld [vmem:[%s7761_s0 + $0x500] sm:$0xff] }
  0x18   :  { %4237 = vmatmul.mubr.msk.f32.gmra.mrb[8].mxu0 %vm278_vm1, %v29_v21  ;;  %v53_v5 = vld [vmem:[%s7761_s0 + $0x108] sm:$0xff]  ;;  %v54_v7 = vld [vmem:[%s7761_s0 + $0x110] sm:$0xff]  ;;  %v55_v9 = vld [vmem:[%s7761_s0 + $0x118] sm:$0xff] }
  0x19   :  { %4429 = vmatmul.mubr.msk.f32.gmra.mrb[8].mxu1 %vm278_vm1, %v157_v22  ;;  %4239 = vmatprep.mubr.msk.f32.mxu0 %vm278_vm1, %v30_v23  ;;  %v181_v6 = vld [vmem:[%s7761_s0 + $0x508] sm:$0xff]  ;;  %v182_v8 = vld [vmem:[%s7761_s0 + $0x510] sm:$0xff]  ;;  %v183_v10 = vld [vmem:[%s7761_s0 + $0x518] sm:$0xff] }
  0x1a   :  { %4431 = vmatprep.mubr.msk.f32.mxu1 %vm278_vm1, %v158_v24  ;;  %v56_v11 = vld [vmem:[%s7761_s0 + $0x120] sm:$0xff]  ;;  %v57_v13 = vld [vmem:[%s7761_s0 + $0x128] sm:$0xff]  ;;  %v58_v15 = vld [vmem:[%s7761_s0 + $0x130] sm:$0xff] }
  0x1b   :  { %v184_v12 = vld [vmem:[%s7761_s0 + $0x520] sm:$0xff]  ;;  %v185_v14 = vld [vmem:[%s7761_s0 + $0x528] sm:$0xff]  ;;  %v186_v16 = vld [vmem:[%s7761_s0 + $0x530] sm:$0xff] }
  0x1c   :  { %4240 = vmatmul.mubr.msk.f32.gmra.mrb[10].mxu0 %vm278_vm1, %v31_v25  ;;  %v59_v17 = vld [vmem:[%s7761_s0 + $0x138] sm:$0xff]  ;;  %v60_v19 = vld [vmem:[%s7761_s0 + $0x140] sm:$0xff]  ;;  %v61_v21 = vld [vmem:[%s7761_s0 + $0x148] sm:$0xff] }
  0x1d   :  { %4432 = vmatmul.mubr.msk.f32.gmra.mrb[10].mxu1 %vm278_vm1, %v159_v26  ;;  %4242 = vmatprep.mubr.msk.f32.mxu0 %vm278_vm1, %v32_v27  ;;  %v187_v18 = vld [vmem:[%s7761_s0 + $0x538] sm:$0xff]  ;;  %v188_v20 = vld [vmem:[%s7761_s0 + $0x540] sm:$0xff]  ;;  %v189_v22 = vld [vmem:[%s7761_s0 + $0x548] sm:$0xff] }
  0x1e   :  { %4434 = vmatprep.mubr.msk.f32.mxu1 %vm278_vm1, %v160_v28  ;;  %v62_v23 = vld [vmem:[%s7761_s0 + $0x150] sm:$0xff]  ;;  %v63_v25 = vld [vmem:[%s7761_s0 + $0x158] sm:$0xff]  ;;  %v64_v27 = vld [vmem:[%s7761_s0 + $0x160] sm:$0xff] }
  0x1f   :  { %v190_v24 = vld [vmem:[%s7761_s0 + $0x550] sm:$0xff]  ;;  %v191_v26 = vld [vmem:[%s7761_s0 + $0x558] sm:$0xff]  ;;  %v192_v28 = vld [vmem:[%s7761_s0 + $0x560] sm:$0xff] }
  0x20   :  { %4243 = vmatmul.mubr.msk.f32.gmra.mrb[12].mxu0 %vm278_vm1, %v33_v29  ;;  %v65_v29 = vld [vmem:[%s7761_s0 + $0x168] sm:$0xff] }
  0x21   :  { %4435 = vmatmul.mubr.msk.f32.gmra.mrb[12].mxu1 %vm278_vm1, %v161_v30  ;;  %4245 = vmatprep.mubr.msk.f32.mxu0 %vm278_vm1, %v34_v31  ;;  %v193_v30 = vld [vmem:[%s7761_s0 + $0x568] sm:$0xff]  ;;  %v66_v31 = vld [vmem:[%s7761_s0 + $0x170] sm:$0xff] }
  0x22   :  { %4437 = vmatprep.mubr.msk.f32.mxu1 %vm278_vm1, %v162_v32  ;;  %v194_v32 = vld [vmem:[%s7761_s0 + $0x570] sm:$0xff] }
  0x24   :  { %4246 = vmatmul.mubr.msk.f32.gmra.mrb[14].mxu0 %vm278_vm1, %v35_v33  ;;  %v67_v33 = vld [vmem:[%s7761_s0 + $0x178] sm:$0xff] }
  0x25   :  { %4438 = vmatmul.mubr.msk.f32.gmra.mrb[14].mxu1 %vm278_vm1, %v163_v34  ;;  %4248 = vmatprep.mubr.msk.f32.mxu0 %vm278_vm1, %v36_v35  ;;  %v195_v34 = vld [vmem:[%s7761_s0 + $0x578] sm:$0xff]  ;;  %v68_v35 = vld [vmem:[%s7761_s0 + $0x180] sm:$0xff] }
  0x26   :  { %4440 = vmatprep.mubr.msk.f32.mxu1 %vm278_vm1, %v164_v36  ;;  %v196_v36 = vld [vmem:[%s7761_s0 + $0x580] sm:$0xff] }
  0x28   :  { %4249 = vmatmul.mubr.msk.f32.gmra.mrb[16].mxu0 %vm278_vm1, %v37_v37  ;;  %v69_v37 = vld [vmem:[%s7761_s0 + $0x188] sm:$0xff] }
  0x29   :  { %4441 = vmatmul.mubr.msk.f32.gmra.mrb[16].mxu1 %vm278_vm1, %v165_v38  ;;  %4251 = vmatprep.mubr.msk.f32.mxu0 %vm278_vm1, %v38_v39  ;;  %v197_v38 = vld [vmem:[%s7761_s0 + $0x588] sm:$0xff]  ;;  %v70_v39 = vld [vmem:[%s7761_s0 + $0x190] sm:$0xff] }
  0x2a   :  { %4443 = vmatprep.mubr.msk.f32.mxu1 %vm278_vm1, %v166_v40  ;;  %v198_v40 = vld [vmem:[%s7761_s0 + $0x590] sm:$0xff] }
  0x2c   :  { %4252 = vmatmul.mubr.msk.f32.gmra.mrb[18].mxu0 %vm278_vm1, %v39_v41  ;;  %v71_v41 = vld [vmem:[%s7761_s0 + $0x198] sm:$0xff] }
  0x2d   :  { %4444 = vmatmul.mubr.msk.f32.gmra.mrb[18].mxu1 %vm278_vm1, %v167_v42  ;;  %4254 = vmatprep.mubr.msk.f32.mxu0 %vm278_vm1, %v40_v43  ;;  %v199_v42 = vld [vmem:[%s7761_s0 + $0x598] sm:$0xff]  ;;  %v72_v43 = vld [vmem:[%s7761_s0 + $0x1a0] sm:$0xff] }
  0x2e   :  { %4446 = vmatprep.mubr.msk.f32.mxu1 %vm278_vm1, %v168_v44  ;;  %v200_v44 = vld [vmem:[%s7761_s0 + $0x5a0] sm:$0xff] }
  0x30   :  { %4255 = vmatmul.mubr.msk.f32.gmra.mrb[20].mxu0 %vm278_vm1, %v41_v45  ;;  %v73_v45 = vld [vmem:[%s7761_s0 + $0x1a8] sm:$0xff] }
  0x31   :  { %4447 = vmatmul.mubr.msk.f32.gmra.mrb[20].mxu1 %vm278_vm1, %v169_v46  ;;  %4257 = vmatprep.mubr.msk.f32.mxu0 %vm278_vm1, %v42_v47  ;;  %v201_v46 = vld [vmem:[%s7761_s0 + $0x5a8] sm:$0xff]  ;;  %v74_v47 = vld [vmem:[%s7761_s0 + $0x1b0] sm:$0xff] }
  0x32   :  { %4449 = vmatprep.mubr.msk.f32.mxu1 %vm278_vm1, %v170_v48  ;;  %v202_v48 = vld [vmem:[%s7761_s0 + $0x5b0] sm:$0xff] }
  0x34   :  { %4258 = vmatmul.mubr.msk.f32.gmra.mrb[22].mxu0 %vm278_vm1, %v43_v49  ;;  %v75_v49 = vld [vmem:[%s7761_s0 + $0x1b8] sm:$0xff] }
  0x35   :  { %4450 = vmatmul.mubr.msk.f32.gmra.mrb[22].mxu1 %vm278_vm1, %v171_v50  ;;  %4260 = vmatprep.mubr.msk.f32.mxu0 %vm278_vm1, %v44_v51  ;;  %v203_v50 = vld [vmem:[%s7761_s0 + $0x5b8] sm:$0xff]  ;;  %v76_v51 = vld [vmem:[%s7761_s0 + $0x1c0] sm:$0xff] }
  0x36   :  { %4452 = vmatprep.mubr.msk.f32.mxu1 %vm278_vm1, %v172_v52  ;;  %v204_v52 = vld [vmem:[%s7761_s0 + $0x5c0] sm:$0xff] }
  0x38   :  { %4261 = vmatmul.mubr.msk.f32.gmra.mrb[24].mxu0 %vm278_vm1, %v45_v53  ;;  %v77_v53 = vld [vmem:[%s7761_s0 + $0x1c8] sm:$0xff] }
  0x39   :  { %4453 = vmatmul.mubr.msk.f32.gmra.mrb[24].mxu1 %vm278_vm1, %v173_v54  ;;  %4263 = vmatprep.mubr.msk.f32.mxu0 %vm278_vm1, %v46_v55  ;;  %v205_v54 = vld [vmem:[%s7761_s0 + $0x5c8] sm:$0xff]  ;;  %v78_v55 = vld [vmem:[%s7761_s0 + $0x1d0] sm:$0xff] }
  0x3a   :  { %4455 = vmatprep.mubr.msk.f32.mxu1 %vm278_vm1, %v174_v56  ;;  %v206_v56 = vld [vmem:[%s7761_s0 + $0x5d0] sm:$0xff] }
  0x3c   :  { %4264 = vmatmul.mubr.msk.f32.gmra.mrb[26].mxu0 %vm278_vm1, %v47_v57  ;;  %v79_v57 = vld [vmem:[%s7761_s0 + $0x1d8] sm:$0xff] }
  0x3d   :  { %4456 = vmatmul.mubr.msk.f32.gmra.mrb[26].mxu1 %vm278_vm1, %v175_v58  ;;  %4266 = vmatprep.mubr.msk.f32.mxu0 %vm278_vm1, %v48_v59  ;;  %v207_v58 = vld [vmem:[%s7761_s0 + $0x5d8] sm:$0xff]  ;;  %v80_v59 = vld [vmem:[%s7761_s0 + $0x1e0] sm:$0xff] }
  0x3e   :  { %4458 = vmatprep.mubr.msk.f32.mxu1 %vm278_vm1, %v176_v60  ;;  %v208_v60 = vld [vmem:[%s7761_s0 + $0x5e0] sm:$0xff] }
  0x40   :  { %4267 = vmatmul.mubr.msk.f32.gmra.mrb[28].mxu0 %vm278_vm1, %v49_v61  ;;  %v81_v61 = vld [vmem:[%s7761_s0 + $0x1e8] sm:$0xff] }
  0x41   :  { %4459 = vmatmul.mubr.msk.f32.gmra.mrb[28].mxu1 %vm278_vm1, %v177_v62  ;;  %4269 = vmatprep.mubr.msk.f32.mxu0 %vm278_vm1, %v50_v63  ;;  %v209_v62 = vld [vmem:[%s7761_s0 + $0x5e8] sm:$0xff]  ;;  %v82_v63 = vld [vmem:[%s7761_s0 + $0x1f0] sm:$0xff] }
  0x42   :  { %4461 = vmatprep.mubr.msk.f32.mxu1 %vm278_vm1, %v178_v0  ;;  %v210_v0 = vld [vmem:[%s7761_s0 + $0x5f0] sm:$0xff] }
  0x44   :  { %4270 = vmatmul.mubr.msk.f32.gmra.mrb[30].mxu0 %vm278_vm1, %v51_v1  ;;  %v83_v1 = vld [vmem:[%s7761_s0 + $0x1f8] sm:$0xff] }
  0x45   :  { %4462 = vmatmul.mubr.msk.f32.gmra.mrb[30].mxu1 %vm278_vm1, %v179_v2  ;;  %4272 = vmatprep.mubr.msk.f32.mxu0 %vm278_vm1, %v52_v3  ;;  %v211_v2 = vld [vmem:[%s7761_s0 + $0x5f8] sm:$0xff]  ;;  %v84_v3 = vld [vmem:[%s7761_s0 + $0x200] sm:$0xff] }
  0x46   :  { %4464 = vmatprep.mubr.msk.f32.mxu1 %vm278_vm1, %v180_v4  ;;  %v212_v4 = vld [vmem:[%s7761_s0 + $0x600] sm:$0xff] }
  0x48   :  { %4273 = vmatmul.mubr.msk.f32.gmra.mrb[32].mxu0 %vm278_vm1, %v53_v5  ;;  %v85_v5 = vld [vmem:[%s7761_s0 + $0x208] sm:$0xff] }
  0x49   :  { %4465 = vmatmul.mubr.msk.f32.gmra.mrb[32].mxu1 %vm278_vm1, %v181_v6  ;;  %4275 = vmatprep.mubr.msk.f32.mxu0 %vm278_vm1, %v54_v7  ;;  %v213_v6 = vld [vmem:[%s7761_s0 + $0x608] sm:$0xff]  ;;  %v86_v7 = vld [vmem:[%s7761_s0 + $0x210] sm:$0xff] }
  0x4a   :  { %4467 = vmatprep.mubr.msk.f32.mxu1 %vm278_vm1, %v182_v8  ;;  %v214_v8 = vld [vmem:[%s7761_s0 + $0x610] sm:$0xff] }
  0x4c   :  { %4276 = vmatmul.mubr.msk.f32.gmra.mrb[34].mxu0 %vm278_vm1, %v55_v9  ;;  %v87_v9 = vld [vmem:[%s7761_s0 + $0x218] sm:$0xff] }
  0x4d   :  { %4468 = vmatmul.mubr.msk.f32.gmra.mrb[34].mxu1 %vm278_vm1, %v183_v10  ;;  %4278 = vmatprep.mubr.msk.f32.mxu0 %vm278_vm1, %v56_v11  ;;  %v215_v10 = vld [vmem:[%s7761_s0 + $0x618] sm:$0xff]  ;;  %v88_v11 = vld [vmem:[%s7761_s0 + $0x220] sm:$0xff] }
  0x4e   :  { %4470 = vmatprep.mubr.msk.f32.mxu1 %vm278_vm1, %v184_v12  ;;  %v216_v12 = vld [vmem:[%s7761_s0 + $0x620] sm:$0xff] }
  0x50   :  { %4279 = vmatmul.mubr.msk.f32.gmra.mrb[36].mxu0 %vm278_vm1, %v57_v13  ;;  %v89_v13 = vld [vmem:[%s7761_s0 + $0x228] sm:$0xff] }
  0x51   :  { %4471 = vmatmul.mubr.msk.f32.gmra.mrb[36].mxu1 %vm278_vm1, %v185_v14  ;;  %4281 = vmatprep.mubr.msk.f32.mxu0 %vm278_vm1, %v58_v15  ;;  %v217_v14 = vld [vmem:[%s7761_s0 + $0x628] sm:$0xff]  ;;  %v90_v15 = vld [vmem:[%s7761_s0 + $0x230] sm:$0xff] }
  0x52   :  { %4473 = vmatprep.mubr.msk.f32.mxu1 %vm278_vm1, %v186_v16  ;;  %v218_v16 = vld [vmem:[%s7761_s0 + $0x630] sm:$0xff] }
  0x54   :  { %4282 = vmatmul.mubr.msk.f32.gmra.mrb[38].mxu0 %vm278_vm1, %v59_v17  ;;  %v91_v17 = vld [vmem:[%s7761_s0 + $0x238] sm:$0xff] }
  0x55   :  { %4474 = vmatmul.mubr.msk.f32.gmra.mrb[38].mxu1 %vm278_vm1, %v187_v18  ;;  %4284 = vmatprep.mubr.msk.f32.mxu0 %vm278_vm1, %v60_v19  ;;  %v219_v18 = vld [vmem:[%s7761_s0 + $0x638] sm:$0xff]  ;;  %v92_v19 = vld [vmem:[%s7761_s0 + $0x240] sm:$0xff] }
  0x56   :  { %4476 = vmatprep.mubr.msk.f32.mxu1 %vm278_vm1, %v188_v20  ;;  %v220_v20 = vld [vmem:[%s7761_s0 + $0x640] sm:$0xff] }
  0x58   :  { %4285 = vmatmul.mubr.msk.f32.gmra.mrb[40].mxu0 %vm278_vm1, %v61_v21  ;;  %v93_v21 = vld [vmem:[%s7761_s0 + $0x248] sm:$0xff] }
  0x59   :  { %4477 = vmatmul.mubr.msk.f32.gmra.mrb[40].mxu1 %vm278_vm1, %v189_v22  ;;  %4287 = vmatprep.mubr.msk.f32.mxu0 %vm278_vm1, %v62_v23  ;;  %v221_v22 = vld [vmem:[%s7761_s0 + $0x648] sm:$0xff]  ;;  %v94_v23 = vld [vmem:[%s7761_s0 + $0x250] sm:$0xff] }
  0x5a   :  { %4479 = vmatprep.mubr.msk.f32.mxu1 %vm278_vm1, %v190_v24  ;;  %v222_v24 = vld [vmem:[%s7761_s0 + $0x650] sm:$0xff] }
  0x5c   :  { %4288 = vmatmul.mubr.msk.f32.gmra.mrb[42].mxu0 %vm278_vm1, %v63_v25  ;;  %v95_v25 = vld [vmem:[%s7761_s0 + $0x258] sm:$0xff] }
  0x5d   :  { %4480 = vmatmul.mubr.msk.f32.gmra.mrb[42].mxu1 %vm278_vm1, %v191_v26  ;;  %4290 = vmatprep.mubr.msk.f32.mxu0 %vm278_vm1, %v64_v27  ;;  %v223_v26 = vld [vmem:[%s7761_s0 + $0x658] sm:$0xff]  ;;  %v96_v27 = vld [vmem:[%s7761_s0 + $0x260] sm:$0xff] }
  0x5e   :  { %4482 = vmatprep.mubr.msk.f32.mxu1 %vm278_vm1, %v192_v28  ;;  %v224_v28 = vld [vmem:[%s7761_s0 + $0x660] sm:$0xff] }
  0x60   :  { %4291 = vmatmul.mubr.msk.f32.gmra.mrb[44].mxu0 %vm278_vm1, %v65_v29  ;;  %v97_v29 = vld [vmem:[%s7761_s0 + $0x268] sm:$0xff] }
  0x61   :  { %4483 = vmatmul.mubr.msk.f32.gmra.mrb[44].mxu1 %vm278_vm1, %v193_v30  ;;  %4293 = vmatprep.mubr.msk.f32.mxu0 %vm278_vm1, %v66_v31  ;;  %v225_v30 = vld [vmem:[%s7761_s0 + $0x668] sm:$0xff]  ;;  %v98_v31 = vld [vmem:[%s7761_s0 + $0x270] sm:$0xff] }
  0x62   :  { %4485 = vmatprep.mubr.msk.f32.mxu1 %vm278_vm1, %v194_v32  ;;  %v226_v32 = vld [vmem:[%s7761_s0 + $0x670] sm:$0xff] }
  0x64   :  { %4294 = vmatmul.mubr.msk.f32.gmra.mrb[46].mxu0 %vm278_vm1, %v67_v33  ;;  %v99_v33 = vld [vmem:[%s7761_s0 + $0x278] sm:$0xff] }
  0x65   :  { %4486 = vmatmul.mubr.msk.f32.gmra.mrb[46].mxu1 %vm278_vm1, %v195_v34  ;;  %4296 = vmatprep.mubr.msk.f32.mxu0 %vm278_vm1, %v68_v35  ;;  %v227_v34 = vld [vmem:[%s7761_s0 + $0x678] sm:$0xff]  ;;  %v100_v35 = vld [vmem:[%s7761_s0 + $0x280] sm:$0xff] }
  0x66   :  { %4488 = vmatprep.mubr.msk.f32.mxu1 %vm278_vm1, %v196_v36  ;;  %v228_v36 = vld [vmem:[%s7761_s0 + $0x680] sm:$0xff] }
  0x68   :  { %4297 = vmatmul.mubr.msk.f32.gmra.mrb[48].mxu0 %vm278_vm1, %v69_v37  ;;  %v101_v37 = vld [vmem:[%s7761_s0 + $0x288] sm:$0xff] }
  0x69   :  { %4489 = vmatmul.mubr.msk.f32.gmra.mrb[48].mxu1 %vm278_vm1, %v197_v38  ;;  %4299 = vmatprep.mubr.msk.f32.mxu0 %vm278_vm1, %v70_v39  ;;  %v229_v38 = vld [vmem:[%s7761_s0 + $0x688] sm:$0xff]  ;;  %v102_v39 = vld [vmem:[%s7761_s0 + $0x290] sm:$0xff] }
  0x6a   :  { %4491 = vmatprep.mubr.msk.f32.mxu1 %vm278_vm1, %v198_v40  ;;  %v230_v40 = vld [vmem:[%s7761_s0 + $0x690] sm:$0xff] }
  0x6c   :  { %4300 = vmatmul.mubr.msk.f32.gmra.mrb[50].mxu0 %vm278_vm1, %v71_v41  ;;  %v103_v41 = vld [vmem:[%s7761_s0 + $0x298] sm:$0xff] }
  0x6d   :  { %4492 = vmatmul.mubr.msk.f32.gmra.mrb[50].mxu1 %vm278_vm1, %v199_v42  ;;  %4302 = vmatprep.mubr.msk.f32.mxu0 %vm278_vm1, %v72_v43  ;;  %v231_v42 = vld [vmem:[%s7761_s0 + $0x698] sm:$0xff]  ;;  %v104_v43 = vld [vmem:[%s7761_s0 + $0x2a0] sm:$0xff] }
  0x6e   :  { %4494 = vmatprep.mubr.msk.f32.mxu1 %vm278_vm1, %v200_v44  ;;  %v232_v44 = vld [vmem:[%s7761_s0 + $0x6a0] sm:$0xff] }
  0x70   :  { %4303 = vmatmul.mubr.msk.f32.gmra.mrb[52].mxu0 %vm278_vm1, %v73_v45  ;;  %v105_v45 = vld [vmem:[%s7761_s0 + $0x2a8] sm:$0xff] }
  0x71   :  { %4495 = vmatmul.mubr.msk.f32.gmra.mrb[52].mxu1 %vm278_vm1, %v201_v46  ;;  %4305 = vmatprep.mubr.msk.f32.mxu0 %vm278_vm1, %v74_v47  ;;  %v233_v46 = vld [vmem:[%s7761_s0 + $0x6a8] sm:$0xff]  ;;  %v106_v47 = vld [vmem:[%s7761_s0 + $0x2b0] sm:$0xff] }
  0x72   :  { %4497 = vmatprep.mubr.msk.f32.mxu1 %vm278_vm1, %v202_v48  ;;  %v234_v48 = vld [vmem:[%s7761_s0 + $0x6b0] sm:$0xff] }
  0x74   :  { %4306 = vmatmul.mubr.msk.f32.gmra.mrb[54].mxu0 %vm278_vm1, %v75_v49  ;;  %v107_v49 = vld [vmem:[%s7761_s0 + $0x2b8] sm:$0xff] }
  0x75   :  { %4498 = vmatmul.mubr.msk.f32.gmra.mrb[54].mxu1 %vm278_vm1, %v203_v50  ;;  %4308 = vmatprep.mubr.msk.f32.mxu0 %vm278_vm1, %v76_v51  ;;  %v235_v50 = vld [vmem:[%s7761_s0 + $0x6b8] sm:$0xff]  ;;  %v108_v51 = vld [vmem:[%s7761_s0 + $0x2c0] sm:$0xff] }
  0x76   :  { %4500 = vmatprep.mubr.msk.f32.mxu1 %vm278_vm1, %v204_v52  ;;  %v236_v52 = vld [vmem:[%s7761_s0 + $0x6c0] sm:$0xff] }
  0x78   :  { %4309 = vmatmul.mubr.msk.f32.gmra.mrb[56].mxu0 %vm278_vm1, %v77_v53  ;;  %v109_v53 = vld [vmem:[%s7761_s0 + $0x2c8] sm:$0xff] }
  0x79   :  { %4501 = vmatmul.mubr.msk.f32.gmra.mrb[56].mxu1 %vm278_vm1, %v205_v54  ;;  %4311 = vmatprep.mubr.msk.f32.mxu0 %vm278_vm1, %v78_v55  ;;  %v237_v54 = vld [vmem:[%s7761_s0 + $0x6c8] sm:$0xff]  ;;  %v110_v55 = vld [vmem:[%s7761_s0 + $0x2d0] sm:$0xff] }
  0x7a   :  { %4503 = vmatprep.mubr.msk.f32.mxu1 %vm278_vm1, %v206_v56  ;;  %v238_v56 = vld [vmem:[%s7761_s0 + $0x6d0] sm:$0xff] }
  0x7c   :  { %4312 = vmatmul.mubr.msk.f32.gmra.mrb[58].mxu0 %vm278_vm1, %v79_v57  ;;  %v111_v57 = vld [vmem:[%s7761_s0 + $0x2d8] sm:$0xff] }
  0x7d   :  { %4504 = vmatmul.mubr.msk.f32.gmra.mrb[58].mxu1 %vm278_vm1, %v207_v58  ;;  %4314 = vmatprep.mubr.msk.f32.mxu0 %vm278_vm1, %v80_v59  ;;  %v239_v58 = vld [vmem:[%s7761_s0 + $0x6d8] sm:$0xff]  ;;  %v112_v59 = vld [vmem:[%s7761_s0 + $0x2e0] sm:$0xff] }
  0x7e   :  { %4506 = vmatprep.mubr.msk.f32.mxu1 %vm278_vm1, %v208_v60  ;;  %v240_v60 = vld [vmem:[%s7761_s0 + $0x6e0] sm:$0xff] }
  0x80   :  { %4315 = vmatmul.mubr.msk.f32.gmra.mrb[60].mxu0 %vm278_vm1, %v81_v61  ;;  %v113_v61 = vld [vmem:[%s7761_s0 + $0x2e8] sm:$0xff] }
  0x81   :  { %4507 = vmatmul.mubr.msk.f32.gmra.mrb[60].mxu1 %vm278_vm1, %v209_v62  ;;  %4317 = vmatprep.mubr.msk.f32.mxu0 %vm278_vm1, %v82_v63  ;;  %v241_v62 = vld [vmem:[%s7761_s0 + $0x6e8] sm:$0xff]  ;;  %v114_v63 = vld [vmem:[%s7761_s0 + $0x2f0] sm:$0xff] }
  0x82   :  { %4509 = vmatprep.mubr.msk.f32.mxu1 %vm278_vm1, %v210_v0  ;;  %v242_v0 = vld [vmem:[%s7761_s0 + $0x6f0] sm:$0xff] }
  0x84   :  { %4318 = vmatmul.mubr.msk.f32.gmra.mrb[62].mxu0 %vm278_vm1, %v83_v1  ;;  %v115_v1 = vld [vmem:[%s7761_s0 + $0x2f8] sm:$0xff] }
  0x85   :  { %4510 = vmatmul.mubr.msk.f32.gmra.mrb[62].mxu1 %vm278_vm1, %v211_v2  ;;  %4320 = vmatprep.mubr.msk.f32.mxu0 %vm278_vm1, %v84_v3  ;;  %v243_v2 = vld [vmem:[%s7761_s0 + $0x6f8] sm:$0xff]  ;;  %v116_v3 = vld [vmem:[%s7761_s0 + $0x300] sm:$0xff] }
  0x86   :  { %4512 = vmatprep.mubr.msk.f32.mxu1 %vm278_vm1, %v212_v4  ;;  %v244_v4 = vld [vmem:[%s7761_s0 + $0x700] sm:$0xff] }
  0x88   :  { %4321 = vmatmul.mubr.msk.f32.gmra.mrb[64].mxu0 %vm278_vm1, %v85_v5  ;;  %v117_v5 = vld [vmem:[%s7761_s0 + $0x308] sm:$0xff] }
  0x89   :  { %4513 = vmatmul.mubr.msk.f32.gmra.mrb[64].mxu1 %vm278_vm1, %v213_v6  ;;  %4323 = vmatprep.mubr.msk.f32.mxu0 %vm278_vm1, %v86_v7  ;;  %v245_v6 = vld [vmem:[%s7761_s0 + $0x708] sm:$0xff]  ;;  %v118_v7 = vld [vmem:[%s7761_s0 + $0x310] sm:$0xff] }
  0x8a   :  { %4515 = vmatprep.mubr.msk.f32.mxu1 %vm278_vm1, %v214_v8  ;;  %v246_v8 = vld [vmem:[%s7761_s0 + $0x710] sm:$0xff] }
  0x8c   :  { %4324 = vmatmul.mubr.msk.f32.gmra.mrb[66].mxu0 %vm278_vm1, %v87_v9  ;;  %v119_v9 = vld [vmem:[%s7761_s0 + $0x318] sm:$0xff] }
  0x8d   :  { %4516 = vmatmul.mubr.msk.f32.gmra.mrb[66].mxu1 %vm278_vm1, %v215_v10  ;;  %4326 = vmatprep.mubr.msk.f32.mxu0 %vm278_vm1, %v88_v11  ;;  %v247_v10 = vld [vmem:[%s7761_s0 + $0x718] sm:$0xff]  ;;  %v120_v11 = vld [vmem:[%s7761_s0 + $0x320] sm:$0xff] }
  0x8e   :  { %4518 = vmatprep.mubr.msk.f32.mxu1 %vm278_vm1, %v216_v12  ;;  %v248_v12 = vld [vmem:[%s7761_s0 + $0x720] sm:$0xff] }
  0x90   :  { %4327 = vmatmul.mubr.msk.f32.gmra.mrb[68].mxu0 %vm278_vm1, %v89_v13  ;;  %v121_v13 = vld [vmem:[%s7761_s0 + $0x328] sm:$0xff] }
  0x91   :  { %4519 = vmatmul.mubr.msk.f32.gmra.mrb[68].mxu1 %vm278_vm1, %v217_v14  ;;  %4329 = vmatprep.mubr.msk.f32.mxu0 %vm278_vm1, %v90_v15  ;;  %v249_v14 = vld [vmem:[%s7761_s0 + $0x728] sm:$0xff]  ;;  %v122_v15 = vld [vmem:[%s7761_s0 + $0x330] sm:$0xff] }
  0x92   :  { %4521 = vmatprep.mubr.msk.f32.mxu1 %vm278_vm1, %v218_v16  ;;  %v250_v16 = vld [vmem:[%s7761_s0 + $0x730] sm:$0xff] }
  0x94   :  { %4330 = vmatmul.mubr.msk.f32.gmra.mrb[70].mxu0 %vm278_vm1, %v91_v17  ;;  %v3181_v17 = vlaneseq }
  0x95   :  { %4522 = vmatmul.mubr.msk.f32.gmra.mrb[70].mxu1 %vm278_vm1, %v219_v18  ;;  %4332 = vmatprep.mubr.msk.f32.mxu0 %vm278_vm1, %v92_v19  ;;  %v123_v18 = vld [vmem:[%s7761_s0 + $0x338] sm:$0xff] }
  0x96   :  { %4524 = vmatprep.mubr.msk.f32.mxu1 %vm278_vm1, %v220_v20  ;;  %v251_v19 = vld [vmem:[%s7761_s0 + $0x738] sm:$0xff]  ;;  %v124_v20 = vld [vmem:[%s7761_s0 + $0x340] sm:$0xff] }
  0x98   :  { %4333 = vmatmul.mubr.msk.f32.gmra.mrb[72].mxu0 %vm278_vm1, %v93_v21  ;;  %v252_v21 = vld [vmem:[%s7761_s0 + $0x740] sm:$0xff] }
  0x99   :  { %4525 = vmatmul.mubr.msk.f32.gmra.mrb[72].mxu1 %vm278_vm1, %v221_v22  ;;  %4335 = vmatprep.mubr.msk.f32.mxu0 %vm278_vm1, %v94_v23  ;;  %v2922_v22 = vld [vmem:[%s7762_s4] sm:$0x1]  ;;  %v3182_v23 = vshrl.u32 %v3181_v17, 7 }
  0x9a   :  { %4527 = vmatprep.mubr.msk.f32.mxu1 %vm278_vm1, %v222_v24  ;;  %v125_v24 = vld [vmem:[%s7761_s0 + $0x348] sm:$0xff]  ;;  %vm2923_vm4 = vcmp.gt.f32.partialorder %v2922_v22, 0.0 }
  0x9c   :  { %4336 = vmatmul.mubr.msk.f32.gmra.mrb[74].mxu0 %vm278_vm1, %v95_v25  ;;  %v253_v25 = vld [vmem:[%s7761_s0 + $0x748] sm:$0xff] }
  0x9d   :  { %4528 = vmatmul.mubr.msk.f32.gmra.mrb[74].mxu1 %vm278_vm1, %v223_v26  ;;  %4338 = vmatprep.mubr.msk.f32.mxu0 %vm278_vm1, %v96_v27  ;;  %v126_v26 = vld [vmem:[%s7761_s0 + $0x350] sm:$0xff] }
  0x9e   :  { %4530 = vmatprep.mubr.msk.f32.mxu1 %vm278_vm1, %v224_v28  ;;  %v254_v27 = vld [vmem:[%s7761_s0 + $0x750] sm:$0xff]  ;;  %v3183_v28 = vsub.s32 0, %v3182_v23 }
  0xa0   :  { %4339 = vmatmul.mubr.msk.f32.gmra.mrb[76].mxu0 %vm278_vm1, %v97_v29  ;;  %v4625_v29 = vmov 0  }
  0xa1   :  { %4531 = vmatmul.mubr.msk.f32.gmra.mrb[76].mxu1 %vm278_vm1, %v225_v30  ;;  %4341 = vmatprep.mubr.msk.f32.mxu0 %vm278_vm1, %v98_v31  ;;  %v3180_v30 = vsel %vm2923_vm4, 1, %v4625_v29  ;;  %v5522_v31 = vld [vmem:[%s7763_s2] ss:$0 sm:$0xff] }
  0xa2   :  { %4533 = vmatprep.mubr.msk.f32.mxu1 %vm278_vm1, %v226_v32  ;;  %v127_v32 = vld [vmem:[%s7761_s0 + $0x358] sm:$0xff] }
  0xa4   :  { %4342 = vmatmul.mubr.msk.f32.gmra.mrb[78].mxu0 %vm278_vm1, %v99_v33  ;;  %v255_v33 = vld [vmem:[%s7761_s0 + $0x758] sm:$0xff] }
  0xa5   :  { %4534 = vmatmul.mubr.msk.f32.gmra.mrb[78].mxu1 %vm278_vm1, %v227_v34  ;;  %4344 = vmatprep.mubr.msk.f32.mxu0 %vm278_vm1, %v100_v35  ;;  %v128_v34 = vld [vmem:[%s7761_s0 + $0x360] sm:$0xff] }
  0xa6   :  { %4536 = vmatprep.mubr.msk.f32.mxu1 %vm278_vm1, %v228_v36  ;;  %v256_v35 = vld [vmem:[%s7761_s0 + $0x760] sm:$0xff] }
  0xa8   :  { %4345 = vmatmul.mubr.msk.f32.gmra.mrb[80].mxu0 %vm278_vm1, %v101_v37  ;;  %v5541_v37 = vld [vmem:[%s7764_s3] ss:$0 sm:$0xff] }
  0xa9   :  { %4537 = vmatmul.mubr.msk.f32.gmra.mrb[80].mxu1 %vm278_vm1, %v229_v38  ;;  %4347 = vmatprep.mubr.msk.f32.mxu0 %vm278_vm1, %v102_v39  ;;  %v5543_v38 = vrot.slane %v3180_v30, %v3183_v28 }
  0xaa   :  { %4539 = vmatprep.mubr.msk.f32.mxu1 %vm278_vm1, %v230_v40 }
  0xab   :  { %vm3185_vm5 = vcmp.eq.s32.totalorder %v5543_v38, 1 }
  0xac   :  { %4348 = vmatmul.mubr.msk.f32.gmra.mrb[82].mxu0 %vm278_vm1, %v103_v41 }
  0xad   :  { %4540 = vmatmul.mubr.msk.f32.gmra.mrb[82].mxu1 %vm278_vm1, %v231_v42  ;;  %4350 = vmatprep.mubr.msk.f32.mxu0 %vm278_vm1, %v104_v43 }
  0xae   :  { %4542 = vmatprep.mubr.msk.f32.mxu1 %vm278_vm1, %v232_v44 }
  0xb0   :  { %4351 = vmatmul.mubr.msk.f32.gmra.mrb[84].mxu0 %vm278_vm1, %v105_v45 }
  0xb1   :  { %4543 = vmatmul.mubr.msk.f32.gmra.mrb[84].mxu1 %vm278_vm1, %v233_v46  ;;  %4353 = vmatprep.mubr.msk.f32.mxu0 %vm278_vm1, %v106_v47  ;;  %v129_v46 = vld [vmem:[%s7761_s0 + $0x368] sm:$0xff] }
  0xb2   :  { %4545 = vmatprep.mubr.msk.f32.mxu1 %vm278_vm1, %v234_v48  ;;  %v257_v47 = vld [vmem:[%s7761_s0 + $0x768] sm:$0xff] }
  0xb4   :  { %4354 = vmatmul.mubr.msk.f32.gmra.mrb[86].mxu0 %vm278_vm1, %v107_v49 }
  0xb5   :  { %4546 = vmatmul.mubr.msk.f32.gmra.mrb[86].mxu1 %vm278_vm1, %v235_v50  ;;  %4356 = vmatprep.mubr.msk.f32.mxu0 %vm278_vm1, %v108_v51  ;;  %v130_v50 = vld [vmem:[%s7761_s0 + $0x370] sm:$0xff] }
  0xb6   :  { %4548 = vmatprep.mubr.msk.f32.mxu1 %vm278_vm1, %v236_v52  ;;  %v258_v51 = vld [vmem:[%s7761_s0 + $0x770] sm:$0xff] }
  0xb8   :  { %4357 = vmatmul.mubr.msk.f32.gmra.mrb[88].mxu0 %vm278_vm1, %v109_v53 }
  0xb9   :  { %4549 = vmatmul.mubr.msk.f32.gmra.mrb[88].mxu1 %vm278_vm1, %v237_v54  ;;  %4359 = vmatprep.mubr.msk.f32.mxu0 %vm278_vm1, %v110_v55 }
  0xba   :  { %4551 = vmatprep.mubr.msk.f32.mxu1 %vm278_vm1, %v238_v56 }
  0xbc   :  { %4360 = vmatmul.mubr.msk.f32.gmra.mrb[90].mxu0 %vm278_vm1, %v111_v57 }
  0xbd   :  { %4552 = vmatmul.mubr.msk.f32.gmra.mrb[90].mxu1 %vm278_vm1, %v239_v58  ;;  %4362 = vmatprep.mubr.msk.f32.mxu0 %vm278_vm1, %v112_v59 }
  0xbe   :  { %4554 = vmatprep.mubr.msk.f32.mxu1 %vm278_vm1, %v240_v60 }
  0xc0   :  { %4363 = vmatmul.mubr.msk.f32.gmra.mrb[92].mxu0 %vm278_vm1, %v113_v61 }
  0xc1   :  { %4555 = vmatmul.mubr.msk.f32.gmra.mrb[92].mxu1 %vm278_vm1, %v241_v62  ;;  %4365 = vmatprep.mubr.msk.f32.mxu0 %vm278_vm1, %v114_v63 }
  0xc2   :  { %4557 = vmatprep.mubr.msk.f32.mxu1 %vm278_vm1, %v242_v0 }
  0xc4   :  { %4366 = vmatmul.mubr.msk.f32.gmra.mrb[94].mxu0 %vm278_vm1, %v115_v1 }
  0xc5   :  { %4558 = vmatmul.mubr.msk.f32.gmra.mrb[94].mxu1 %vm278_vm1, %v243_v2  ;;  %4368 = vmatprep.mubr.msk.f32.mxu0 %vm278_vm1, %v116_v3  ;;  %v131_v2 = vld [vmem:[%s7761_s0 + $0x378] sm:$0xff] }
  0xc6   :  { %4560 = vmatprep.mubr.msk.f32.mxu1 %vm278_vm1, %v244_v4  ;;  %v259_v3 = vld [vmem:[%s7761_s0 + $0x778] sm:$0xff] }
  0xc8   :  { %4369 = vmatmul.mubr.msk.f32.gmra.mrb[96].mxu0 %vm278_vm1, %v117_v5 }
  0xc9   :  { %4561 = vmatmul.mubr.msk.f32.gmra.mrb[96].mxu1 %vm278_vm1, %v245_v6  ;;  %4371 = vmatprep.mubr.msk.f32.mxu0 %vm278_vm1, %v118_v7 }
  0xca   :  { %4563 = vmatprep.mubr.msk.f32.mxu1 %vm278_vm1, %v246_v8  ;;  %v132_v8 = vld [vmem:[%s7761_s0 + $0x380] sm:$0xff] }
  0xcc   :  { %4372 = vmatmul.mubr.msk.f32.gmra.mrb[98].mxu0 %vm278_vm1, %v119_v9  ;;  %v260_v9 = vld [vmem:[%s7761_s0 + $0x780] sm:$0xff] }
  0xcd   :  { %4564 = vmatmul.mubr.msk.f32.gmra.mrb[98].mxu1 %vm278_vm1, %v247_v10  ;;  %4374 = vmatprep.mubr.msk.f32.mxu0 %vm278_vm1, %v120_v11 }
  0xce   :  { %4566 = vmatprep.mubr.msk.f32.mxu1 %vm278_vm1, %v248_v12 }
  0xd0   :  { %4375 = vmatmul.mubr.msk.f32.gmra.mrb[100].mxu0 %vm278_vm1, %v121_v13 }
  0xd1   :  { %4567 = vmatmul.mubr.msk.f32.gmra.mrb[100].mxu1 %vm278_vm1, %v249_v14  ;;  %4377 = vmatprep.mubr.msk.f32.mxu0 %vm278_vm1, %v122_v15 }
  0xd2   :  { %4569 = vmatprep.mubr.msk.f32.mxu1 %vm278_vm1, %v250_v16 }
  0xd4   :  { %4378 = vmatmul.mubr.msk.f32.gmra.mrb[102].mxu0 %vm278_vm1, %v123_v18 }
  0xd5   :  { %4570 = vmatmul.mubr.msk.f32.gmra.mrb[102].mxu1 %vm278_vm1, %v251_v19  ;;  %4380 = vmatprep.mubr.msk.f32.mxu0 %vm278_vm1, %v124_v20 }
  0xd6   :  { %4572 = vmatprep.mubr.msk.f32.mxu1 %vm278_vm1, %v252_v21 }
  0xd8   :  { %4381 = vmatmul.mubr.msk.f32.gmra.mrb[104].mxu0 %vm278_vm1, %v125_v24 }
  0xd9   :  { %4573 = vmatmul.mubr.msk.f32.gmra.mrb[104].mxu1 %vm278_vm1, %v253_v25  ;;  %4383 = vmatprep.mubr.msk.f32.mxu0 %vm278_vm1, %v126_v26  ;;  %v133_v26 = vld [vmem:[%s7761_s0 + $0x388] sm:$0xff] }
  0xda   :  { %4575 = vmatprep.mubr.msk.f32.mxu1 %vm278_vm1, %v254_v27  ;;  %v261_v27 = vld [vmem:[%s7761_s0 + $0x788] sm:$0xff] }
  0xdb   :  { %v4226_v36 = vpop.f32.mrb[0].mxu0 }
  0xdc   :  { %v4418_v39 = vpop.f32.mrb[0].mxu1  ;;  %v2404_v40 = vmul.f32 %v4226_v36, %v5522_v31  ;;  %v1117_v42 = vpop.f32.mrb[1].mxu0  ;;  %4384 = vmatmul.mubr.msk.f32.gmra.mrb[106].mxu0 %vm278_vm1, %v127_v32 }
  0xdd   :  { %v2532_v41 = vmul.f32 %v4418_v39, %v5522_v31  ;;  %v1757_v43 = vpop.f32.mrb[1].mxu1  ;;  %4576 = vmatmul.mubr.msk.f32.gmra.mrb[106].mxu1 %vm278_vm1, %v255_v33  ;;  %v2403_v44 = vmul.f32 %v5522_v31, %v1117_v42  ;;  %4386 = vmatprep.mubr.msk.f32.mxu0 %vm278_vm1, %v128_v34  ;;  %v134_v33 = vld [vmem:[%s7761_s0 + $0x390] sm:$0xff] }
  0xde   :  { %v2531_v45 = vmul.f32 %v5522_v31, %v1757_v43  ;;  %4578 = vmatprep.mubr.msk.f32.mxu1 %vm278_vm1, %v256_v35  ;;  %v2667_v48 = vadd.f32 %v5541_v37, %v2404_v40  ;;  %v262_v34 = vld [vmem:[%s7761_s0 + $0x790] sm:$0xff] }
  0xdf   :  { %v2795_v49 = vadd.f32 %v5541_v37, %v2532_v41  ;;  %v2666_v52 = vadd.f32 %v5541_v37, %v2403_v44  ;;  %v4229_v54 = vpop.f32.mrb[2].mxu0 }
  0xe0   :  { %v2794_v53 = vadd.f32 %v5541_v37, %v2531_v45  ;;  %v4421_v55 = vpop.f32.mrb[2].mxu1  ;;  %v2925_v56 = vmax.f32 %v2667_v48, 0.0  ;;  %v2406_v58 = vmul.f32 %v4229_v54, %v5522_v31  ;;  %v1127_v60 = vpop.f32.mrb[3].mxu0  ;;  %4387 = vmatmul.mubr.msk.f32.gmra.mrb[108].mxu0 %vm278_vm1, %v129_v46  ;;  %v263_v54 = vld [vmem:[%s7761_s0 + $0x798] sm:$0xff] }
  0xe1   :  { %v3053_v57 = vmax.f32 %v2795_v49, 0.0  ;;  %v2534_v59 = vmul.f32 %v4421_v55, %v5522_v31  ;;  %v1767_v61 = vpop.f32.mrb[3].mxu1  ;;  %4579 = vmatmul.mubr.msk.f32.gmra.mrb[108].mxu1 %vm278_vm1, %v257_v47  ;;  %v2924_v62 = vmax.f32 %v2666_v52, 0.0  ;;  %v2405_v0 = vmul.f32 %v5522_v31, %v1127_v60  ;;  %4389 = vmatprep.mubr.msk.f32.mxu0 %vm278_vm1, %v130_v50  ;;  %v264_v60 = vld [vmem:[%s7761_s0 + $0x7a0] sm:$0xff] }
  0xe2   :  { %v3052_v63 = vmax.f32 %v2794_v53, 0.0  ;;  %v2533_v1 = vmul.f32 %v5522_v31, %v1767_v61  ;;  %4581 = vmatprep.mubr.msk.f32.mxu1 %vm278_vm1, %v258_v51  ;;  %v3187_v4 = vsel %vm3185_vm5, %v2925_v56, %v2667_v48  ;;  %v2669_v6 = vadd.f32 %v5541_v37, %v2406_v58 }
  0xe3   :  { %v3315_v5 = vsel %vm3185_vm5, %v3053_v57, %v2795_v49  ;;  %v2797_v7 = vadd.f32 %v5541_v37, %v2534_v59  ;;  %3444 = vst.msk [vmem:[%s7765_s5 + $0x8] sm:$0xff] %vm3442_vm6, %v3187_v4  ;;  %v3186_v10 = vsel %vm3185_vm5, %v2924_v62, %v2666_v52  ;;  %v2668_v12 = vadd.f32 %v5541_v37, %v2405_v0  ;;  %v4232_v14 = vpop.f32.mrb[4].mxu0  ;;  %v136_v59 = vld [vmem:[%s7761_s0 + $0x3a0] sm:$0xff] }
  0xe4   :  { %3572 = vst.msk [vmem:[%s7765_s5 + $0x408] sm:$0xff] %vm3442_vm6, %v3315_v5  ;;  %v3314_v11 = vsel %vm3185_vm5, %v3052_v63, %v2794_v53  ;;  %v2796_v13 = vadd.f32 %v5541_v37, %v2533_v1  ;;  %v4424_v15 = vpop.f32.mrb[4].mxu1  ;;  %3443 = vst.msk [vmem:[%s7765_s5] sm:$0xff] %vm3442_vm6, %v3186_v10  ;;  %v2927_v16 = vmax.f32 %v2669_v6, 0.0  ;;  %v2408_v18 = vmul.f32 %v4232_v14, %v5522_v31  ;;  %v1137_v20 = vpop.f32.mrb[5].mxu0  ;;  %v135_v53 = vld [vmem:[%s7761_s0 + $0x398] sm:$0xff] }
  0xe5   :  { %3571 = vst.msk [vmem:[%s7765_s5 + $0x400] sm:$0xff] %vm3442_vm6, %v3314_v11  ;;  %v3055_v17 = vmax.f32 %v2797_v7, 0.0  ;;  %v2536_v19 = vmul.f32 %v4424_v15, %v5522_v31  ;;  %4390 = vmatmul.mubr.msk.f32.gmra.mrb[110].mxu0 %vm278_vm1, %v131_v2  ;;  %v1777_v21 = vpop.f32.mrb[5].mxu1  ;;  %4582 = vmatmul.mubr.msk.f32.gmra.mrb[110].mxu1 %vm278_vm1, %v259_v3  ;;  %v2926_v22 = vmax.f32 %v2668_v12, 0.0  ;;  %v2407_v24 = vmul.f32 %v5522_v31, %v1137_v20  ;;  %v265_v14 = vld [vmem:[%s7761_s0 + $0x7a8] sm:$0xff]  ;;  %v266_v20 = vld [vmem:[%s7761_s0 + $0x7b0] sm:$0xff] }
  0xe6   :  { %v3054_v23 = vmax.f32 %v2796_v13, 0.0  ;;  %v2535_v25 = vmul.f32 %v5522_v31, %v1777_v21  ;;  %4392 = vmatprep.mubr.msk.f32.mxu0 %vm278_vm1, %v132_v8  ;;  %4584 = vmatprep.mubr.msk.f32.mxu1 %vm278_vm1, %v260_v9  ;;  %v3189_v28 = vsel %vm3185_vm5, %v2927_v16, %v2669_v6  ;;  %v2671_v30 = vadd.f32 %v5541_v37, %v2408_v18 }
  0xe7   :  { %v3317_v29 = vsel %vm3185_vm5, %v3055_v17, %v2797_v7  ;;  %v2799_v32 = vadd.f32 %v5541_v37, %v2536_v19  ;;  %3446 = vst.msk [vmem:[%s7765_s5 + $0x18] sm:$0xff] %vm3442_vm6, %v3189_v28  ;;  %v3188_v35 = vsel %vm3185_vm5, %v2926_v22, %v2668_v12  ;;  %v2670_v39 = vadd.f32 %v5541_v37, %v2407_v24  ;;  %v4235_v41 = vpop.f32.mrb[6].mxu0  ;;  %v138_v19 = vld [vmem:[%s7761_s0 + $0x3b0] sm:$0xff] }
  0xe8   :  { %3574 = vst.msk [vmem:[%s7765_s5 + $0x418] sm:$0xff] %vm3442_vm6, %v3317_v29  ;;  %v3316_v36 = vsel %vm3185_vm5, %v3054_v23, %v2796_v13  ;;  %v2798_v40 = vadd.f32 %v5541_v37, %v2535_v25  ;;  %v4427_v42 = vpop.f32.mrb[6].mxu1  ;;  %3445 = vst.msk [vmem:[%s7765_s5 + $0x10] sm:$0xff] %vm3442_vm6, %v3188_v35  ;;  %v2929_v43 = vmax.f32 %v2671_v30, 0.0  ;;  %v2410_v45 = vmul.f32 %v4235_v41, %v5522_v31  ;;  %v1147_v47 = vpop.f32.mrb[7].mxu0  ;;  %v137_v13 = vld [vmem:[%s7761_s0 + $0x3a8] sm:$0xff] }
  0xe9   :  { %3573 = vst.msk [vmem:[%s7765_s5 + $0x410] sm:$0xff] %vm3442_vm6, %v3316_v36  ;;  %v3057_v44 = vmax.f32 %v2799_v32, 0.0  ;;  %v2538_v46 = vmul.f32 %v4427_v42, %v5522_v31  ;;  %4393 = vmatmul.mubr.msk.f32.gmra.mrb[112].mxu0 %vm278_vm1, %v133_v26  ;;  %v1787_v48 = vpop.f32.mrb[7].mxu1  ;;  %4585 = vmatmul.mubr.msk.f32.gmra.mrb[112].mxu1 %vm278_vm1, %v261_v27  ;;  %v2928_v49 = vmax.f32 %v2670_v39, 0.0  ;;  %v2409_v51 = vmul.f32 %v5522_v31, %v1147_v47  ;;  %v267_v41 = vld [vmem:[%s7761_s0 + $0x7b8] sm:$0xff]  ;;  %v268_v47 = vld [vmem:[%s7761_s0 + $0x7c0] sm:$0xff] }
  0xea   :  { %v3056_v50 = vmax.f32 %v2798_v40, 0.0  ;;  %v2537_v52 = vmul.f32 %v5522_v31, %v1787_v48  ;;  %4395 = vmatprep.mubr.msk.f32.mxu0 %vm278_vm1, %v134_v33  ;;  %4587 = vmatprep.mubr.msk.f32.mxu1 %vm278_vm1, %v262_v34  ;;  %v3191_v55 = vsel %vm3185_vm5, %v2929_v43, %v2671_v30  ;;  %v2673_v57 = vadd.f32 %v5541_v37, %v2410_v45 }
  0xeb   :  { %v3319_v56 = vsel %vm3185_vm5, %v3057_v44, %v2799_v32  ;;  %v2801_v58 = vadd.f32 %v5541_v37, %v2538_v46  ;;  %3448 = vst.msk [vmem:[%s7765_s5 + $0x28] sm:$0xff] %vm3442_vm6, %v3191_v55  ;;  %v3190_v61 = vsel %vm3185_vm5, %v2928_v49, %v2670_v39  ;;  %v2672_v63 = vadd.f32 %v5541_v37, %v2409_v51  ;;  %v4238_v1 = vpop.f32.mrb[8].mxu0  ;;  %v140_v46 = vld [vmem:[%s7761_s0 + $0x3c0] sm:$0xff] }
  0xec   :  { %3576 = vst.msk [vmem:[%s7765_s5 + $0x428] sm:$0xff] %vm3442_vm6, %v3319_v56  ;;  %v3318_v62 = vsel %vm3185_vm5, %v3056_v50, %v2798_v40  ;;  %v2800_v0 = vadd.f32 %v5541_v37, %v2537_v52  ;;  %v4430_v2 = vpop.f32.mrb[8].mxu1  ;;  %3447 = vst.msk [vmem:[%s7765_s5 + $0x20] sm:$0xff] %vm3442_vm6, %v3190_v61  ;;  %v2931_v3 = vmax.f32 %v2673_v57, 0.0  ;;  %v2412_v5 = vmul.f32 %v4238_v1, %v5522_v31  ;;  %v1157_v7 = vpop.f32.mrb[9].mxu0  ;;  %v139_v40 = vld [vmem:[%s7761_s0 + $0x3b8] sm:$0xff] }
  0xed   :  { %3575 = vst.msk [vmem:[%s7765_s5 + $0x420] sm:$0xff] %vm3442_vm6, %v3318_v62  ;;  %v3059_v4 = vmax.f32 %v2801_v58, 0.0  ;;  %v2540_v6 = vmul.f32 %v4430_v2, %v5522_v31  ;;  %4396 = vmatmul.mubr.msk.f32.gmra.mrb[114].mxu0 %vm278_vm1, %v135_v53  ;;  %v1797_v8 = vpop.f32.mrb[9].mxu1  ;;  %4588 = vmatmul.mubr.msk.f32.gmra.mrb[114].mxu1 %vm278_vm1, %v263_v54  ;;  %v2930_v9 = vmax.f32 %v2672_v63, 0.0  ;;  %v2411_v11 = vmul.f32 %v5522_v31, %v1157_v7  ;;  %v269_v1 = vld [vmem:[%s7761_s0 + $0x7c8] sm:$0xff]  ;;  %v270_v7 = vld [vmem:[%s7761_s0 + $0x7d0] sm:$0xff] }
  0xee   :  { %v3058_v10 = vmax.f32 %v2800_v0, 0.0  ;;  %v2539_v12 = vmul.f32 %v5522_v31, %v1797_v8  ;;  %4398 = vmatprep.mubr.msk.f32.mxu0 %vm278_vm1, %v136_v59  ;;  %4590 = vmatprep.mubr.msk.f32.mxu1 %vm278_vm1, %v264_v60  ;;  %v3193_v15 = vsel %vm3185_vm5, %v2931_v3, %v2673_v57  ;;  %v2675_v17 = vadd.f32 %v5541_v37, %v2412_v5 }
  0xef   :  { %v3321_v16 = vsel %vm3185_vm5, %v3059_v4, %v2801_v58  ;;  %v2803_v18 = vadd.f32 %v5541_v37, %v2540_v6  ;;  %3450 = vst.msk [vmem:[%s7765_s5 + $0x38] sm:$0xff] %vm3442_vm6, %v3193_v15  ;;  %v3192_v21 = vsel %vm3185_vm5, %v2930_v9, %v2672_v63  ;;  %v2674_v23 = vadd.f32 %v5541_v37, %v2411_v11  ;;  %v4241_v25 = vpop.f32.mrb[10].mxu0  ;;  %v142_v6 = vld [vmem:[%s7761_s0 + $0x3d0] sm:$0xff] }
  0xf0   :  { %3578 = vst.msk [vmem:[%s7765_s5 + $0x438] sm:$0xff] %vm3442_vm6, %v3321_v16  ;;  %v3320_v22 = vsel %vm3185_vm5, %v3058_v10, %v2800_v0  ;;  %v2802_v24 = vadd.f32 %v5541_v37, %v2539_v12  ;;  %v4433_v26 = vpop.f32.mrb[10].mxu1  ;;  %3449 = vst.msk [vmem:[%s7765_s5 + $0x30] sm:$0xff] %vm3442_vm6, %v3192_v21  ;;  %v2933_v27 = vmax.f32 %v2675_v17, 0.0  ;;  %v2414_v29 = vmul.f32 %v4241_v25, %v5522_v31  ;;  %v1167_v32 = vpop.f32.mrb[11].mxu0  ;;  %v141_v0 = vld [vmem:[%s7761_s0 + $0x3c8] sm:$0xff] }
  0xf1   :  { %3577 = vst.msk [vmem:[%s7765_s5 + $0x430] sm:$0xff] %vm3442_vm6, %v3320_v22  ;;  %v3061_v28 = vmax.f32 %v2803_v18, 0.0  ;;  %v2542_v30 = vmul.f32 %v4433_v26, %v5522_v31  ;;  %4399 = vmatmul.mubr.msk.f32.gmra.mrb[116].mxu0 %vm278_vm1, %v137_v13  ;;  %v1807_v33 = vpop.f32.mrb[11].mxu1  ;;  %4591 = vmatmul.mubr.msk.f32.gmra.mrb[116].mxu1 %vm278_vm1, %v265_v14  ;;  %v2932_v34 = vmax.f32 %v2674_v23, 0.0  ;;  %v2413_v36 = vmul.f32 %v5522_v31, %v1167_v32  ;;  %v271_v25 = vld [vmem:[%s7761_s0 + $0x7d8] sm:$0xff]  ;;  %v272_v32 = vld [vmem:[%s7761_s0 + $0x7e0] sm:$0xff] }
  0xf2   :  { %v3060_v35 = vmax.f32 %v2802_v24, 0.0  ;;  %v2541_v39 = vmul.f32 %v5522_v31, %v1807_v33  ;;  %4401 = vmatprep.mubr.msk.f32.mxu0 %vm278_vm1, %v138_v19  ;;  %4593 = vmatprep.mubr.msk.f32.mxu1 %vm278_vm1, %v266_v20  ;;  %v3195_v42 = vsel %vm3185_vm5, %v2933_v27, %v2675_v17  ;;  %v2677_v44 = vadd.f32 %v5541_v37, %v2414_v29 }
  0xf3   :  { %v3323_v43 = vsel %vm3185_vm5, %v3061_v28, %v2803_v18  ;;  %v2805_v45 = vadd.f32 %v5541_v37, %v2542_v30  ;;  %3452 = vst.msk [vmem:[%s7765_s5 + $0x48] sm:$0xff] %vm3442_vm6, %v3195_v42  ;;  %v3194_v48 = vsel %vm3185_vm5, %v2932_v34, %v2674_v23  ;;  %v2676_v50 = vadd.f32 %v5541_v37, %v2413_v36  ;;  %v4244_v52 = vpop.f32.mrb[12].mxu0  ;;  %v144_v30 = vld [vmem:[%s7761_s0 + $0x3e0] sm:$0xff] }
  0xf4   :  { %3580 = vst.msk [vmem:[%s7765_s5 + $0x448] sm:$0xff] %vm3442_vm6, %v3323_v43  ;;  %v3322_v49 = vsel %vm3185_vm5, %v3060_v35, %v2802_v24  ;;  %v2804_v51 = vadd.f32 %v5541_v37, %v2541_v39  ;;  %v4436_v53 = vpop.f32.mrb[12].mxu1  ;;  %3451 = vst.msk [vmem:[%s7765_s5 + $0x40] sm:$0xff] %vm3442_vm6, %v3194_v48  ;;  %v2935_v54 = vmax.f32 %v2677_v44, 0.0  ;;  %v2416_v56 = vmul.f32 %v4244_v52, %v5522_v31  ;;  %v1177_v58 = vpop.f32.mrb[13].mxu0  ;;  %v143_v24 = vld [vmem:[%s7761_s0 + $0x3d8] sm:$0xff] }
  0xf5   :  { %3579 = vst.msk [vmem:[%s7765_s5 + $0x440] sm:$0xff] %vm3442_vm6, %v3322_v49  ;;  %v3063_v55 = vmax.f32 %v2805_v45, 0.0  ;;  %v2544_v57 = vmul.f32 %v4436_v53, %v5522_v31  ;;  %4402 = vmatmul.mubr.msk.f32.gmra.mrb[118].mxu0 %vm278_vm1, %v139_v40  ;;  %v1817_v59 = vpop.f32.mrb[13].mxu1  ;;  %4594 = vmatmul.mubr.msk.f32.gmra.mrb[118].mxu1 %vm278_vm1, %v267_v41  ;;  %v2934_v60 = vmax.f32 %v2676_v50, 0.0  ;;  %v2415_v62 = vmul.f32 %v5522_v31, %v1177_v58  ;;  %v273_v52 = vld [vmem:[%s7761_s0 + $0x7e8] sm:$0xff]  ;;  %v274_v58 = vld [vmem:[%s7761_s0 + $0x7f0] sm:$0xff] }
  0xf6   :  { %v3062_v61 = vmax.f32 %v2804_v51, 0.0  ;;  %v2543_v63 = vmul.f32 %v5522_v31, %v1817_v59  ;;  %4404 = vmatprep.mubr.msk.f32.mxu0 %vm278_vm1, %v140_v46  ;;  %4596 = vmatprep.mubr.msk.f32.mxu1 %vm278_vm1, %v268_v47  ;;  %v3197_v2 = vsel %vm3185_vm5, %v2935_v54, %v2677_v44  ;;  %v2679_v4 = vadd.f32 %v5541_v37, %v2416_v56 }
  0xf7   :  { %v3325_v3 = vsel %vm3185_vm5, %v3063_v55, %v2805_v45  ;;  %v2807_v5 = vadd.f32 %v5541_v37, %v2544_v57  ;;  %3454 = vst.msk [vmem:[%s7765_s5 + $0x58] sm:$0xff] %vm3442_vm6, %v3197_v2  ;;  %v3196_v8 = vsel %vm3185_vm5, %v2934_v60, %v2676_v50  ;;  %v2678_v10 = vadd.f32 %v5541_v37, %v2415_v62  ;;  %v4247_v12 = vpop.f32.mrb[14].mxu0  ;;  %v146_v57 = vld [vmem:[%s7761_s0 + $0x3f0] sm:$0xff] }
  0xf8   :  { %3582 = vst.msk [vmem:[%s7765_s5 + $0x458] sm:$0xff] %vm3442_vm6, %v3325_v3  ;;  %v3324_v9 = vsel %vm3185_vm5, %v3062_v61, %v2804_v51  ;;  %v2806_v11 = vadd.f32 %v5541_v37, %v2543_v63  ;;  %v4439_v13 = vpop.f32.mrb[14].mxu1  ;;  %3453 = vst.msk [vmem:[%s7765_s5 + $0x50] sm:$0xff] %vm3442_vm6, %v3196_v8  ;;  %v2937_v14 = vmax.f32 %v2679_v4, 0.0  ;;  %v2418_v16 = vmul.f32 %v4247_v12, %v5522_v31  ;;  %v1187_v18 = vpop.f32.mrb[15].mxu0  ;;  %v145_v51 = vld [vmem:[%s7761_s0 + $0x3e8] sm:$0xff] }
  0xf9   :  { %3581 = vst.msk [vmem:[%s7765_s5 + $0x450] sm:$0xff] %vm3442_vm6, %v3324_v9  ;;  %v3065_v15 = vmax.f32 %v2807_v5, 0.0  ;;  %v2546_v17 = vmul.f32 %v4439_v13, %v5522_v31  ;;  %4405 = vmatmul.mubr.msk.f32.gmra.mrb[120].mxu0 %vm278_vm1, %v141_v0  ;;  %v1827_v19 = vpop.f32.mrb[15].mxu1  ;;  %4597 = vmatmul.mubr.msk.f32.gmra.mrb[120].mxu1 %vm278_vm1, %v269_v1  ;;  %v2936_v20 = vmax.f32 %v2678_v10, 0.0  ;;  %v2417_v22 = vmul.f32 %v5522_v31, %v1187_v18  ;;  %v275_v12 = vld [vmem:[%s7761_s0 + $0x7f8] sm:$0xff] }
  0xfa   :  { %v3064_v21 = vmax.f32 %v2806_v11, 0.0  ;;  %v2545_v23 = vmul.f32 %v5522_v31, %v1827_v19  ;;  %4407 = vmatprep.mubr.msk.f32.mxu0 %vm278_vm1, %v142_v6  ;;  %4599 = vmatprep.mubr.msk.f32.mxu1 %vm278_vm1, %v270_v7  ;;  %v3199_v26 = vsel %vm3185_vm5, %v2937_v14, %v2679_v4  ;;  %v2681_v28 = vadd.f32 %v5541_v37, %v2418_v16 }
  0xfb   :  { %v3327_v27 = vsel %vm3185_vm5, %v3065_v15, %v2807_v5  ;;  %v2809_v29 = vadd.f32 %v5541_v37, %v2546_v17  ;;  %3456 = vst.msk [vmem:[%s7765_s5 + $0x68] sm:$0xff] %vm3442_vm6, %v3199_v26  ;;  %v3198_v33 = vsel %vm3185_vm5, %v2936_v20, %v2678_v10  ;;  %v2680_v35 = vadd.f32 %v5541_v37, %v2417_v22  ;;  %v4250_v39 = vpop.f32.mrb[16].mxu0 }
  0xfc   :  { %3584 = vst.msk [vmem:[%s7765_s5 + $0x468] sm:$0xff] %vm3442_vm6, %v3327_v27  ;;  %v3326_v34 = vsel %vm3185_vm5, %v3064_v21, %v2806_v11  ;;  %v2808_v36 = vadd.f32 %v5541_v37, %v2545_v23  ;;  %v4442_v40 = vpop.f32.mrb[16].mxu1  ;;  %3455 = vst.msk [vmem:[%s7765_s5 + $0x60] sm:$0xff] %vm3442_vm6, %v3198_v33  ;;  %v2939_v41 = vmax.f32 %v2681_v28, 0.0  ;;  %v2420_v43 = vmul.f32 %v4250_v39, %v5522_v31  ;;  %v1197_v45 = vpop.f32.mrb[17].mxu0  ;;  %v147_v11 = vld [vmem:[%s7761_s0 + $0x3f8] sm:$0xff] }
  0xfd   :  { %3583 = vst.msk [vmem:[%s7765_s5 + $0x460] sm:$0xff] %vm3442_vm6, %v3326_v34  ;;  %v3067_v42 = vmax.f32 %v2809_v29, 0.0  ;;  %v2548_v44 = vmul.f32 %v4442_v40, %v5522_v31  ;;  %4408 = vmatmul.mubr.msk.f32.gmra.mrb[122].mxu0 %vm278_vm1, %v143_v24  ;;  %v1837_v46 = vpop.f32.mrb[17].mxu1  ;;  %4600 = vmatmul.mubr.msk.f32.gmra.mrb[122].mxu1 %vm278_vm1, %v271_v25  ;;  %v2938_v47 = vmax.f32 %v2680_v35, 0.0  ;;  %v2419_v49 = vmul.f32 %v5522_v31, %v1197_v45 }
  0xfe   :  { %v3066_v48 = vmax.f32 %v2808_v36, 0.0  ;;  %v2547_v50 = vmul.f32 %v5522_v31, %v1837_v46  ;;  %4410 = vmatprep.mubr.msk.f32.mxu0 %vm278_vm1, %v144_v30  ;;  %4602 = vmatprep.mubr.msk.f32.mxu1 %vm278_vm1, %v272_v32  ;;  %v3201_v53 = vsel %vm3185_vm5, %v2939_v41, %v2681_v28  ;;  %v2683_v55 = vadd.f32 %v5541_v37, %v2420_v43 }
  0xff   :  { %v3329_v54 = vsel %vm3185_vm5, %v3067_v42, %v2809_v29  ;;  %v2811_v56 = vadd.f32 %v5541_v37, %v2548_v44  ;;  %3458 = vst.msk [vmem:[%s7765_s5 + $0x78] sm:$0xff] %vm3442_vm6, %v3201_v53  ;;  %v3200_v59 = vsel %vm3185_vm5, %v2938_v47, %v2680_v35  ;;  %v2682_v61 = vadd.f32 %v5541_v37, %v2419_v49  ;;  %v4253_v63 = vpop.f32.mrb[18].mxu0 }
 0x100   :  { %3586 = vst.msk [vmem:[%s7765_s5 + $0x478] sm:$0xff] %vm3442_vm6, %v3329_v54  ;;  %v3328_v60 = vsel %vm3185_vm5, %v3066_v48, %v2808_v36  ;;  %v2810_v62 = vadd.f32 %v5541_v37, %v2547_v50  ;;  %v4445_v0 = vpop.f32.mrb[18].mxu1  ;;  %3457 = vst.msk [vmem:[%s7765_s5 + $0x70] sm:$0xff] %vm3442_vm6, %v3200_v59  ;;  %v2941_v1 = vmax.f32 %v2683_v55, 0.0  ;;  %v2422_v3 = vmul.f32 %v4253_v63, %v5522_v31  ;;  %v1207_v5 = vpop.f32.mrb[19].mxu0 }
 0x101   :  { %3585 = vst.msk [vmem:[%s7765_s5 + $0x470] sm:$0xff] %vm3442_vm6, %v3328_v60  ;;  %v3069_v2 = vmax.f32 %v2811_v56, 0.0  ;;  %v2550_v4 = vmul.f32 %v4445_v0, %v5522_v31  ;;  %4411 = vmatmul.mubr.msk.f32.gmra.mrb[124].mxu0 %vm278_vm1, %v145_v51  ;;  %v1847_v6 = vpop.f32.mrb[19].mxu1  ;;  %4603 = vmatmul.mubr.msk.f32.gmra.mrb[124].mxu1 %vm278_vm1, %v273_v52  ;;  %v2940_v7 = vmax.f32 %v2682_v61, 0.0  ;;  %v2421_v9 = vmul.f32 %v5522_v31, %v1207_v5 }
 0x102   :  { %v3068_v8 = vmax.f32 %v2810_v62, 0.0  ;;  %v2549_v10 = vmul.f32 %v5522_v31, %v1847_v6  ;;  %4413 = vmatprep.mubr.msk.f32.mxu0 %vm278_vm1, %v146_v57  ;;  %4605 = vmatprep.mubr.msk.f32.mxu1 %vm278_vm1, %v274_v58  ;;  %v3203_v13 = vsel %vm3185_vm5, %v2941_v1, %v2683_v55  ;;  %v2685_v15 = vadd.f32 %v5541_v37, %v2422_v3 }
 0x103   :  { %v3331_v14 = vsel %vm3185_vm5, %v3069_v2, %v2811_v56  ;;  %v2813_v16 = vadd.f32 %v5541_v37, %v2550_v4  ;;  %3460 = vst.msk [vmem:[%s7765_s5 + $0x88] sm:$0xff] %vm3442_vm6, %v3203_v13  ;;  %v3202_v17 = vsel %vm3185_vm5, %v2940_v7, %v2682_v61  ;;  %v2684_v19 = vadd.f32 %v5541_v37, %v2421_v9  ;;  %v4256_v21 = vpop.f32.mrb[20].mxu0 }
 0x104   :  { %3588 = vst.msk [vmem:[%s7765_s5 + $0x488] sm:$0xff] %vm3442_vm6, %v3331_v14  ;;  %v3330_v18 = vsel %vm3185_vm5, %v3068_v8, %v2810_v62  ;;  %v2812_v20 = vadd.f32 %v5541_v37, %v2549_v10  ;;  %v4448_v22 = vpop.f32.mrb[20].mxu1  ;;  %3459 = vst.msk [vmem:[%s7765_s5 + $0x80] sm:$0xff] %vm3442_vm6, %v3202_v17  ;;  %v2943_v23 = vmax.f32 %v2685_v15, 0.0  ;;  %v2424_v25 = vmul.f32 %v4256_v21, %v5522_v31  ;;  %v1217_v27 = vpop.f32.mrb[21].mxu0 }
 0x105   :  { %3587 = vst.msk [vmem:[%s7765_s5 + $0x480] sm:$0xff] %vm3442_vm6, %v3330_v18  ;;  %v3071_v24 = vmax.f32 %v2813_v16, 0.0  ;;  %v2552_v26 = vmul.f32 %v4448_v22, %v5522_v31  ;;  %4414 = vmatmul.mubr.msk.f32.gmra.mrb[126].mxu0 %vm278_vm1, %v147_v11  ;;  %v1857_v28 = vpop.f32.mrb[21].mxu1  ;;  %4606 = vmatmul.mubr.msk.f32.gmra.mrb[126].mxu1 %vm278_vm1, %v275_v12  ;;  %v2942_v29 = vmax.f32 %v2684_v19, 0.0  ;;  %v2423_v32 = vmul.f32 %v5522_v31, %v1217_v27 }
 0x106   :  { %v3070_v30 = vmax.f32 %v2812_v20, 0.0  ;;  %v2551_v33 = vmul.f32 %v5522_v31, %v1857_v28  ;;  %v3205_v34 = vsel %vm3185_vm5, %v2943_v23, %v2685_v15  ;;  %v2687_v36 = vadd.f32 %v5541_v37, %v2424_v25 }
 0x107   :  { %v3333_v35 = vsel %vm3185_vm5, %v3071_v24, %v2813_v16  ;;  %v2815_v39 = vadd.f32 %v5541_v37, %v2552_v26  ;;  %3462 = vst.msk [vmem:[%s7765_s5 + $0x98] sm:$0xff] %vm3442_vm6, %v3205_v34  ;;  %v3204_v40 = vsel %vm3185_vm5, %v2942_v29, %v2684_v19  ;;  %v2686_v42 = vadd.f32 %v5541_v37, %v2423_v32  ;;  %v4259_v44 = vpop.f32.mrb[22].mxu0 }
 0x108   :  { %3590 = vst.msk [vmem:[%s7765_s5 + $0x498] sm:$0xff] %vm3442_vm6, %v3333_v35  ;;  %v3332_v41 = vsel %vm3185_vm5, %v3070_v30, %v2812_v20  ;;  %v2814_v43 = vadd.f32 %v5541_v37, %v2551_v33  ;;  %v4451_v45 = vpop.f32.mrb[22].mxu1  ;;  %3461 = vst.msk [vmem:[%s7765_s5 + $0x90] sm:$0xff] %vm3442_vm6, %v3204_v40  ;;  %v2945_v46 = vmax.f32 %v2687_v36, 0.0  ;;  %v2426_v48 = vmul.f32 %v4259_v44, %v5522_v31  ;;  %v1227_v50 = vpop.f32.mrb[23].mxu0 }
 0x109   :  { %3589 = vst.msk [vmem:[%s7765_s5 + $0x490] sm:$0xff] %vm3442_vm6, %v3332_v41  ;;  %v3073_v47 = vmax.f32 %v2815_v39, 0.0  ;;  %v2554_v49 = vmul.f32 %v4451_v45, %v5522_v31  ;;  %v1867_v51 = vpop.f32.mrb[23].mxu1  ;;  %v2944_v52 = vmax.f32 %v2686_v42, 0.0  ;;  %v2425_v54 = vmul.f32 %v5522_v31, %v1227_v50 }
 0x10a   :  { %v3072_v53 = vmax.f32 %v2814_v43, 0.0  ;;  %v2553_v55 = vmul.f32 %v5522_v31, %v1867_v51  ;;  %v3207_v56 = vsel %vm3185_vm5, %v2945_v46, %v2687_v36  ;;  %v2689_v58 = vadd.f32 %v5541_v37, %v2426_v48 }
 0x10b   :  { %v3335_v57 = vsel %vm3185_vm5, %v3073_v47, %v2815_v39  ;;  %v2817_v59 = vadd.f32 %v5541_v37, %v2554_v49  ;;  %3464 = vst.msk [vmem:[%s7765_s5 + $0xa8] sm:$0xff] %vm3442_vm6, %v3207_v56  ;;  %v3206_v60 = vsel %vm3185_vm5, %v2944_v52, %v2686_v42  ;;  %v2688_v62 = vadd.f32 %v5541_v37, %v2425_v54  ;;  %v4262_v0 = vpop.f32.mrb[24].mxu0 }
 0x10c   :  { %3592 = vst.msk [vmem:[%s7765_s5 + $0x4a8] sm:$0xff] %vm3442_vm6, %v3335_v57  ;;  %v3334_v61 = vsel %vm3185_vm5, %v3072_v53, %v2814_v43  ;;  %v2816_v63 = vadd.f32 %v5541_v37, %v2553_v55  ;;  %v4454_v1 = vpop.f32.mrb[24].mxu1  ;;  %3463 = vst.msk [vmem:[%s7765_s5 + $0xa0] sm:$0xff] %vm3442_vm6, %v3206_v60  ;;  %v2947_v2 = vmax.f32 %v2689_v58, 0.0  ;;  %v2428_v4 = vmul.f32 %v4262_v0, %v5522_v31  ;;  %v1237_v6 = vpop.f32.mrb[25].mxu0 }
 0x10d   :  { %3591 = vst.msk [vmem:[%s7765_s5 + $0x4a0] sm:$0xff] %vm3442_vm6, %v3334_v61  ;;  %v3075_v3 = vmax.f32 %v2817_v59, 0.0  ;;  %v2556_v5 = vmul.f32 %v4454_v1, %v5522_v31  ;;  %v1877_v7 = vpop.f32.mrb[25].mxu1  ;;  %v2946_v8 = vmax.f32 %v2688_v62, 0.0  ;;  %v2427_v10 = vmul.f32 %v5522_v31, %v1237_v6 }
 0x10e   :  { %v3074_v9 = vmax.f32 %v2816_v63, 0.0  ;;  %v2555_v11 = vmul.f32 %v5522_v31, %v1877_v7  ;;  %v3209_v12 = vsel %vm3185_vm5, %v2947_v2, %v2689_v58  ;;  %v2691_v14 = vadd.f32 %v5541_v37, %v2428_v4 }
 0x10f   :  { %v3337_v13 = vsel %vm3185_vm5, %v3075_v3, %v2817_v59  ;;  %v2819_v15 = vadd.f32 %v5541_v37, %v2556_v5  ;;  %3466 = vst.msk [vmem:[%s7765_s5 + $0xb8] sm:$0xff] %vm3442_vm6, %v3209_v12  ;;  %v3208_v16 = vsel %vm3185_vm5, %v2946_v8, %v2688_v62  ;;  %v2690_v18 = vadd.f32 %v5541_v37, %v2427_v10  ;;  %v4265_v20 = vpop.f32.mrb[26].mxu0 }
 0x110   :  { %3594 = vst.msk [vmem:[%s7765_s5 + $0x4b8] sm:$0xff] %vm3442_vm6, %v3337_v13  ;;  %v3336_v17 = vsel %vm3185_vm5, %v3074_v9, %v2816_v63  ;;  %v2818_v19 = vadd.f32 %v5541_v37, %v2555_v11  ;;  %v4457_v21 = vpop.f32.mrb[26].mxu1  ;;  %3465 = vst.msk [vmem:[%s7765_s5 + $0xb0] sm:$0xff] %vm3442_vm6, %v3208_v16  ;;  %v2949_v22 = vmax.f32 %v2691_v14, 0.0  ;;  %v2430_v24 = vmul.f32 %v4265_v20, %v5522_v31  ;;  %v1247_v26 = vpop.f32.mrb[27].mxu0 }
 0x111   :  { %3593 = vst.msk [vmem:[%s7765_s5 + $0x4b0] sm:$0xff] %vm3442_vm6, %v3336_v17  ;;  %v3077_v23 = vmax.f32 %v2819_v15, 0.0  ;;  %v2558_v25 = vmul.f32 %v4457_v21, %v5522_v31  ;;  %v1887_v27 = vpop.f32.mrb[27].mxu1  ;;  %v2948_v28 = vmax.f32 %v2690_v18, 0.0  ;;  %v2429_v30 = vmul.f32 %v5522_v31, %v1247_v26 }
 0x112   :  { %v3076_v29 = vmax.f32 %v2818_v19, 0.0  ;;  %v2557_v32 = vmul.f32 %v5522_v31, %v1887_v27  ;;  %v3211_v33 = vsel %vm3185_vm5, %v2949_v22, %v2691_v14  ;;  %v2693_v35 = vadd.f32 %v5541_v37, %v2430_v24 }
 0x113   :  { %v3339_v34 = vsel %vm3185_vm5, %v3077_v23, %v2819_v15  ;;  %v2821_v36 = vadd.f32 %v5541_v37, %v2558_v25  ;;  %3468 = vst.msk [vmem:[%s7765_s5 + $0xc8] sm:$0xff] %vm3442_vm6, %v3211_v33  ;;  %v3210_v39 = vsel %vm3185_vm5, %v2948_v28, %v2690_v18  ;;  %v2692_v41 = vadd.f32 %v5541_v37, %v2429_v30  ;;  %v4268_v43 = vpop.f32.mrb[28].mxu0 }
 0x114   :  { %3596 = vst.msk [vmem:[%s7765_s5 + $0x4c8] sm:$0xff] %vm3442_vm6, %v3339_v34  ;;  %v3338_v40 = vsel %vm3185_vm5, %v3076_v29, %v2818_v19  ;;  %v2820_v42 = vadd.f32 %v5541_v37, %v2557_v32  ;;  %v4460_v44 = vpop.f32.mrb[28].mxu1  ;;  %3467 = vst.msk [vmem:[%s7765_s5 + $0xc0] sm:$0xff] %vm3442_vm6, %v3210_v39  ;;  %v2951_v45 = vmax.f32 %v2693_v35, 0.0  ;;  %v2432_v47 = vmul.f32 %v4268_v43, %v5522_v31  ;;  %v1257_v49 = vpop.f32.mrb[29].mxu0 }
 0x115   :  { %3595 = vst.msk [vmem:[%s7765_s5 + $0x4c0] sm:$0xff] %vm3442_vm6, %v3338_v40  ;;  %v3079_v46 = vmax.f32 %v2821_v36, 0.0  ;;  %v2560_v48 = vmul.f32 %v4460_v44, %v5522_v31  ;;  %v1897_v50 = vpop.f32.mrb[29].mxu1  ;;  %v2950_v51 = vmax.f32 %v2692_v41, 0.0  ;;  %v2431_v53 = vmul.f32 %v5522_v31, %v1257_v49 }
 0x116   :  { %v3078_v52 = vmax.f32 %v2820_v42, 0.0  ;;  %v2559_v54 = vmul.f32 %v5522_v31, %v1897_v50  ;;  %v3213_v55 = vsel %vm3185_vm5, %v2951_v45, %v2693_v35  ;;  %v2695_v57 = vadd.f32 %v5541_v37, %v2432_v47 }
 0x117   :  { %v3341_v56 = vsel %vm3185_vm5, %v3079_v46, %v2821_v36  ;;  %v2823_v58 = vadd.f32 %v5541_v37, %v2560_v48  ;;  %3470 = vst.msk [vmem:[%s7765_s5 + $0xd8] sm:$0xff] %vm3442_vm6, %v3213_v55  ;;  %v3212_v59 = vsel %vm3185_vm5, %v2950_v51, %v2692_v41  ;;  %v2694_v61 = vadd.f32 %v5541_v37, %v2431_v53  ;;  %v4271_v63 = vpop.f32.mrb[30].mxu0 }
 0x118   :  { %3598 = vst.msk [vmem:[%s7765_s5 + $0x4d8] sm:$0xff] %vm3442_vm6, %v3341_v56  ;;  %v3340_v60 = vsel %vm3185_vm5, %v3078_v52, %v2820_v42  ;;  %v2822_v62 = vadd.f32 %v5541_v37, %v2559_v54  ;;  %v4463_v0 = vpop.f32.mrb[30].mxu1  ;;  %3469 = vst.msk [vmem:[%s7765_s5 + $0xd0] sm:$0xff] %vm3442_vm6, %v3212_v59  ;;  %v2953_v1 = vmax.f32 %v2695_v57, 0.0  ;;  %v2434_v3 = vmul.f32 %v4271_v63, %v5522_v31  ;;  %v1267_v5 = vpop.f32.mrb[31].mxu0 }
 0x119   :  { %3597 = vst.msk [vmem:[%s7765_s5 + $0x4d0] sm:$0xff] %vm3442_vm6, %v3340_v60  ;;  %v3081_v2 = vmax.f32 %v2823_v58, 0.0  ;;  %v2562_v4 = vmul.f32 %v4463_v0, %v5522_v31  ;;  %v1907_v6 = vpop.f32.mrb[31].mxu1  ;;  %v2952_v7 = vmax.f32 %v2694_v61, 0.0  ;;  %v2433_v9 = vmul.f32 %v5522_v31, %v1267_v5 }
 0x11a   :  { %v3080_v8 = vmax.f32 %v2822_v62, 0.0  ;;  %v2561_v10 = vmul.f32 %v5522_v31, %v1907_v6  ;;  %v3215_v11 = vsel %vm3185_vm5, %v2953_v1, %v2695_v57  ;;  %v2697_v13 = vadd.f32 %v5541_v37, %v2434_v3  ;;  %v6257_v1 = vld [vmem:[%s7763_s2] ss:$0 sm:$0xff] }
 0x11b   :  { %v3343_v12 = vsel %vm3185_vm5, %v3081_v2, %v2823_v58  ;;  %v2825_v14 = vadd.f32 %v5541_v37, %v2562_v4  ;;  %3472 = vst.msk [vmem:[%s7765_s5 + $0xe8] sm:$0xff] %vm3442_vm6, %v3215_v11  ;;  %v3214_v15 = vsel %vm3185_vm5, %v2952_v7, %v2694_v61  ;;  %v2696_v17 = vadd.f32 %v5541_v37, %v2433_v9  ;;  %v4274_v19 = vpop.f32.mrb[32].mxu0  ;;  %v6270_v11 = vld [vmem:[%s7764_s3] ss:$0 sm:$0xff] }
 0x11c   :  { %3600 = vst.msk [vmem:[%s7765_s5 + $0x4e8] sm:$0xff] %vm3442_vm6, %v3343_v12  ;;  %v3342_v16 = vsel %vm3185_vm5, %v3080_v8, %v2822_v62  ;;  %v2824_v18 = vadd.f32 %v5541_v37, %v2561_v10  ;;  %v4466_v20 = vpop.f32.mrb[32].mxu1  ;;  %3471 = vst.msk [vmem:[%s7765_s5 + $0xe0] sm:$0xff] %vm3442_vm6, %v3214_v15  ;;  %v2955_v21 = vmax.f32 %v2697_v13, 0.0  ;;  %v2436_v23 = vmul.f32 %v4274_v19, %v5522_v31  ;;  %v1277_v25 = vpop.f32.mrb[33].mxu0 }
 0x11d   :  { %3599 = vst.msk [vmem:[%s7765_s5 + $0x4e0] sm:$0xff] %vm3442_vm6, %v3342_v16  ;;  %v3083_v22 = vmax.f32 %v2825_v14, 0.0  ;;  %v2564_v24 = vmul.f32 %v4466_v20, %v5522_v31  ;;  %v1917_v26 = vpop.f32.mrb[33].mxu1  ;;  %v2954_v27 = vmax.f32 %v2696_v17, 0.0  ;;  %v2435_v29 = vmul.f32 %v5522_v31, %v1277_v25 }
 0x11e   :  { %v3082_v28 = vmax.f32 %v2824_v18, 0.0  ;;  %v2563_v30 = vmul.f32 %v5522_v31, %v1917_v26  ;;  %v3217_v32 = vsel %vm3185_vm5, %v2955_v21, %v2697_v13  ;;  %v2699_v34 = vadd.f32 %v5541_v37, %v2436_v23 }
 0x11f   :  { %v3345_v33 = vsel %vm3185_vm5, %v3083_v22, %v2825_v14  ;;  %v2827_v35 = vadd.f32 %v5541_v37, %v2564_v24  ;;  %3474 = vst.msk [vmem:[%s7765_s5 + $0xf8] sm:$0xff] %vm3442_vm6, %v3217_v32  ;;  %v3216_v36 = vsel %vm3185_vm5, %v2954_v27, %v2696_v17  ;;  %v2698_v40 = vadd.f32 %v5541_v37, %v2435_v29  ;;  %v4277_v42 = vpop.f32.mrb[34].mxu0 }
 0x120   :  { %3602 = vst.msk [vmem:[%s7765_s5 + $0x4f8] sm:$0xff] %vm3442_vm6, %v3345_v33  ;;  %v3344_v39 = vsel %vm3185_vm5, %v3082_v28, %v2824_v18  ;;  %v2826_v41 = vadd.f32 %v5541_v37, %v2563_v30  ;;  %v4469_v43 = vpop.f32.mrb[34].mxu1  ;;  %3473 = vst.msk [vmem:[%s7765_s5 + $0xf0] sm:$0xff] %vm3442_vm6, %v3216_v36  ;;  %v2957_v44 = vmax.f32 %v2699_v34, 0.0  ;;  %v2438_v46 = vmul.f32 %v4277_v42, %v5522_v31  ;;  %v1287_v48 = vpop.f32.mrb[35].mxu0 }
 0x121   :  { %3601 = vst.msk [vmem:[%s7765_s5 + $0x4f0] sm:$0xff] %vm3442_vm6, %v3344_v39  ;;  %v3085_v45 = vmax.f32 %v2827_v35, 0.0  ;;  %v2566_v47 = vmul.f32 %v4469_v43, %v5522_v31  ;;  %v1927_v49 = vpop.f32.mrb[35].mxu1  ;;  %v2956_v50 = vmax.f32 %v2698_v40, 0.0  ;;  %v2437_v52 = vmul.f32 %v5522_v31, %v1287_v48 }
 0x122   :  { %v3084_v51 = vmax.f32 %v2826_v41, 0.0  ;;  %v2565_v53 = vmul.f32 %v5522_v31, %v1927_v49  ;;  %v3219_v54 = vsel %vm3185_vm5, %v2957_v44, %v2699_v34  ;;  %v2701_v56 = vadd.f32 %v5541_v37, %v2438_v46 }
 0x123   :  { %v3347_v55 = vsel %vm3185_vm5, %v3085_v45, %v2827_v35  ;;  %v2829_v57 = vadd.f32 %v5541_v37, %v2566_v47  ;;  %3476 = vst.msk [vmem:[%s7765_s5 + $0x108] sm:$0xff] %vm3442_vm6, %v3219_v54  ;;  %v3218_v31 = vsel %vm3185_vm5, %v2956_v50, %v2698_v40  ;;  %v2700_v59 = vadd.f32 %v5541_v37, %v2437_v52  ;;  %v4280_v61 = vpop.f32.mrb[36].mxu0 }
 0x124   :  { %3604 = vst.msk [vmem:[%s7765_s5 + $0x508] sm:$0xff] %vm3442_vm6, %v3347_v55  ;;  %v3346_v58 = vsel %vm3185_vm5, %v3084_v51, %v2826_v41  ;;  %v2828_v60 = vadd.f32 %v5541_v37, %v2565_v53  ;;  %v4472_v62 = vpop.f32.mrb[36].mxu1  ;;  %3475 = vst.msk [vmem:[%s7765_s5 + $0x100] sm:$0xff] %vm3442_vm6, %v3218_v31  ;;  %v2959_v63 = vmax.f32 %v2701_v56, 0.0  ;;  %v2440_v37 = vmul.f32 %v6257_v1, %v4280_v61  ;;  %v1297_v3 = vpop.f32.mrb[37].mxu0 }
 0x125   :  { %3603 = vst.msk [vmem:[%s7765_s5 + $0x500] sm:$0xff] %vm3442_vm6, %v3346_v58  ;;  %v3087_v0 = vmax.f32 %v2829_v57, 0.0  ;;  %v2568_v2 = vmul.f32 %v6257_v1, %v4472_v62  ;;  %v1937_v4 = vpop.f32.mrb[37].mxu1  ;;  %v2958_v5 = vmax.f32 %v2700_v59, 0.0  ;;  %v2439_v7 = vmul.f32 %v6257_v1, %v1297_v3 }
 0x126   :  { %v3086_v6 = vmax.f32 %v2828_v60, 0.0  ;;  %v2567_v8 = vmul.f32 %v6257_v1, %v1937_v4  ;;  %v3221_v9 = vsel %vm3185_vm5, %v2959_v63, %v2701_v56  ;;  %v2703_v12 = vadd.f32 %v6270_v11, %v2440_v37 }
 0x127   :  { %v3349_v10 = vsel %vm3185_vm5, %v3087_v0, %v2829_v57  ;;  %v2831_v13 = vadd.f32 %v6270_v11, %v2568_v2  ;;  %3478 = vst.msk [vmem:[%s7765_s5 + $0x118] sm:$0xff] %vm3442_vm6, %v3221_v9  ;;  %v3220_v14 = vsel %vm3185_vm5, %v2958_v5, %v2700_v59  ;;  %v2702_v16 = vadd.f32 %v6270_v11, %v2439_v7  ;;  %v4283_v18 = vpop.f32.mrb[38].mxu0 }
 0x128   :  { %3606 = vst.msk [vmem:[%s7765_s5 + $0x518] sm:$0xff] %vm3442_vm6, %v3349_v10  ;;  %v3348_v15 = vsel %vm3185_vm5, %v3086_v6, %v2828_v60  ;;  %v2830_v17 = vadd.f32 %v6270_v11, %v2567_v8  ;;  %v4475_v19 = vpop.f32.mrb[38].mxu1  ;;  %3477 = vst.msk [vmem:[%s7765_s5 + $0x110] sm:$0xff] %vm3442_vm6, %v3220_v14  ;;  %v2961_v20 = vmax.f32 %v2703_v12, 0.0  ;;  %v2442_v22 = vmul.f32 %v6257_v1, %v4283_v18  ;;  %v1307_v24 = vpop.f32.mrb[39].mxu0 }
 0x129   :  { %3605 = vst.msk [vmem:[%s7765_s5 + $0x510] sm:$0xff] %vm3442_vm6, %v3348_v15  ;;  %v3089_v21 = vmax.f32 %v2831_v13, 0.0  ;;  %v2570_v23 = vmul.f32 %v6257_v1, %v4475_v19  ;;  %v1947_v25 = vpop.f32.mrb[39].mxu1  ;;  %v2960_v26 = vmax.f32 %v2702_v16, 0.0  ;;  %v2441_v28 = vmul.f32 %v6257_v1, %v1307_v24 }
 0x12a   :  { %v3088_v27 = vmax.f32 %v2830_v17, 0.0  ;;  %v2569_v29 = vmul.f32 %v6257_v1, %v1947_v25  ;;  %v3223_v30 = vsel %vm3185_vm5, %v2961_v20, %v2703_v12  ;;  %v2705_v33 = vadd.f32 %v6270_v11, %v2442_v22 }
 0x12b   :  { %v3351_v32 = vsel %vm3185_vm5, %v3089_v21, %v2831_v13  ;;  %v2833_v34 = vadd.f32 %v6270_v11, %v2570_v23  ;;  %3480 = vst.msk [vmem:[%s7765_s5 + $0x128] sm:$0xff] %vm3442_vm6, %v3223_v30  ;;  %v3222_v35 = vsel %vm3185_vm5, %v2960_v26, %v2702_v16  ;;  %v2704_v39 = vadd.f32 %v6270_v11, %v2441_v28  ;;  %v4286_v41 = vpop.f32.mrb[40].mxu0 }
 0x12c   :  { %3608 = vst.msk [vmem:[%s7765_s5 + $0x528] sm:$0xff] %vm3442_vm6, %v3351_v32  ;;  %v3350_v36 = vsel %vm3185_vm5, %v3088_v27, %v2830_v17  ;;  %v2832_v40 = vadd.f32 %v6270_v11, %v2569_v29  ;;  %v4478_v42 = vpop.f32.mrb[40].mxu1  ;;  %3479 = vst.msk [vmem:[%s7765_s5 + $0x120] sm:$0xff] %vm3442_vm6, %v3222_v35  ;;  %v2963_v43 = vmax.f32 %v2705_v33, 0.0  ;;  %v2444_v45 = vmul.f32 %v6257_v1, %v4286_v41  ;;  %v1317_v47 = vpop.f32.mrb[41].mxu0 }
 0x12d   :  { %3607 = vst.msk [vmem:[%s7765_s5 + $0x520] sm:$0xff] %vm3442_vm6, %v3350_v36  ;;  %v3091_v44 = vmax.f32 %v2833_v34, 0.0  ;;  %v2572_v46 = vmul.f32 %v6257_v1, %v4478_v42  ;;  %v1957_v48 = vpop.f32.mrb[41].mxu1  ;;  %v2962_v49 = vmax.f32 %v2704_v39, 0.0  ;;  %v2443_v51 = vmul.f32 %v6257_v1, %v1317_v47 }
 0x12e   :  { %v3090_v50 = vmax.f32 %v2832_v40, 0.0  ;;  %v2571_v52 = vmul.f32 %v6257_v1, %v1957_v48  ;;  %v3225_v53 = vsel %vm3185_vm5, %v2963_v43, %v2705_v33  ;;  %v2707_v55 = vadd.f32 %v6270_v11, %v2444_v45 }
 0x12f   :  { %v3353_v54 = vsel %vm3185_vm5, %v3091_v44, %v2833_v34  ;;  %v2835_v56 = vadd.f32 %v6270_v11, %v2572_v46  ;;  %3482 = vst.msk [vmem:[%s7765_s5 + $0x138] sm:$0xff] %vm3442_vm6, %v3225_v53  ;;  %v3224_v57 = vsel %vm3185_vm5, %v2962_v49, %v2704_v39  ;;  %v2706_v58 = vadd.f32 %v6270_v11, %v2443_v51  ;;  %v4289_v60 = vpop.f32.mrb[42].mxu0 }
 0x130   :  { %3610 = vst.msk [vmem:[%s7765_s5 + $0x538] sm:$0xff] %vm3442_vm6, %v3353_v54  ;;  %v3352_v31 = vsel %vm3185_vm5, %v3090_v50, %v2832_v40  ;;  %v2834_v59 = vadd.f32 %v6270_v11, %v2571_v52  ;;  %v4481_v61 = vpop.f32.mrb[42].mxu1  ;;  %3481 = vst.msk [vmem:[%s7765_s5 + $0x130] sm:$0xff] %vm3442_vm6, %v3224_v57  ;;  %v2965_v62 = vmax.f32 %v2707_v55, 0.0  ;;  %v2446_v0 = vmul.f32 %v6257_v1, %v4289_v60  ;;  %v1327_v2 = vpop.f32.mrb[43].mxu0 }
 0x131   :  { %3609 = vst.msk [vmem:[%s7765_s5 + $0x530] sm:$0xff] %vm3442_vm6, %v3352_v31  ;;  %v3093_v63 = vmax.f32 %v2835_v56, 0.0  ;;  %v2574_v37 = vmul.f32 %v6257_v1, %v4481_v61  ;;  %v1967_v3 = vpop.f32.mrb[43].mxu1  ;;  %v2964_v4 = vmax.f32 %v2706_v58, 0.0  ;;  %v2445_v6 = vmul.f32 %v6257_v1, %v1327_v2 }
 0x132   :  { %v3092_v5 = vmax.f32 %v2834_v59, 0.0  ;;  %v2573_v7 = vmul.f32 %v6257_v1, %v1967_v3  ;;  %v3227_v8 = vsel %vm3185_vm5, %v2965_v62, %v2707_v55  ;;  %v2709_v10 = vadd.f32 %v6270_v11, %v2446_v0 }
 0x133   :  { %v3355_v9 = vsel %vm3185_vm5, %v3093_v63, %v2835_v56  ;;  %v2837_v12 = vadd.f32 %v6270_v11, %v2574_v37  ;;  %3484 = vst.msk [vmem:[%s7765_s5 + $0x148] sm:$0xff] %vm3442_vm6, %v3227_v8  ;;  %v3226_v13 = vsel %vm3185_vm5, %v2964_v4, %v2706_v58  ;;  %v2708_v15 = vadd.f32 %v6270_v11, %v2445_v6  ;;  %v4292_v17 = vpop.f32.mrb[44].mxu0 }
 0x134   :  { %3612 = vst.msk [vmem:[%s7765_s5 + $0x548] sm:$0xff] %vm3442_vm6, %v3355_v9  ;;  %v3354_v14 = vsel %vm3185_vm5, %v3092_v5, %v2834_v59  ;;  %v2836_v16 = vadd.f32 %v6270_v11, %v2573_v7  ;;  %v4484_v18 = vpop.f32.mrb[44].mxu1  ;;  %3483 = vst.msk [vmem:[%s7765_s5 + $0x140] sm:$0xff] %vm3442_vm6, %v3226_v13  ;;  %v2967_v19 = vmax.f32 %v2709_v10, 0.0  ;;  %v2448_v21 = vmul.f32 %v6257_v1, %v4292_v17  ;;  %v1337_v23 = vpop.f32.mrb[45].mxu0 }
 0x135   :  { %3611 = vst.msk [vmem:[%s7765_s5 + $0x540] sm:$0xff] %vm3442_vm6, %v3354_v14  ;;  %v3095_v20 = vmax.f32 %v2837_v12, 0.0  ;;  %v2576_v22 = vmul.f32 %v6257_v1, %v4484_v18  ;;  %v1977_v24 = vpop.f32.mrb[45].mxu1  ;;  %v2966_v25 = vmax.f32 %v2708_v15, 0.0  ;;  %v2447_v27 = vmul.f32 %v6257_v1, %v1337_v23 }
 0x136   :  { %v3094_v26 = vmax.f32 %v2836_v16, 0.0  ;;  %v2575_v28 = vmul.f32 %v6257_v1, %v1977_v24  ;;  %v3229_v29 = vsel %vm3185_vm5, %v2967_v19, %v2709_v10  ;;  %v2711_v32 = vadd.f32 %v6270_v11, %v2448_v21 }
 0x137   :  { %v3357_v30 = vsel %vm3185_vm5, %v3095_v20, %v2837_v12  ;;  %v2839_v33 = vadd.f32 %v6270_v11, %v2576_v22  ;;  %3486 = vst.msk [vmem:[%s7765_s5 + $0x158] sm:$0xff] %vm3442_vm6, %v3229_v29  ;;  %v3228_v34 = vsel %vm3185_vm5, %v2966_v25, %v2708_v15  ;;  %v2710_v36 = vadd.f32 %v6270_v11, %v2447_v27  ;;  %v4295_v40 = vpop.f32.mrb[46].mxu0 }
 0x138   :  { %3614 = vst.msk [vmem:[%s7765_s5 + $0x558] sm:$0xff] %vm3442_vm6, %v3357_v30  ;;  %v3356_v35 = vsel %vm3185_vm5, %v3094_v26, %v2836_v16  ;;  %v2838_v39 = vadd.f32 %v6270_v11, %v2575_v28  ;;  %v4487_v41 = vpop.f32.mrb[46].mxu1  ;;  %3485 = vst.msk [vmem:[%s7765_s5 + $0x150] sm:$0xff] %vm3442_vm6, %v3228_v34  ;;  %v2969_v42 = vmax.f32 %v2711_v32, 0.0  ;;  %v2450_v44 = vmul.f32 %v6257_v1, %v4295_v40  ;;  %v1347_v46 = vpop.f32.mrb[47].mxu0 }
 0x139   :  { %3613 = vst.msk [vmem:[%s7765_s5 + $0x550] sm:$0xff] %vm3442_vm6, %v3356_v35  ;;  %v3097_v43 = vmax.f32 %v2839_v33, 0.0  ;;  %v2578_v45 = vmul.f32 %v6257_v1, %v4487_v41  ;;  %v1987_v47 = vpop.f32.mrb[47].mxu1  ;;  %v2968_v48 = vmax.f32 %v2710_v36, 0.0  ;;  %v2449_v50 = vmul.f32 %v6257_v1, %v1347_v46 }
 0x13a   :  { %v3096_v49 = vmax.f32 %v2838_v39, 0.0  ;;  %v2577_v51 = vmul.f32 %v6257_v1, %v1987_v47  ;;  %v3231_v52 = vsel %vm3185_vm5, %v2969_v42, %v2711_v32  ;;  %v2713_v54 = vadd.f32 %v6270_v11, %v2450_v44 }
 0x13b   :  { %v3359_v53 = vsel %vm3185_vm5, %v3097_v43, %v2839_v33  ;;  %v2841_v55 = vadd.f32 %v6270_v11, %v2578_v45  ;;  %3488 = vst.msk [vmem:[%s7765_s5 + $0x168] sm:$0xff] %vm3442_vm6, %v3231_v52  ;;  %v3230_v56 = vsel %vm3185_vm5, %v2968_v48, %v2710_v36  ;;  %v2712_v31 = vadd.f32 %v6270_v11, %v2449_v50  ;;  %v4298_v59 = vpop.f32.mrb[48].mxu0 }
 0x13c   :  { %3616 = vst.msk [vmem:[%s7765_s5 + $0x568] sm:$0xff] %vm3442_vm6, %v3359_v53  ;;  %v3358_v57 = vsel %vm3185_vm5, %v3096_v49, %v2838_v39  ;;  %v2840_v58 = vadd.f32 %v6270_v11, %v2577_v51  ;;  %v4490_v60 = vpop.f32.mrb[48].mxu1  ;;  %3487 = vst.msk [vmem:[%s7765_s5 + $0x160] sm:$0xff] %vm3442_vm6, %v3230_v56  ;;  %v2971_v61 = vmax.f32 %v2713_v54, 0.0  ;;  %v2452_v63 = vmul.f32 %v6257_v1, %v4298_v59  ;;  %v1357_v37 = vpop.f32.mrb[49].mxu0 }
 0x13d   :  { %3615 = vst.msk [vmem:[%s7765_s5 + $0x560] sm:$0xff] %vm3442_vm6, %v3358_v57  ;;  %v3099_v62 = vmax.f32 %v2841_v55, 0.0  ;;  %v2580_v0 = vmul.f32 %v6257_v1, %v4490_v60  ;;  %v1997_v2 = vpop.f32.mrb[49].mxu1  ;;  %v2970_v3 = vmax.f32 %v2712_v31, 0.0  ;;  %v2451_v5 = vmul.f32 %v6257_v1, %v1357_v37 }
 0x13e   :  { %v3098_v4 = vmax.f32 %v2840_v58, 0.0  ;;  %v2579_v6 = vmul.f32 %v6257_v1, %v1997_v2  ;;  %v3233_v7 = vsel %vm3185_vm5, %v2971_v61, %v2713_v54  ;;  %v2715_v9 = vadd.f32 %v6270_v11, %v2452_v63 }
 0x13f   :  { %v3361_v8 = vsel %vm3185_vm5, %v3099_v62, %v2841_v55  ;;  %v2843_v10 = vadd.f32 %v6270_v11, %v2580_v0  ;;  %3490 = vst.msk [vmem:[%s7765_s5 + $0x178] sm:$0xff] %vm3442_vm6, %v3233_v7  ;;  %v3232_v12 = vsel %vm3185_vm5, %v2970_v3, %v2712_v31  ;;  %v2714_v14 = vadd.f32 %v6270_v11, %v2451_v5  ;;  %v4301_v16 = vpop.f32.mrb[50].mxu0 }
 0x140   :  { %3618 = vst.msk [vmem:[%s7765_s5 + $0x578] sm:$0xff] %vm3442_vm6, %v3361_v8  ;;  %v3360_v13 = vsel %vm3185_vm5, %v3098_v4, %v2840_v58  ;;  %v2842_v15 = vadd.f32 %v6270_v11, %v2579_v6  ;;  %v4493_v17 = vpop.f32.mrb[50].mxu1  ;;  %3489 = vst.msk [vmem:[%s7765_s5 + $0x170] sm:$0xff] %vm3442_vm6, %v3232_v12  ;;  %v2973_v18 = vmax.f32 %v2715_v9, 0.0  ;;  %v2454_v20 = vmul.f32 %v6257_v1, %v4301_v16  ;;  %v1367_v22 = vpop.f32.mrb[51].mxu0 }
 0x141   :  { %3617 = vst.msk [vmem:[%s7765_s5 + $0x570] sm:$0xff] %vm3442_vm6, %v3360_v13  ;;  %v3101_v19 = vmax.f32 %v2843_v10, 0.0  ;;  %v2582_v21 = vmul.f32 %v6257_v1, %v4493_v17  ;;  %v2007_v23 = vpop.f32.mrb[51].mxu1  ;;  %v2972_v24 = vmax.f32 %v2714_v14, 0.0  ;;  %v2453_v26 = vmul.f32 %v6257_v1, %v1367_v22 }
 0x142   :  { %v3100_v25 = vmax.f32 %v2842_v15, 0.0  ;;  %v2581_v27 = vmul.f32 %v6257_v1, %v2007_v23  ;;  %v3235_v28 = vsel %vm3185_vm5, %v2973_v18, %v2715_v9  ;;  %v2717_v30 = vadd.f32 %v6270_v11, %v2454_v20 }
 0x143   :  { %v3363_v29 = vsel %vm3185_vm5, %v3101_v19, %v2843_v10  ;;  %v2845_v32 = vadd.f32 %v6270_v11, %v2582_v21  ;;  %3492 = vst.msk [vmem:[%s7765_s5 + $0x188] sm:$0xff] %vm3442_vm6, %v3235_v28  ;;  %v3234_v33 = vsel %vm3185_vm5, %v2972_v24, %v2714_v14  ;;  %v2716_v35 = vadd.f32 %v6270_v11, %v2453_v26  ;;  %v4304_v39 = vpop.f32.mrb[52].mxu0 }
 0x144   :  { %3620 = vst.msk [vmem:[%s7765_s5 + $0x588] sm:$0xff] %vm3442_vm6, %v3363_v29  ;;  %v3362_v34 = vsel %vm3185_vm5, %v3100_v25, %v2842_v15  ;;  %v2844_v36 = vadd.f32 %v6270_v11, %v2581_v27  ;;  %v4496_v40 = vpop.f32.mrb[52].mxu1  ;;  %3491 = vst.msk [vmem:[%s7765_s5 + $0x180] sm:$0xff] %vm3442_vm6, %v3234_v33  ;;  %v2975_v41 = vmax.f32 %v2717_v30, 0.0  ;;  %v2456_v43 = vmul.f32 %v6257_v1, %v4304_v39  ;;  %v1377_v45 = vpop.f32.mrb[53].mxu0 }
 0x145   :  { %3619 = vst.msk [vmem:[%s7765_s5 + $0x580] sm:$0xff] %vm3442_vm6, %v3362_v34  ;;  %v3103_v42 = vmax.f32 %v2845_v32, 0.0  ;;  %v2584_v44 = vmul.f32 %v6257_v1, %v4496_v40  ;;  %v2017_v46 = vpop.f32.mrb[53].mxu1  ;;  %v2974_v47 = vmax.f32 %v2716_v35, 0.0  ;;  %v2455_v49 = vmul.f32 %v6257_v1, %v1377_v45 }
 0x146   :  { %v3102_v48 = vmax.f32 %v2844_v36, 0.0  ;;  %v2583_v50 = vmul.f32 %v6257_v1, %v2017_v46  ;;  %v3237_v51 = vsel %vm3185_vm5, %v2975_v41, %v2717_v30  ;;  %v2719_v53 = vadd.f32 %v6270_v11, %v2456_v43 }
 0x147   :  { %v3365_v52 = vsel %vm3185_vm5, %v3103_v42, %v2845_v32  ;;  %v2847_v54 = vadd.f32 %v6270_v11, %v2584_v44  ;;  %3494 = vst.msk [vmem:[%s7765_s5 + $0x198] sm:$0xff] %vm3442_vm6, %v3237_v51  ;;  %v3236_v55 = vsel %vm3185_vm5, %v2974_v47, %v2716_v35  ;;  %v2718_v57 = vadd.f32 %v6270_v11, %v2455_v49  ;;  %v4307_v58 = vpop.f32.mrb[54].mxu0 }
 0x148   :  { %3622 = vst.msk [vmem:[%s7765_s5 + $0x598] sm:$0xff] %vm3442_vm6, %v3365_v52  ;;  %v3364_v56 = vsel %vm3185_vm5, %v3102_v48, %v2844_v36  ;;  %v2846_v31 = vadd.f32 %v6270_v11, %v2583_v50  ;;  %v4499_v59 = vpop.f32.mrb[54].mxu1  ;;  %3493 = vst.msk [vmem:[%s7765_s5 + $0x190] sm:$0xff] %vm3442_vm6, %v3236_v55  ;;  %v2977_v60 = vmax.f32 %v2719_v53, 0.0  ;;  %v2458_v62 = vmul.f32 %v6257_v1, %v4307_v58  ;;  %v1387_v0 = vpop.f32.mrb[55].mxu0 }
 0x149   :  { %3621 = vst.msk [vmem:[%s7765_s5 + $0x590] sm:$0xff] %vm3442_vm6, %v3364_v56  ;;  %v3105_v61 = vmax.f32 %v2847_v54, 0.0  ;;  %v2586_v63 = vmul.f32 %v6257_v1, %v4499_v59  ;;  %v2027_v37 = vpop.f32.mrb[55].mxu1  ;;  %v2976_v2 = vmax.f32 %v2718_v57, 0.0  ;;  %v2457_v4 = vmul.f32 %v6257_v1, %v1387_v0 }
 0x14a   :  { %v3104_v3 = vmax.f32 %v2846_v31, 0.0  ;;  %v2585_v5 = vmul.f32 %v6257_v1, %v2027_v37  ;;  %v3239_v6 = vsel %vm3185_vm5, %v2977_v60, %v2719_v53  ;;  %v2721_v8 = vadd.f32 %v6270_v11, %v2458_v62 }
 0x14b   :  { %v3367_v7 = vsel %vm3185_vm5, %v3105_v61, %v2847_v54  ;;  %v2849_v9 = vadd.f32 %v6270_v11, %v2586_v63  ;;  %3496 = vst.msk [vmem:[%s7765_s5 + $0x1a8] sm:$0xff] %vm3442_vm6, %v3239_v6  ;;  %v3238_v10 = vsel %vm3185_vm5, %v2976_v2, %v2718_v57  ;;  %v2720_v13 = vadd.f32 %v6270_v11, %v2457_v4  ;;  %v4310_v15 = vpop.f32.mrb[56].mxu0 }
 0x14c   :  { %3624 = vst.msk [vmem:[%s7765_s5 + $0x5a8] sm:$0xff] %vm3442_vm6, %v3367_v7  ;;  %v3366_v12 = vsel %vm3185_vm5, %v3104_v3, %v2846_v31  ;;  %v2848_v14 = vadd.f32 %v6270_v11, %v2585_v5  ;;  %v4502_v16 = vpop.f32.mrb[56].mxu1  ;;  %3495 = vst.msk [vmem:[%s7765_s5 + $0x1a0] sm:$0xff] %vm3442_vm6, %v3238_v10  ;;  %v2979_v17 = vmax.f32 %v2721_v8, 0.0  ;;  %v2460_v19 = vmul.f32 %v6257_v1, %v4310_v15  ;;  %v1397_v21 = vpop.f32.mrb[57].mxu0 }
 0x14d   :  { %3623 = vst.msk [vmem:[%s7765_s5 + $0x5a0] sm:$0xff] %vm3442_vm6, %v3366_v12  ;;  %v3107_v18 = vmax.f32 %v2849_v9, 0.0  ;;  %v2588_v20 = vmul.f32 %v6257_v1, %v4502_v16  ;;  %v2037_v22 = vpop.f32.mrb[57].mxu1  ;;  %v2978_v23 = vmax.f32 %v2720_v13, 0.0  ;;  %v2459_v25 = vmul.f32 %v6257_v1, %v1397_v21 }
 0x14e   :  { %v3106_v24 = vmax.f32 %v2848_v14, 0.0  ;;  %v2587_v26 = vmul.f32 %v6257_v1, %v2037_v22  ;;  %v3241_v27 = vsel %vm3185_vm5, %v2979_v17, %v2721_v8  ;;  %v2723_v29 = vadd.f32 %v6270_v11, %v2460_v19 }
 0x14f   :  { %v3369_v28 = vsel %vm3185_vm5, %v3107_v18, %v2849_v9  ;;  %v2851_v30 = vadd.f32 %v6270_v11, %v2588_v20  ;;  %3498 = vst.msk [vmem:[%s7765_s5 + $0x1b8] sm:$0xff] %vm3442_vm6, %v3241_v27  ;;  %v3240_v32 = vsel %vm3185_vm5, %v2978_v23, %v2720_v13  ;;  %v2722_v34 = vadd.f32 %v6270_v11, %v2459_v25  ;;  %v4313_v36 = vpop.f32.mrb[58].mxu0 }
 0x150   :  { %3626 = vst.msk [vmem:[%s7765_s5 + $0x5b8] sm:$0xff] %vm3442_vm6, %v3369_v28  ;;  %v3368_v33 = vsel %vm3185_vm5, %v3106_v24, %v2848_v14  ;;  %v2850_v35 = vadd.f32 %v6270_v11, %v2587_v26  ;;  %v4505_v39 = vpop.f32.mrb[58].mxu1  ;;  %3497 = vst.msk [vmem:[%s7765_s5 + $0x1b0] sm:$0xff] %vm3442_vm6, %v3240_v32  ;;  %v2981_v40 = vmax.f32 %v2723_v29, 0.0  ;;  %v2462_v42 = vmul.f32 %v6257_v1, %v4313_v36  ;;  %v1407_v44 = vpop.f32.mrb[59].mxu0 }
 0x151   :  { %3625 = vst.msk [vmem:[%s7765_s5 + $0x5b0] sm:$0xff] %vm3442_vm6, %v3368_v33  ;;  %v3109_v41 = vmax.f32 %v2851_v30, 0.0  ;;  %v2590_v43 = vmul.f32 %v6257_v1, %v4505_v39  ;;  %v2047_v45 = vpop.f32.mrb[59].mxu1  ;;  %v2980_v46 = vmax.f32 %v2722_v34, 0.0  ;;  %v2461_v48 = vmul.f32 %v6257_v1, %v1407_v44 }
 0x152   :  { %v3108_v47 = vmax.f32 %v2850_v35, 0.0  ;;  %v2589_v49 = vmul.f32 %v6257_v1, %v2047_v45  ;;  %v3243_v50 = vsel %vm3185_vm5, %v2981_v40, %v2723_v29  ;;  %v2725_v52 = vadd.f32 %v6270_v11, %v2462_v42 }
 0x153   :  { %v3371_v51 = vsel %vm3185_vm5, %v3109_v41, %v2851_v30  ;;  %v2853_v53 = vadd.f32 %v6270_v11, %v2590_v43  ;;  %3500 = vst.msk [vmem:[%s7765_s5 + $0x1c8] sm:$0xff] %vm3442_vm6, %v3243_v50  ;;  %v3242_v54 = vsel %vm3185_vm5, %v2980_v46, %v2722_v34  ;;  %v2724_v56 = vadd.f32 %v6270_v11, %v2461_v48  ;;  %v4316_v31 = vpop.f32.mrb[60].mxu0 }
 0x154   :  { %3628 = vst.msk [vmem:[%s7765_s5 + $0x5c8] sm:$0xff] %vm3442_vm6, %v3371_v51  ;;  %v3370_v55 = vsel %vm3185_vm5, %v3108_v47, %v2850_v35  ;;  %v2852_v57 = vadd.f32 %v6270_v11, %v2589_v49  ;;  %v4508_v58 = vpop.f32.mrb[60].mxu1  ;;  %3499 = vst.msk [vmem:[%s7765_s5 + $0x1c0] sm:$0xff] %vm3442_vm6, %v3242_v54  ;;  %v2983_v59 = vmax.f32 %v2725_v52, 0.0  ;;  %v2464_v61 = vmul.f32 %v6257_v1, %v4316_v31  ;;  %v1417_v63 = vpop.f32.mrb[61].mxu0 }
 0x155   :  { %3627 = vst.msk [vmem:[%s7765_s5 + $0x5c0] sm:$0xff] %vm3442_vm6, %v3370_v55  ;;  %v3111_v60 = vmax.f32 %v2853_v53, 0.0  ;;  %v2592_v62 = vmul.f32 %v6257_v1, %v4508_v58  ;;  %v2057_v0 = vpop.f32.mrb[61].mxu1  ;;  %v2982_v37 = vmax.f32 %v2724_v56, 0.0  ;;  %v2463_v3 = vmul.f32 %v6257_v1, %v1417_v63 }
 0x156   :  { %v3110_v2 = vmax.f32 %v2852_v57, 0.0  ;;  %v2591_v4 = vmul.f32 %v6257_v1, %v2057_v0  ;;  %v3245_v5 = vsel %vm3185_vm5, %v2983_v59, %v2725_v52  ;;  %v2727_v7 = vadd.f32 %v6270_v11, %v2464_v61 }
 0x157   :  { %v3373_v6 = vsel %vm3185_vm5, %v3111_v60, %v2853_v53  ;;  %v2855_v8 = vadd.f32 %v6270_v11, %v2592_v62  ;;  %3502 = vst.msk [vmem:[%s7765_s5 + $0x1d8] sm:$0xff] %vm3442_vm6, %v3245_v5  ;;  %v3244_v9 = vsel %vm3185_vm5, %v2982_v37, %v2724_v56  ;;  %v2726_v12 = vadd.f32 %v6270_v11, %v2463_v3  ;;  %v4319_v14 = vpop.f32.mrb[62].mxu0 }
 0x158   :  { %3630 = vst.msk [vmem:[%s7765_s5 + $0x5d8] sm:$0xff] %vm3442_vm6, %v3373_v6  ;;  %v3372_v10 = vsel %vm3185_vm5, %v3110_v2, %v2852_v57  ;;  %v2854_v13 = vadd.f32 %v6270_v11, %v2591_v4  ;;  %v4511_v15 = vpop.f32.mrb[62].mxu1  ;;  %3501 = vst.msk [vmem:[%s7765_s5 + $0x1d0] sm:$0xff] %vm3442_vm6, %v3244_v9  ;;  %v2985_v16 = vmax.f32 %v2727_v7, 0.0  ;;  %v2466_v18 = vmul.f32 %v6257_v1, %v4319_v14  ;;  %v1427_v20 = vpop.f32.mrb[63].mxu0 }
 0x159   :  { %3629 = vst.msk [vmem:[%s7765_s5 + $0x5d0] sm:$0xff] %vm3442_vm6, %v3372_v10  ;;  %v3113_v17 = vmax.f32 %v2855_v8, 0.0  ;;  %v2594_v19 = vmul.f32 %v6257_v1, %v4511_v15  ;;  %v2067_v21 = vpop.f32.mrb[63].mxu1  ;;  %v2984_v22 = vmax.f32 %v2726_v12, 0.0  ;;  %v2465_v24 = vmul.f32 %v6257_v1, %v1427_v20 }
 0x15a   :  { %v3112_v23 = vmax.f32 %v2854_v13, 0.0  ;;  %v2593_v25 = vmul.f32 %v6257_v1, %v2067_v21  ;;  %v3247_v26 = vsel %vm3185_vm5, %v2985_v16, %v2727_v7  ;;  %v2729_v28 = vadd.f32 %v6270_v11, %v2466_v18 }
 0x15b   :  { %v3375_v27 = vsel %vm3185_vm5, %v3113_v17, %v2855_v8  ;;  %v2857_v29 = vadd.f32 %v6270_v11, %v2594_v19  ;;  %3504 = vst.msk [vmem:[%s7765_s5 + $0x1e8] sm:$0xff] %vm3442_vm6, %v3247_v26  ;;  %v3246_v30 = vsel %vm3185_vm5, %v2984_v22, %v2726_v12  ;;  %v2728_v33 = vadd.f32 %v6270_v11, %v2465_v24  ;;  %v4322_v35 = vpop.f32.mrb[64].mxu0 }
 0x15c   :  { %3632 = vst.msk [vmem:[%s7765_s5 + $0x5e8] sm:$0xff] %vm3442_vm6, %v3375_v27  ;;  %v3374_v32 = vsel %vm3185_vm5, %v3112_v23, %v2854_v13  ;;  %v2856_v34 = vadd.f32 %v6270_v11, %v2593_v25  ;;  %v4514_v36 = vpop.f32.mrb[64].mxu1  ;;  %3503 = vst.msk [vmem:[%s7765_s5 + $0x1e0] sm:$0xff] %vm3442_vm6, %v3246_v30  ;;  %v2987_v39 = vmax.f32 %v2729_v28, 0.0  ;;  %v2468_v41 = vmul.f32 %v6257_v1, %v4322_v35  ;;  %v1437_v43 = vpop.f32.mrb[65].mxu0 }
 0x15d   :  { %3631 = vst.msk [vmem:[%s7765_s5 + $0x5e0] sm:$0xff] %vm3442_vm6, %v3374_v32  ;;  %v3115_v40 = vmax.f32 %v2857_v29, 0.0  ;;  %v2596_v42 = vmul.f32 %v6257_v1, %v4514_v36  ;;  %v2077_v44 = vpop.f32.mrb[65].mxu1  ;;  %v2986_v45 = vmax.f32 %v2728_v33, 0.0  ;;  %v2467_v47 = vmul.f32 %v6257_v1, %v1437_v43 }
 0x15e   :  { %v3114_v46 = vmax.f32 %v2856_v34, 0.0  ;;  %v2595_v48 = vmul.f32 %v6257_v1, %v2077_v44  ;;  %v3249_v49 = vsel %vm3185_vm5, %v2987_v39, %v2729_v28  ;;  %v2731_v51 = vadd.f32 %v6270_v11, %v2468_v41 }
 0x15f   :  { %v3377_v50 = vsel %vm3185_vm5, %v3115_v40, %v2857_v29  ;;  %v2859_v52 = vadd.f32 %v6270_v11, %v2596_v42  ;;  %3506 = vst.msk [vmem:[%s7765_s5 + $0x1f8] sm:$0xff] %vm3442_vm6, %v3249_v49  ;;  %v3248_v53 = vsel %vm3185_vm5, %v2986_v45, %v2728_v33  ;;  %v2730_v55 = vadd.f32 %v6270_v11, %v2467_v47  ;;  %v4325_v57 = vpop.f32.mrb[66].mxu0 }
 0x160   :  { %3634 = vst.msk [vmem:[%s7765_s5 + $0x5f8] sm:$0xff] %vm3442_vm6, %v3377_v50  ;;  %v3376_v54 = vsel %vm3185_vm5, %v3114_v46, %v2856_v34  ;;  %v2858_v56 = vadd.f32 %v6270_v11, %v2595_v48  ;;  %v4517_v31 = vpop.f32.mrb[66].mxu1  ;;  %3505 = vst.msk [vmem:[%s7765_s5 + $0x1f0] sm:$0xff] %vm3442_vm6, %v3248_v53  ;;  %v2989_v58 = vmax.f32 %v2731_v51, 0.0  ;;  %v2470_v60 = vmul.f32 %v6257_v1, %v4325_v57  ;;  %v1447_v62 = vpop.f32.mrb[67].mxu0 }
 0x161   :  { %3633 = vst.msk [vmem:[%s7765_s5 + $0x5f0] sm:$0xff] %vm3442_vm6, %v3376_v54  ;;  %v3117_v59 = vmax.f32 %v2859_v52, 0.0  ;;  %v2598_v61 = vmul.f32 %v6257_v1, %v4517_v31  ;;  %v2087_v63 = vpop.f32.mrb[67].mxu1  ;;  %v2988_v0 = vmax.f32 %v2730_v55, 0.0  ;;  %v2469_v2 = vmul.f32 %v6257_v1, %v1447_v62 }
 0x162   :  { %v3116_v37 = vmax.f32 %v2858_v56, 0.0  ;;  %v2597_v3 = vmul.f32 %v6257_v1, %v2087_v63  ;;  %v3251_v4 = vsel %vm3185_vm5, %v2989_v58, %v2731_v51  ;;  %v2733_v6 = vadd.f32 %v6270_v11, %v2470_v60 }
 0x163   :  { %v3379_v5 = vsel %vm3185_vm5, %v3117_v59, %v2859_v52  ;;  %v2861_v7 = vadd.f32 %v6270_v11, %v2598_v61  ;;  %3508 = vst.msk [vmem:[%s7765_s5 + $0x208] sm:$0xff] %vm3442_vm6, %v3251_v4  ;;  %v3250_v8 = vsel %vm3185_vm5, %v2988_v0, %v2730_v55  ;;  %v2732_v10 = vadd.f32 %v6270_v11, %v2469_v2  ;;  %v4328_v13 = vpop.f32.mrb[68].mxu0 }
 0x164   :  { %3636 = vst.msk [vmem:[%s7765_s5 + $0x608] sm:$0xff] %vm3442_vm6, %v3379_v5  ;;  %v3378_v9 = vsel %vm3185_vm5, %v3116_v37, %v2858_v56  ;;  %v2860_v12 = vadd.f32 %v6270_v11, %v2597_v3  ;;  %v4520_v14 = vpop.f32.mrb[68].mxu1  ;;  %3507 = vst.msk [vmem:[%s7765_s5 + $0x200] sm:$0xff] %vm3442_vm6, %v3250_v8  ;;  %v2991_v15 = vmax.f32 %v2733_v6, 0.0  ;;  %v2472_v17 = vmul.f32 %v6257_v1, %v4328_v13  ;;  %v1457_v19 = vpop.f32.mrb[69].mxu0 }
 0x165   :  { %3635 = vst.msk [vmem:[%s7765_s5 + $0x600] sm:$0xff] %vm3442_vm6, %v3378_v9  ;;  %v3119_v16 = vmax.f32 %v2861_v7, 0.0  ;;  %v2600_v18 = vmul.f32 %v6257_v1, %v4520_v14  ;;  %v2097_v20 = vpop.f32.mrb[69].mxu1  ;;  %v2990_v21 = vmax.f32 %v2732_v10, 0.0  ;;  %v2471_v23 = vmul.f32 %v6257_v1, %v1457_v19 }
 0x166   :  { %v3118_v22 = vmax.f32 %v2860_v12, 0.0  ;;  %v2599_v24 = vmul.f32 %v6257_v1, %v2097_v20  ;;  %v3253_v25 = vsel %vm3185_vm5, %v2991_v15, %v2733_v6  ;;  %v2735_v27 = vadd.f32 %v6270_v11, %v2472_v17 }
 0x167   :  { %v3381_v26 = vsel %vm3185_vm5, %v3119_v16, %v2861_v7  ;;  %v2863_v28 = vadd.f32 %v6270_v11, %v2600_v18  ;;  %3510 = vst.msk [vmem:[%s7765_s5 + $0x218] sm:$0xff] %vm3442_vm6, %v3253_v25  ;;  %v3252_v29 = vsel %vm3185_vm5, %v2990_v21, %v2732_v10  ;;  %v2734_v32 = vadd.f32 %v6270_v11, %v2471_v23  ;;  %v4331_v34 = vpop.f32.mrb[70].mxu0 }
 0x168   :  { %3638 = vst.msk [vmem:[%s7765_s5 + $0x618] sm:$0xff] %vm3442_vm6, %v3381_v26  ;;  %v3380_v30 = vsel %vm3185_vm5, %v3118_v22, %v2860_v12  ;;  %v2862_v33 = vadd.f32 %v6270_v11, %v2599_v24  ;;  %v4523_v35 = vpop.f32.mrb[70].mxu1  ;;  %3509 = vst.msk [vmem:[%s7765_s5 + $0x210] sm:$0xff] %vm3442_vm6, %v3252_v29  ;;  %v2993_v36 = vmax.f32 %v2735_v27, 0.0  ;;  %v2474_v40 = vmul.f32 %v6257_v1, %v4331_v34  ;;  %v1467_v42 = vpop.f32.mrb[71].mxu0 }
 0x169   :  { %3637 = vst.msk [vmem:[%s7765_s5 + $0x610] sm:$0xff] %vm3442_vm6, %v3380_v30  ;;  %v3121_v39 = vmax.f32 %v2863_v28, 0.0  ;;  %v2602_v41 = vmul.f32 %v6257_v1, %v4523_v35  ;;  %v2107_v43 = vpop.f32.mrb[71].mxu1  ;;  %v2992_v44 = vmax.f32 %v2734_v32, 0.0  ;;  %v2473_v46 = vmul.f32 %v6257_v1, %v1467_v42 }
 0x16a   :  { %v3120_v45 = vmax.f32 %v2862_v33, 0.0  ;;  %v2601_v47 = vmul.f32 %v6257_v1, %v2107_v43  ;;  %v3255_v48 = vsel %vm3185_vm5, %v2993_v36, %v2735_v27  ;;  %v2737_v50 = vadd.f32 %v6270_v11, %v2474_v40 }
 0x16b   :  { %v3383_v49 = vsel %vm3185_vm5, %v3121_v39, %v2863_v28  ;;  %v2865_v51 = vadd.f32 %v6270_v11, %v2602_v41  ;;  %3512 = vst.msk [vmem:[%s7765_s5 + $0x228] sm:$0xff] %vm3442_vm6, %v3255_v48  ;;  %v3254_v52 = vsel %vm3185_vm5, %v2992_v44, %v2734_v32  ;;  %v2736_v54 = vadd.f32 %v6270_v11, %v2473_v46  ;;  %v4334_v56 = vpop.f32.mrb[72].mxu0 }
 0x16c   :  { %3640 = vst.msk [vmem:[%s7765_s5 + $0x628] sm:$0xff] %vm3442_vm6, %v3383_v49  ;;  %v3382_v53 = vsel %vm3185_vm5, %v3120_v45, %v2862_v33  ;;  %v2864_v55 = vadd.f32 %v6270_v11, %v2601_v47  ;;  %v4526_v57 = vpop.f32.mrb[72].mxu1  ;;  %3511 = vst.msk [vmem:[%s7765_s5 + $0x220] sm:$0xff] %vm3442_vm6, %v3254_v52  ;;  %v2995_v31 = vmax.f32 %v2737_v50, 0.0  ;;  %v2476_v59 = vmul.f32 %v6257_v1, %v4334_v56  ;;  %v1477_v61 = vpop.f32.mrb[73].mxu0 }
 0x16d   :  { %3639 = vst.msk [vmem:[%s7765_s5 + $0x620] sm:$0xff] %vm3442_vm6, %v3382_v53  ;;  %v3123_v58 = vmax.f32 %v2865_v51, 0.0  ;;  %v2604_v60 = vmul.f32 %v6257_v1, %v4526_v57  ;;  %v2117_v62 = vpop.f32.mrb[73].mxu1  ;;  %v2994_v63 = vmax.f32 %v2736_v54, 0.0  ;;  %v2475_v37 = vmul.f32 %v6257_v1, %v1477_v61 }
 0x16e   :  { %v3122_v0 = vmax.f32 %v2864_v55, 0.0  ;;  %v2603_v2 = vmul.f32 %v6257_v1, %v2117_v62  ;;  %v3257_v3 = vsel %vm3185_vm5, %v2995_v31, %v2737_v50  ;;  %v2739_v5 = vadd.f32 %v6270_v11, %v2476_v59 }
 0x16f   :  { %v3385_v4 = vsel %vm3185_vm5, %v3123_v58, %v2865_v51  ;;  %v2867_v6 = vadd.f32 %v6270_v11, %v2604_v60  ;;  %3514 = vst.msk [vmem:[%s7765_s5 + $0x238] sm:$0xff] %vm3442_vm6, %v3257_v3  ;;  %v3256_v7 = vsel %vm3185_vm5, %v2994_v63, %v2736_v54  ;;  %v2738_v9 = vadd.f32 %v6270_v11, %v2475_v37  ;;  %v4337_v12 = vpop.f32.mrb[74].mxu0 }
 0x170   :  { %3642 = vst.msk [vmem:[%s7765_s5 + $0x638] sm:$0xff] %vm3442_vm6, %v3385_v4  ;;  %v3384_v8 = vsel %vm3185_vm5, %v3122_v0, %v2864_v55  ;;  %v2866_v10 = vadd.f32 %v6270_v11, %v2603_v2  ;;  %v4529_v13 = vpop.f32.mrb[74].mxu1  ;;  %3513 = vst.msk [vmem:[%s7765_s5 + $0x230] sm:$0xff] %vm3442_vm6, %v3256_v7  ;;  %v2997_v14 = vmax.f32 %v2739_v5, 0.0  ;;  %v2478_v16 = vmul.f32 %v6257_v1, %v4337_v12  ;;  %v1487_v18 = vpop.f32.mrb[75].mxu0 }
 0x171   :  { %3641 = vst.msk [vmem:[%s7765_s5 + $0x630] sm:$0xff] %vm3442_vm6, %v3384_v8  ;;  %v3125_v15 = vmax.f32 %v2867_v6, 0.0  ;;  %v2606_v17 = vmul.f32 %v6257_v1, %v4529_v13  ;;  %v2127_v19 = vpop.f32.mrb[75].mxu1  ;;  %v2996_v20 = vmax.f32 %v2738_v9, 0.0  ;;  %v2477_v22 = vmul.f32 %v6257_v1, %v1487_v18 }
 0x172   :  { %v3124_v21 = vmax.f32 %v2866_v10, 0.0  ;;  %v2605_v23 = vmul.f32 %v6257_v1, %v2127_v19  ;;  %v3259_v24 = vsel %vm3185_vm5, %v2997_v14, %v2739_v5  ;;  %v2741_v26 = vadd.f32 %v6270_v11, %v2478_v16  ;;  %v6971_v14 = vld [vmem:[%s7763_s2] ss:$0 sm:$0xff] }
 0x173   :  { %v3387_v25 = vsel %vm3185_vm5, %v3125_v15, %v2867_v6  ;;  %v2869_v27 = vadd.f32 %v6270_v11, %v2606_v17  ;;  %3516 = vst.msk [vmem:[%s7765_s5 + $0x248] sm:$0xff] %vm3442_vm6, %v3259_v24  ;;  %v3258_v28 = vsel %vm3185_vm5, %v2996_v20, %v2738_v9  ;;  %v2740_v30 = vadd.f32 %v6270_v11, %v2477_v22  ;;  %v4340_v33 = vpop.f32.mrb[76].mxu0  ;;  %v6984_v24 = vld [vmem:[%s7764_s3] ss:$0 sm:$0xff] }
 0x174   :  { %3644 = vst.msk [vmem:[%s7765_s5 + $0x648] sm:$0xff] %vm3442_vm6, %v3387_v25  ;;  %v3386_v29 = vsel %vm3185_vm5, %v3124_v21, %v2866_v10  ;;  %v2868_v32 = vadd.f32 %v6270_v11, %v2605_v23  ;;  %v4532_v34 = vpop.f32.mrb[76].mxu1  ;;  %3515 = vst.msk [vmem:[%s7765_s5 + $0x240] sm:$0xff] %vm3442_vm6, %v3258_v28  ;;  %v2999_v35 = vmax.f32 %v2741_v26, 0.0  ;;  %v2480_v39 = vmul.f32 %v6257_v1, %v4340_v33  ;;  %v1497_v41 = vpop.f32.mrb[77].mxu0 }
 0x175   :  { %3643 = vst.msk [vmem:[%s7765_s5 + $0x640] sm:$0xff] %vm3442_vm6, %v3386_v29  ;;  %v3127_v36 = vmax.f32 %v2869_v27, 0.0  ;;  %v2608_v40 = vmul.f32 %v6257_v1, %v4532_v34  ;;  %v2137_v42 = vpop.f32.mrb[77].mxu1  ;;  %v2998_v43 = vmax.f32 %v2740_v30, 0.0  ;;  %v2479_v45 = vmul.f32 %v6257_v1, %v1497_v41 }
 0x176   :  { %v3126_v44 = vmax.f32 %v2868_v32, 0.0  ;;  %v2607_v46 = vmul.f32 %v6257_v1, %v2137_v42  ;;  %v3261_v47 = vsel %vm3185_vm5, %v2999_v35, %v2741_v26  ;;  %v2743_v49 = vadd.f32 %v6270_v11, %v2480_v39 }
 0x177   :  { %v3389_v48 = vsel %vm3185_vm5, %v3127_v36, %v2869_v27  ;;  %v2871_v50 = vadd.f32 %v6270_v11, %v2608_v40  ;;  %3518 = vst.msk [vmem:[%s7765_s5 + $0x258] sm:$0xff] %vm3442_vm6, %v3261_v47  ;;  %v3260_v51 = vsel %vm3185_vm5, %v2998_v43, %v2740_v30  ;;  %v2742_v53 = vadd.f32 %v6270_v11, %v2479_v45  ;;  %v4343_v55 = vpop.f32.mrb[78].mxu0 }
 0x178   :  { %3646 = vst.msk [vmem:[%s7765_s5 + $0x658] sm:$0xff] %vm3442_vm6, %v3389_v48  ;;  %v3388_v52 = vsel %vm3185_vm5, %v3126_v44, %v2868_v32  ;;  %v2870_v54 = vadd.f32 %v6270_v11, %v2607_v46  ;;  %v4535_v56 = vpop.f32.mrb[78].mxu1  ;;  %3517 = vst.msk [vmem:[%s7765_s5 + $0x250] sm:$0xff] %vm3442_vm6, %v3260_v51  ;;  %v3001_v57 = vmax.f32 %v2743_v49, 0.0  ;;  %v2482_v58 = vmul.f32 %v6257_v1, %v4343_v55  ;;  %v1507_v60 = vpop.f32.mrb[79].mxu0 }
 0x179   :  { %3645 = vst.msk [vmem:[%s7765_s5 + $0x650] sm:$0xff] %vm3442_vm6, %v3388_v52  ;;  %v3129_v31 = vmax.f32 %v2871_v50, 0.0  ;;  %v2610_v59 = vmul.f32 %v6257_v1, %v4535_v56  ;;  %v2147_v61 = vpop.f32.mrb[79].mxu1  ;;  %v3000_v62 = vmax.f32 %v2742_v53, 0.0  ;;  %v2481_v0 = vmul.f32 %v6257_v1, %v1507_v60 }
 0x17a   :  { %v3128_v63 = vmax.f32 %v2870_v54, 0.0  ;;  %v2609_v37 = vmul.f32 %v6257_v1, %v2147_v61  ;;  %v3263_v2 = vsel %vm3185_vm5, %v3001_v57, %v2743_v49  ;;  %v2745_v4 = vadd.f32 %v6270_v11, %v2482_v58 }
 0x17b   :  { %v3391_v3 = vsel %vm3185_vm5, %v3129_v31, %v2871_v50  ;;  %v2873_v5 = vadd.f32 %v6270_v11, %v2610_v59  ;;  %3520 = vst.msk [vmem:[%s7765_s5 + $0x268] sm:$0xff] %vm3442_vm6, %v3263_v2  ;;  %v3262_v1 = vsel %vm3185_vm5, %v3000_v62, %v2742_v53  ;;  %v2744_v7 = vadd.f32 %v6270_v11, %v2481_v0  ;;  %v4346_v9 = vpop.f32.mrb[80].mxu0 }
 0x17c   :  { %3648 = vst.msk [vmem:[%s7765_s5 + $0x668] sm:$0xff] %vm3442_vm6, %v3391_v3  ;;  %v3390_v6 = vsel %vm3185_vm5, %v3128_v63, %v2870_v54  ;;  %v2872_v8 = vadd.f32 %v6270_v11, %v2609_v37  ;;  %v4538_v10 = vpop.f32.mrb[80].mxu1  ;;  %3519 = vst.msk [vmem:[%s7765_s5 + $0x260] sm:$0xff] %vm3442_vm6, %v3262_v1  ;;  %v3003_v12 = vmax.f32 %v2745_v4, 0.0  ;;  %v2484_v11 = vmul.f32 %v6971_v14, %v4346_v9  ;;  %v1517_v16 = vpop.f32.mrb[81].mxu0 }
 0x17d   :  { %3647 = vst.msk [vmem:[%s7765_s5 + $0x660] sm:$0xff] %vm3442_vm6, %v3390_v6  ;;  %v3131_v13 = vmax.f32 %v2873_v5, 0.0  ;;  %v2612_v15 = vmul.f32 %v6971_v14, %v4538_v10  ;;  %v2157_v17 = vpop.f32.mrb[81].mxu1  ;;  %v3002_v18 = vmax.f32 %v2744_v7, 0.0  ;;  %v2483_v20 = vmul.f32 %v6971_v14, %v1517_v16 }
 0x17e   :  { %v3130_v19 = vmax.f32 %v2872_v8, 0.0  ;;  %v2611_v21 = vmul.f32 %v6971_v14, %v2157_v17  ;;  %v3265_v22 = vsel %vm3185_vm5, %v3003_v12, %v2745_v4  ;;  %v2747_v25 = vadd.f32 %v6984_v24, %v2484_v11 }
 0x17f   :  { %v3393_v23 = vsel %vm3185_vm5, %v3131_v13, %v2873_v5  ;;  %v2875_v26 = vadd.f32 %v6984_v24, %v2612_v15  ;;  %3522 = vst.msk [vmem:[%s7765_s5 + $0x278] sm:$0xff] %vm3442_vm6, %v3265_v22  ;;  %v3264_v27 = vsel %vm3185_vm5, %v3002_v18, %v2744_v7  ;;  %v2746_v29 = vadd.f32 %v6984_v24, %v2483_v20  ;;  %v4349_v32 = vpop.f32.mrb[82].mxu0 }
 0x180   :  { %3650 = vst.msk [vmem:[%s7765_s5 + $0x678] sm:$0xff] %vm3442_vm6, %v3393_v23  ;;  %v3392_v28 = vsel %vm3185_vm5, %v3130_v19, %v2872_v8  ;;  %v2874_v30 = vadd.f32 %v6984_v24, %v2611_v21  ;;  %v4541_v33 = vpop.f32.mrb[82].mxu1  ;;  %3521 = vst.msk [vmem:[%s7765_s5 + $0x270] sm:$0xff] %vm3442_vm6, %v3264_v27  ;;  %v3005_v34 = vmax.f32 %v2747_v25, 0.0  ;;  %v2486_v36 = vmul.f32 %v6971_v14, %v4349_v32  ;;  %v1527_v40 = vpop.f32.mrb[83].mxu0 }
 0x181   :  { %3649 = vst.msk [vmem:[%s7765_s5 + $0x670] sm:$0xff] %vm3442_vm6, %v3392_v28  ;;  %v3133_v35 = vmax.f32 %v2875_v26, 0.0  ;;  %v2614_v39 = vmul.f32 %v6971_v14, %v4541_v33  ;;  %v2167_v41 = vpop.f32.mrb[83].mxu1  ;;  %v3004_v42 = vmax.f32 %v2746_v29, 0.0  ;;  %v2485_v44 = vmul.f32 %v6971_v14, %v1527_v40 }
 0x182   :  { %v3132_v43 = vmax.f32 %v2874_v30, 0.0  ;;  %v2613_v45 = vmul.f32 %v6971_v14, %v2167_v41  ;;  %v3267_v46 = vsel %vm3185_vm5, %v3005_v34, %v2747_v25  ;;  %v2749_v48 = vadd.f32 %v6984_v24, %v2486_v36 }
 0x183   :  { %v3395_v47 = vsel %vm3185_vm5, %v3133_v35, %v2875_v26  ;;  %v2877_v49 = vadd.f32 %v6984_v24, %v2614_v39  ;;  %3524 = vst.msk [vmem:[%s7765_s5 + $0x288] sm:$0xff] %vm3442_vm6, %v3267_v46  ;;  %v3266_v50 = vsel %vm3185_vm5, %v3004_v42, %v2746_v29  ;;  %v2748_v52 = vadd.f32 %v6984_v24, %v2485_v44  ;;  %v4352_v54 = vpop.f32.mrb[84].mxu0 }
 0x184   :  { %3652 = vst.msk [vmem:[%s7765_s5 + $0x688] sm:$0xff] %vm3442_vm6, %v3395_v47  ;;  %v3394_v51 = vsel %vm3185_vm5, %v3132_v43, %v2874_v30  ;;  %v2876_v53 = vadd.f32 %v6984_v24, %v2613_v45  ;;  %v4544_v55 = vpop.f32.mrb[84].mxu1  ;;  %3523 = vst.msk [vmem:[%s7765_s5 + $0x280] sm:$0xff] %vm3442_vm6, %v3266_v50  ;;  %v3007_v56 = vmax.f32 %v2749_v48, 0.0  ;;  %v2488_v31 = vmul.f32 %v6971_v14, %v4352_v54  ;;  %v1537_v59 = vpop.f32.mrb[85].mxu0 }
 0x185   :  { %3651 = vst.msk [vmem:[%s7765_s5 + $0x680] sm:$0xff] %vm3442_vm6, %v3394_v51  ;;  %v3135_v57 = vmax.f32 %v2877_v49, 0.0  ;;  %v2616_v58 = vmul.f32 %v6971_v14, %v4544_v55  ;;  %v2177_v60 = vpop.f32.mrb[85].mxu1  ;;  %v3006_v61 = vmax.f32 %v2748_v52, 0.0  ;;  %v2487_v63 = vmul.f32 %v6971_v14, %v1537_v59 }
 0x186   :  { %v3134_v62 = vmax.f32 %v2876_v53, 0.0  ;;  %v2615_v0 = vmul.f32 %v6971_v14, %v2177_v60  ;;  %v3269_v37 = vsel %vm3185_vm5, %v3007_v56, %v2749_v48  ;;  %v2751_v3 = vadd.f32 %v6984_v24, %v2488_v31 }
 0x187   :  { %v3397_v2 = vsel %vm3185_vm5, %v3135_v57, %v2877_v49  ;;  %v2879_v4 = vadd.f32 %v6984_v24, %v2616_v58  ;;  %3526 = vst.msk [vmem:[%s7765_s5 + $0x298] sm:$0xff] %vm3442_vm6, %v3269_v37  ;;  %v3268_v5 = vsel %vm3185_vm5, %v3006_v61, %v2748_v52  ;;  %v2750_v6 = vadd.f32 %v6984_v24, %v2487_v63  ;;  %v4355_v8 = vpop.f32.mrb[86].mxu0 }
 0x188   :  { %3654 = vst.msk [vmem:[%s7765_s5 + $0x698] sm:$0xff] %vm3442_vm6, %v3397_v2  ;;  %v3396_v1 = vsel %vm3185_vm5, %v3134_v62, %v2876_v53  ;;  %v2878_v7 = vadd.f32 %v6984_v24, %v2615_v0  ;;  %v4547_v9 = vpop.f32.mrb[86].mxu1  ;;  %3525 = vst.msk [vmem:[%s7765_s5 + $0x290] sm:$0xff] %vm3442_vm6, %v3268_v5  ;;  %v3009_v10 = vmax.f32 %v2751_v3, 0.0  ;;  %v2490_v13 = vmul.f32 %v6971_v14, %v4355_v8  ;;  %v1547_v15 = vpop.f32.mrb[87].mxu0 }
 0x189   :  { %3653 = vst.msk [vmem:[%s7765_s5 + $0x690] sm:$0xff] %vm3442_vm6, %v3396_v1  ;;  %v3137_v12 = vmax.f32 %v2879_v4, 0.0  ;;  %v2618_v11 = vmul.f32 %v6971_v14, %v4547_v9  ;;  %v2187_v16 = vpop.f32.mrb[87].mxu1  ;;  %v3008_v17 = vmax.f32 %v2750_v6, 0.0  ;;  %v2489_v19 = vmul.f32 %v6971_v14, %v1547_v15 }
 0x18a   :  { %v3136_v18 = vmax.f32 %v2878_v7, 0.0  ;;  %v2617_v20 = vmul.f32 %v6971_v14, %v2187_v16  ;;  %v3271_v21 = vsel %vm3185_vm5, %v3009_v10, %v2751_v3  ;;  %v2753_v23 = vadd.f32 %v6984_v24, %v2490_v13 }
 0x18b   :  { %v3399_v22 = vsel %vm3185_vm5, %v3137_v12, %v2879_v4  ;;  %v2881_v25 = vadd.f32 %v6984_v24, %v2618_v11  ;;  %3528 = vst.msk [vmem:[%s7765_s5 + $0x2a8] sm:$0xff] %vm3442_vm6, %v3271_v21  ;;  %v3270_v26 = vsel %vm3185_vm5, %v3008_v17, %v2750_v6  ;;  %v2752_v28 = vadd.f32 %v6984_v24, %v2489_v19  ;;  %v4358_v30 = vpop.f32.mrb[88].mxu0 }
 0x18c   :  { %3656 = vst.msk [vmem:[%s7765_s5 + $0x6a8] sm:$0xff] %vm3442_vm6, %v3399_v22  ;;  %v3398_v27 = vsel %vm3185_vm5, %v3136_v18, %v2878_v7  ;;  %v2880_v29 = vadd.f32 %v6984_v24, %v2617_v20  ;;  %v4550_v32 = vpop.f32.mrb[88].mxu1  ;;  %3527 = vst.msk [vmem:[%s7765_s5 + $0x2a0] sm:$0xff] %vm3442_vm6, %v3270_v26  ;;  %v3011_v33 = vmax.f32 %v2753_v23, 0.0  ;;  %v2492_v35 = vmul.f32 %v6971_v14, %v4358_v30  ;;  %v1557_v39 = vpop.f32.mrb[89].mxu0 }
 0x18d   :  { %3655 = vst.msk [vmem:[%s7765_s5 + $0x6a0] sm:$0xff] %vm3442_vm6, %v3398_v27  ;;  %v3139_v34 = vmax.f32 %v2881_v25, 0.0  ;;  %v2620_v36 = vmul.f32 %v6971_v14, %v4550_v32  ;;  %v2197_v40 = vpop.f32.mrb[89].mxu1  ;;  %v3010_v41 = vmax.f32 %v2752_v28, 0.0  ;;  %v2491_v43 = vmul.f32 %v6971_v14, %v1557_v39 }
 0x18e   :  { %v3138_v42 = vmax.f32 %v2880_v29, 0.0  ;;  %v2619_v44 = vmul.f32 %v6971_v14, %v2197_v40  ;;  %v3273_v45 = vsel %vm3185_vm5, %v3011_v33, %v2753_v23  ;;  %v2755_v47 = vadd.f32 %v6984_v24, %v2492_v35 }
 0x18f   :  { %v3401_v46 = vsel %vm3185_vm5, %v3139_v34, %v2881_v25  ;;  %v2883_v48 = vadd.f32 %v6984_v24, %v2620_v36  ;;  %3530 = vst.msk [vmem:[%s7765_s5 + $0x2b8] sm:$0xff] %vm3442_vm6, %v3273_v45  ;;  %v3272_v49 = vsel %vm3185_vm5, %v3010_v41, %v2752_v28  ;;  %v2754_v51 = vadd.f32 %v6984_v24, %v2491_v43  ;;  %v4361_v53 = vpop.f32.mrb[90].mxu0 }
 0x190   :  { %3658 = vst.msk [vmem:[%s7765_s5 + $0x6b8] sm:$0xff] %vm3442_vm6, %v3401_v46  ;;  %v3400_v50 = vsel %vm3185_vm5, %v3138_v42, %v2880_v29  ;;  %v2882_v52 = vadd.f32 %v6984_v24, %v2619_v44  ;;  %v4553_v54 = vpop.f32.mrb[90].mxu1  ;;  %3529 = vst.msk [vmem:[%s7765_s5 + $0x2b0] sm:$0xff] %vm3442_vm6, %v3272_v49  ;;  %v3013_v55 = vmax.f32 %v2755_v47, 0.0  ;;  %v2494_v57 = vmul.f32 %v6971_v14, %v4361_v53  ;;  %v1567_v58 = vpop.f32.mrb[91].mxu0 }
 0x191   :  { %3657 = vst.msk [vmem:[%s7765_s5 + $0x6b0] sm:$0xff] %vm3442_vm6, %v3400_v50  ;;  %v3141_v56 = vmax.f32 %v2883_v48, 0.0  ;;  %v2622_v31 = vmul.f32 %v6971_v14, %v4553_v54  ;;  %v2207_v59 = vpop.f32.mrb[91].mxu1  ;;  %v3012_v60 = vmax.f32 %v2754_v51, 0.0  ;;  %v2493_v62 = vmul.f32 %v6971_v14, %v1567_v58 }
 0x192   :  { %v3140_v61 = vmax.f32 %v2882_v52, 0.0  ;;  %v2621_v63 = vmul.f32 %v6971_v14, %v2207_v59  ;;  %v3275_v0 = vsel %vm3185_vm5, %v3013_v55, %v2755_v47  ;;  %v2757_v2 = vadd.f32 %v6984_v24, %v2494_v57 }
 0x193   :  { %v3403_v37 = vsel %vm3185_vm5, %v3141_v56, %v2883_v48  ;;  %v2885_v3 = vadd.f32 %v6984_v24, %v2622_v31  ;;  %3532 = vst.msk [vmem:[%s7765_s5 + $0x2c8] sm:$0xff] %vm3442_vm6, %v3275_v0  ;;  %v3274_v4 = vsel %vm3185_vm5, %v3012_v60, %v2754_v51  ;;  %v2756_v1 = vadd.f32 %v6984_v24, %v2493_v62  ;;  %v4364_v7 = vpop.f32.mrb[92].mxu0 }
 0x194   :  { %3660 = vst.msk [vmem:[%s7765_s5 + $0x6c8] sm:$0xff] %vm3442_vm6, %v3403_v37  ;;  %v3402_v5 = vsel %vm3185_vm5, %v3140_v61, %v2882_v52  ;;  %v2884_v6 = vadd.f32 %v6984_v24, %v2621_v63  ;;  %v4556_v8 = vpop.f32.mrb[92].mxu1  ;;  %3531 = vst.msk [vmem:[%s7765_s5 + $0x2c0] sm:$0xff] %vm3442_vm6, %v3274_v4  ;;  %v3015_v9 = vmax.f32 %v2757_v2, 0.0  ;;  %v2496_v12 = vmul.f32 %v6971_v14, %v4364_v7  ;;  %v1577_v11 = vpop.f32.mrb[93].mxu0 }
 0x195   :  { %3659 = vst.msk [vmem:[%s7765_s5 + $0x6c0] sm:$0xff] %vm3442_vm6, %v3402_v5  ;;  %v3143_v10 = vmax.f32 %v2885_v3, 0.0  ;;  %v2624_v13 = vmul.f32 %v6971_v14, %v4556_v8  ;;  %v2217_v15 = vpop.f32.mrb[93].mxu1  ;;  %v3014_v16 = vmax.f32 %v2756_v1, 0.0  ;;  %v2495_v18 = vmul.f32 %v6971_v14, %v1577_v11 }
 0x196   :  { %v3142_v17 = vmax.f32 %v2884_v6, 0.0  ;;  %v2623_v19 = vmul.f32 %v6971_v14, %v2217_v15  ;;  %v3277_v20 = vsel %vm3185_vm5, %v3015_v9, %v2757_v2  ;;  %v2759_v22 = vadd.f32 %v6984_v24, %v2496_v12 }
 0x197   :  { %v3405_v21 = vsel %vm3185_vm5, %v3143_v10, %v2885_v3  ;;  %v2887_v23 = vadd.f32 %v6984_v24, %v2624_v13  ;;  %3534 = vst.msk [vmem:[%s7765_s5 + $0x2d8] sm:$0xff] %vm3442_vm6, %v3277_v20  ;;  %v3276_v25 = vsel %vm3185_vm5, %v3014_v16, %v2756_v1  ;;  %v2758_v27 = vadd.f32 %v6984_v24, %v2495_v18  ;;  %v4367_v29 = vpop.f32.mrb[94].mxu0 }
 0x198   :  { %3662 = vst.msk [vmem:[%s7765_s5 + $0x6d8] sm:$0xff] %vm3442_vm6, %v3405_v21  ;;  %v3404_v26 = vsel %vm3185_vm5, %v3142_v17, %v2884_v6  ;;  %v2886_v28 = vadd.f32 %v6984_v24, %v2623_v19  ;;  %v4559_v30 = vpop.f32.mrb[94].mxu1  ;;  %3533 = vst.msk [vmem:[%s7765_s5 + $0x2d0] sm:$0xff] %vm3442_vm6, %v3276_v25  ;;  %v3017_v32 = vmax.f32 %v2759_v22, 0.0  ;;  %v2498_v34 = vmul.f32 %v6971_v14, %v4367_v29  ;;  %v1587_v36 = vpop.f32.mrb[95].mxu0 }
 0x199   :  { %3661 = vst.msk [vmem:[%s7765_s5 + $0x6d0] sm:$0xff] %vm3442_vm6, %v3404_v26  ;;  %v3145_v33 = vmax.f32 %v2887_v23, 0.0  ;;  %v2626_v35 = vmul.f32 %v6971_v14, %v4559_v30  ;;  %v2227_v39 = vpop.f32.mrb[95].mxu1  ;;  %v3016_v40 = vmax.f32 %v2758_v27, 0.0  ;;  %v2497_v42 = vmul.f32 %v6971_v14, %v1587_v36 }
 0x19a   :  { %v3144_v41 = vmax.f32 %v2886_v28, 0.0  ;;  %v2625_v43 = vmul.f32 %v6971_v14, %v2227_v39  ;;  %v3279_v44 = vsel %vm3185_vm5, %v3017_v32, %v2759_v22  ;;  %v2761_v46 = vadd.f32 %v6984_v24, %v2498_v34 }
 0x19b   :  { %v3407_v45 = vsel %vm3185_vm5, %v3145_v33, %v2887_v23  ;;  %v2889_v47 = vadd.f32 %v6984_v24, %v2626_v35  ;;  %3536 = vst.msk [vmem:[%s7765_s5 + $0x2e8] sm:$0xff] %vm3442_vm6, %v3279_v44  ;;  %v3278_v48 = vsel %vm3185_vm5, %v3016_v40, %v2758_v27  ;;  %v2760_v50 = vadd.f32 %v6984_v24, %v2497_v42  ;;  %v4370_v52 = vpop.f32.mrb[96].mxu0 }
 0x19c   :  { %3664 = vst.msk [vmem:[%s7765_s5 + $0x6e8] sm:$0xff] %vm3442_vm6, %v3407_v45  ;;  %v3406_v49 = vsel %vm3185_vm5, %v3144_v41, %v2886_v28  ;;  %v2888_v51 = vadd.f32 %v6984_v24, %v2625_v43  ;;  %v4562_v53 = vpop.f32.mrb[96].mxu1  ;;  %3535 = vst.msk [vmem:[%s7765_s5 + $0x2e0] sm:$0xff] %vm3442_vm6, %v3278_v48  ;;  %v3019_v54 = vmax.f32 %v2761_v46, 0.0  ;;  %v2500_v56 = vmul.f32 %v6971_v14, %v4370_v52  ;;  %v1597_v31 = vpop.f32.mrb[97].mxu0 }
 0x19d   :  { %3663 = vst.msk [vmem:[%s7765_s5 + $0x6e0] sm:$0xff] %vm3442_vm6, %v3406_v49  ;;  %v3147_v55 = vmax.f32 %v2889_v47, 0.0  ;;  %v2628_v57 = vmul.f32 %v6971_v14, %v4562_v53  ;;  %v2237_v58 = vpop.f32.mrb[97].mxu1  ;;  %v3018_v59 = vmax.f32 %v2760_v50, 0.0  ;;  %v2499_v61 = vmul.f32 %v6971_v14, %v1597_v31 }
 0x19e   :  { %v3146_v60 = vmax.f32 %v2888_v51, 0.0  ;;  %v2627_v62 = vmul.f32 %v6971_v14, %v2237_v58  ;;  %v3281_v63 = vsel %vm3185_vm5, %v3019_v54, %v2761_v46  ;;  %v2763_v37 = vadd.f32 %v6984_v24, %v2500_v56 }
 0x19f   :  { %v3409_v0 = vsel %vm3185_vm5, %v3147_v55, %v2889_v47  ;;  %v2891_v2 = vadd.f32 %v6984_v24, %v2628_v57  ;;  %3538 = vst.msk [vmem:[%s7765_s5 + $0x2f8] sm:$0xff] %vm3442_vm6, %v3281_v63  ;;  %v3280_v3 = vsel %vm3185_vm5, %v3018_v59, %v2760_v50  ;;  %v2762_v5 = vadd.f32 %v6984_v24, %v2499_v61  ;;  %v4373_v6 = vpop.f32.mrb[98].mxu0 }
 0x1a0   :  { %3666 = vst.msk [vmem:[%s7765_s5 + $0x6f8] sm:$0xff] %vm3442_vm6, %v3409_v0  ;;  %v3408_v4 = vsel %vm3185_vm5, %v3146_v60, %v2888_v51  ;;  %v2890_v1 = vadd.f32 %v6984_v24, %v2627_v62  ;;  %v4565_v7 = vpop.f32.mrb[98].mxu1  ;;  %3537 = vst.msk [vmem:[%s7765_s5 + $0x2f0] sm:$0xff] %vm3442_vm6, %v3280_v3  ;;  %v3021_v8 = vmax.f32 %v2763_v37, 0.0  ;;  %v2502_v10 = vmul.f32 %v6971_v14, %v4373_v6  ;;  %v1607_v13 = vpop.f32.mrb[99].mxu0 }
 0x1a1   :  { %3665 = vst.msk [vmem:[%s7765_s5 + $0x6f0] sm:$0xff] %vm3442_vm6, %v3408_v4  ;;  %v3149_v9 = vmax.f32 %v2891_v2, 0.0  ;;  %v2630_v12 = vmul.f32 %v6971_v14, %v4565_v7  ;;  %v2247_v11 = vpop.f32.mrb[99].mxu1  ;;  %v3020_v15 = vmax.f32 %v2762_v5, 0.0  ;;  %v2501_v17 = vmul.f32 %v6971_v14, %v1607_v13 }
 0x1a2   :  { %v3148_v16 = vmax.f32 %v2890_v1, 0.0  ;;  %v2629_v18 = vmul.f32 %v6971_v14, %v2247_v11  ;;  %v3283_v19 = vsel %vm3185_vm5, %v3021_v8, %v2763_v37  ;;  %v2765_v21 = vadd.f32 %v6984_v24, %v2502_v10 }
 0x1a3   :  { %v3411_v20 = vsel %vm3185_vm5, %v3149_v9, %v2891_v2  ;;  %v2893_v22 = vadd.f32 %v6984_v24, %v2630_v12  ;;  %3540 = vst.msk [vmem:[%s7765_s5 + $0x308] sm:$0xff] %vm3442_vm6, %v3283_v19  ;;  %v3282_v23 = vsel %vm3185_vm5, %v3020_v15, %v2762_v5  ;;  %v2764_v26 = vadd.f32 %v6984_v24, %v2501_v17  ;;  %v4376_v28 = vpop.f32.mrb[100].mxu0 }
 0x1a4   :  { %3668 = vst.msk [vmem:[%s7765_s5 + $0x708] sm:$0xff] %vm3442_vm6, %v3411_v20  ;;  %v3410_v25 = vsel %vm3185_vm5, %v3148_v16, %v2890_v1  ;;  %v2892_v27 = vadd.f32 %v6984_v24, %v2629_v18  ;;  %v4568_v29 = vpop.f32.mrb[100].mxu1  ;;  %3539 = vst.msk [vmem:[%s7765_s5 + $0x300] sm:$0xff] %vm3442_vm6, %v3282_v23  ;;  %v3023_v30 = vmax.f32 %v2765_v21, 0.0  ;;  %v2504_v33 = vmul.f32 %v6971_v14, %v4376_v28  ;;  %v1617_v35 = vpop.f32.mrb[101].mxu0 }
 0x1a5   :  { %3667 = vst.msk [vmem:[%s7765_s5 + $0x700] sm:$0xff] %vm3442_vm6, %v3410_v25  ;;  %v3151_v32 = vmax.f32 %v2893_v22, 0.0  ;;  %v2632_v34 = vmul.f32 %v6971_v14, %v4568_v29  ;;  %v2257_v36 = vpop.f32.mrb[101].mxu1  ;;  %v3022_v39 = vmax.f32 %v2764_v26, 0.0  ;;  %v2503_v41 = vmul.f32 %v6971_v14, %v1617_v35 }
 0x1a6   :  { %v3150_v40 = vmax.f32 %v2892_v27, 0.0  ;;  %v2631_v42 = vmul.f32 %v6971_v14, %v2257_v36  ;;  %v3285_v43 = vsel %vm3185_vm5, %v3023_v30, %v2765_v21  ;;  %v2767_v45 = vadd.f32 %v6984_v24, %v2504_v33 }
 0x1a7   :  { %v3413_v44 = vsel %vm3185_vm5, %v3151_v32, %v2893_v22  ;;  %v2895_v46 = vadd.f32 %v6984_v24, %v2632_v34  ;;  %3542 = vst.msk [vmem:[%s7765_s5 + $0x318] sm:$0xff] %vm3442_vm6, %v3285_v43  ;;  %v3284_v47 = vsel %vm3185_vm5, %v3022_v39, %v2764_v26  ;;  %v2766_v49 = vadd.f32 %v6984_v24, %v2503_v41  ;;  %v4379_v51 = vpop.f32.mrb[102].mxu0 }
 0x1a8   :  { %3670 = vst.msk [vmem:[%s7765_s5 + $0x718] sm:$0xff] %vm3442_vm6, %v3413_v44  ;;  %v3412_v48 = vsel %vm3185_vm5, %v3150_v40, %v2892_v27  ;;  %v2894_v50 = vadd.f32 %v6984_v24, %v2631_v42  ;;  %v4571_v52 = vpop.f32.mrb[102].mxu1  ;;  %3541 = vst.msk [vmem:[%s7765_s5 + $0x310] sm:$0xff] %vm3442_vm6, %v3284_v47  ;;  %v3025_v53 = vmax.f32 %v2767_v45, 0.0  ;;  %v2506_v55 = vmul.f32 %v6971_v14, %v4379_v51  ;;  %v1627_v57 = vpop.f32.mrb[103].mxu0 }
 0x1a9   :  { %3669 = vst.msk [vmem:[%s7765_s5 + $0x710] sm:$0xff] %vm3442_vm6, %v3412_v48  ;;  %v3153_v54 = vmax.f32 %v2895_v46, 0.0  ;;  %v2634_v56 = vmul.f32 %v6971_v14, %v4571_v52  ;;  %v2267_v31 = vpop.f32.mrb[103].mxu1  ;;  %v3024_v58 = vmax.f32 %v2766_v49, 0.0  ;;  %v2505_v60 = vmul.f32 %v6971_v14, %v1627_v57 }
 0x1aa   :  { %v3152_v59 = vmax.f32 %v2894_v50, 0.0  ;;  %v2633_v61 = vmul.f32 %v6971_v14, %v2267_v31  ;;  %v3287_v62 = vsel %vm3185_vm5, %v3025_v53, %v2767_v45  ;;  %v2769_v0 = vadd.f32 %v6984_v24, %v2506_v55 }
 0x1ab   :  { %v3415_v63 = vsel %vm3185_vm5, %v3153_v54, %v2895_v46  ;;  %v2897_v37 = vadd.f32 %v6984_v24, %v2634_v56  ;;  %3544 = vst.msk [vmem:[%s7765_s5 + $0x328] sm:$0xff] %vm3442_vm6, %v3287_v62  ;;  %v3286_v2 = vsel %vm3185_vm5, %v3024_v58, %v2766_v49  ;;  %v2768_v4 = vadd.f32 %v6984_v24, %v2505_v60  ;;  %v4382_v1 = vpop.f32.mrb[104].mxu0 }
 0x1ac   :  { %3672 = vst.msk [vmem:[%s7765_s5 + $0x728] sm:$0xff] %vm3442_vm6, %v3415_v63  ;;  %v3414_v3 = vsel %vm3185_vm5, %v3152_v59, %v2894_v50  ;;  %v2896_v5 = vadd.f32 %v6984_v24, %v2633_v61  ;;  %v4574_v6 = vpop.f32.mrb[104].mxu1  ;;  %3543 = vst.msk [vmem:[%s7765_s5 + $0x320] sm:$0xff] %vm3442_vm6, %v3286_v2  ;;  %v3027_v7 = vmax.f32 %v2769_v0, 0.0  ;;  %v2508_v9 = vmul.f32 %v6971_v14, %v4382_v1  ;;  %v1637_v12 = vpop.f32.mrb[105].mxu0 }
 0x1ad   :  { %3671 = vst.msk [vmem:[%s7765_s5 + $0x720] sm:$0xff] %vm3442_vm6, %v3414_v3  ;;  %v3155_v8 = vmax.f32 %v2897_v37, 0.0  ;;  %v2636_v10 = vmul.f32 %v6971_v14, %v4574_v6  ;;  %v2277_v13 = vpop.f32.mrb[105].mxu1  ;;  %v3026_v11 = vmax.f32 %v2768_v4, 0.0  ;;  %v2507_v16 = vmul.f32 %v6971_v14, %v1637_v12 }
 0x1ae   :  { %v3154_v15 = vmax.f32 %v2896_v5, 0.0  ;;  %v2635_v17 = vmul.f32 %v6971_v14, %v2277_v13  ;;  %v3289_v18 = vsel %vm3185_vm5, %v3027_v7, %v2769_v0  ;;  %v2771_v20 = vadd.f32 %v6984_v24, %v2508_v9 }
 0x1af   :  { %v3417_v19 = vsel %vm3185_vm5, %v3155_v8, %v2897_v37  ;;  %v2899_v21 = vadd.f32 %v6984_v24, %v2636_v10  ;;  %3546 = vst.msk [vmem:[%s7765_s5 + $0x338] sm:$0xff] %vm3442_vm6, %v3289_v18  ;;  %v3288_v22 = vsel %vm3185_vm5, %v3026_v11, %v2768_v4  ;;  %v2770_v25 = vadd.f32 %v6984_v24, %v2507_v16  ;;  %v4385_v27 = vpop.f32.mrb[106].mxu0 }
 0x1b0   :  { %3674 = vst.msk [vmem:[%s7765_s5 + $0x738] sm:$0xff] %vm3442_vm6, %v3417_v19  ;;  %v3416_v23 = vsel %vm3185_vm5, %v3154_v15, %v2896_v5  ;;  %v2898_v26 = vadd.f32 %v6984_v24, %v2635_v17  ;;  %v4577_v28 = vpop.f32.mrb[106].mxu1  ;;  %3545 = vst.msk [vmem:[%s7765_s5 + $0x330] sm:$0xff] %vm3442_vm6, %v3288_v22  ;;  %v3029_v29 = vmax.f32 %v2771_v20, 0.0  ;;  %v2510_v32 = vmul.f32 %v6971_v14, %v4385_v27  ;;  %v1647_v34 = vpop.f32.mrb[107].mxu0 }
 0x1b1   :  { %3673 = vst.msk [vmem:[%s7765_s5 + $0x730] sm:$0xff] %vm3442_vm6, %v3416_v23  ;;  %v3157_v30 = vmax.f32 %v2899_v21, 0.0  ;;  %v2638_v33 = vmul.f32 %v6971_v14, %v4577_v28  ;;  %v2287_v35 = vpop.f32.mrb[107].mxu1  ;;  %v3028_v36 = vmax.f32 %v2770_v25, 0.0  ;;  %v2509_v40 = vmul.f32 %v6971_v14, %v1647_v34 }
 0x1b2   :  { %v3156_v39 = vmax.f32 %v2898_v26, 0.0  ;;  %v2637_v41 = vmul.f32 %v6971_v14, %v2287_v35  ;;  %v3291_v42 = vsel %vm3185_vm5, %v3029_v29, %v2771_v20  ;;  %v2773_v44 = vadd.f32 %v6984_v24, %v2510_v32 }
 0x1b3   :  { %v3419_v43 = vsel %vm3185_vm5, %v3157_v30, %v2899_v21  ;;  %v2901_v45 = vadd.f32 %v6984_v24, %v2638_v33  ;;  %3548 = vst.msk [vmem:[%s7765_s5 + $0x348] sm:$0xff] %vm3442_vm6, %v3291_v42  ;;  %v3290_v46 = vsel %vm3185_vm5, %v3028_v36, %v2770_v25  ;;  %v2772_v48 = vadd.f32 %v6984_v24, %v2509_v40  ;;  %v4388_v50 = vpop.f32.mrb[108].mxu0 }
 0x1b4   :  { %3676 = vst.msk [vmem:[%s7765_s5 + $0x748] sm:$0xff] %vm3442_vm6, %v3419_v43  ;;  %v3418_v47 = vsel %vm3185_vm5, %v3156_v39, %v2898_v26  ;;  %v2900_v49 = vadd.f32 %v6984_v24, %v2637_v41  ;;  %v4580_v51 = vpop.f32.mrb[108].mxu1  ;;  %3547 = vst.msk [vmem:[%s7765_s5 + $0x340] sm:$0xff] %vm3442_vm6, %v3290_v46  ;;  %v3031_v52 = vmax.f32 %v2773_v44, 0.0  ;;  %v2512_v54 = vmul.f32 %v6971_v14, %v4388_v50  ;;  %v1657_v56 = vpop.f32.mrb[109].mxu0 }
 0x1b5   :  { %3675 = vst.msk [vmem:[%s7765_s5 + $0x740] sm:$0xff] %vm3442_vm6, %v3418_v47  ;;  %v3159_v53 = vmax.f32 %v2901_v45, 0.0  ;;  %v2640_v55 = vmul.f32 %v6971_v14, %v4580_v51  ;;  %v2297_v57 = vpop.f32.mrb[109].mxu1  ;;  %v3030_v31 = vmax.f32 %v2772_v48, 0.0  ;;  %v2511_v59 = vmul.f32 %v6971_v14, %v1657_v56 }
 0x1b6   :  { %v3158_v58 = vmax.f32 %v2900_v49, 0.0  ;;  %v2639_v60 = vmul.f32 %v6971_v14, %v2297_v57  ;;  %v3293_v61 = vsel %vm3185_vm5, %v3031_v52, %v2773_v44  ;;  %v2775_v63 = vadd.f32 %v6984_v24, %v2512_v54 }
 0x1b7   :  { %v3421_v62 = vsel %vm3185_vm5, %v3159_v53, %v2901_v45  ;;  %v2903_v0 = vadd.f32 %v6984_v24, %v2640_v55  ;;  %3550 = vst.msk [vmem:[%s7765_s5 + $0x358] sm:$0xff] %vm3442_vm6, %v3293_v61  ;;  %v3292_v37 = vsel %vm3185_vm5, %v3030_v31, %v2772_v48  ;;  %v2774_v3 = vadd.f32 %v6984_v24, %v2511_v59 }
 0x1b8   :  { %3678 = vst.msk [vmem:[%s7765_s5 + $0x758] sm:$0xff] %vm3442_vm6, %v3421_v62  ;;  %v3420_v2 = vsel %vm3185_vm5, %v3158_v58, %v2900_v49  ;;  %v2902_v4 = vadd.f32 %v6984_v24, %v2639_v60  ;;  %v4391_v5 = vpop.f32.mrb[110].mxu0  ;;  %v4583_v1 = vpop.f32.mrb[110].mxu1  ;;  %3549 = vst.msk [vmem:[%s7765_s5 + $0x350] sm:$0xff] %vm3442_vm6, %v3292_v37  ;;  %v3033_v6 = vmax.f32 %v2775_v63, 0.0 }
 0x1b9   :  { %3677 = vst.msk [vmem:[%s7765_s5 + $0x750] sm:$0xff] %vm3442_vm6, %v3420_v2  ;;  %v3161_v7 = vmax.f32 %v2903_v0, 0.0  ;;  %v2514_v8 = vmul.f32 %v6971_v14, %v4391_v5  ;;  %v2642_v9 = vmul.f32 %v6971_v14, %v4583_v1  ;;  %v1667_v10 = vpop.f32.mrb[111].mxu0  ;;  %v2307_v12 = vpop.f32.mrb[111].mxu1  ;;  %v3032_v13 = vmax.f32 %v2774_v3, 0.0 }
 0x1ba   :  { %v3160_v11 = vmax.f32 %v2902_v4, 0.0  ;;  %v2513_v15 = vmul.f32 %v6971_v14, %v1667_v10  ;;  %v2641_v16 = vmul.f32 %v6971_v14, %v2307_v12  ;;  %v3295_v17 = vsel %vm3185_vm5, %v3033_v6, %v2775_v63 }
 0x1bb   :  { %v3423_v18 = vsel %vm3185_vm5, %v3161_v7, %v2903_v0  ;;  %v2777_v19 = vadd.f32 %v6984_v24, %v2514_v8  ;;  %v2905_v20 = vadd.f32 %v6984_v24, %v2642_v9  ;;  %3552 = vst.msk [vmem:[%s7765_s5 + $0x368] sm:$0xff] %vm3442_vm6, %v3295_v17  ;;  %v3294_v21 = vsel %vm3185_vm5, %v3032_v13, %v2774_v3 }
 0x1bc   :  { %3680 = vst.msk [vmem:[%s7765_s5 + $0x768] sm:$0xff] %vm3442_vm6, %v3423_v18  ;;  %v3422_v22 = vsel %vm3185_vm5, %v3160_v11, %v2902_v4  ;;  %v2776_v23 = vadd.f32 %v6984_v24, %v2513_v15  ;;  %v2904_v25 = vadd.f32 %v6984_v24, %v2641_v16  ;;  %v4394_v26 = vpop.f32.mrb[112].mxu0  ;;  %v4586_v27 = vpop.f32.mrb[112].mxu1  ;;  %3551 = vst.msk [vmem:[%s7765_s5 + $0x360] sm:$0xff] %vm3442_vm6, %v3294_v21 }
 0x1bd   :  { %3679 = vst.msk [vmem:[%s7765_s5 + $0x760] sm:$0xff] %vm3442_vm6, %v3422_v22  ;;  %v3035_v28 = vmax.f32 %v2777_v19, 0.0  ;;  %v3163_v29 = vmax.f32 %v2905_v20, 0.0  ;;  %v2516_v30 = vmul.f32 %v6971_v14, %v4394_v26  ;;  %v2644_v32 = vmul.f32 %v6971_v14, %v4586_v27  ;;  %v1677_v33 = vpop.f32.mrb[113].mxu0  ;;  %v2317_v34 = vpop.f32.mrb[113].mxu1 }
 0x1be   :  { %v3034_v35 = vmax.f32 %v2776_v23, 0.0  ;;  %v3162_v36 = vmax.f32 %v2904_v25, 0.0  ;;  %v2515_v39 = vmul.f32 %v6971_v14, %v1677_v33  ;;  %v2643_v40 = vmul.f32 %v6971_v14, %v2317_v34 }
 0x1bf   :  { %v3297_v41 = vsel %vm3185_vm5, %v3035_v28, %v2777_v19  ;;  %v3425_v42 = vsel %vm3185_vm5, %v3163_v29, %v2905_v20  ;;  %v2779_v43 = vadd.f32 %v6984_v24, %v2516_v30  ;;  %v2907_v44 = vadd.f32 %v6984_v24, %v2644_v32 }
 0x1c0   :  { %3554 = vst.msk [vmem:[%s7765_s5 + $0x378] sm:$0xff] %vm3442_vm6, %v3297_v41  ;;  %3682 = vst.msk [vmem:[%s7765_s5 + $0x778] sm:$0xff] %vm3442_vm6, %v3425_v42  ;;  %v3296_v45 = vsel %vm3185_vm5, %v3034_v35, %v2776_v23  ;;  %v3424_v46 = vsel %vm3185_vm5, %v3162_v36, %v2904_v25  ;;  %v2778_v47 = vadd.f32 %v6984_v24, %v2515_v39  ;;  %v4397_v49 = vpop.f32.mrb[114].mxu0  ;;  %v4589_v50 = vpop.f32.mrb[114].mxu1 }
 0x1c1   :  { %v2906_v48 = vadd.f32 %v6984_v24, %v2643_v40  ;;  %3553 = vst.msk [vmem:[%s7765_s5 + $0x370] sm:$0xff] %vm3442_vm6, %v3296_v45  ;;  %3681 = vst.msk [vmem:[%s7765_s5 + $0x770] sm:$0xff] %vm3442_vm6, %v3424_v46  ;;  %v3037_v51 = vmax.f32 %v2779_v43, 0.0  ;;  %v3165_v52 = vmax.f32 %v2907_v44, 0.0  ;;  %v2518_v53 = vmul.f32 %v6971_v14, %v4397_v49  ;;  %v1687_v55 = vpop.f32.mrb[115].mxu0  ;;  %v2327_v56 = vpop.f32.mrb[115].mxu1 }
 0x1c2   :  { %v2646_v54 = vmul.f32 %v6971_v14, %v4589_v50  ;;  %v3036_v57 = vmax.f32 %v2778_v47, 0.0  ;;  %v2517_v58 = vmul.f32 %v6971_v14, %v1687_v55  ;;  %v2645_v59 = vmul.f32 %v6971_v14, %v2327_v56 }
 0x1c3   :  { %v3164_v31 = vmax.f32 %v2906_v48, 0.0  ;;  %v3299_v60 = vsel %vm3185_vm5, %v3037_v51, %v2779_v43  ;;  %v3427_v61 = vsel %vm3185_vm5, %v3165_v52, %v2907_v44  ;;  %v2781_v62 = vadd.f32 %v6984_v24, %v2518_v53 }
 0x1c4   :  { %v2909_v63 = vadd.f32 %v6984_v24, %v2646_v54  ;;  %3556 = vst.msk [vmem:[%s7765_s5 + $0x388] sm:$0xff] %vm3442_vm6, %v3299_v60  ;;  %3684 = vst.msk [vmem:[%s7765_s5 + $0x788] sm:$0xff] %vm3442_vm6, %v3427_v61  ;;  %v3298_v0 = vsel %vm3185_vm5, %v3036_v57, %v2778_v47  ;;  %v2780_v2 = vadd.f32 %v6984_v24, %v2517_v58  ;;  %v4400_v4 = vpop.f32.mrb[116].mxu0  ;;  %v4592_v5 = vpop.f32.mrb[116].mxu1 }
 0x1c5   :  { %v3426_v37 = vsel %vm3185_vm5, %v3164_v31, %v2906_v48  ;;  %v2908_v3 = vadd.f32 %v6984_v24, %v2645_v59  ;;  %3555 = vst.msk [vmem:[%s7765_s5 + $0x380] sm:$0xff] %vm3442_vm6, %v3298_v0  ;;  %v3039_v1 = vmax.f32 %v2781_v62, 0.0  ;;  %v2520_v7 = vmul.f32 %v6971_v14, %v4400_v4  ;;  %v1697_v9 = vpop.f32.mrb[117].mxu0  ;;  %v2337_v10 = vpop.f32.mrb[117].mxu1 }
 0x1c6   :  { %3683 = vst.msk [vmem:[%s7765_s5 + $0x780] sm:$0xff] %vm3442_vm6, %v3426_v37  ;;  %v3167_v6 = vmax.f32 %v2909_v63, 0.0  ;;  %v2648_v8 = vmul.f32 %v6971_v14, %v4592_v5  ;;  %v3038_v12 = vmax.f32 %v2780_v2, 0.0  ;;  %v2519_v11 = vmul.f32 %v6971_v14, %v1697_v9 }
 0x1c7   :  { %v3166_v13 = vmax.f32 %v2908_v3, 0.0  ;;  %v2647_v15 = vmul.f32 %v6971_v14, %v2337_v10  ;;  %v3301_v16 = vsel %vm3185_vm5, %v3039_v1, %v2781_v62  ;;  %v2783_v18 = vadd.f32 %v6984_v24, %v2520_v7 }
 0x1c8   :  { %v3429_v17 = vsel %vm3185_vm5, %v3167_v6, %v2909_v63  ;;  %v2911_v19 = vadd.f32 %v6984_v24, %v2648_v8  ;;  %3558 = vst.msk [vmem:[%s7765_s5 + $0x398] sm:$0xff] %vm3442_vm6, %v3301_v16  ;;  %v3300_v20 = vsel %vm3185_vm5, %v3038_v12, %v2780_v2  ;;  %v2782_v22 = vadd.f32 %v6984_v24, %v2519_v11  ;;  %v4403_v25 = vpop.f32.mrb[118].mxu0  ;;  %v4595_v26 = vpop.f32.mrb[118].mxu1 }
 0x1c9   :  { %3686 = vst.msk [vmem:[%s7765_s5 + $0x798] sm:$0xff] %vm3442_vm6, %v3429_v17  ;;  %v3428_v21 = vsel %vm3185_vm5, %v3166_v13, %v2908_v3  ;;  %v2910_v23 = vadd.f32 %v6984_v24, %v2647_v15  ;;  %3557 = vst.msk [vmem:[%s7765_s5 + $0x390] sm:$0xff] %vm3442_vm6, %v3300_v20  ;;  %v3041_v27 = vmax.f32 %v2783_v18, 0.0  ;;  %v2522_v29 = vmul.f32 %v6971_v14, %v4403_v25  ;;  %v1707_v32 = vpop.f32.mrb[119].mxu0  ;;  %v2347_v33 = vpop.f32.mrb[119].mxu1 }
 0x1ca   :  { %3685 = vst.msk [vmem:[%s7765_s5 + $0x790] sm:$0xff] %vm3442_vm6, %v3428_v21  ;;  %v3169_v28 = vmax.f32 %v2911_v19, 0.0  ;;  %v2650_v30 = vmul.f32 %v6971_v14, %v4595_v26  ;;  %v3040_v34 = vmax.f32 %v2782_v22, 0.0  ;;  %v2521_v36 = vmul.f32 %v6971_v14, %v1707_v32 }
 0x1cb   :  { %v3168_v35 = vmax.f32 %v2910_v23, 0.0  ;;  %v2649_v39 = vmul.f32 %v6971_v14, %v2347_v33  ;;  %v3303_v40 = vsel %vm3185_vm5, %v3041_v27, %v2783_v18  ;;  %v2785_v42 = vadd.f32 %v6984_v24, %v2522_v29  ;;  %v4622_v27 = vld [vmem:[%s7763_s2] ss:$0 sm:$0xff] }
 0x1cc   :  { %v3431_v41 = vsel %vm3185_vm5, %v3169_v28, %v2911_v19  ;;  %v2913_v43 = vadd.f32 %v6984_v24, %v2650_v30  ;;  %3560 = vst.msk [vmem:[%s7765_s5 + $0x3a8] sm:$0xff] %vm3442_vm6, %v3303_v40  ;;  %v3302_v44 = vsel %vm3185_vm5, %v3040_v34, %v2782_v22  ;;  %v2784_v46 = vadd.f32 %v6984_v24, %v2521_v36  ;;  %v4406_v48 = vpop.f32.mrb[120].mxu0  ;;  %v4598_v49 = vpop.f32.mrb[120].mxu1  ;;  %v4623_v40 = vld [vmem:[%s7764_s3] ss:$0 sm:$0xff] }
 0x1cd   :  { %3688 = vst.msk [vmem:[%s7765_s5 + $0x7a8] sm:$0xff] %vm3442_vm6, %v3431_v41  ;;  %v3430_v45 = vsel %vm3185_vm5, %v3168_v35, %v2910_v23  ;;  %v2912_v47 = vadd.f32 %v6984_v24, %v2649_v39  ;;  %3559 = vst.msk [vmem:[%s7765_s5 + $0x3a0] sm:$0xff] %vm3442_vm6, %v3302_v44  ;;  %v3043_v50 = vmax.f32 %v2785_v42, 0.0  ;;  %v2524_v52 = vmul.f32 %v6971_v14, %v4406_v48  ;;  %v1717_v54 = vpop.f32.mrb[121].mxu0  ;;  %v2357_v55 = vpop.f32.mrb[121].mxu1 }
 0x1ce   :  { %3687 = vst.msk [vmem:[%s7765_s5 + $0x7a0] sm:$0xff] %vm3442_vm6, %v3430_v45  ;;  %v3171_v51 = vmax.f32 %v2913_v43, 0.0  ;;  %v2652_v53 = vmul.f32 %v6971_v14, %v4598_v49  ;;  %v3042_v56 = vmax.f32 %v2784_v46, 0.0  ;;  %v2523_v31 = vmul.f32 %v6971_v14, %v1717_v54 }
 0x1cf   :  { %v3170_v57 = vmax.f32 %v2912_v47, 0.0  ;;  %v2651_v58 = vmul.f32 %v6971_v14, %v2357_v55  ;;  %v3305_v59 = vsel %vm3185_vm5, %v3043_v50, %v2785_v42  ;;  %v2787_v61 = vadd.f32 %v6984_v24, %v2524_v52 }
 0x1d0   :  { %v3433_v60 = vsel %vm3185_vm5, %v3171_v51, %v2913_v43  ;;  %v2915_v62 = vadd.f32 %v6984_v24, %v2652_v53  ;;  %3562 = vst.msk [vmem:[%s7765_s5 + $0x3b8] sm:$0xff] %vm3442_vm6, %v3305_v59  ;;  %v3304_v63 = vsel %vm3185_vm5, %v3042_v56, %v2784_v46  ;;  %v2786_v37 = vadd.f32 %v6984_v24, %v2523_v31  ;;  %v4409_v3 = vpop.f32.mrb[122].mxu0  ;;  %v4601_v4 = vpop.f32.mrb[122].mxu1 }
 0x1d1   :  { %3690 = vst.msk [vmem:[%s7765_s5 + $0x7b8] sm:$0xff] %vm3442_vm6, %v3433_v60  ;;  %v3432_v0 = vsel %vm3185_vm5, %v3170_v57, %v2912_v47  ;;  %v2914_v2 = vadd.f32 %v6984_v24, %v2651_v58  ;;  %3561 = vst.msk [vmem:[%s7765_s5 + $0x3b0] sm:$0xff] %vm3442_vm6, %v3304_v63  ;;  %v3045_v5 = vmax.f32 %v2787_v61, 0.0  ;;  %v2526_v6 = vmul.f32 %v6971_v14, %v4409_v3  ;;  %v1727_v8 = vpop.f32.mrb[123].mxu0  ;;  %v2367_v9 = vpop.f32.mrb[123].mxu1 }
 0x1d2   :  { %3689 = vst.msk [vmem:[%s7765_s5 + $0x7b0] sm:$0xff] %vm3442_vm6, %v3432_v0  ;;  %v3173_v1 = vmax.f32 %v2915_v62, 0.0  ;;  %v2654_v7 = vmul.f32 %v6971_v14, %v4601_v4  ;;  %v3044_v10 = vmax.f32 %v2786_v37, 0.0  ;;  %v2525_v13 = vmul.f32 %v6971_v14, %v1727_v8 }
 0x1d3   :  { %v3172_v12 = vmax.f32 %v2914_v2, 0.0  ;;  %v2653_v11 = vmul.f32 %v6971_v14, %v2367_v9  ;;  %v3307_v15 = vsel %vm3185_vm5, %v3045_v5, %v2787_v61  ;;  %v2789_v17 = vadd.f32 %v6984_v24, %v2526_v6 }
 0x1d4   :  { %v3435_v16 = vsel %vm3185_vm5, %v3173_v1, %v2915_v62  ;;  %v2917_v18 = vadd.f32 %v6984_v24, %v2654_v7  ;;  %3564 = vst.msk [vmem:[%s7765_s5 + $0x3c8] sm:$0xff] %vm3442_vm6, %v3307_v15  ;;  %v3306_v14 = vsel %vm3185_vm5, %v3044_v10, %v2786_v37  ;;  %v2788_v20 = vadd.f32 %v6984_v24, %v2525_v13  ;;  %v4412_v22 = vpop.f32.mrb[124].mxu0  ;;  %v4604_v23 = vpop.f32.mrb[124].mxu1 }
 0x1d5   :  { %3692 = vst.msk [vmem:[%s7765_s5 + $0x7c8] sm:$0xff] %vm3442_vm6, %v3435_v16  ;;  %v3434_v19 = vsel %vm3185_vm5, %v3172_v12, %v2914_v2  ;;  %v2916_v21 = vadd.f32 %v6984_v24, %v2653_v11  ;;  %3563 = vst.msk [vmem:[%s7765_s5 + $0x3c0] sm:$0xff] %vm3442_vm6, %v3306_v14  ;;  %v3047_v25 = vmax.f32 %v2789_v17, 0.0  ;;  %v2528_v28 = vmul.f32 %v4622_v27, %v4412_v22  ;;  %v1737_v29 = vpop.f32.mrb[125].mxu0  ;;  %v2377_v30 = vpop.f32.mrb[125].mxu1 }
 0x1d6   :  { %3691 = vst.msk [vmem:[%s7765_s5 + $0x7c0] sm:$0xff] %vm3442_vm6, %v3434_v19  ;;  %v3175_v26 = vmax.f32 %v2917_v18, 0.0  ;;  %v2656_v24 = vmul.f32 %v4622_v27, %v4604_v23  ;;  %v3046_v32 = vmax.f32 %v2788_v20, 0.0  ;;  %v2527_v34 = vmul.f32 %v4622_v27, %v1737_v29 }
 0x1d7   :  { %v3174_v33 = vmax.f32 %v2916_v21, 0.0  ;;  %v2655_v35 = vmul.f32 %v4622_v27, %v2377_v30  ;;  %v3309_v36 = vsel %vm3185_vm5, %v3047_v25, %v2789_v17  ;;  %v2791_v41 = vadd.f32 %v4623_v40, %v2528_v28 }
 0x1d8   :  { %v3437_v39 = vsel %vm3185_vm5, %v3175_v26, %v2917_v18  ;;  %v2919_v42 = vadd.f32 %v4623_v40, %v2656_v24  ;;  %3566 = vst.msk [vmem:[%s7765_s5 + $0x3d8] sm:$0xff] %vm3442_vm6, %v3309_v36  ;;  %v3308_v43 = vsel %vm3185_vm5, %v3046_v32, %v2788_v20  ;;  %v2790_v45 = vadd.f32 %v4623_v40, %v2527_v34  ;;  %v4415_v47 = vpop.f32.mrb[126].mxu0  ;;  %v4607_v48 = vpop.f32.mrb[126].mxu1 }
 0x1d9   :  { %3694 = vst.msk [vmem:[%s7765_s5 + $0x7d8] sm:$0xff] %vm3442_vm6, %v3437_v39  ;;  %v3436_v44 = vsel %vm3185_vm5, %v3174_v33, %v2916_v21  ;;  %v2918_v46 = vadd.f32 %v4623_v40, %v2655_v35  ;;  %3565 = vst.msk [vmem:[%s7765_s5 + $0x3d0] sm:$0xff] %vm3442_vm6, %v3308_v43  ;;  %v3049_v49 = vmax.f32 %v2791_v41, 0.0  ;;  %v2530_v51 = vmul.f32 %v4622_v27, %v4415_v47  ;;  %v1747_v53 = vpop.f32.mrb[127].mxu0  ;;  %v2387_v54 = vpop.f32.mrb[127].mxu1 }
 0x1da   :  { %3693 = vst.msk [vmem:[%s7765_s5 + $0x7d0] sm:$0xff] %vm3442_vm6, %v3436_v44  ;;  %v3177_v50 = vmax.f32 %v2919_v42, 0.0  ;;  %v2658_v52 = vmul.f32 %v4622_v27, %v4607_v48  ;;  %v3048_v55 = vmax.f32 %v2790_v45, 0.0  ;;  %v2529_v57 = vmul.f32 %v4622_v27, %v1747_v53 }
 0x1db   :  { %v3176_v56 = vmax.f32 %v2918_v46, 0.0  ;;  %v2657_v31 = vmul.f32 %v4622_v27, %v2387_v54  ;;  %v3311_v58 = vsel %vm3185_vm5, %v3049_v49, %v2791_v41  ;;  %v2793_v60 = vadd.f32 %v4623_v40, %v2530_v51 }
 0x1dc   :  { %v3439_v59 = vsel %vm3185_vm5, %v3177_v50, %v2919_v42  ;;  %v2921_v61 = vadd.f32 %v4623_v40, %v2658_v52  ;;  %3568 = vst.msk [vmem:[%s7765_s5 + $0x3e8] sm:$0xff] %vm3442_vm6, %v3311_v58  ;;  %v3310_v62 = vsel %vm3185_vm5, %v3048_v55, %v2790_v45  ;;  %v2792_v0 = vadd.f32 %v4623_v40, %v2529_v57 }
 0x1dd   :  { %3696 = vst.msk [vmem:[%s7765_s5 + $0x7e8] sm:$0xff] %vm3442_vm6, %v3439_v59  ;;  %v3438_v63 = vsel %vm3185_vm5, %v3176_v56, %v2918_v46  ;;  %v2920_v37 = vadd.f32 %v4623_v40, %v2657_v31  ;;  %3567 = vst.msk [vmem:[%s7765_s5 + $0x3e0] sm:$0xff] %vm3442_vm6, %v3310_v62  ;;  %v3051_v2 = vmax.f32 %v2793_v60, 0.0 }
 0x1de   :  { %3695 = vst.msk [vmem:[%s7765_s5 + $0x7e0] sm:$0xff] %vm3442_vm6, %v3438_v63  ;;  %v3179_v3 = vmax.f32 %v2921_v61, 0.0  ;;  %v3050_v4 = vmax.f32 %v2792_v0, 0.0 }
 0x1df   :  { %v3178_v5 = vmax.f32 %v2920_v37, 0.0  ;;  %v3313_v1 = vsel %vm3185_vm5, %v3051_v2, %v2793_v60 }
 0x1e0   :  { %v3441_v6 = vsel %vm3185_vm5, %v3179_v3, %v2921_v61  ;;  %3570 = vst.msk [vmem:[%s7765_s5 + $0x3f8] sm:$0xff] %vm3442_vm6, %v3313_v1  ;;  %v3312_v7 = vsel %vm3185_vm5, %v3050_v4, %v2792_v0 }
 0x1e1   :  { %3698 = vst.msk [vmem:[%s7765_s5 + $0x7f8] sm:$0xff] %vm3442_vm6, %v3441_v6  ;;  %v3440_v8 = vsel %vm3185_vm5, %v3178_v5, %v2920_v37  ;;  %3569 = vst.msk [vmem:[%s7765_s5 + $0x3f0] sm:$0xff] %vm3442_vm6, %v3312_v7 }
 0x1e2   :  { %3697 = vst.msk [vmem:[%s7765_s5 + $0x7f0] sm:$0xff] %vm3442_vm6, %v3440_v8 }

// kernel: embedding_map_net_forward.10
= control target key start
LH: loop header
LB: loop body
LE: loop exit
PB: predicated region body
PF: predicated region fallthrough
CT: control target
= control target key end

     0   :  { %vm281_vm0 = vcmask 293888   ;;  %vm1050_vm1 = vcmask 1043456   ;;  %vm3693_vm2 = vcmask 31744   ;;  %s8301_s1 = inlined_call_operand.vmem [shape: f32[36,4], index: 1, kind: input, shape index: {}]   ;;  %s8302_s0 = inlined_call_operand.vmem [shape: f32[2048,36], index: 0, kind: input, shape index: {}]   ;;  %s8303_s2 = inlined_call_operand.vmem [shape: f32[1,4], index: 2, kind: input, shape index: {}]   ;;  %s8304_s3 = inlined_call_operand.vmem [shape: f32[1,4], index: 3, kind: input, shape index: {}]   ;;  %s8305_s4 = inlined_call_operand.vmem [shape: f32[2048,4], index: 4, kind: input, shape index: {}]   ;;  %s8306_s5 = inlined_call_operand.vmem [shape: f32[2048,4], index: 5, kind: output, shape index: {}]  }
   0x1   :  { %v276_v0 = vld [vmem:[%s8301_s1] sm:$0xff]  ;;  %v277_v1 = vld [vmem:[%s8301_s1 + $0x8] sm:$0xff]  ;;  %v278_v2 = vld [vmem:[%s8301_s1 + $0x10] sm:$0xff] }
   0x2   :  { %v4868_v3 = vpack.c.bf16 %v277_v1, %v276_v0  ;;  %v279_v4 = vld [vmem:[%s8301_s1 + $0x18] sm:$0xff]  ;;  %v20_v5 = vld [vmem:[%s8302_s0] sm:$0xff]  ;;  %v21_v9 = vld [vmem:[%s8302_s0 + $0x8] sm:$0xff] }
   0x3   :  { %v4872_v6 = vpack.c.bf16 %v279_v4, %v278_v2  ;;  %4484 = vmatprep.mubr.msk.f32.mxu0 %vm281_vm0, %v20_v5  ;;  %v148_v7 = vld [vmem:[%s8302_s0 + $0x400] sm:$0xff]  ;;  %v149_v10 = vld [vmem:[%s8302_s0 + $0x408] sm:$0xff]  ;;  %v22_v11 = vld [vmem:[%s8302_s0 + $0x10] sm:$0xff] }
   0x4   :  { %4869 = vmatprep.subr.bf16.mxu0 %v4868_v3  ;;  %4876 = vmatprep.subr.bf16.mxu1 %v4868_v3  ;;  %v280_v8 = vld [vmem:[%s8301_s1 + $0x20] sm:$0xf]  ;;  %v150_v12 = vld [vmem:[%s8302_s0 + $0x410] sm:$0xff]  ;;  %v23_v13 = vld [vmem:[%s8302_s0 + $0x18] sm:$0xff] }
   0x5   :  { %4871 = vmatpush3.bf16.msra.mxu0 %v4868_v3  ;;  %4879 = vmatpush3.bf16.msra.mxu1 %v4868_v3  ;;  %v151_v14 = vld [vmem:[%s8302_s0 + $0x418] sm:$0xff]  ;;  %v24_v15 = vld [vmem:[%s8302_s0 + $0x20] sm:$0xff]  ;;  %v25_v17 = vld [vmem:[%s8302_s0 + $0x28] sm:$0xff] }
   0x6   :  { %4873 = vmatprep.subr.bf16.mxu0 %v4872_v6  ;;  %4877 = vmatprep.subr.bf16.mxu1 %v4872_v6  ;;  %v152_v16 = vld [vmem:[%s8302_s0 + $0x420] sm:$0xff]  ;;  %v153_v18 = vld [vmem:[%s8302_s0 + $0x428] sm:$0xff]  ;;  %v26_v19 = vld [vmem:[%s8302_s0 + $0x30] sm:$0xff] }
   0x7   :  { %4676 = vmatprep.mubr.msk.f32.mxu1 %vm281_vm0, %v148_v7  ;;  %v154_v20 = vld [vmem:[%s8302_s0 + $0x430] sm:$0xff]  ;;  %v27_v21 = vld [vmem:[%s8302_s0 + $0x38] sm:$0xff]  ;;  %v28_v23 = vld [vmem:[%s8302_s0 + $0x40] sm:$0xff] }
   0x8   :  { %v155_v22 = vld [vmem:[%s8302_s0 + $0x438] sm:$0xff]  ;;  %v156_v24 = vld [vmem:[%s8302_s0 + $0x440] sm:$0xff]  ;;  %v29_v25 = vld [vmem:[%s8302_s0 + $0x48] sm:$0xff] }
   0x9   :  { %4875 = vmatpush3.bf16.msra.mxu0 %v4872_v6  ;;  %4880 = vmatpush3.bf16.msra.mxu1 %v4872_v6  ;;  %v157_v26 = vld [vmem:[%s8302_s0 + $0x448] sm:$0xff]  ;;  %v30_v27 = vld [vmem:[%s8302_s0 + $0x50] sm:$0xff]  ;;  %v31_v29 = vld [vmem:[%s8302_s0 + $0x58] sm:$0xff] }
   0xa   :  { %4482 = vmatprep.subr.msk.mxu0 %vm1050_vm1, %v280_v8  ;;  %4878 = vmatprep.subr.msk.mxu1 %vm1050_vm1, %v280_v8  ;;  %v158_v28 = vld [vmem:[%s8302_s0 + $0x450] sm:$0xff]  ;;  %v159_v30 = vld [vmem:[%s8302_s0 + $0x458] sm:$0xff]  ;;  %v32_v31 = vld [vmem:[%s8302_s0 + $0x60] sm:$0xff] }
   0xb   :  { %v160_v32 = vld [vmem:[%s8302_s0 + $0x460] sm:$0xff]  ;;  %v33_v33 = vld [vmem:[%s8302_s0 + $0x68] sm:$0xff]  ;;  %v34_v35 = vld [vmem:[%s8302_s0 + $0x70] sm:$0xff] }
   0xc   :  { %v161_v34 = vld [vmem:[%s8302_s0 + $0x468] sm:$0xff]  ;;  %v162_v36 = vld [vmem:[%s8302_s0 + $0x470] sm:$0xff]  ;;  %v35_v37 = vld [vmem:[%s8302_s0 + $0x78] sm:$0xff] }
   0xd   :  { %4483 = vmatpush3.msk.msra.mxu0 %vm1050_vm1, %v280_v8  ;;  %4881 = vmatpush3.msk.msra.mxu1 %vm1050_vm1, %v280_v8  ;;  %v163_v38 = vld [vmem:[%s8302_s0 + $0x478] sm:$0xff]  ;;  %v36_v39 = vld [vmem:[%s8302_s0 + $0x80] sm:$0xff]  ;;  %v37_v41 = vld [vmem:[%s8302_s0 + $0x88] sm:$0xff] }
   0xe   :  { %4485 = vmatmul.mubr.msk.f32.vlgmr.msra.gmra.mrb[0].mxu0 %vm281_vm0, %v21_v9  ;;  %4677 = vmatmul.mubr.msk.f32.vlgmr.msra.gmra.mrb[0].mxu1 %vm281_vm0, %v149_v10  ;;  %v164_v40 = vld [vmem:[%s8302_s0 + $0x480] sm:$0xff]  ;;  %v165_v42 = vld [vmem:[%s8302_s0 + $0x488] sm:$0xff]  ;;  %v38_v43 = vld [vmem:[%s8302_s0 + $0x90] sm:$0xff] }
   0xf   :  { %4487 = vmatprep.mubr.msk.f32.mxu0 %vm281_vm0, %v22_v11  ;;  %4679 = vmatprep.mubr.msk.f32.mxu1 %vm281_vm0, %v150_v12  ;;  %v166_v44 = vld [vmem:[%s8302_s0 + $0x490] sm:$0xff]  ;;  %v39_v45 = vld [vmem:[%s8302_s0 + $0x98] sm:$0xff]  ;;  %v40_v47 = vld [vmem:[%s8302_s0 + $0xa0] sm:$0xff] }
  0x10   :  { %v167_v46 = vld [vmem:[%s8302_s0 + $0x498] sm:$0xff]  ;;  %v168_v48 = vld [vmem:[%s8302_s0 + $0x4a0] sm:$0xff]  ;;  %v41_v49 = vld [vmem:[%s8302_s0 + $0xa8] sm:$0xff] }
  0x11   :  { %v169_v50 = vld [vmem:[%s8302_s0 + $0x4a8] sm:$0xff]  ;;  %v42_v51 = vld [vmem:[%s8302_s0 + $0xb0] sm:$0xff]  ;;  %v43_v53 = vld [vmem:[%s8302_s0 + $0xb8] sm:$0xff] }
  0x12   :  { %4488 = vmatmul.mubr.msk.f32.gmra.mrb[2].mxu0 %vm281_vm0, %v23_v13  ;;  %4680 = vmatmul.mubr.msk.f32.gmra.mrb[2].mxu1 %vm281_vm0, %v151_v14  ;;  %v170_v52 = vld [vmem:[%s8302_s0 + $0x4b0] sm:$0xff]  ;;  %v171_v54 = vld [vmem:[%s8302_s0 + $0x4b8] sm:$0xff]  ;;  %v44_v55 = vld [vmem:[%s8302_s0 + $0xc0] sm:$0xff] }
  0x13   :  { %4490 = vmatprep.mubr.msk.f32.mxu0 %vm281_vm0, %v24_v15  ;;  %4682 = vmatprep.mubr.msk.f32.mxu1 %vm281_vm0, %v152_v16  ;;  %v172_v56 = vld [vmem:[%s8302_s0 + $0x4c0] sm:$0xff]  ;;  %v45_v57 = vld [vmem:[%s8302_s0 + $0xc8] sm:$0xff]  ;;  %v46_v59 = vld [vmem:[%s8302_s0 + $0xd0] sm:$0xff] }
  0x14   :  { %v173_v58 = vld [vmem:[%s8302_s0 + $0x4c8] sm:$0xff]  ;;  %v174_v60 = vld [vmem:[%s8302_s0 + $0x4d0] sm:$0xff]  ;;  %v47_v61 = vld [vmem:[%s8302_s0 + $0xd8] sm:$0xff] }
  0x15   :  { %v175_v62 = vld [vmem:[%s8302_s0 + $0x4d8] sm:$0xff]  ;;  %v48_v63 = vld [vmem:[%s8302_s0 + $0xe0] sm:$0xff]  ;;  %v49_v1 = vld [vmem:[%s8302_s0 + $0xe8] sm:$0xff] }
  0x16   :  { %4491 = vmatmul.mubr.msk.f32.gmra.mrb[4].mxu0 %vm281_vm0, %v25_v17  ;;  %4683 = vmatmul.mubr.msk.f32.gmra.mrb[4].mxu1 %vm281_vm0, %v153_v18  ;;  %v176_v0 = vld [vmem:[%s8302_s0 + $0x4e0] sm:$0xff]  ;;  %v177_v2 = vld [vmem:[%s8302_s0 + $0x4e8] sm:$0xff]  ;;  %v50_v3 = vld [vmem:[%s8302_s0 + $0xf0] sm:$0xff] }
  0x17   :  { %4493 = vmatprep.mubr.msk.f32.mxu0 %vm281_vm0, %v26_v19  ;;  %4685 = vmatprep.mubr.msk.f32.mxu1 %vm281_vm0, %v154_v20  ;;  %v178_v4 = vld [vmem:[%s8302_s0 + $0x4f0] sm:$0xff]  ;;  %v51_v5 = vld [vmem:[%s8302_s0 + $0xf8] sm:$0xff]  ;;  %v52_v7 = vld [vmem:[%s8302_s0 + $0x100] sm:$0xff] }
  0x18   :  { %v179_v6 = vld [vmem:[%s8302_s0 + $0x4f8] sm:$0xff]  ;;  %v180_v8 = vld [vmem:[%s8302_s0 + $0x500] sm:$0xff]  ;;  %v53_v9 = vld [vmem:[%s8302_s0 + $0x108] sm:$0xff] }
  0x19   :  { %v181_v10 = vld [vmem:[%s8302_s0 + $0x508] sm:$0xff]  ;;  %v54_v11 = vld [vmem:[%s8302_s0 + $0x110] sm:$0xff]  ;;  %v55_v13 = vld [vmem:[%s8302_s0 + $0x118] sm:$0xff] }
  0x1a   :  { %4494 = vmatmul.mubr.msk.f32.gmra.mrb[6].mxu0 %vm281_vm0, %v27_v21  ;;  %4686 = vmatmul.mubr.msk.f32.gmra.mrb[6].mxu1 %vm281_vm0, %v155_v22  ;;  %v182_v12 = vld [vmem:[%s8302_s0 + $0x510] sm:$0xff]  ;;  %v183_v14 = vld [vmem:[%s8302_s0 + $0x518] sm:$0xff]  ;;  %v56_v15 = vld [vmem:[%s8302_s0 + $0x120] sm:$0xff] }
  0x1b   :  { %4496 = vmatprep.mubr.msk.f32.mxu0 %vm281_vm0, %v28_v23  ;;  %4688 = vmatprep.mubr.msk.f32.mxu1 %vm281_vm0, %v156_v24  ;;  %v184_v16 = vld [vmem:[%s8302_s0 + $0x520] sm:$0xff]  ;;  %v57_v17 = vld [vmem:[%s8302_s0 + $0x128] sm:$0xff]  ;;  %v58_v19 = vld [vmem:[%s8302_s0 + $0x130] sm:$0xff] }
  0x1c   :  { %v185_v18 = vld [vmem:[%s8302_s0 + $0x528] sm:$0xff]  ;;  %v186_v20 = vld [vmem:[%s8302_s0 + $0x530] sm:$0xff]  ;;  %v59_v21 = vld [vmem:[%s8302_s0 + $0x138] sm:$0xff] }
  0x1d   :  { %v187_v22 = vld [vmem:[%s8302_s0 + $0x538] sm:$0xff]  ;;  %v60_v23 = vld [vmem:[%s8302_s0 + $0x140] sm:$0xff] }
  0x1e   :  { %4497 = vmatmul.mubr.msk.f32.gmra.mrb[8].mxu0 %vm281_vm0, %v29_v25  ;;  %4689 = vmatmul.mubr.msk.f32.gmra.mrb[8].mxu1 %vm281_vm0, %v157_v26  ;;  %v188_v24 = vld [vmem:[%s8302_s0 + $0x540] sm:$0xff]  ;;  %v61_v25 = vld [vmem:[%s8302_s0 + $0x148] sm:$0xff] }
  0x1f   :  { %4499 = vmatprep.mubr.msk.f32.mxu0 %vm281_vm0, %v30_v27  ;;  %4691 = vmatprep.mubr.msk.f32.mxu1 %vm281_vm0, %v158_v28  ;;  %v189_v26 = vld [vmem:[%s8302_s0 + $0x548] sm:$0xff]  ;;  %v62_v27 = vld [vmem:[%s8302_s0 + $0x150] sm:$0xff] }
  0x20   :  { %v190_v28 = vld [vmem:[%s8302_s0 + $0x550] sm:$0xff] }
  0x22   :  { %4500 = vmatmul.mubr.msk.f32.gmra.mrb[10].mxu0 %vm281_vm0, %v31_v29  ;;  %4692 = vmatmul.mubr.msk.f32.gmra.mrb[10].mxu1 %vm281_vm0, %v159_v30  ;;  %v63_v29 = vld [vmem:[%s8302_s0 + $0x158] sm:$0xff] }
  0x23   :  { %4502 = vmatprep.mubr.msk.f32.mxu0 %vm281_vm0, %v32_v31  ;;  %4694 = vmatprep.mubr.msk.f32.mxu1 %vm281_vm0, %v160_v32  ;;  %v191_v30 = vld [vmem:[%s8302_s0 + $0x558] sm:$0xff]  ;;  %v64_v31 = vld [vmem:[%s8302_s0 + $0x160] sm:$0xff] }
  0x24   :  { %v192_v32 = vld [vmem:[%s8302_s0 + $0x560] sm:$0xff] }
  0x26   :  { %4503 = vmatmul.mubr.msk.f32.gmra.mrb[12].mxu0 %vm281_vm0, %v33_v33  ;;  %4695 = vmatmul.mubr.msk.f32.gmra.mrb[12].mxu1 %vm281_vm0, %v161_v34  ;;  %v65_v33 = vld [vmem:[%s8302_s0 + $0x168] sm:$0xff] }
  0x27   :  { %4505 = vmatprep.mubr.msk.f32.mxu0 %vm281_vm0, %v34_v35  ;;  %4697 = vmatprep.mubr.msk.f32.mxu1 %vm281_vm0, %v162_v36  ;;  %v193_v34 = vld [vmem:[%s8302_s0 + $0x568] sm:$0xff]  ;;  %v66_v35 = vld [vmem:[%s8302_s0 + $0x170] sm:$0xff] }
  0x28   :  { %v194_v36 = vld [vmem:[%s8302_s0 + $0x570] sm:$0xff] }
  0x2a   :  { %4506 = vmatmul.mubr.msk.f32.gmra.mrb[14].mxu0 %vm281_vm0, %v35_v37  ;;  %4698 = vmatmul.mubr.msk.f32.gmra.mrb[14].mxu1 %vm281_vm0, %v163_v38  ;;  %v67_v37 = vld [vmem:[%s8302_s0 + $0x178] sm:$0xff] }
  0x2b   :  { %4508 = vmatprep.mubr.msk.f32.mxu0 %vm281_vm0, %v36_v39  ;;  %4700 = vmatprep.mubr.msk.f32.mxu1 %vm281_vm0, %v164_v40  ;;  %v195_v38 = vld [vmem:[%s8302_s0 + $0x578] sm:$0xff]  ;;  %v68_v39 = vld [vmem:[%s8302_s0 + $0x180] sm:$0xff] }
  0x2c   :  { %v196_v40 = vld [vmem:[%s8302_s0 + $0x580] sm:$0xff] }
  0x2e   :  { %4509 = vmatmul.mubr.msk.f32.gmra.mrb[16].mxu0 %vm281_vm0, %v37_v41  ;;  %4701 = vmatmul.mubr.msk.f32.gmra.mrb[16].mxu1 %vm281_vm0, %v165_v42  ;;  %v69_v41 = vld [vmem:[%s8302_s0 + $0x188] sm:$0xff] }
  0x2f   :  { %4511 = vmatprep.mubr.msk.f32.mxu0 %vm281_vm0, %v38_v43  ;;  %4703 = vmatprep.mubr.msk.f32.mxu1 %vm281_vm0, %v166_v44  ;;  %v197_v42 = vld [vmem:[%s8302_s0 + $0x588] sm:$0xff]  ;;  %v70_v43 = vld [vmem:[%s8302_s0 + $0x190] sm:$0xff] }
  0x30   :  { %v198_v44 = vld [vmem:[%s8302_s0 + $0x590] sm:$0xff] }
  0x32   :  { %4512 = vmatmul.mubr.msk.f32.gmra.mrb[18].mxu0 %vm281_vm0, %v39_v45  ;;  %4704 = vmatmul.mubr.msk.f32.gmra.mrb[18].mxu1 %vm281_vm0, %v167_v46  ;;  %v71_v45 = vld [vmem:[%s8302_s0 + $0x198] sm:$0xff] }
  0x33   :  { %4514 = vmatprep.mubr.msk.f32.mxu0 %vm281_vm0, %v40_v47  ;;  %4706 = vmatprep.mubr.msk.f32.mxu1 %vm281_vm0, %v168_v48  ;;  %v199_v46 = vld [vmem:[%s8302_s0 + $0x598] sm:$0xff]  ;;  %v72_v47 = vld [vmem:[%s8302_s0 + $0x1a0] sm:$0xff] }
  0x34   :  { %v200_v48 = vld [vmem:[%s8302_s0 + $0x5a0] sm:$0xff] }
  0x36   :  { %4515 = vmatmul.mubr.msk.f32.gmra.mrb[20].mxu0 %vm281_vm0, %v41_v49  ;;  %4707 = vmatmul.mubr.msk.f32.gmra.mrb[20].mxu1 %vm281_vm0, %v169_v50  ;;  %v73_v49 = vld [vmem:[%s8302_s0 + $0x1a8] sm:$0xff] }
  0x37   :  { %4517 = vmatprep.mubr.msk.f32.mxu0 %vm281_vm0, %v42_v51  ;;  %4709 = vmatprep.mubr.msk.f32.mxu1 %vm281_vm0, %v170_v52  ;;  %v201_v50 = vld [vmem:[%s8302_s0 + $0x5a8] sm:$0xff]  ;;  %v74_v51 = vld [vmem:[%s8302_s0 + $0x1b0] sm:$0xff] }
  0x38   :  { %v202_v52 = vld [vmem:[%s8302_s0 + $0x5b0] sm:$0xff] }
  0x3a   :  { %4518 = vmatmul.mubr.msk.f32.gmra.mrb[22].mxu0 %vm281_vm0, %v43_v53  ;;  %4710 = vmatmul.mubr.msk.f32.gmra.mrb[22].mxu1 %vm281_vm0, %v171_v54  ;;  %v75_v53 = vld [vmem:[%s8302_s0 + $0x1b8] sm:$0xff] }
  0x3b   :  { %4520 = vmatprep.mubr.msk.f32.mxu0 %vm281_vm0, %v44_v55  ;;  %4712 = vmatprep.mubr.msk.f32.mxu1 %vm281_vm0, %v172_v56  ;;  %v203_v54 = vld [vmem:[%s8302_s0 + $0x5b8] sm:$0xff]  ;;  %v76_v55 = vld [vmem:[%s8302_s0 + $0x1c0] sm:$0xff] }
  0x3c   :  { %v204_v56 = vld [vmem:[%s8302_s0 + $0x5c0] sm:$0xff] }
  0x3e   :  { %4521 = vmatmul.mubr.msk.f32.gmra.mrb[24].mxu0 %vm281_vm0, %v45_v57  ;;  %4713 = vmatmul.mubr.msk.f32.gmra.mrb[24].mxu1 %vm281_vm0, %v173_v58  ;;  %v77_v57 = vld [vmem:[%s8302_s0 + $0x1c8] sm:$0xff] }
  0x3f   :  { %4523 = vmatprep.mubr.msk.f32.mxu0 %vm281_vm0, %v46_v59  ;;  %4715 = vmatprep.mubr.msk.f32.mxu1 %vm281_vm0, %v174_v60  ;;  %v205_v58 = vld [vmem:[%s8302_s0 + $0x5c8] sm:$0xff]  ;;  %v78_v59 = vld [vmem:[%s8302_s0 + $0x1d0] sm:$0xff] }
  0x40   :  { %v206_v60 = vld [vmem:[%s8302_s0 + $0x5d0] sm:$0xff] }
  0x42   :  { %4524 = vmatmul.mubr.msk.f32.gmra.mrb[26].mxu0 %vm281_vm0, %v47_v61  ;;  %4716 = vmatmul.mubr.msk.f32.gmra.mrb[26].mxu1 %vm281_vm0, %v175_v62  ;;  %v79_v61 = vld [vmem:[%s8302_s0 + $0x1d8] sm:$0xff] }
  0x43   :  { %4526 = vmatprep.mubr.msk.f32.mxu0 %vm281_vm0, %v48_v63  ;;  %4718 = vmatprep.mubr.msk.f32.mxu1 %vm281_vm0, %v176_v0  ;;  %v207_v62 = vld [vmem:[%s8302_s0 + $0x5d8] sm:$0xff]  ;;  %v80_v63 = vld [vmem:[%s8302_s0 + $0x1e0] sm:$0xff] }
  0x44   :  { %v208_v0 = vld [vmem:[%s8302_s0 + $0x5e0] sm:$0xff] }
  0x46   :  { %4527 = vmatmul.mubr.msk.f32.gmra.mrb[28].mxu0 %vm281_vm0, %v49_v1  ;;  %4719 = vmatmul.mubr.msk.f32.gmra.mrb[28].mxu1 %vm281_vm0, %v177_v2  ;;  %v81_v1 = vld [vmem:[%s8302_s0 + $0x1e8] sm:$0xff] }
  0x47   :  { %4529 = vmatprep.mubr.msk.f32.mxu0 %vm281_vm0, %v50_v3  ;;  %4721 = vmatprep.mubr.msk.f32.mxu1 %vm281_vm0, %v178_v4  ;;  %v209_v2 = vld [vmem:[%s8302_s0 + $0x5e8] sm:$0xff]  ;;  %v82_v3 = vld [vmem:[%s8302_s0 + $0x1f0] sm:$0xff] }
  0x48   :  { %v210_v4 = vld [vmem:[%s8302_s0 + $0x5f0] sm:$0xff] }
  0x4a   :  { %4530 = vmatmul.mubr.msk.f32.gmra.mrb[30].mxu0 %vm281_vm0, %v51_v5  ;;  %4722 = vmatmul.mubr.msk.f32.gmra.mrb[30].mxu1 %vm281_vm0, %v179_v6  ;;  %v83_v5 = vld [vmem:[%s8302_s0 + $0x1f8] sm:$0xff] }
  0x4b   :  { %4532 = vmatprep.mubr.msk.f32.mxu0 %vm281_vm0, %v52_v7  ;;  %4724 = vmatprep.mubr.msk.f32.mxu1 %vm281_vm0, %v180_v8  ;;  %v211_v6 = vld [vmem:[%s8302_s0 + $0x5f8] sm:$0xff]  ;;  %v84_v7 = vld [vmem:[%s8302_s0 + $0x200] sm:$0xff] }
  0x4c   :  { %v212_v8 = vld [vmem:[%s8302_s0 + $0x600] sm:$0xff] }
  0x4e   :  { %4533 = vmatmul.mubr.msk.f32.gmra.mrb[32].mxu0 %vm281_vm0, %v53_v9  ;;  %4725 = vmatmul.mubr.msk.f32.gmra.mrb[32].mxu1 %vm281_vm0, %v181_v10  ;;  %v85_v9 = vld [vmem:[%s8302_s0 + $0x208] sm:$0xff] }
  0x4f   :  { %4535 = vmatprep.mubr.msk.f32.mxu0 %vm281_vm0, %v54_v11  ;;  %4727 = vmatprep.mubr.msk.f32.mxu1 %vm281_vm0, %v182_v12  ;;  %v213_v10 = vld [vmem:[%s8302_s0 + $0x608] sm:$0xff]  ;;  %v86_v11 = vld [vmem:[%s8302_s0 + $0x210] sm:$0xff] }
  0x50   :  { %v214_v12 = vld [vmem:[%s8302_s0 + $0x610] sm:$0xff] }
  0x52   :  { %4536 = vmatmul.mubr.msk.f32.gmra.mrb[34].mxu0 %vm281_vm0, %v55_v13  ;;  %4728 = vmatmul.mubr.msk.f32.gmra.mrb[34].mxu1 %vm281_vm0, %v183_v14  ;;  %v87_v13 = vld [vmem:[%s8302_s0 + $0x218] sm:$0xff] }
  0x53   :  { %4538 = vmatprep.mubr.msk.f32.mxu0 %vm281_vm0, %v56_v15  ;;  %4730 = vmatprep.mubr.msk.f32.mxu1 %vm281_vm0, %v184_v16  ;;  %v215_v14 = vld [vmem:[%s8302_s0 + $0x618] sm:$0xff]  ;;  %v88_v15 = vld [vmem:[%s8302_s0 + $0x220] sm:$0xff] }
  0x54   :  { %v216_v16 = vld [vmem:[%s8302_s0 + $0x620] sm:$0xff] }
  0x56   :  { %4539 = vmatmul.mubr.msk.f32.gmra.mrb[36].mxu0 %vm281_vm0, %v57_v17  ;;  %4731 = vmatmul.mubr.msk.f32.gmra.mrb[36].mxu1 %vm281_vm0, %v185_v18  ;;  %v89_v17 = vld [vmem:[%s8302_s0 + $0x228] sm:$0xff] }
  0x57   :  { %4541 = vmatprep.mubr.msk.f32.mxu0 %vm281_vm0, %v58_v19  ;;  %4733 = vmatprep.mubr.msk.f32.mxu1 %vm281_vm0, %v186_v20  ;;  %v217_v18 = vld [vmem:[%s8302_s0 + $0x628] sm:$0xff]  ;;  %v90_v19 = vld [vmem:[%s8302_s0 + $0x230] sm:$0xff] }
  0x58   :  { %v218_v20 = vld [vmem:[%s8302_s0 + $0x630] sm:$0xff] }
  0x5a   :  { %4542 = vmatmul.mubr.msk.f32.gmra.mrb[38].mxu0 %vm281_vm0, %v59_v21  ;;  %4734 = vmatmul.mubr.msk.f32.gmra.mrb[38].mxu1 %vm281_vm0, %v187_v22  ;;  %v91_v21 = vld [vmem:[%s8302_s0 + $0x238] sm:$0xff] }
  0x5b   :  { %4544 = vmatprep.mubr.msk.f32.mxu0 %vm281_vm0, %v60_v23  ;;  %4736 = vmatprep.mubr.msk.f32.mxu1 %vm281_vm0, %v188_v24  ;;  %v219_v22 = vld [vmem:[%s8302_s0 + $0x638] sm:$0xff]  ;;  %v92_v23 = vld [vmem:[%s8302_s0 + $0x240] sm:$0xff] }
  0x5c   :  { %v220_v24 = vld [vmem:[%s8302_s0 + $0x640] sm:$0xff] }
  0x5e   :  { %4545 = vmatmul.mubr.msk.f32.gmra.mrb[40].mxu0 %vm281_vm0, %v61_v25  ;;  %4737 = vmatmul.mubr.msk.f32.gmra.mrb[40].mxu1 %vm281_vm0, %v189_v26  ;;  %v93_v25 = vld [vmem:[%s8302_s0 + $0x248] sm:$0xff] }
  0x5f   :  { %4547 = vmatprep.mubr.msk.f32.mxu0 %vm281_vm0, %v62_v27  ;;  %4739 = vmatprep.mubr.msk.f32.mxu1 %vm281_vm0, %v190_v28  ;;  %v221_v26 = vld [vmem:[%s8302_s0 + $0x648] sm:$0xff]  ;;  %v94_v27 = vld [vmem:[%s8302_s0 + $0x250] sm:$0xff] }
  0x60   :  { %v222_v28 = vld [vmem:[%s8302_s0 + $0x650] sm:$0xff] }
  0x62   :  { %4548 = vmatmul.mubr.msk.f32.gmra.mrb[42].mxu0 %vm281_vm0, %v63_v29  ;;  %4740 = vmatmul.mubr.msk.f32.gmra.mrb[42].mxu1 %vm281_vm0, %v191_v30  ;;  %v95_v29 = vld [vmem:[%s8302_s0 + $0x258] sm:$0xff] }
  0x63   :  { %4550 = vmatprep.mubr.msk.f32.mxu0 %vm281_vm0, %v64_v31  ;;  %4742 = vmatprep.mubr.msk.f32.mxu1 %vm281_vm0, %v192_v32  ;;  %v223_v30 = vld [vmem:[%s8302_s0 + $0x658] sm:$0xff]  ;;  %v96_v31 = vld [vmem:[%s8302_s0 + $0x260] sm:$0xff] }
  0x64   :  { %v224_v32 = vld [vmem:[%s8302_s0 + $0x660] sm:$0xff] }
  0x66   :  { %4551 = vmatmul.mubr.msk.f32.gmra.mrb[44].mxu0 %vm281_vm0, %v65_v33  ;;  %4743 = vmatmul.mubr.msk.f32.gmra.mrb[44].mxu1 %vm281_vm0, %v193_v34  ;;  %v97_v33 = vld [vmem:[%s8302_s0 + $0x268] sm:$0xff] }
  0x67   :  { %4553 = vmatprep.mubr.msk.f32.mxu0 %vm281_vm0, %v66_v35  ;;  %4745 = vmatprep.mubr.msk.f32.mxu1 %vm281_vm0, %v194_v36  ;;  %v225_v34 = vld [vmem:[%s8302_s0 + $0x668] sm:$0xff]  ;;  %v98_v35 = vld [vmem:[%s8302_s0 + $0x270] sm:$0xff] }
  0x68   :  { %v226_v36 = vld [vmem:[%s8302_s0 + $0x670] sm:$0xff] }
  0x6a   :  { %4554 = vmatmul.mubr.msk.f32.gmra.mrb[46].mxu0 %vm281_vm0, %v67_v37  ;;  %4746 = vmatmul.mubr.msk.f32.gmra.mrb[46].mxu1 %vm281_vm0, %v195_v38  ;;  %v99_v37 = vld [vmem:[%s8302_s0 + $0x278] sm:$0xff] }
  0x6b   :  { %4556 = vmatprep.mubr.msk.f32.mxu0 %vm281_vm0, %v68_v39  ;;  %4748 = vmatprep.mubr.msk.f32.mxu1 %vm281_vm0, %v196_v40  ;;  %v227_v38 = vld [vmem:[%s8302_s0 + $0x678] sm:$0xff]  ;;  %v100_v39 = vld [vmem:[%s8302_s0 + $0x280] sm:$0xff] }
  0x6c   :  { %v228_v40 = vld [vmem:[%s8302_s0 + $0x680] sm:$0xff] }
  0x6e   :  { %4557 = vmatmul.mubr.msk.f32.gmra.mrb[48].mxu0 %vm281_vm0, %v69_v41  ;;  %4749 = vmatmul.mubr.msk.f32.gmra.mrb[48].mxu1 %vm281_vm0, %v197_v42  ;;  %v101_v41 = vld [vmem:[%s8302_s0 + $0x288] sm:$0xff] }
  0x6f   :  { %4559 = vmatprep.mubr.msk.f32.mxu0 %vm281_vm0, %v70_v43  ;;  %4751 = vmatprep.mubr.msk.f32.mxu1 %vm281_vm0, %v198_v44  ;;  %v229_v42 = vld [vmem:[%s8302_s0 + $0x688] sm:$0xff]  ;;  %v102_v43 = vld [vmem:[%s8302_s0 + $0x290] sm:$0xff] }
  0x70   :  { %v230_v44 = vld [vmem:[%s8302_s0 + $0x690] sm:$0xff] }
  0x72   :  { %4560 = vmatmul.mubr.msk.f32.gmra.mrb[50].mxu0 %vm281_vm0, %v71_v45  ;;  %4752 = vmatmul.mubr.msk.f32.gmra.mrb[50].mxu1 %vm281_vm0, %v199_v46  ;;  %v103_v45 = vld [vmem:[%s8302_s0 + $0x298] sm:$0xff] }
  0x73   :  { %4562 = vmatprep.mubr.msk.f32.mxu0 %vm281_vm0, %v72_v47  ;;  %4754 = vmatprep.mubr.msk.f32.mxu1 %vm281_vm0, %v200_v48  ;;  %v231_v46 = vld [vmem:[%s8302_s0 + $0x698] sm:$0xff]  ;;  %v104_v47 = vld [vmem:[%s8302_s0 + $0x2a0] sm:$0xff] }
  0x74   :  { %v232_v48 = vld [vmem:[%s8302_s0 + $0x6a0] sm:$0xff] }
  0x76   :  { %4563 = vmatmul.mubr.msk.f32.gmra.mrb[52].mxu0 %vm281_vm0, %v73_v49  ;;  %4755 = vmatmul.mubr.msk.f32.gmra.mrb[52].mxu1 %vm281_vm0, %v201_v50  ;;  %v105_v49 = vld [vmem:[%s8302_s0 + $0x2a8] sm:$0xff] }
  0x77   :  { %4565 = vmatprep.mubr.msk.f32.mxu0 %vm281_vm0, %v74_v51  ;;  %4757 = vmatprep.mubr.msk.f32.mxu1 %vm281_vm0, %v202_v52  ;;  %v233_v50 = vld [vmem:[%s8302_s0 + $0x6a8] sm:$0xff]  ;;  %v106_v51 = vld [vmem:[%s8302_s0 + $0x2b0] sm:$0xff] }
  0x78   :  { %v234_v52 = vld [vmem:[%s8302_s0 + $0x6b0] sm:$0xff] }
  0x7a   :  { %4566 = vmatmul.mubr.msk.f32.gmra.mrb[54].mxu0 %vm281_vm0, %v75_v53  ;;  %4758 = vmatmul.mubr.msk.f32.gmra.mrb[54].mxu1 %vm281_vm0, %v203_v54  ;;  %v107_v53 = vld [vmem:[%s8302_s0 + $0x2b8] sm:$0xff] }
  0x7b   :  { %4568 = vmatprep.mubr.msk.f32.mxu0 %vm281_vm0, %v76_v55  ;;  %4760 = vmatprep.mubr.msk.f32.mxu1 %vm281_vm0, %v204_v56  ;;  %v235_v54 = vld [vmem:[%s8302_s0 + $0x6b8] sm:$0xff]  ;;  %v108_v55 = vld [vmem:[%s8302_s0 + $0x2c0] sm:$0xff] }
  0x7c   :  { %v236_v56 = vld [vmem:[%s8302_s0 + $0x6c0] sm:$0xff] }
  0x7e   :  { %4569 = vmatmul.mubr.msk.f32.gmra.mrb[56].mxu0 %vm281_vm0, %v77_v57  ;;  %4761 = vmatmul.mubr.msk.f32.gmra.mrb[56].mxu1 %vm281_vm0, %v205_v58  ;;  %v109_v57 = vld [vmem:[%s8302_s0 + $0x2c8] sm:$0xff] }
  0x7f   :  { %4571 = vmatprep.mubr.msk.f32.mxu0 %vm281_vm0, %v78_v59  ;;  %4763 = vmatprep.mubr.msk.f32.mxu1 %vm281_vm0, %v206_v60  ;;  %v237_v58 = vld [vmem:[%s8302_s0 + $0x6c8] sm:$0xff]  ;;  %v110_v59 = vld [vmem:[%s8302_s0 + $0x2d0] sm:$0xff] }
  0x80   :  { %v238_v60 = vld [vmem:[%s8302_s0 + $0x6d0] sm:$0xff] }
  0x82   :  { %4572 = vmatmul.mubr.msk.f32.gmra.mrb[58].mxu0 %vm281_vm0, %v79_v61  ;;  %4764 = vmatmul.mubr.msk.f32.gmra.mrb[58].mxu1 %vm281_vm0, %v207_v62  ;;  %v111_v61 = vld [vmem:[%s8302_s0 + $0x2d8] sm:$0xff] }
  0x83   :  { %4574 = vmatprep.mubr.msk.f32.mxu0 %vm281_vm0, %v80_v63  ;;  %4766 = vmatprep.mubr.msk.f32.mxu1 %vm281_vm0, %v208_v0  ;;  %v239_v62 = vld [vmem:[%s8302_s0 + $0x6d8] sm:$0xff]  ;;  %v112_v63 = vld [vmem:[%s8302_s0 + $0x2e0] sm:$0xff] }
  0x84   :  { %v240_v0 = vld [vmem:[%s8302_s0 + $0x6e0] sm:$0xff] }
  0x86   :  { %4575 = vmatmul.mubr.msk.f32.gmra.mrb[60].mxu0 %vm281_vm0, %v81_v1  ;;  %4767 = vmatmul.mubr.msk.f32.gmra.mrb[60].mxu1 %vm281_vm0, %v209_v2  ;;  %v113_v1 = vld [vmem:[%s8302_s0 + $0x2e8] sm:$0xff] }
  0x87   :  { %4577 = vmatprep.mubr.msk.f32.mxu0 %vm281_vm0, %v82_v3  ;;  %4769 = vmatprep.mubr.msk.f32.mxu1 %vm281_vm0, %v210_v4  ;;  %v241_v2 = vld [vmem:[%s8302_s0 + $0x6e8] sm:$0xff]  ;;  %v114_v3 = vld [vmem:[%s8302_s0 + $0x2f0] sm:$0xff] }
  0x88   :  { %v242_v4 = vld [vmem:[%s8302_s0 + $0x6f0] sm:$0xff] }
  0x8a   :  { %4578 = vmatmul.mubr.msk.f32.gmra.mrb[62].mxu0 %vm281_vm0, %v83_v5  ;;  %4770 = vmatmul.mubr.msk.f32.gmra.mrb[62].mxu1 %vm281_vm0, %v211_v6  ;;  %v115_v5 = vld [vmem:[%s8302_s0 + $0x2f8] sm:$0xff] }
  0x8b   :  { %4580 = vmatprep.mubr.msk.f32.mxu0 %vm281_vm0, %v84_v7  ;;  %4772 = vmatprep.mubr.msk.f32.mxu1 %vm281_vm0, %v212_v8  ;;  %v243_v6 = vld [vmem:[%s8302_s0 + $0x6f8] sm:$0xff]  ;;  %v116_v7 = vld [vmem:[%s8302_s0 + $0x300] sm:$0xff] }
  0x8c   :  { %v244_v8 = vld [vmem:[%s8302_s0 + $0x700] sm:$0xff] }
  0x8e   :  { %4581 = vmatmul.mubr.msk.f32.gmra.mrb[64].mxu0 %vm281_vm0, %v85_v9  ;;  %4773 = vmatmul.mubr.msk.f32.gmra.mrb[64].mxu1 %vm281_vm0, %v213_v10  ;;  %v117_v9 = vld [vmem:[%s8302_s0 + $0x308] sm:$0xff] }
  0x8f   :  { %4583 = vmatprep.mubr.msk.f32.mxu0 %vm281_vm0, %v86_v11  ;;  %4775 = vmatprep.mubr.msk.f32.mxu1 %vm281_vm0, %v214_v12  ;;  %v245_v10 = vld [vmem:[%s8302_s0 + $0x708] sm:$0xff]  ;;  %v118_v11 = vld [vmem:[%s8302_s0 + $0x310] sm:$0xff] }
  0x90   :  { %v246_v12 = vld [vmem:[%s8302_s0 + $0x710] sm:$0xff] }
  0x92   :  { %4584 = vmatmul.mubr.msk.f32.gmra.mrb[66].mxu0 %vm281_vm0, %v87_v13  ;;  %4776 = vmatmul.mubr.msk.f32.gmra.mrb[66].mxu1 %vm281_vm0, %v215_v14  ;;  %v119_v13 = vld [vmem:[%s8302_s0 + $0x318] sm:$0xff] }
  0x93   :  { %4586 = vmatprep.mubr.msk.f32.mxu0 %vm281_vm0, %v88_v15  ;;  %4778 = vmatprep.mubr.msk.f32.mxu1 %vm281_vm0, %v216_v16  ;;  %v247_v14 = vld [vmem:[%s8302_s0 + $0x718] sm:$0xff]  ;;  %v120_v15 = vld [vmem:[%s8302_s0 + $0x320] sm:$0xff] }
  0x94   :  { %v248_v16 = vld [vmem:[%s8302_s0 + $0x720] sm:$0xff] }
  0x96   :  { %4587 = vmatmul.mubr.msk.f32.gmra.mrb[68].mxu0 %vm281_vm0, %v89_v17  ;;  %4779 = vmatmul.mubr.msk.f32.gmra.mrb[68].mxu1 %vm281_vm0, %v217_v18  ;;  %v121_v17 = vld [vmem:[%s8302_s0 + $0x328] sm:$0xff] }
  0x97   :  { %4589 = vmatprep.mubr.msk.f32.mxu0 %vm281_vm0, %v90_v19  ;;  %4781 = vmatprep.mubr.msk.f32.mxu1 %vm281_vm0, %v218_v20  ;;  %v249_v18 = vld [vmem:[%s8302_s0 + $0x728] sm:$0xff]  ;;  %v122_v19 = vld [vmem:[%s8302_s0 + $0x330] sm:$0xff] }
  0x98   :  { %v250_v20 = vld [vmem:[%s8302_s0 + $0x730] sm:$0xff] }
  0x9a   :  { %4590 = vmatmul.mubr.msk.f32.gmra.mrb[70].mxu0 %vm281_vm0, %v91_v21  ;;  %4782 = vmatmul.mubr.msk.f32.gmra.mrb[70].mxu1 %vm281_vm0, %v219_v22  ;;  %v123_v21 = vld [vmem:[%s8302_s0 + $0x338] sm:$0xff] }
  0x9b   :  { %4592 = vmatprep.mubr.msk.f32.mxu0 %vm281_vm0, %v92_v23  ;;  %4784 = vmatprep.mubr.msk.f32.mxu1 %vm281_vm0, %v220_v24  ;;  %v251_v22 = vld [vmem:[%s8302_s0 + $0x738] sm:$0xff]  ;;  %v124_v23 = vld [vmem:[%s8302_s0 + $0x340] sm:$0xff] }
  0x9c   :  { %v252_v24 = vld [vmem:[%s8302_s0 + $0x740] sm:$0xff] }
  0x9e   :  { %4593 = vmatmul.mubr.msk.f32.gmra.mrb[72].mxu0 %vm281_vm0, %v93_v25  ;;  %4785 = vmatmul.mubr.msk.f32.gmra.mrb[72].mxu1 %vm281_vm0, %v221_v26  ;;  %v125_v25 = vld [vmem:[%s8302_s0 + $0x348] sm:$0xff] }
  0x9f   :  { %4595 = vmatprep.mubr.msk.f32.mxu0 %vm281_vm0, %v94_v27  ;;  %4787 = vmatprep.mubr.msk.f32.mxu1 %vm281_vm0, %v222_v28  ;;  %v253_v26 = vld [vmem:[%s8302_s0 + $0x748] sm:$0xff]  ;;  %v126_v27 = vld [vmem:[%s8302_s0 + $0x350] sm:$0xff] }
  0xa0   :  { %v254_v28 = vld [vmem:[%s8302_s0 + $0x750] sm:$0xff] }
  0xa2   :  { %4596 = vmatmul.mubr.msk.f32.gmra.mrb[74].mxu0 %vm281_vm0, %v95_v29  ;;  %4788 = vmatmul.mubr.msk.f32.gmra.mrb[74].mxu1 %vm281_vm0, %v223_v30  ;;  %v5790_v29 = vld [vmem:[%s8303_s2] ss:$0 sm:$0xff]  ;;  %v127_v30 = vld [vmem:[%s8302_s0 + $0x358] sm:$0xff] }
  0xa3   :  { %4598 = vmatprep.mubr.msk.f32.mxu0 %vm281_vm0, %v96_v31  ;;  %4790 = vmatprep.mubr.msk.f32.mxu1 %vm281_vm0, %v224_v32  ;;  %v255_v31 = vld [vmem:[%s8302_s0 + $0x758] sm:$0xff]  ;;  %v128_v32 = vld [vmem:[%s8302_s0 + $0x360] sm:$0xff] }
  0xa6   :  { %4599 = vmatmul.mubr.msk.f32.gmra.mrb[76].mxu0 %vm281_vm0, %v97_v33  ;;  %4791 = vmatmul.mubr.msk.f32.gmra.mrb[76].mxu1 %vm281_vm0, %v225_v34  ;;  %v256_v33 = vld [vmem:[%s8302_s0 + $0x760] sm:$0xff] }
  0xa7   :  { %4601 = vmatprep.mubr.msk.f32.mxu0 %vm281_vm0, %v98_v35  ;;  %4793 = vmatprep.mubr.msk.f32.mxu1 %vm281_vm0, %v226_v36  ;;  %v5809_v35 = vld [vmem:[%s8304_s3] ss:$0 sm:$0xff] }
  0xaa   :  { %4602 = vmatmul.mubr.msk.f32.gmra.mrb[78].mxu0 %vm281_vm0, %v99_v37  ;;  %4794 = vmatmul.mubr.msk.f32.gmra.mrb[78].mxu1 %vm281_vm0, %v227_v38 }
  0xab   :  { %4604 = vmatprep.mubr.msk.f32.mxu0 %vm281_vm0, %v100_v39  ;;  %4796 = vmatprep.mubr.msk.f32.mxu1 %vm281_vm0, %v228_v40 }
  0xae   :  { %4605 = vmatmul.mubr.msk.f32.gmra.mrb[80].mxu0 %vm281_vm0, %v101_v41  ;;  %4797 = vmatmul.mubr.msk.f32.gmra.mrb[80].mxu1 %vm281_vm0, %v229_v42  ;;  %v2926_v41 = vld [vmem:[%s8305_s4 + $0x8] sm:$0xff] }
  0xaf   :  { %4607 = vmatprep.mubr.msk.f32.mxu0 %vm281_vm0, %v102_v43  ;;  %4799 = vmatprep.mubr.msk.f32.mxu1 %vm281_vm0, %v230_v44  ;;  %v3054_v42 = vld [vmem:[%s8305_s4 + $0x408] sm:$0xff] }
  0xb2   :  { %4608 = vmatmul.mubr.msk.f32.gmra.mrb[82].mxu0 %vm281_vm0, %v103_v45  ;;  %4800 = vmatmul.mubr.msk.f32.gmra.mrb[82].mxu1 %vm281_vm0, %v231_v46  ;;  %v129_v45 = vld [vmem:[%s8302_s0 + $0x368] sm:$0xff] }
  0xb3   :  { %4610 = vmatprep.mubr.msk.f32.mxu0 %vm281_vm0, %v104_v47  ;;  %4802 = vmatprep.mubr.msk.f32.mxu1 %vm281_vm0, %v232_v48  ;;  %v2925_v48 = vld [vmem:[%s8305_s4] sm:$0xff] }
  0xb6   :  { %4611 = vmatmul.mubr.msk.f32.gmra.mrb[84].mxu0 %vm281_vm0, %v105_v49  ;;  %4803 = vmatmul.mubr.msk.f32.gmra.mrb[84].mxu1 %vm281_vm0, %v233_v50  ;;  %v3053_v49 = vld [vmem:[%s8305_s4 + $0x400] sm:$0xff]  ;;  %v257_v50 = vld [vmem:[%s8302_s0 + $0x768] sm:$0xff] }
  0xb7   :  { %4613 = vmatprep.mubr.msk.f32.mxu0 %vm281_vm0, %v106_v51  ;;  %4805 = vmatprep.mubr.msk.f32.mxu1 %vm281_vm0, %v234_v52 }
  0xba   :  { %4614 = vmatmul.mubr.msk.f32.gmra.mrb[86].mxu0 %vm281_vm0, %v107_v53  ;;  %4806 = vmatmul.mubr.msk.f32.gmra.mrb[86].mxu1 %vm281_vm0, %v235_v54 }
  0xbb   :  { %4616 = vmatprep.mubr.msk.f32.mxu0 %vm281_vm0, %v108_v55  ;;  %4808 = vmatprep.mubr.msk.f32.mxu1 %vm281_vm0, %v236_v56  ;;  %v130_v55 = vld [vmem:[%s8302_s0 + $0x370] sm:$0xff] }
  0xbc   :  { %v258_v56 = vld [vmem:[%s8302_s0 + $0x770] sm:$0xff] }
  0xbe   :  { %4617 = vmatmul.mubr.msk.f32.gmra.mrb[88].mxu0 %vm281_vm0, %v109_v57  ;;  %4809 = vmatmul.mubr.msk.f32.gmra.mrb[88].mxu1 %vm281_vm0, %v237_v58 }
  0xbf   :  { %4619 = vmatprep.mubr.msk.f32.mxu0 %vm281_vm0, %v110_v59  ;;  %4811 = vmatprep.mubr.msk.f32.mxu1 %vm281_vm0, %v238_v60 }
  0xc2   :  { %4620 = vmatmul.mubr.msk.f32.gmra.mrb[90].mxu0 %vm281_vm0, %v111_v61  ;;  %4812 = vmatmul.mubr.msk.f32.gmra.mrb[90].mxu1 %vm281_vm0, %v239_v62 }
  0xc3   :  { %4622 = vmatprep.mubr.msk.f32.mxu0 %vm281_vm0, %v112_v63  ;;  %4814 = vmatprep.mubr.msk.f32.mxu1 %vm281_vm0, %v240_v0 }
  0xc6   :  { %4623 = vmatmul.mubr.msk.f32.gmra.mrb[92].mxu0 %vm281_vm0, %v113_v1  ;;  %4815 = vmatmul.mubr.msk.f32.gmra.mrb[92].mxu1 %vm281_vm0, %v241_v2  ;;  %v2928_v1 = vld [vmem:[%s8305_s4 + $0x18] sm:$0xff] }
  0xc7   :  { %4625 = vmatprep.mubr.msk.f32.mxu0 %vm281_vm0, %v114_v3  ;;  %4817 = vmatprep.mubr.msk.f32.mxu1 %vm281_vm0, %v242_v4  ;;  %v3056_v2 = vld [vmem:[%s8305_s4 + $0x418] sm:$0xff] }
  0xca   :  { %4626 = vmatmul.mubr.msk.f32.gmra.mrb[94].mxu0 %vm281_vm0, %v115_v5  ;;  %4818 = vmatmul.mubr.msk.f32.gmra.mrb[94].mxu1 %vm281_vm0, %v243_v6  ;;  %v131_v5 = vld [vmem:[%s8302_s0 + $0x378] sm:$0xff] }
  0xcb   :  { %4628 = vmatprep.mubr.msk.f32.mxu0 %vm281_vm0, %v116_v7  ;;  %4820 = vmatprep.mubr.msk.f32.mxu1 %vm281_vm0, %v244_v8 }
  0xce   :  { %4629 = vmatmul.mubr.msk.f32.gmra.mrb[96].mxu0 %vm281_vm0, %v117_v9  ;;  %4821 = vmatmul.mubr.msk.f32.gmra.mrb[96].mxu1 %vm281_vm0, %v245_v10  ;;  %v2927_v10 = vld [vmem:[%s8305_s4 + $0x10] sm:$0xff] }
  0xcf   :  { %4631 = vmatprep.mubr.msk.f32.mxu0 %vm281_vm0, %v118_v11  ;;  %4823 = vmatprep.mubr.msk.f32.mxu1 %vm281_vm0, %v246_v12  ;;  %v3055_v11 = vld [vmem:[%s8305_s4 + $0x410] sm:$0xff]  ;;  %v259_v12 = vld [vmem:[%s8302_s0 + $0x778] sm:$0xff] }
  0xd2   :  { %4632 = vmatmul.mubr.msk.f32.gmra.mrb[98].mxu0 %vm281_vm0, %v119_v13  ;;  %4824 = vmatmul.mubr.msk.f32.gmra.mrb[98].mxu1 %vm281_vm0, %v247_v14 }
  0xd3   :  { %4634 = vmatprep.mubr.msk.f32.mxu0 %vm281_vm0, %v120_v15  ;;  %4826 = vmatprep.mubr.msk.f32.mxu1 %vm281_vm0, %v248_v16 }
  0xd6   :  { %4635 = vmatmul.mubr.msk.f32.gmra.mrb[100].mxu0 %vm281_vm0, %v121_v17  ;;  %4827 = vmatmul.mubr.msk.f32.gmra.mrb[100].mxu1 %vm281_vm0, %v249_v18 }
  0xd7   :  { %4637 = vmatprep.mubr.msk.f32.mxu0 %vm281_vm0, %v122_v19  ;;  %4829 = vmatprep.mubr.msk.f32.mxu1 %vm281_vm0, %v250_v20  ;;  %v132_v19 = vld [vmem:[%s8302_s0 + $0x380] sm:$0xff] }
  0xd8   :  { %v260_v20 = vld [vmem:[%s8302_s0 + $0x780] sm:$0xff] }
  0xda   :  { %4638 = vmatmul.mubr.msk.f32.gmra.mrb[102].mxu0 %vm281_vm0, %v123_v21  ;;  %4830 = vmatmul.mubr.msk.f32.gmra.mrb[102].mxu1 %vm281_vm0, %v251_v22 }
  0xdb   :  { %4640 = vmatprep.mubr.msk.f32.mxu0 %vm281_vm0, %v124_v23  ;;  %4832 = vmatprep.mubr.msk.f32.mxu1 %vm281_vm0, %v252_v24 }
  0xde   :  { %4641 = vmatmul.mubr.msk.f32.gmra.mrb[104].mxu0 %vm281_vm0, %v125_v25  ;;  %4833 = vmatmul.mubr.msk.f32.gmra.mrb[104].mxu1 %vm281_vm0, %v253_v26 }
  0xdf   :  { %4643 = vmatprep.mubr.msk.f32.mxu0 %vm281_vm0, %v126_v27  ;;  %4835 = vmatprep.mubr.msk.f32.mxu1 %vm281_vm0, %v254_v28 }
  0xe1   :  { %v4486_v34 = vpop.f32.mrb[0].mxu0  ;;  %v4678_v36 = vpop.f32.mrb[0].mxu1 }
  0xe2   :  { %v2407_v37 = vmul.f32 %v4486_v34, %v5790_v29  ;;  %v2535_v38 = vmul.f32 %v4678_v36, %v5790_v29  ;;  %v1120_v39 = vpop.f32.mrb[1].mxu0  ;;  %4644 = vmatmul.mubr.msk.f32.gmra.mrb[106].mxu0 %vm281_vm0, %v127_v30  ;;  %v1760_v40 = vpop.f32.mrb[1].mxu1  ;;  %4836 = vmatmul.mubr.msk.f32.gmra.mrb[106].mxu1 %vm281_vm0, %v255_v31  ;;  %v2930_v30 = vld [vmem:[%s8305_s4 + $0x28] sm:$0xff] }
  0xe3   :  { %v2406_v43 = vmul.f32 %v5790_v29, %v1120_v39  ;;  %v2534_v44 = vmul.f32 %v5790_v29, %v1760_v40  ;;  %4646 = vmatprep.mubr.msk.f32.mxu0 %vm281_vm0, %v128_v32  ;;  %4838 = vmatprep.mubr.msk.f32.mxu1 %vm281_vm0, %v256_v33  ;;  %v3058_v31 = vld [vmem:[%s8305_s4 + $0x428] sm:$0xff]  ;;  %v2929_v40 = vld [vmem:[%s8305_s4 + $0x20] sm:$0xff] }
  0xe4   :  { %v2670_v46 = vadd.f32 %v5809_v35, %v2407_v37  ;;  %v2798_v47 = vadd.f32 %v5809_v35, %v2535_v38  ;;  %v133_v34 = vld [vmem:[%s8302_s0 + $0x388] sm:$0xff] }
  0xe5   :  { %v2669_v51 = vadd.f32 %v5809_v35, %v2406_v43  ;;  %v2797_v52 = vadd.f32 %v5809_v35, %v2534_v44  ;;  %v4489_v53 = vpop.f32.mrb[2].mxu0  ;;  %v4681_v54 = vpop.f32.mrb[2].mxu1 }
  0xe6   :  { %v3182_v57 = vadd.f32 %v2926_v41, %v2670_v46  ;;  %v3310_v58 = vadd.f32 %v3054_v42, %v2798_v47  ;;  %v2409_v59 = vmul.f32 %v4489_v53, %v5790_v29  ;;  %v2537_v60 = vmul.f32 %v4681_v54, %v5790_v29  ;;  %v1130_v61 = vpop.f32.mrb[3].mxu0  ;;  %4647 = vmatmul.mubr.msk.f32.gmra.mrb[108].mxu0 %vm281_vm0, %v129_v45  ;;  %v1770_v62 = vpop.f32.mrb[3].mxu1  ;;  %v3057_v41 = vld [vmem:[%s8305_s4 + $0x420] sm:$0xff]  ;;  %v261_v42 = vld [vmem:[%s8302_s0 + $0x788] sm:$0xff] }
  0xe7   :  { %v3181_v63 = vadd.f32 %v2925_v48, %v2669_v51  ;;  %v3309_v0 = vadd.f32 %v3053_v49, %v2797_v52  ;;  %v2408_v3 = vmul.f32 %v5790_v29, %v1130_v61  ;;  %v2536_v4 = vmul.f32 %v5790_v29, %v1770_v62  ;;  %4839 = vmatmul.mubr.msk.f32.gmra.mrb[108].mxu1 %vm281_vm0, %v257_v50  ;;  %v134_v49 = vld [vmem:[%s8302_s0 + $0x390] sm:$0xff] }
  0xe8   :  { %v3438_v6 = vmax.f32 %v3182_v57, 0.0  ;;  %v3566_v7 = vmax.f32 %v3310_v58, 0.0  ;;  %v2672_v8 = vadd.f32 %v5809_v35, %v2409_v59  ;;  %v2800_v9 = vadd.f32 %v5809_v35, %v2537_v60  ;;  %4649 = vmatprep.mubr.msk.f32.mxu0 %vm281_vm0, %v130_v55  ;;  %4841 = vmatprep.mubr.msk.f32.mxu1 %vm281_vm0, %v258_v56  ;;  %v262_v50 = vld [vmem:[%s8302_s0 + $0x790] sm:$0xff]  ;;  %v2932_v59 = vld [vmem:[%s8305_s4 + $0x38] sm:$0xff] }
  0xe9   :  { %v3437_v13 = vmax.f32 %v3181_v63, 0.0  ;;  %v3565_v14 = vmax.f32 %v3309_v0, 0.0  ;;  %v2671_v15 = vadd.f32 %v5809_v35, %v2408_v3  ;;  %v2799_v16 = vadd.f32 %v5809_v35, %v2536_v4  ;;  %v4492_v17 = vpop.f32.mrb[4].mxu0  ;;  %v4684_v18 = vpop.f32.mrb[4].mxu1  ;;  %v3060_v60 = vld [vmem:[%s8305_s4 + $0x438] sm:$0xff]  ;;  %v2931_v4 = vld [vmem:[%s8305_s4 + $0x30] sm:$0xff] }
  0xea   :  { %3695 = vst.msk [vmem:[%s8306_s5 + $0x8] sm:$0xff] %vm3693_vm2, %v3438_v6  ;;  %3823 = vst.msk [vmem:[%s8306_s5 + $0x408] sm:$0xff] %vm3693_vm2, %v3566_v7  ;;  %v3184_v21 = vadd.f32 %v2928_v1, %v2672_v8  ;;  %v3312_v22 = vadd.f32 %v3056_v2, %v2800_v9  ;;  %v2411_v23 = vmul.f32 %v4492_v17, %v5790_v29  ;;  %v1140_v25 = vpop.f32.mrb[5].mxu0  ;;  %4650 = vmatmul.mubr.msk.f32.gmra.mrb[110].mxu0 %vm281_vm0, %v131_v5  ;;  %v1780_v26 = vpop.f32.mrb[5].mxu1  ;;  %v135_v63 = vld [vmem:[%s8302_s0 + $0x398] sm:$0xff]  ;;  %v3059_v5 = vld [vmem:[%s8305_s4 + $0x430] sm:$0xff] }
  0xeb   :  { %v2539_v24 = vmul.f32 %v4684_v18, %v5790_v29  ;;  %3694 = vst.msk [vmem:[%s8306_s5] sm:$0xff] %vm3693_vm2, %v3437_v13  ;;  %3822 = vst.msk [vmem:[%s8306_s5 + $0x400] sm:$0xff] %vm3693_vm2, %v3565_v14  ;;  %v3183_v27 = vadd.f32 %v2927_v10, %v2671_v15  ;;  %v3311_v28 = vadd.f32 %v3055_v11, %v2799_v16  ;;  %4842 = vmatmul.mubr.msk.f32.gmra.mrb[110].mxu1 %vm281_vm0, %v259_v12  ;;  %v263_v6 = vld [vmem:[%s8302_s0 + $0x798] sm:$0xff]  ;;  %v136_v13 = vld [vmem:[%s8302_s0 + $0x3a0] sm:$0xff] }
  0xec   :  { %v2410_v32 = vmul.f32 %v5790_v29, %v1140_v25  ;;  %v2538_v33 = vmul.f32 %v5790_v29, %v1780_v26  ;;  %v3440_v36 = vmax.f32 %v3184_v21, 0.0  ;;  %v3568_v37 = vmax.f32 %v3312_v22, 0.0  ;;  %4652 = vmatprep.mubr.msk.f32.mxu0 %vm281_vm0, %v132_v19  ;;  %4844 = vmatprep.mubr.msk.f32.mxu1 %vm281_vm0, %v260_v20  ;;  %v264_v14 = vld [vmem:[%s8302_s0 + $0x7a0] sm:$0xff] }
  0xed   :  { %v2674_v38 = vadd.f32 %v5809_v35, %v2411_v23  ;;  %v2802_v39 = vadd.f32 %v5809_v35, %v2539_v24  ;;  %v3439_v43 = vmax.f32 %v3183_v27, 0.0  ;;  %v3567_v44 = vmax.f32 %v3311_v28, 0.0  ;;  %v4495_v47 = vpop.f32.mrb[6].mxu0  ;;  %v4687_v48 = vpop.f32.mrb[6].mxu1  ;;  %v2934_v23 = vld [vmem:[%s8305_s4 + $0x48] sm:$0xff] }
  0xee   :  { %v2673_v45 = vadd.f32 %v5809_v35, %v2410_v32  ;;  %v2801_v46 = vadd.f32 %v5809_v35, %v2538_v33  ;;  %3697 = vst.msk [vmem:[%s8306_s5 + $0x18] sm:$0xff] %vm3693_vm2, %v3440_v36  ;;  %3825 = vst.msk [vmem:[%s8306_s5 + $0x418] sm:$0xff] %vm3693_vm2, %v3568_v37  ;;  %v2413_v53 = vmul.f32 %v4495_v47, %v5790_v29  ;;  %v1150_v55 = vpop.f32.mrb[7].mxu0  ;;  %4653 = vmatmul.mubr.msk.f32.gmra.mrb[112].mxu0 %vm281_vm0, %v133_v34  ;;  %v1790_v56 = vpop.f32.mrb[7].mxu1  ;;  %v3062_v24 = vld [vmem:[%s8305_s4 + $0x448] sm:$0xff]  ;;  %v2933_v33 = vld [vmem:[%s8305_s4 + $0x40] sm:$0xff] }
  0xef   :  { %v3186_v51 = vadd.f32 %v2930_v30, %v2674_v38  ;;  %v3314_v52 = vadd.f32 %v3058_v31, %v2802_v39  ;;  %v2541_v54 = vmul.f32 %v4687_v48, %v5790_v29  ;;  %3696 = vst.msk [vmem:[%s8306_s5 + $0x10] sm:$0xff] %vm3693_vm2, %v3439_v43  ;;  %3824 = vst.msk [vmem:[%s8306_s5 + $0x410] sm:$0xff] %vm3693_vm2, %v3567_v44  ;;  %4845 = vmatmul.mubr.msk.f32.gmra.mrb[112].mxu1 %vm281_vm0, %v261_v42  ;;  %v137_v27 = vld [vmem:[%s8302_s0 + $0x3a8] sm:$0xff]  ;;  %v3061_v34 = vld [vmem:[%s8305_s4 + $0x440] sm:$0xff] }
  0xf0   :  { %v3185_v57 = vadd.f32 %v2929_v40, %v2673_v45  ;;  %v3313_v58 = vadd.f32 %v3057_v41, %v2801_v46  ;;  %v2412_v61 = vmul.f32 %v5790_v29, %v1150_v55  ;;  %v2540_v62 = vmul.f32 %v5790_v29, %v1790_v56  ;;  %4655 = vmatprep.mubr.msk.f32.mxu0 %vm281_vm0, %v134_v49  ;;  %v265_v36 = vld [vmem:[%s8302_s0 + $0x7a8] sm:$0xff]  ;;  %v138_v43 = vld [vmem:[%s8302_s0 + $0x3b0] sm:$0xff] }
  0xf1   :  { %v3442_v0 = vmax.f32 %v3186_v51, 0.0  ;;  %v3570_v1 = vmax.f32 %v3314_v52, 0.0  ;;  %v2676_v2 = vadd.f32 %v5809_v35, %v2413_v53  ;;  %v2804_v3 = vadd.f32 %v5809_v35, %v2541_v54  ;;  %4847 = vmatprep.mubr.msk.f32.mxu1 %vm281_vm0, %v262_v50  ;;  %v4498_v11 = vpop.f32.mrb[8].mxu0  ;;  %v4690_v12 = vpop.f32.mrb[8].mxu1  ;;  %v266_v44 = vld [vmem:[%s8302_s0 + $0x7b0] sm:$0xff]  ;;  %v2936_v53 = vld [vmem:[%s8305_s4 + $0x58] sm:$0xff] }
  0xf2   :  { %v3441_v7 = vmax.f32 %v3185_v57, 0.0  ;;  %v3569_v8 = vmax.f32 %v3313_v58, 0.0  ;;  %v2675_v9 = vadd.f32 %v5809_v35, %v2412_v61  ;;  %v2803_v10 = vadd.f32 %v5809_v35, %v2540_v62  ;;  %v1160_v19 = vpop.f32.mrb[9].mxu0  ;;  %4656 = vmatmul.mubr.msk.f32.gmra.mrb[114].mxu0 %vm281_vm0, %v135_v63  ;;  %v1800_v20 = vpop.f32.mrb[9].mxu1  ;;  %v3064_v54 = vld [vmem:[%s8305_s4 + $0x458] sm:$0xff]  ;;  %v2935_v62 = vld [vmem:[%s8305_s4 + $0x50] sm:$0xff] }
  0xf3   :  { %3699 = vst.msk [vmem:[%s8306_s5 + $0x28] sm:$0xff] %vm3693_vm2, %v3442_v0  ;;  %3827 = vst.msk [vmem:[%s8306_s5 + $0x428] sm:$0xff] %vm3693_vm2, %v3570_v1  ;;  %v3188_v15 = vadd.f32 %v2932_v59, %v2676_v2  ;;  %v3316_v16 = vadd.f32 %v3060_v60, %v2804_v3  ;;  %v2415_v17 = vmul.f32 %v4498_v11, %v5790_v29  ;;  %4848 = vmatmul.mubr.msk.f32.gmra.mrb[114].mxu1 %vm281_vm0, %v263_v6  ;;  %v139_v57 = vld [vmem:[%s8302_s0 + $0x3b8] sm:$0xff]  ;;  %v3063_v63 = vld [vmem:[%s8305_s4 + $0x450] sm:$0xff] }
  0xf4   :  { %v2543_v18 = vmul.f32 %v4690_v12, %v5790_v29  ;;  %3698 = vst.msk [vmem:[%s8306_s5 + $0x20] sm:$0xff] %vm3693_vm2, %v3441_v7  ;;  %3826 = vst.msk [vmem:[%s8306_s5 + $0x420] sm:$0xff] %vm3693_vm2, %v3569_v8  ;;  %v3187_v21 = vadd.f32 %v2931_v4, %v2675_v9  ;;  %v3315_v22 = vadd.f32 %v3059_v5, %v2803_v10  ;;  %4658 = vmatprep.mubr.msk.f32.mxu0 %vm281_vm0, %v136_v13  ;;  %v267_v0 = vld [vmem:[%s8302_s0 + $0x7b8] sm:$0xff]  ;;  %v140_v7 = vld [vmem:[%s8302_s0 + $0x3c0] sm:$0xff] }
  0xf5   :  { %v2414_v25 = vmul.f32 %v5790_v29, %v1160_v19  ;;  %v2542_v26 = vmul.f32 %v5790_v29, %v1800_v20  ;;  %v3444_v28 = vmax.f32 %v3188_v15, 0.0  ;;  %v3572_v30 = vmax.f32 %v3316_v16, 0.0  ;;  %4850 = vmatprep.mubr.msk.f32.mxu1 %vm281_vm0, %v264_v14  ;;  %v4501_v41 = vpop.f32.mrb[10].mxu0  ;;  %v4693_v42 = vpop.f32.mrb[10].mxu1  ;;  %v268_v8 = vld [vmem:[%s8302_s0 + $0x7c0] sm:$0xff] }
  0xf6   :  { %v2678_v31 = vadd.f32 %v5809_v35, %v2415_v17  ;;  %v2806_v32 = vadd.f32 %v5809_v35, %v2543_v18  ;;  %v3443_v37 = vmax.f32 %v3187_v21, 0.0  ;;  %v3571_v38 = vmax.f32 %v3315_v22, 0.0  ;;  %v1170_v49 = vpop.f32.mrb[11].mxu0  ;;  %4659 = vmatmul.mubr.msk.f32.gmra.mrb[116].mxu0 %vm281_vm0, %v137_v27  ;;  %v1810_v50 = vpop.f32.mrb[11].mxu1  ;;  %v2938_v17 = vld [vmem:[%s8305_s4 + $0x68] sm:$0xff]  ;;  %v3065_v27 = vld [vmem:[%s8305_s4 + $0x460] sm:$0xff] }
  0xf7   :  { %v2677_v39 = vadd.f32 %v5809_v35, %v2414_v25  ;;  %v2805_v40 = vadd.f32 %v5809_v35, %v2542_v26  ;;  %3701 = vst.msk [vmem:[%s8306_s5 + $0x38] sm:$0xff] %vm3693_vm2, %v3444_v28  ;;  %3829 = vst.msk [vmem:[%s8306_s5 + $0x438] sm:$0xff] %vm3693_vm2, %v3572_v30  ;;  %v2417_v47 = vmul.f32 %v4501_v41, %v5790_v29  ;;  %4851 = vmatmul.mubr.msk.f32.gmra.mrb[116].mxu1 %vm281_vm0, %v265_v36  ;;  %v3066_v18 = vld [vmem:[%s8305_s4 + $0x468] sm:$0xff]  ;;  %v2937_v26 = vld [vmem:[%s8305_s4 + $0x60] sm:$0xff] }
  0xf8   :  { %v3190_v45 = vadd.f32 %v2934_v23, %v2678_v31  ;;  %v3318_v46 = vadd.f32 %v3062_v24, %v2806_v32  ;;  %v2545_v48 = vmul.f32 %v4693_v42, %v5790_v29  ;;  %3700 = vst.msk [vmem:[%s8306_s5 + $0x30] sm:$0xff] %vm3693_vm2, %v3443_v37  ;;  %3828 = vst.msk [vmem:[%s8306_s5 + $0x430] sm:$0xff] %vm3693_vm2, %v3571_v38  ;;  %4661 = vmatprep.mubr.msk.f32.mxu0 %vm281_vm0, %v138_v43  ;;  %v141_v21 = vld [vmem:[%s8302_s0 + $0x3c8] sm:$0xff]  ;;  %v142_v37 = vld [vmem:[%s8302_s0 + $0x3d0] sm:$0xff] }
  0xf9   :  { %v3189_v51 = vadd.f32 %v2933_v33, %v2677_v39  ;;  %v3317_v52 = vadd.f32 %v3061_v34, %v2805_v40  ;;  %v2416_v55 = vmul.f32 %v5790_v29, %v1170_v49  ;;  %v2544_v56 = vmul.f32 %v5790_v29, %v1810_v50  ;;  %4853 = vmatprep.mubr.msk.f32.mxu1 %vm281_vm0, %v266_v44  ;;  %v4504_v5 = vpop.f32.mrb[12].mxu0  ;;  %v4696_v6 = vpop.f32.mrb[12].mxu1  ;;  %v269_v28 = vld [vmem:[%s8302_s0 + $0x7c8] sm:$0xff]  ;;  %v270_v38 = vld [vmem:[%s8302_s0 + $0x7d0] sm:$0xff] }
  0xfa   :  { %v3446_v58 = vmax.f32 %v3190_v45, 0.0  ;;  %v3574_v59 = vmax.f32 %v3318_v46, 0.0  ;;  %v2680_v60 = vadd.f32 %v5809_v35, %v2417_v47  ;;  %v2808_v61 = vadd.f32 %v5809_v35, %v2545_v48  ;;  %v1180_v13 = vpop.f32.mrb[13].mxu0  ;;  %4662 = vmatmul.mubr.msk.f32.gmra.mrb[118].mxu0 %vm281_vm0, %v139_v57  ;;  %v1820_v14 = vpop.f32.mrb[13].mxu1  ;;  %v2940_v47 = vld [vmem:[%s8305_s4 + $0x78] sm:$0xff]  ;;  %v3067_v57 = vld [vmem:[%s8305_s4 + $0x470] sm:$0xff] }
  0xfb   :  { %v3445_v1 = vmax.f32 %v3189_v51, 0.0  ;;  %v3573_v2 = vmax.f32 %v3317_v52, 0.0  ;;  %v2679_v3 = vadd.f32 %v5809_v35, %v2416_v55  ;;  %v2807_v4 = vadd.f32 %v5809_v35, %v2544_v56  ;;  %4854 = vmatmul.mubr.msk.f32.gmra.mrb[118].mxu1 %vm281_vm0, %v267_v0  ;;  %4664 = vmatprep.mubr.msk.f32.mxu0 %vm281_vm0, %v140_v7  ;;  %v3068_v48 = vld [vmem:[%s8305_s4 + $0x478] sm:$0xff]  ;;  %v2939_v56 = vld [vmem:[%s8305_s4 + $0x70] sm:$0xff] }
  0xfc   :  { %3703 = vst.msk [vmem:[%s8306_s5 + $0x48] sm:$0xff] %vm3693_vm2, %v3446_v58  ;;  %3831 = vst.msk [vmem:[%s8306_s5 + $0x448] sm:$0xff] %vm3693_vm2, %v3574_v59  ;;  %v3192_v9 = vadd.f32 %v2936_v53, %v2680_v60  ;;  %v3320_v10 = vadd.f32 %v3064_v54, %v2808_v61  ;;  %v2419_v11 = vmul.f32 %v4504_v5, %v5790_v29  ;;  %4856 = vmatprep.mubr.msk.f32.mxu1 %vm281_vm0, %v268_v8  ;;  %v143_v51 = vld [vmem:[%s8302_s0 + $0x3d8] sm:$0xff] }
  0xfd   :  { %v2547_v12 = vmul.f32 %v4696_v6, %v5790_v29  ;;  %3702 = vst.msk [vmem:[%s8306_s5 + $0x40] sm:$0xff] %vm3693_vm2, %v3445_v1  ;;  %3830 = vst.msk [vmem:[%s8306_s5 + $0x440] sm:$0xff] %vm3693_vm2, %v3573_v2  ;;  %v3191_v15 = vadd.f32 %v2935_v62, %v2679_v3  ;;  %v3319_v16 = vadd.f32 %v3063_v63, %v2807_v4  ;;  %v4507_v34 = vpop.f32.mrb[14].mxu0  ;;  %v4699_v36 = vpop.f32.mrb[14].mxu1  ;;  %v271_v58 = vld [vmem:[%s8302_s0 + $0x7d8] sm:$0xff]  ;;  %v144_v1 = vld [vmem:[%s8302_s0 + $0x3e0] sm:$0xff] }
  0xfe   :  { %v2418_v19 = vmul.f32 %v5790_v29, %v1180_v13  ;;  %v2546_v20 = vmul.f32 %v5790_v29, %v1820_v14  ;;  %v3448_v22 = vmax.f32 %v3192_v9, 0.0  ;;  %v3576_v23 = vmax.f32 %v3320_v10, 0.0  ;;  %v1190_v43 = vpop.f32.mrb[15].mxu0  ;;  %4665 = vmatmul.mubr.msk.f32.gmra.mrb[120].mxu0 %vm281_vm0, %v141_v21  ;;  %v1830_v44 = vpop.f32.mrb[15].mxu1  ;;  %v272_v2 = vld [vmem:[%s8302_s0 + $0x7e0] sm:$0xff] }
  0xff   :  { %v2682_v24 = vadd.f32 %v5809_v35, %v2419_v11  ;;  %v2810_v25 = vadd.f32 %v5809_v35, %v2547_v12  ;;  %v3447_v30 = vmax.f32 %v3191_v15, 0.0  ;;  %v3575_v31 = vmax.f32 %v3319_v16, 0.0  ;;  %4857 = vmatmul.mubr.msk.f32.gmra.mrb[120].mxu1 %vm281_vm0, %v269_v28  ;;  %4667 = vmatprep.mubr.msk.f32.mxu0 %vm281_vm0, %v142_v37  ;;  %v2942_v11 = vld [vmem:[%s8305_s4 + $0x88] sm:$0xff]  ;;  %v3069_v21 = vld [vmem:[%s8305_s4 + $0x480] sm:$0xff] }
 0x100   :  { %v2681_v32 = vadd.f32 %v5809_v35, %v2418_v19  ;;  %v2809_v33 = vadd.f32 %v5809_v35, %v2546_v20  ;;  %3705 = vst.msk [vmem:[%s8306_s5 + $0x58] sm:$0xff] %vm3693_vm2, %v3448_v22  ;;  %3833 = vst.msk [vmem:[%s8306_s5 + $0x458] sm:$0xff] %vm3693_vm2, %v3576_v23  ;;  %v2421_v41 = vmul.f32 %v4507_v34, %v5790_v29  ;;  %4859 = vmatprep.mubr.msk.f32.mxu1 %vm281_vm0, %v270_v38  ;;  %v3070_v12 = vld [vmem:[%s8305_s4 + $0x488] sm:$0xff]  ;;  %v2941_v20 = vld [vmem:[%s8305_s4 + $0x80] sm:$0xff] }
 0x101   :  { %v3194_v39 = vadd.f32 %v2938_v17, %v2682_v24  ;;  %v3322_v40 = vadd.f32 %v3066_v18, %v2810_v25  ;;  %v2549_v42 = vmul.f32 %v4699_v36, %v5790_v29  ;;  %3704 = vst.msk [vmem:[%s8306_s5 + $0x50] sm:$0xff] %vm3693_vm2, %v3447_v30  ;;  %3832 = vst.msk [vmem:[%s8306_s5 + $0x450] sm:$0xff] %vm3693_vm2, %v3575_v31  ;;  %v4510_v63 = vpop.f32.mrb[16].mxu0  ;;  %v4702_v0 = vpop.f32.mrb[16].mxu1  ;;  %v145_v15 = vld [vmem:[%s8302_s0 + $0x3e8] sm:$0xff]  ;;  %v146_v30 = vld [vmem:[%s8302_s0 + $0x3f0] sm:$0xff] }
 0x102   :  { %v3193_v45 = vadd.f32 %v2937_v26, %v2681_v32  ;;  %v3321_v46 = vadd.f32 %v3065_v27, %v2809_v33  ;;  %v2420_v49 = vmul.f32 %v5790_v29, %v1190_v43  ;;  %v2548_v50 = vmul.f32 %v5790_v29, %v1830_v44  ;;  %v1200_v7 = vpop.f32.mrb[17].mxu0  ;;  %4668 = vmatmul.mubr.msk.f32.gmra.mrb[122].mxu0 %vm281_vm0, %v143_v51  ;;  %v1840_v8 = vpop.f32.mrb[17].mxu1  ;;  %v273_v22 = vld [vmem:[%s8302_s0 + $0x7e8] sm:$0xff]  ;;  %v274_v31 = vld [vmem:[%s8302_s0 + $0x7f0] sm:$0xff] }
 0x103   :  { %v3450_v52 = vmax.f32 %v3194_v39, 0.0  ;;  %v3578_v53 = vmax.f32 %v3322_v40, 0.0  ;;  %v2684_v54 = vadd.f32 %v5809_v35, %v2421_v41  ;;  %v2812_v55 = vadd.f32 %v5809_v35, %v2549_v42  ;;  %4860 = vmatmul.mubr.msk.f32.gmra.mrb[122].mxu1 %vm281_vm0, %v271_v58  ;;  %4670 = vmatprep.mubr.msk.f32.mxu0 %vm281_vm0, %v144_v1  ;;  %v2944_v41 = vld [vmem:[%s8305_s4 + $0x98] sm:$0xff]  ;;  %v3071_v51 = vld [vmem:[%s8305_s4 + $0x490] sm:$0xff] }
 0x104   :  { %v3449_v59 = vmax.f32 %v3193_v45, 0.0  ;;  %v3577_v60 = vmax.f32 %v3321_v46, 0.0  ;;  %v2683_v61 = vadd.f32 %v5809_v35, %v2420_v49  ;;  %v2811_v62 = vadd.f32 %v5809_v35, %v2548_v50  ;;  %4862 = vmatprep.mubr.msk.f32.mxu1 %vm281_vm0, %v272_v2  ;;  %v3072_v42 = vld [vmem:[%s8305_s4 + $0x498] sm:$0xff]  ;;  %v2943_v50 = vld [vmem:[%s8305_s4 + $0x90] sm:$0xff] }
 0x105   :  { %3707 = vst.msk [vmem:[%s8306_s5 + $0x68] sm:$0xff] %vm3693_vm2, %v3450_v52  ;;  %3835 = vst.msk [vmem:[%s8306_s5 + $0x468] sm:$0xff] %vm3693_vm2, %v3578_v53  ;;  %v3196_v3 = vadd.f32 %v2940_v47, %v2684_v54  ;;  %v3324_v4 = vadd.f32 %v3068_v48, %v2812_v55  ;;  %v2423_v5 = vmul.f32 %v4510_v63, %v5790_v29  ;;  %v4513_v27 = vpop.f32.mrb[18].mxu0  ;;  %v4705_v28 = vpop.f32.mrb[18].mxu1  ;;  %v147_v45 = vld [vmem:[%s8302_s0 + $0x3f8] sm:$0xff] }
 0x106   :  { %v2551_v6 = vmul.f32 %v4702_v0, %v5790_v29  ;;  %3706 = vst.msk [vmem:[%s8306_s5 + $0x60] sm:$0xff] %vm3693_vm2, %v3449_v59  ;;  %3834 = vst.msk [vmem:[%s8306_s5 + $0x460] sm:$0xff] %vm3693_vm2, %v3577_v60  ;;  %v3195_v9 = vadd.f32 %v2939_v56, %v2683_v61  ;;  %v3323_v10 = vadd.f32 %v3067_v57, %v2811_v62  ;;  %v1210_v37 = vpop.f32.mrb[19].mxu0  ;;  %4671 = vmatmul.mubr.msk.f32.gmra.mrb[124].mxu0 %vm281_vm0, %v145_v15  ;;  %v1850_v38 = vpop.f32.mrb[19].mxu1  ;;  %v275_v52 = vld [vmem:[%s8302_s0 + $0x7f8] sm:$0xff] }
 0x107   :  { %v2422_v13 = vmul.f32 %v5790_v29, %v1200_v7  ;;  %v2550_v14 = vmul.f32 %v5790_v29, %v1840_v8  ;;  %v3452_v16 = vmax.f32 %v3196_v3, 0.0  ;;  %v3580_v17 = vmax.f32 %v3324_v4, 0.0  ;;  %4863 = vmatmul.mubr.msk.f32.gmra.mrb[124].mxu1 %vm281_vm0, %v273_v22  ;;  %4673 = vmatprep.mubr.msk.f32.mxu0 %vm281_vm0, %v146_v30  ;;  %v2946_v3 = vld [vmem:[%s8305_s4 + $0xa8] sm:$0xff] }
 0x108   :  { %v2686_v18 = vadd.f32 %v5809_v35, %v2423_v5  ;;  %v2814_v19 = vadd.f32 %v5809_v35, %v2551_v6  ;;  %v3451_v23 = vmax.f32 %v3195_v9, 0.0  ;;  %v3579_v24 = vmax.f32 %v3323_v10, 0.0  ;;  %4865 = vmatprep.mubr.msk.f32.mxu1 %vm281_vm0, %v274_v31  ;;  %v3074_v4 = vld [vmem:[%s8305_s4 + $0x4a8] sm:$0xff] }
 0x109   :  { %v2685_v25 = vadd.f32 %v5809_v35, %v2422_v13  ;;  %v2813_v26 = vadd.f32 %v5809_v35, %v2550_v14  ;;  %3709 = vst.msk [vmem:[%s8306_s5 + $0x78] sm:$0xff] %vm3693_vm2, %v3452_v16  ;;  %3837 = vst.msk [vmem:[%s8306_s5 + $0x478] sm:$0xff] %vm3693_vm2, %v3580_v17  ;;  %v2425_v34 = vmul.f32 %v4513_v27, %v5790_v29  ;;  %v4516_v57 = vpop.f32.mrb[20].mxu0  ;;  %v4708_v58 = vpop.f32.mrb[20].mxu1  ;;  %v2948_v27 = vld [vmem:[%s8305_s4 + $0xb8] sm:$0xff] }
 0x10a   :  { %v3198_v32 = vadd.f32 %v2942_v11, %v2686_v18  ;;  %v3326_v33 = vadd.f32 %v3070_v12, %v2814_v19  ;;  %v2553_v36 = vmul.f32 %v4705_v28, %v5790_v29  ;;  %3708 = vst.msk [vmem:[%s8306_s5 + $0x70] sm:$0xff] %vm3693_vm2, %v3451_v23  ;;  %3836 = vst.msk [vmem:[%s8306_s5 + $0x470] sm:$0xff] %vm3693_vm2, %v3579_v24  ;;  %v1220_v63 = vpop.f32.mrb[21].mxu0  ;;  %4674 = vmatmul.mubr.msk.f32.gmra.mrb[126].mxu0 %vm281_vm0, %v147_v45  ;;  %v1860_v0 = vpop.f32.mrb[21].mxu1  ;;  %v2945_v11 = vld [vmem:[%s8305_s4 + $0xa0] sm:$0xff]  ;;  %v3076_v28 = vld [vmem:[%s8305_s4 + $0x4b8] sm:$0xff] }
 0x10b   :  { %v3197_v39 = vadd.f32 %v2941_v20, %v2685_v25  ;;  %v3325_v40 = vadd.f32 %v3069_v21, %v2813_v26  ;;  %v2424_v43 = vmul.f32 %v5790_v29, %v1210_v37  ;;  %v2552_v44 = vmul.f32 %v5790_v29, %v1850_v38  ;;  %4866 = vmatmul.mubr.msk.f32.gmra.mrb[126].mxu1 %vm281_vm0, %v275_v52  ;;  %v3073_v12 = vld [vmem:[%s8305_s4 + $0x4a0] sm:$0xff]  ;;  %v2947_v37 = vld [vmem:[%s8305_s4 + $0xb0] sm:$0xff] }
 0x10c   :  { %v3454_v46 = vmax.f32 %v3198_v32, 0.0  ;;  %v3582_v47 = vmax.f32 %v3326_v33, 0.0  ;;  %v2688_v48 = vadd.f32 %v5809_v35, %v2425_v34  ;;  %v2816_v49 = vadd.f32 %v5809_v35, %v2553_v36  ;;  %v3075_v38 = vld [vmem:[%s8305_s4 + $0x4b0] sm:$0xff] }
 0x10d   :  { %v3453_v53 = vmax.f32 %v3197_v39, 0.0  ;;  %v3581_v54 = vmax.f32 %v3325_v40, 0.0  ;;  %v2687_v55 = vadd.f32 %v5809_v35, %v2424_v43  ;;  %v2815_v56 = vadd.f32 %v5809_v35, %v2552_v44  ;;  %v4519_v17 = vpop.f32.mrb[22].mxu0  ;;  %v4711_v18 = vpop.f32.mrb[22].mxu1 }
 0x10e   :  { %3711 = vst.msk [vmem:[%s8306_s5 + $0x88] sm:$0xff] %vm3693_vm2, %v3454_v46  ;;  %3839 = vst.msk [vmem:[%s8306_s5 + $0x488] sm:$0xff] %vm3693_vm2, %v3582_v47  ;;  %v3200_v59 = vadd.f32 %v2944_v41, %v2688_v48  ;;  %v3328_v60 = vadd.f32 %v3072_v42, %v2816_v49  ;;  %v2427_v61 = vmul.f32 %v4516_v57, %v5790_v29  ;;  %v1230_v23 = vpop.f32.mrb[23].mxu0  ;;  %v1870_v24 = vpop.f32.mrb[23].mxu1 }
 0x10f   :  { %v2555_v62 = vmul.f32 %v4708_v58, %v5790_v29  ;;  %3710 = vst.msk [vmem:[%s8306_s5 + $0x80] sm:$0xff] %vm3693_vm2, %v3453_v53  ;;  %3838 = vst.msk [vmem:[%s8306_s5 + $0x480] sm:$0xff] %vm3693_vm2, %v3581_v54  ;;  %v3199_v1 = vadd.f32 %v2943_v50, %v2687_v55  ;;  %v3327_v2 = vadd.f32 %v3071_v51, %v2815_v56  ;;  %v2950_v53 = vld [vmem:[%s8305_s4 + $0xc8] sm:$0xff] }
 0x110   :  { %v2426_v5 = vmul.f32 %v5790_v29, %v1220_v63  ;;  %v2554_v6 = vmul.f32 %v5790_v29, %v1860_v0  ;;  %v3456_v7 = vmax.f32 %v3200_v59, 0.0  ;;  %v3584_v8 = vmax.f32 %v3328_v60, 0.0  ;;  %v3078_v54 = vld [vmem:[%s8305_s4 + $0x4c8] sm:$0xff] }
 0x111   :  { %v2690_v9 = vadd.f32 %v5809_v35, %v2427_v61  ;;  %v2818_v10 = vadd.f32 %v5809_v35, %v2555_v62  ;;  %v3455_v13 = vmax.f32 %v3199_v1, 0.0  ;;  %v3583_v14 = vmax.f32 %v3327_v2, 0.0  ;;  %v4522_v43 = vpop.f32.mrb[24].mxu0  ;;  %v4714_v44 = vpop.f32.mrb[24].mxu1  ;;  %v2949_v61 = vld [vmem:[%s8305_s4 + $0xc0] sm:$0xff] }
 0x112   :  { %v2689_v15 = vadd.f32 %v5809_v35, %v2426_v5  ;;  %v2817_v16 = vadd.f32 %v5809_v35, %v2554_v6  ;;  %3713 = vst.msk [vmem:[%s8306_s5 + $0x98] sm:$0xff] %vm3693_vm2, %v3456_v7  ;;  %3841 = vst.msk [vmem:[%s8306_s5 + $0x498] sm:$0xff] %vm3693_vm2, %v3584_v8  ;;  %v2429_v21 = vmul.f32 %v4519_v17, %v5790_v29  ;;  %v1240_v49 = vpop.f32.mrb[25].mxu0  ;;  %v1880_v50 = vpop.f32.mrb[25].mxu1  ;;  %v3077_v62 = vld [vmem:[%s8305_s4 + $0x4c0] sm:$0xff] }
 0x113   :  { %v3202_v19 = vadd.f32 %v2946_v3, %v2690_v9  ;;  %v3330_v20 = vadd.f32 %v3074_v4, %v2818_v10  ;;  %v2557_v22 = vmul.f32 %v4711_v18, %v5790_v29  ;;  %3712 = vst.msk [vmem:[%s8306_s5 + $0x90] sm:$0xff] %vm3693_vm2, %v3455_v13  ;;  %3840 = vst.msk [vmem:[%s8306_s5 + $0x490] sm:$0xff] %vm3693_vm2, %v3583_v14  ;;  %v2952_v13 = vld [vmem:[%s8305_s4 + $0xd8] sm:$0xff] }
 0x114   :  { %v3201_v25 = vadd.f32 %v2945_v11, %v2689_v15  ;;  %v3329_v26 = vadd.f32 %v3073_v12, %v2817_v16  ;;  %v2428_v30 = vmul.f32 %v5790_v29, %v1230_v23  ;;  %v2556_v31 = vmul.f32 %v5790_v29, %v1870_v24  ;;  %v3080_v14 = vld [vmem:[%s8305_s4 + $0x4d8] sm:$0xff] }
 0x115   :  { %v3458_v32 = vmax.f32 %v3202_v19, 0.0  ;;  %v3586_v33 = vmax.f32 %v3330_v20, 0.0  ;;  %v2692_v34 = vadd.f32 %v5809_v35, %v2429_v21  ;;  %v2820_v36 = vadd.f32 %v5809_v35, %v2557_v22  ;;  %v4525_v3 = vpop.f32.mrb[26].mxu0  ;;  %v4717_v4 = vpop.f32.mrb[26].mxu1  ;;  %v2951_v21 = vld [vmem:[%s8305_s4 + $0xd0] sm:$0xff] }
 0x116   :  { %v3457_v39 = vmax.f32 %v3201_v25, 0.0  ;;  %v3585_v40 = vmax.f32 %v3329_v26, 0.0  ;;  %v2691_v41 = vadd.f32 %v5809_v35, %v2428_v30  ;;  %v2819_v42 = vadd.f32 %v5809_v35, %v2556_v31  ;;  %v1250_v9 = vpop.f32.mrb[27].mxu0  ;;  %v1890_v10 = vpop.f32.mrb[27].mxu1  ;;  %v3079_v22 = vld [vmem:[%s8305_s4 + $0x4d0] sm:$0xff] }
 0x117   :  { %3715 = vst.msk [vmem:[%s8306_s5 + $0xa8] sm:$0xff] %vm3693_vm2, %v3458_v32  ;;  %3843 = vst.msk [vmem:[%s8306_s5 + $0x4a8] sm:$0xff] %vm3693_vm2, %v3586_v33  ;;  %v3204_v45 = vadd.f32 %v2948_v27, %v2692_v34  ;;  %v3332_v46 = vadd.f32 %v3076_v28, %v2820_v36  ;;  %v2431_v47 = vmul.f32 %v4522_v43, %v5790_v29 }
 0x118   :  { %v2559_v48 = vmul.f32 %v4714_v44, %v5790_v29  ;;  %3714 = vst.msk [vmem:[%s8306_s5 + $0xa0] sm:$0xff] %vm3693_vm2, %v3457_v39  ;;  %3842 = vst.msk [vmem:[%s8306_s5 + $0x4a0] sm:$0xff] %vm3693_vm2, %v3585_v40  ;;  %v3203_v51 = vadd.f32 %v2947_v37, %v2691_v41  ;;  %v3331_v52 = vadd.f32 %v3075_v38, %v2819_v42  ;;  %v2954_v39 = vld [vmem:[%s8305_s4 + $0xe8] sm:$0xff] }
 0x119   :  { %v2430_v55 = vmul.f32 %v5790_v29, %v1240_v49  ;;  %v2558_v56 = vmul.f32 %v5790_v29, %v1880_v50  ;;  %v3460_v57 = vmax.f32 %v3204_v45, 0.0  ;;  %v3588_v58 = vmax.f32 %v3332_v46, 0.0  ;;  %v4528_v27 = vpop.f32.mrb[28].mxu0  ;;  %v4720_v28 = vpop.f32.mrb[28].mxu1  ;;  %v3082_v40 = vld [vmem:[%s8305_s4 + $0x4e8] sm:$0xff] }
 0x11a   :  { %v2694_v59 = vadd.f32 %v5809_v35, %v2431_v47  ;;  %v2822_v60 = vadd.f32 %v5809_v35, %v2559_v48  ;;  %v3459_v63 = vmax.f32 %v3203_v51, 0.0  ;;  %v3587_v0 = vmax.f32 %v3331_v52, 0.0  ;;  %v1260_v34 = vpop.f32.mrb[29].mxu0  ;;  %v1900_v36 = vpop.f32.mrb[29].mxu1  ;;  %v2953_v47 = vld [vmem:[%s8305_s4 + $0xe0] sm:$0xff] }
 0x11b   :  { %v2693_v1 = vadd.f32 %v5809_v35, %v2430_v55  ;;  %v2821_v2 = vadd.f32 %v5809_v35, %v2558_v56  ;;  %3717 = vst.msk [vmem:[%s8306_s5 + $0xb8] sm:$0xff] %vm3693_vm2, %v3460_v57  ;;  %3845 = vst.msk [vmem:[%s8306_s5 + $0x4b8] sm:$0xff] %vm3693_vm2, %v3588_v58  ;;  %v2433_v7 = vmul.f32 %v4525_v3, %v5790_v29  ;;  %v3081_v48 = vld [vmem:[%s8305_s4 + $0x4e0] sm:$0xff] }
 0x11c   :  { %v3206_v5 = vadd.f32 %v2950_v53, %v2694_v59  ;;  %v3334_v6 = vadd.f32 %v3078_v54, %v2822_v60  ;;  %v2561_v8 = vmul.f32 %v4717_v4, %v5790_v29  ;;  %3716 = vst.msk [vmem:[%s8306_s5 + $0xb0] sm:$0xff] %vm3693_vm2, %v3459_v63  ;;  %3844 = vst.msk [vmem:[%s8306_s5 + $0x4b0] sm:$0xff] %vm3693_vm2, %v3587_v0  ;;  %v2956_v63 = vld [vmem:[%s8305_s4 + $0xf8] sm:$0xff] }
 0x11d   :  { %v3205_v11 = vadd.f32 %v2949_v61, %v2693_v1  ;;  %v3333_v12 = vadd.f32 %v3077_v62, %v2821_v2  ;;  %v2432_v15 = vmul.f32 %v5790_v29, %v1250_v9  ;;  %v2560_v16 = vmul.f32 %v5790_v29, %v1890_v10  ;;  %v4531_v53 = vpop.f32.mrb[30].mxu0  ;;  %v4723_v54 = vpop.f32.mrb[30].mxu1  ;;  %v3084_v0 = vld [vmem:[%s8305_s4 + $0x4f8] sm:$0xff]  ;;  %v6503_v2 = vld [vmem:[%s8303_s2] ss:$0 sm:$0xff] }
 0x11e   :  { %v3462_v17 = vmax.f32 %v3206_v5, 0.0  ;;  %v3590_v18 = vmax.f32 %v3334_v6, 0.0  ;;  %v2696_v19 = vadd.f32 %v5809_v35, %v2433_v7  ;;  %v2824_v20 = vadd.f32 %v5809_v35, %v2561_v8  ;;  %v1270_v59 = vpop.f32.mrb[31].mxu0  ;;  %v1910_v60 = vpop.f32.mrb[31].mxu1  ;;  %v2955_v8 = vld [vmem:[%s8305_s4 + $0xf0] sm:$0xff] }
 0x11f   :  { %v3461_v23 = vmax.f32 %v3205_v11, 0.0  ;;  %v3589_v24 = vmax.f32 %v3333_v12, 0.0  ;;  %v2695_v25 = vadd.f32 %v5809_v35, %v2432_v15  ;;  %v2823_v26 = vadd.f32 %v5809_v35, %v2560_v16  ;;  %v6517_v11 = vld [vmem:[%s8304_s3] ss:$0 sm:$0xff] }
 0x120   :  { %3719 = vst.msk [vmem:[%s8306_s5 + $0xc8] sm:$0xff] %vm3693_vm2, %v3462_v17  ;;  %3847 = vst.msk [vmem:[%s8306_s5 + $0x4c8] sm:$0xff] %vm3693_vm2, %v3590_v18  ;;  %v3208_v30 = vadd.f32 %v2952_v13, %v2696_v19  ;;  %v3336_v31 = vadd.f32 %v3080_v14, %v2824_v20  ;;  %v2435_v32 = vmul.f32 %v4528_v27, %v5790_v29 }
 0x121   :  { %v2563_v33 = vmul.f32 %v4720_v28, %v5790_v29  ;;  %3718 = vst.msk [vmem:[%s8306_s5 + $0xc0] sm:$0xff] %vm3693_vm2, %v3461_v23  ;;  %3846 = vst.msk [vmem:[%s8306_s5 + $0x4c0] sm:$0xff] %vm3693_vm2, %v3589_v24  ;;  %v3207_v37 = vadd.f32 %v2951_v21, %v2695_v25  ;;  %v3335_v38 = vadd.f32 %v3079_v22, %v2823_v26  ;;  %v4726_v14 = vpop.f32.mrb[32].mxu1  ;;  %v2958_v23 = vld [vmem:[%s8305_s4 + $0x108] sm:$0xff] }
 0x122   :  { %v2434_v41 = vmul.f32 %v5790_v29, %v1260_v34  ;;  %v2562_v42 = vmul.f32 %v5790_v29, %v1900_v36  ;;  %v3464_v43 = vmax.f32 %v3208_v30, 0.0  ;;  %v3592_v44 = vmax.f32 %v3336_v31, 0.0  ;;  %v1920_v20 = vpop.f32.mrb[33].mxu1  ;;  %v3086_v24 = vld [vmem:[%s8305_s4 + $0x508] sm:$0xff] }
 0x123   :  { %v2698_v45 = vadd.f32 %v5809_v35, %v2435_v32  ;;  %v2826_v46 = vadd.f32 %v5809_v35, %v2563_v33  ;;  %v3463_v49 = vmax.f32 %v3207_v37, 0.0  ;;  %v3591_v50 = vmax.f32 %v3335_v38, 0.0  ;;  %v2957_v32 = vld [vmem:[%s8305_s4 + $0x100] sm:$0xff] }
 0x124   :  { %v2697_v51 = vadd.f32 %v5809_v35, %v2434_v41  ;;  %v2825_v52 = vadd.f32 %v5809_v35, %v2562_v42  ;;  %3721 = vst.msk [vmem:[%s8306_s5 + $0xd8] sm:$0xff] %vm3693_vm2, %v3464_v43  ;;  %3849 = vst.msk [vmem:[%s8306_s5 + $0x4d8] sm:$0xff] %vm3693_vm2, %v3592_v44  ;;  %v2437_v57 = vmul.f32 %v4531_v53, %v5790_v29  ;;  %v3085_v33 = vld [vmem:[%s8305_s4 + $0x500] sm:$0xff] }
 0x125   :  { %v3210_v55 = vadd.f32 %v2954_v39, %v2698_v45  ;;  %v3338_v56 = vadd.f32 %v3082_v40, %v2826_v46  ;;  %v2565_v58 = vmul.f32 %v4723_v54, %v5790_v29  ;;  %3720 = vst.msk [vmem:[%s8306_s5 + $0xd0] sm:$0xff] %vm3693_vm2, %v3463_v49  ;;  %3848 = vst.msk [vmem:[%s8306_s5 + $0x4d0] sm:$0xff] %vm3693_vm2, %v3591_v50  ;;  %v4729_v40 = vpop.f32.mrb[34].mxu1  ;;  %v2960_v49 = vld [vmem:[%s8305_s4 + $0x118] sm:$0xff] }
 0x126   :  { %v3209_v61 = vadd.f32 %v2953_v47, %v2697_v51  ;;  %v3337_v62 = vadd.f32 %v3081_v48, %v2825_v52  ;;  %v2436_v1 = vmul.f32 %v5790_v29, %v1270_v59  ;;  %v2564_v3 = vmul.f32 %v6503_v2, %v1910_v60  ;;  %v3083_v29 = vld [vmem:[%s8305_s4 + $0x4f0] sm:$0xff]  ;;  %v1930_v46 = vpop.f32.mrb[35].mxu1  ;;  %v3088_v50 = vld [vmem:[%s8305_s4 + $0x518] sm:$0xff] }
 0x127   :  { %v3466_v4 = vmax.f32 %v3210_v55, 0.0  ;;  %v3594_v5 = vmax.f32 %v3338_v56, 0.0  ;;  %v2700_v6 = vadd.f32 %v5809_v35, %v2437_v57  ;;  %v2828_v7 = vadd.f32 %v5809_v35, %v2565_v58  ;;  %v4534_v35 = vpop.f32.mrb[32].mxu0  ;;  %v2959_v57 = vld [vmem:[%s8305_s4 + $0x110] sm:$0xff] }
 0x128   :  { %v3465_v9 = vmax.f32 %v3209_v61, 0.0  ;;  %v3593_v10 = vmax.f32 %v3337_v62, 0.0  ;;  %v2699_v12 = vadd.f32 %v6517_v11, %v2436_v1  ;;  %v2827_v13 = vadd.f32 %v6517_v11, %v2564_v3  ;;  %v1280_v19 = vpop.f32.mrb[33].mxu0  ;;  %v3087_v58 = vld [vmem:[%s8305_s4 + $0x510] sm:$0xff] }
 0x129   :  { %3723 = vst.msk [vmem:[%s8306_s5 + $0xe8] sm:$0xff] %vm3693_vm2, %v3466_v4  ;;  %3851 = vst.msk [vmem:[%s8306_s5 + $0x4e8] sm:$0xff] %vm3693_vm2, %v3594_v5  ;;  %v3212_v15 = vadd.f32 %v2956_v63, %v2700_v6  ;;  %v3340_v16 = vadd.f32 %v3084_v0, %v2828_v7  ;;  %v2439_v17 = vmul.f32 %v6503_v2, %v4534_v35  ;;  %v4537_v39 = vpop.f32.mrb[34].mxu0  ;;  %v4732_v0 = vpop.f32.mrb[36].mxu1 }
 0x12a   :  { %v2567_v18 = vmul.f32 %v6503_v2, %v4726_v14  ;;  %3722 = vst.msk [vmem:[%s8306_s5 + $0xe0] sm:$0xff] %vm3693_vm2, %v3465_v9  ;;  %3850 = vst.msk [vmem:[%s8306_s5 + $0x4e0] sm:$0xff] %vm3693_vm2, %v3593_v10  ;;  %v3211_v21 = vadd.f32 %v2955_v8, %v2699_v12  ;;  %v3339_v22 = vadd.f32 %v3083_v29, %v2827_v13  ;;  %v1290_v45 = vpop.f32.mrb[35].mxu0  ;;  %v1940_v7 = vpop.f32.mrb[37].mxu1  ;;  %v2962_v9 = vld [vmem:[%s8305_s4 + $0x128] sm:$0xff] }
 0x12b   :  { %v2438_v25 = vmul.f32 %v6503_v2, %v1280_v19  ;;  %v2566_v26 = vmul.f32 %v6503_v2, %v1920_v20  ;;  %v3468_v27 = vmax.f32 %v3212_v15, 0.0  ;;  %v3596_v28 = vmax.f32 %v3340_v16, 0.0  ;;  %v4540_v63 = vpop.f32.mrb[36].mxu0  ;;  %v3090_v10 = vld [vmem:[%s8305_s4 + $0x528] sm:$0xff] }
 0x12c   :  { %v2702_v30 = vadd.f32 %v6517_v11, %v2439_v17  ;;  %v2830_v31 = vadd.f32 %v6517_v11, %v2567_v18  ;;  %v3467_v34 = vmax.f32 %v3211_v21, 0.0  ;;  %v3595_v36 = vmax.f32 %v3339_v22, 0.0  ;;  %v1300_v6 = vpop.f32.mrb[37].mxu0  ;;  %v2961_v17 = vld [vmem:[%s8305_s4 + $0x120] sm:$0xff] }
 0x12d   :  { %v2701_v37 = vadd.f32 %v6517_v11, %v2438_v25  ;;  %v2829_v38 = vadd.f32 %v6517_v11, %v2566_v26  ;;  %3725 = vst.msk [vmem:[%s8306_s5 + $0xf8] sm:$0xff] %vm3693_vm2, %v3468_v27  ;;  %3853 = vst.msk [vmem:[%s8306_s5 + $0x4f8] sm:$0xff] %vm3693_vm2, %v3596_v28  ;;  %v2441_v43 = vmul.f32 %v6503_v2, %v4537_v39  ;;  %v3089_v18 = vld [vmem:[%s8305_s4 + $0x520] sm:$0xff] }
 0x12e   :  { %v3214_v41 = vadd.f32 %v2958_v23, %v2702_v30  ;;  %v3342_v42 = vadd.f32 %v3086_v24, %v2830_v31  ;;  %v2569_v44 = vmul.f32 %v6503_v2, %v4729_v40  ;;  %3724 = vst.msk [vmem:[%s8306_s5 + $0xf0] sm:$0xff] %vm3693_vm2, %v3467_v34  ;;  %3852 = vst.msk [vmem:[%s8306_s5 + $0x4f0] sm:$0xff] %vm3693_vm2, %v3595_v36  ;;  %v4543_v23 = vpop.f32.mrb[38].mxu0  ;;  %v4735_v24 = vpop.f32.mrb[38].mxu1  ;;  %v2964_v34 = vld [vmem:[%s8305_s4 + $0x138] sm:$0xff] }
 0x12f   :  { %v3213_v47 = vadd.f32 %v2957_v32, %v2701_v37  ;;  %v3341_v48 = vadd.f32 %v3085_v33, %v2829_v38  ;;  %v2440_v51 = vmul.f32 %v6503_v2, %v1290_v45  ;;  %v2568_v52 = vmul.f32 %v6503_v2, %v1930_v46  ;;  %v1310_v30 = vpop.f32.mrb[39].mxu0  ;;  %v1950_v31 = vpop.f32.mrb[39].mxu1  ;;  %v3092_v36 = vld [vmem:[%s8305_s4 + $0x538] sm:$0xff] }
 0x130   :  { %v3470_v53 = vmax.f32 %v3214_v41, 0.0  ;;  %v3598_v54 = vmax.f32 %v3342_v42, 0.0  ;;  %v2704_v55 = vadd.f32 %v6517_v11, %v2441_v43  ;;  %v2832_v56 = vadd.f32 %v6517_v11, %v2569_v44  ;;  %v2963_v43 = vld [vmem:[%s8305_s4 + $0x130] sm:$0xff] }
 0x131   :  { %v3469_v59 = vmax.f32 %v3213_v47, 0.0  ;;  %v3597_v60 = vmax.f32 %v3341_v48, 0.0  ;;  %v2703_v61 = vadd.f32 %v6517_v11, %v2440_v51  ;;  %v2831_v62 = vadd.f32 %v6517_v11, %v2568_v52  ;;  %v3091_v44 = vld [vmem:[%s8305_s4 + $0x530] sm:$0xff] }
 0x132   :  { %3727 = vst.msk [vmem:[%s8306_s5 + $0x108] sm:$0xff] %vm3693_vm2, %v3470_v53  ;;  %3855 = vst.msk [vmem:[%s8306_s5 + $0x508] sm:$0xff] %vm3693_vm2, %v3598_v54  ;;  %v3216_v1 = vadd.f32 %v2960_v49, %v2704_v55  ;;  %v3344_v3 = vadd.f32 %v3088_v50, %v2832_v56  ;;  %v2443_v4 = vmul.f32 %v6503_v2, %v4540_v63  ;;  %v4546_v49 = vpop.f32.mrb[40].mxu0  ;;  %v4738_v50 = vpop.f32.mrb[40].mxu1 }
 0x133   :  { %v2571_v5 = vmul.f32 %v6503_v2, %v4732_v0  ;;  %3726 = vst.msk [vmem:[%s8306_s5 + $0x100] sm:$0xff] %vm3693_vm2, %v3469_v59  ;;  %3854 = vst.msk [vmem:[%s8306_s5 + $0x500] sm:$0xff] %vm3693_vm2, %v3597_v60  ;;  %v3215_v8 = vadd.f32 %v2959_v57, %v2703_v61  ;;  %v3343_v29 = vadd.f32 %v3087_v58, %v2831_v62  ;;  %v1320_v55 = vpop.f32.mrb[41].mxu0  ;;  %v1960_v56 = vpop.f32.mrb[41].mxu1  ;;  %v2966_v59 = vld [vmem:[%s8305_s4 + $0x148] sm:$0xff] }
 0x134   :  { %v2442_v12 = vmul.f32 %v6503_v2, %v1300_v6  ;;  %v2570_v13 = vmul.f32 %v6503_v2, %v1940_v7  ;;  %v3472_v35 = vmax.f32 %v3216_v1, 0.0  ;;  %v3600_v14 = vmax.f32 %v3344_v3, 0.0  ;;  %v3094_v60 = vld [vmem:[%s8305_s4 + $0x548] sm:$0xff] }
 0x135   :  { %v2706_v15 = vadd.f32 %v6517_v11, %v2443_v4  ;;  %v2834_v16 = vadd.f32 %v6517_v11, %v2571_v5  ;;  %v3471_v19 = vmax.f32 %v3215_v8, 0.0  ;;  %v3599_v20 = vmax.f32 %v3343_v29, 0.0  ;;  %v2965_v4 = vld [vmem:[%s8305_s4 + $0x140] sm:$0xff] }
 0x136   :  { %v2705_v21 = vadd.f32 %v6517_v11, %v2442_v12  ;;  %v2833_v22 = vadd.f32 %v6517_v11, %v2570_v13  ;;  %3729 = vst.msk [vmem:[%s8306_s5 + $0x118] sm:$0xff] %vm3693_vm2, %v3472_v35  ;;  %3857 = vst.msk [vmem:[%s8306_s5 + $0x518] sm:$0xff] %vm3693_vm2, %v3600_v14  ;;  %v2445_v27 = vmul.f32 %v6503_v2, %v4543_v23  ;;  %v3093_v5 = vld [vmem:[%s8305_s4 + $0x540] sm:$0xff] }
 0x137   :  { %v3218_v25 = vadd.f32 %v2962_v9, %v2706_v15  ;;  %v3346_v26 = vadd.f32 %v3090_v10, %v2834_v16  ;;  %v2573_v28 = vmul.f32 %v6503_v2, %v4735_v24  ;;  %3728 = vst.msk [vmem:[%s8306_s5 + $0x110] sm:$0xff] %vm3693_vm2, %v3471_v19  ;;  %3856 = vst.msk [vmem:[%s8306_s5 + $0x510] sm:$0xff] %vm3693_vm2, %v3599_v20  ;;  %v4549_v9 = vpop.f32.mrb[42].mxu0  ;;  %v4741_v10 = vpop.f32.mrb[42].mxu1  ;;  %v2968_v19 = vld [vmem:[%s8305_s4 + $0x158] sm:$0xff] }
 0x138   :  { %v3217_v32 = vadd.f32 %v2961_v17, %v2705_v21  ;;  %v3345_v33 = vadd.f32 %v3089_v18, %v2833_v22  ;;  %v2444_v37 = vmul.f32 %v6503_v2, %v1310_v30  ;;  %v2572_v38 = vmul.f32 %v6503_v2, %v1950_v31  ;;  %v1330_v15 = vpop.f32.mrb[43].mxu0  ;;  %v1970_v16 = vpop.f32.mrb[43].mxu1  ;;  %v3096_v20 = vld [vmem:[%s8305_s4 + $0x558] sm:$0xff] }
 0x139   :  { %v3474_v39 = vmax.f32 %v3218_v25, 0.0  ;;  %v3602_v40 = vmax.f32 %v3346_v26, 0.0  ;;  %v2708_v41 = vadd.f32 %v6517_v11, %v2445_v27  ;;  %v2836_v42 = vadd.f32 %v6517_v11, %v2573_v28  ;;  %v2967_v27 = vld [vmem:[%s8305_s4 + $0x150] sm:$0xff] }
 0x13a   :  { %v3473_v45 = vmax.f32 %v3217_v32, 0.0  ;;  %v3601_v46 = vmax.f32 %v3345_v33, 0.0  ;;  %v2707_v47 = vadd.f32 %v6517_v11, %v2444_v37  ;;  %v2835_v48 = vadd.f32 %v6517_v11, %v2572_v38  ;;  %v3095_v28 = vld [vmem:[%s8305_s4 + $0x550] sm:$0xff] }
 0x13b   :  { %3731 = vst.msk [vmem:[%s8306_s5 + $0x128] sm:$0xff] %vm3693_vm2, %v3474_v39  ;;  %3859 = vst.msk [vmem:[%s8306_s5 + $0x528] sm:$0xff] %vm3693_vm2, %v3602_v40  ;;  %v3220_v51 = vadd.f32 %v2964_v34, %v2708_v41  ;;  %v3348_v52 = vadd.f32 %v3092_v36, %v2836_v42  ;;  %v2447_v53 = vmul.f32 %v6503_v2, %v4546_v49  ;;  %v4552_v34 = vpop.f32.mrb[44].mxu0  ;;  %v4744_v36 = vpop.f32.mrb[44].mxu1 }
 0x13c   :  { %v2575_v54 = vmul.f32 %v6503_v2, %v4738_v50  ;;  %3730 = vst.msk [vmem:[%s8306_s5 + $0x120] sm:$0xff] %vm3693_vm2, %v3473_v45  ;;  %3858 = vst.msk [vmem:[%s8306_s5 + $0x520] sm:$0xff] %vm3693_vm2, %v3601_v46  ;;  %v3219_v57 = vadd.f32 %v2963_v43, %v2707_v47  ;;  %v3347_v58 = vadd.f32 %v3091_v44, %v2835_v48  ;;  %v1340_v41 = vpop.f32.mrb[45].mxu0  ;;  %v1980_v42 = vpop.f32.mrb[45].mxu1  ;;  %v2970_v45 = vld [vmem:[%s8305_s4 + $0x168] sm:$0xff] }
 0x13d   :  { %v2446_v61 = vmul.f32 %v6503_v2, %v1320_v55  ;;  %v2574_v62 = vmul.f32 %v6503_v2, %v1960_v56  ;;  %v3476_v63 = vmax.f32 %v3220_v51, 0.0  ;;  %v3604_v0 = vmax.f32 %v3348_v52, 0.0  ;;  %v3098_v46 = vld [vmem:[%s8305_s4 + $0x568] sm:$0xff] }
 0x13e   :  { %v2710_v1 = vadd.f32 %v6517_v11, %v2447_v53  ;;  %v2838_v3 = vadd.f32 %v6517_v11, %v2575_v54  ;;  %v3475_v6 = vmax.f32 %v3219_v57, 0.0  ;;  %v3603_v7 = vmax.f32 %v3347_v58, 0.0  ;;  %v2969_v53 = vld [vmem:[%s8305_s4 + $0x160] sm:$0xff] }
 0x13f   :  { %v2709_v8 = vadd.f32 %v6517_v11, %v2446_v61  ;;  %v2837_v29 = vadd.f32 %v6517_v11, %v2574_v62  ;;  %3733 = vst.msk [vmem:[%s8306_s5 + $0x138] sm:$0xff] %vm3693_vm2, %v3476_v63  ;;  %3861 = vst.msk [vmem:[%s8306_s5 + $0x538] sm:$0xff] %vm3693_vm2, %v3604_v0  ;;  %v2449_v35 = vmul.f32 %v6503_v2, %v4549_v9  ;;  %v3097_v54 = vld [vmem:[%s8305_s4 + $0x560] sm:$0xff] }
 0x140   :  { %v3222_v12 = vadd.f32 %v2966_v59, %v2710_v1  ;;  %v3350_v13 = vadd.f32 %v3094_v60, %v2838_v3  ;;  %v2577_v14 = vmul.f32 %v6503_v2, %v4741_v10  ;;  %3732 = vst.msk [vmem:[%s8306_s5 + $0x130] sm:$0xff] %vm3693_vm2, %v3475_v6  ;;  %3860 = vst.msk [vmem:[%s8306_s5 + $0x530] sm:$0xff] %vm3693_vm2, %v3603_v7  ;;  %v4555_v59 = vpop.f32.mrb[46].mxu0  ;;  %v4747_v60 = vpop.f32.mrb[46].mxu1  ;;  %v2972_v6 = vld [vmem:[%s8305_s4 + $0x178] sm:$0xff] }
 0x141   :  { %v3221_v17 = vadd.f32 %v2965_v4, %v2709_v8  ;;  %v3349_v18 = vadd.f32 %v3093_v5, %v2837_v29  ;;  %v2448_v21 = vmul.f32 %v6503_v2, %v1330_v15  ;;  %v2576_v22 = vmul.f32 %v6503_v2, %v1970_v16  ;;  %v1350_v1 = vpop.f32.mrb[47].mxu0  ;;  %v1990_v3 = vpop.f32.mrb[47].mxu1  ;;  %v3100_v7 = vld [vmem:[%s8305_s4 + $0x578] sm:$0xff] }
 0x142   :  { %v3478_v23 = vmax.f32 %v3222_v12, 0.0  ;;  %v3606_v24 = vmax.f32 %v3350_v13, 0.0  ;;  %v2712_v25 = vadd.f32 %v6517_v11, %v2449_v35  ;;  %v2840_v26 = vadd.f32 %v6517_v11, %v2577_v14  ;;  %v2971_v35 = vld [vmem:[%s8305_s4 + $0x170] sm:$0xff] }
 0x143   :  { %v3477_v30 = vmax.f32 %v3221_v17, 0.0  ;;  %v3605_v31 = vmax.f32 %v3349_v18, 0.0  ;;  %v2711_v32 = vadd.f32 %v6517_v11, %v2448_v21  ;;  %v2839_v33 = vadd.f32 %v6517_v11, %v2576_v22  ;;  %v3099_v14 = vld [vmem:[%s8305_s4 + $0x570] sm:$0xff] }
 0x144   :  { %3735 = vst.msk [vmem:[%s8306_s5 + $0x148] sm:$0xff] %vm3693_vm2, %v3478_v23  ;;  %3863 = vst.msk [vmem:[%s8306_s5 + $0x548] sm:$0xff] %vm3693_vm2, %v3606_v24  ;;  %v3224_v37 = vadd.f32 %v2968_v19, %v2712_v25  ;;  %v3352_v38 = vadd.f32 %v3096_v20, %v2840_v26  ;;  %v2451_v39 = vmul.f32 %v6503_v2, %v4552_v34  ;;  %v4558_v19 = vpop.f32.mrb[48].mxu0  ;;  %v4750_v20 = vpop.f32.mrb[48].mxu1 }
 0x145   :  { %v2579_v40 = vmul.f32 %v6503_v2, %v4744_v36  ;;  %3734 = vst.msk [vmem:[%s8306_s5 + $0x140] sm:$0xff] %vm3693_vm2, %v3477_v30  ;;  %3862 = vst.msk [vmem:[%s8306_s5 + $0x540] sm:$0xff] %vm3693_vm2, %v3605_v31  ;;  %v3223_v43 = vadd.f32 %v2967_v27, %v2711_v32  ;;  %v3351_v44 = vadd.f32 %v3095_v28, %v2839_v33  ;;  %v1360_v25 = vpop.f32.mrb[49].mxu0  ;;  %v2000_v26 = vpop.f32.mrb[49].mxu1  ;;  %v2974_v30 = vld [vmem:[%s8305_s4 + $0x188] sm:$0xff] }
 0x146   :  { %v2450_v47 = vmul.f32 %v6503_v2, %v1340_v41  ;;  %v2578_v48 = vmul.f32 %v6503_v2, %v1980_v42  ;;  %v3480_v49 = vmax.f32 %v3224_v37, 0.0  ;;  %v3608_v50 = vmax.f32 %v3352_v38, 0.0  ;;  %v3102_v31 = vld [vmem:[%s8305_s4 + $0x588] sm:$0xff] }
 0x147   :  { %v2714_v51 = vadd.f32 %v6517_v11, %v2451_v39  ;;  %v2842_v52 = vadd.f32 %v6517_v11, %v2579_v40  ;;  %v3479_v55 = vmax.f32 %v3223_v43, 0.0  ;;  %v3607_v56 = vmax.f32 %v3351_v44, 0.0  ;;  %v2973_v39 = vld [vmem:[%s8305_s4 + $0x180] sm:$0xff] }
 0x148   :  { %v2713_v57 = vadd.f32 %v6517_v11, %v2450_v47  ;;  %v2841_v58 = vadd.f32 %v6517_v11, %v2578_v48  ;;  %3737 = vst.msk [vmem:[%s8306_s5 + $0x158] sm:$0xff] %vm3693_vm2, %v3480_v49  ;;  %3865 = vst.msk [vmem:[%s8306_s5 + $0x558] sm:$0xff] %vm3693_vm2, %v3608_v50  ;;  %v2453_v63 = vmul.f32 %v6503_v2, %v4555_v59  ;;  %v3101_v40 = vld [vmem:[%s8305_s4 + $0x580] sm:$0xff] }
 0x149   :  { %v3226_v61 = vadd.f32 %v2970_v45, %v2714_v51  ;;  %v3354_v62 = vadd.f32 %v3098_v46, %v2842_v52  ;;  %v2581_v0 = vmul.f32 %v6503_v2, %v4747_v60  ;;  %3736 = vst.msk [vmem:[%s8306_s5 + $0x150] sm:$0xff] %vm3693_vm2, %v3479_v55  ;;  %3864 = vst.msk [vmem:[%s8306_s5 + $0x550] sm:$0xff] %vm3693_vm2, %v3607_v56  ;;  %v4561_v45 = vpop.f32.mrb[50].mxu0  ;;  %v4753_v46 = vpop.f32.mrb[50].mxu1  ;;  %v2976_v55 = vld [vmem:[%s8305_s4 + $0x198] sm:$0xff] }
 0x14a   :  { %v3225_v4 = vadd.f32 %v2969_v53, %v2713_v57  ;;  %v3353_v5 = vadd.f32 %v3097_v54, %v2841_v58  ;;  %v2452_v8 = vmul.f32 %v6503_v2, %v1350_v1  ;;  %v2580_v29 = vmul.f32 %v6503_v2, %v1990_v3  ;;  %v1370_v51 = vpop.f32.mrb[51].mxu0  ;;  %v2010_v52 = vpop.f32.mrb[51].mxu1  ;;  %v3104_v56 = vld [vmem:[%s8305_s4 + $0x598] sm:$0xff] }
 0x14b   :  { %v3482_v9 = vmax.f32 %v3226_v61, 0.0  ;;  %v3610_v10 = vmax.f32 %v3354_v62, 0.0  ;;  %v2716_v12 = vadd.f32 %v6517_v11, %v2453_v63  ;;  %v2844_v13 = vadd.f32 %v6517_v11, %v2581_v0  ;;  %v2975_v63 = vld [vmem:[%s8305_s4 + $0x190] sm:$0xff] }
 0x14c   :  { %v3481_v15 = vmax.f32 %v3225_v4, 0.0  ;;  %v3609_v16 = vmax.f32 %v3353_v5, 0.0  ;;  %v2715_v17 = vadd.f32 %v6517_v11, %v2452_v8  ;;  %v2843_v18 = vadd.f32 %v6517_v11, %v2580_v29  ;;  %v3103_v0 = vld [vmem:[%s8305_s4 + $0x590] sm:$0xff] }
 0x14d   :  { %3739 = vst.msk [vmem:[%s8306_s5 + $0x168] sm:$0xff] %vm3693_vm2, %v3482_v9  ;;  %3867 = vst.msk [vmem:[%s8306_s5 + $0x568] sm:$0xff] %vm3693_vm2, %v3610_v10  ;;  %v3228_v21 = vadd.f32 %v2972_v6, %v2716_v12  ;;  %v3356_v22 = vadd.f32 %v3100_v7, %v2844_v13  ;;  %v2455_v23 = vmul.f32 %v6503_v2, %v4558_v19  ;;  %v4564_v6 = vpop.f32.mrb[52].mxu0  ;;  %v4756_v7 = vpop.f32.mrb[52].mxu1 }
 0x14e   :  { %v2583_v24 = vmul.f32 %v6503_v2, %v4750_v20  ;;  %3738 = vst.msk [vmem:[%s8306_s5 + $0x160] sm:$0xff] %vm3693_vm2, %v3481_v15  ;;  %3866 = vst.msk [vmem:[%s8306_s5 + $0x560] sm:$0xff] %vm3693_vm2, %v3609_v16  ;;  %v3227_v27 = vadd.f32 %v2971_v35, %v2715_v17  ;;  %v3355_v28 = vadd.f32 %v3099_v14, %v2843_v18  ;;  %v1380_v12 = vpop.f32.mrb[53].mxu0  ;;  %v2020_v13 = vpop.f32.mrb[53].mxu1  ;;  %v2978_v15 = vld [vmem:[%s8305_s4 + $0x1a8] sm:$0xff] }
 0x14f   :  { %v2454_v32 = vmul.f32 %v6503_v2, %v1360_v25  ;;  %v2582_v33 = vmul.f32 %v6503_v2, %v2000_v26  ;;  %v3484_v34 = vmax.f32 %v3228_v21, 0.0  ;;  %v3612_v36 = vmax.f32 %v3356_v22, 0.0  ;;  %v3106_v16 = vld [vmem:[%s8305_s4 + $0x5a8] sm:$0xff] }
 0x150   :  { %v2718_v37 = vadd.f32 %v6517_v11, %v2455_v23  ;;  %v2846_v38 = vadd.f32 %v6517_v11, %v2583_v24  ;;  %v3483_v41 = vmax.f32 %v3227_v27, 0.0  ;;  %v3611_v42 = vmax.f32 %v3355_v28, 0.0  ;;  %v2977_v23 = vld [vmem:[%s8305_s4 + $0x1a0] sm:$0xff] }
 0x151   :  { %v2717_v43 = vadd.f32 %v6517_v11, %v2454_v32  ;;  %v2845_v44 = vadd.f32 %v6517_v11, %v2582_v33  ;;  %3741 = vst.msk [vmem:[%s8306_s5 + $0x178] sm:$0xff] %vm3693_vm2, %v3484_v34  ;;  %3869 = vst.msk [vmem:[%s8306_s5 + $0x578] sm:$0xff] %vm3693_vm2, %v3612_v36  ;;  %v2457_v49 = vmul.f32 %v6503_v2, %v4561_v45  ;;  %v3105_v24 = vld [vmem:[%s8305_s4 + $0x5a0] sm:$0xff] }
 0x152   :  { %v3230_v47 = vadd.f32 %v2974_v30, %v2718_v37  ;;  %v3358_v48 = vadd.f32 %v3102_v31, %v2846_v38  ;;  %v2585_v50 = vmul.f32 %v6503_v2, %v4753_v46  ;;  %3740 = vst.msk [vmem:[%s8306_s5 + $0x170] sm:$0xff] %vm3693_vm2, %v3483_v41  ;;  %3868 = vst.msk [vmem:[%s8306_s5 + $0x570] sm:$0xff] %vm3693_vm2, %v3611_v42  ;;  %v4567_v30 = vpop.f32.mrb[54].mxu0  ;;  %v4759_v31 = vpop.f32.mrb[54].mxu1  ;;  %v2980_v41 = vld [vmem:[%s8305_s4 + $0x1b8] sm:$0xff] }
 0x153   :  { %v3229_v53 = vadd.f32 %v2973_v39, %v2717_v43  ;;  %v3357_v54 = vadd.f32 %v3101_v40, %v2845_v44  ;;  %v2456_v57 = vmul.f32 %v6503_v2, %v1370_v51  ;;  %v2584_v58 = vmul.f32 %v6503_v2, %v2010_v52  ;;  %v1390_v37 = vpop.f32.mrb[55].mxu0  ;;  %v2030_v38 = vpop.f32.mrb[55].mxu1  ;;  %v3108_v42 = vld [vmem:[%s8305_s4 + $0x5b8] sm:$0xff] }
 0x154   :  { %v3486_v59 = vmax.f32 %v3230_v47, 0.0  ;;  %v3614_v60 = vmax.f32 %v3358_v48, 0.0  ;;  %v2720_v61 = vadd.f32 %v6517_v11, %v2457_v49  ;;  %v2848_v62 = vadd.f32 %v6517_v11, %v2585_v50  ;;  %v2979_v49 = vld [vmem:[%s8305_s4 + $0x1b0] sm:$0xff] }
 0x155   :  { %v3485_v1 = vmax.f32 %v3229_v53, 0.0  ;;  %v3613_v3 = vmax.f32 %v3357_v54, 0.0  ;;  %v2719_v4 = vadd.f32 %v6517_v11, %v2456_v57  ;;  %v2847_v5 = vadd.f32 %v6517_v11, %v2584_v58  ;;  %v3107_v50 = vld [vmem:[%s8305_s4 + $0x5b0] sm:$0xff] }
 0x156   :  { %3743 = vst.msk [vmem:[%s8306_s5 + $0x188] sm:$0xff] %vm3693_vm2, %v3486_v59  ;;  %3871 = vst.msk [vmem:[%s8306_s5 + $0x588] sm:$0xff] %vm3693_vm2, %v3614_v60  ;;  %v3232_v8 = vadd.f32 %v2976_v55, %v2720_v61  ;;  %v3360_v29 = vadd.f32 %v3104_v56, %v2848_v62  ;;  %v2459_v9 = vmul.f32 %v6503_v2, %v4564_v6  ;;  %v4570_v55 = vpop.f32.mrb[56].mxu0  ;;  %v4762_v56 = vpop.f32.mrb[56].mxu1 }
 0x157   :  { %v2587_v10 = vmul.f32 %v6503_v2, %v4756_v7  ;;  %3742 = vst.msk [vmem:[%s8306_s5 + $0x180] sm:$0xff] %vm3693_vm2, %v3485_v1  ;;  %3870 = vst.msk [vmem:[%s8306_s5 + $0x580] sm:$0xff] %vm3693_vm2, %v3613_v3  ;;  %v3231_v35 = vadd.f32 %v2975_v63, %v2719_v4  ;;  %v3359_v14 = vadd.f32 %v3103_v0, %v2847_v5  ;;  %v1400_v61 = vpop.f32.mrb[57].mxu0  ;;  %v2040_v62 = vpop.f32.mrb[57].mxu1  ;;  %v2982_v1 = vld [vmem:[%s8305_s4 + $0x1c8] sm:$0xff] }
 0x158   :  { %v2458_v17 = vmul.f32 %v6503_v2, %v1380_v12  ;;  %v2586_v18 = vmul.f32 %v6503_v2, %v2020_v13  ;;  %v3488_v19 = vmax.f32 %v3232_v8, 0.0  ;;  %v3616_v20 = vmax.f32 %v3360_v29, 0.0  ;;  %v3110_v3 = vld [vmem:[%s8305_s4 + $0x5c8] sm:$0xff] }
 0x159   :  { %v2722_v21 = vadd.f32 %v6517_v11, %v2459_v9  ;;  %v2850_v22 = vadd.f32 %v6517_v11, %v2587_v10  ;;  %v3487_v25 = vmax.f32 %v3231_v35, 0.0  ;;  %v3615_v26 = vmax.f32 %v3359_v14, 0.0  ;;  %v2981_v9 = vld [vmem:[%s8305_s4 + $0x1c0] sm:$0xff] }
 0x15a   :  { %v2721_v27 = vadd.f32 %v6517_v11, %v2458_v17  ;;  %v2849_v28 = vadd.f32 %v6517_v11, %v2586_v18  ;;  %3745 = vst.msk [vmem:[%s8306_s5 + $0x198] sm:$0xff] %vm3693_vm2, %v3488_v19  ;;  %3873 = vst.msk [vmem:[%s8306_s5 + $0x598] sm:$0xff] %vm3693_vm2, %v3616_v20  ;;  %v2461_v34 = vmul.f32 %v6503_v2, %v4567_v30  ;;  %v3109_v10 = vld [vmem:[%s8305_s4 + $0x5c0] sm:$0xff] }
 0x15b   :  { %v3234_v32 = vadd.f32 %v2978_v15, %v2722_v21  ;;  %v3362_v33 = vadd.f32 %v3106_v16, %v2850_v22  ;;  %v2589_v36 = vmul.f32 %v6503_v2, %v4759_v31  ;;  %3744 = vst.msk [vmem:[%s8306_s5 + $0x190] sm:$0xff] %vm3693_vm2, %v3487_v25  ;;  %3872 = vst.msk [vmem:[%s8306_s5 + $0x590] sm:$0xff] %vm3693_vm2, %v3615_v26  ;;  %v4573_v15 = vpop.f32.mrb[58].mxu0  ;;  %v4765_v16 = vpop.f32.mrb[58].mxu1  ;;  %v2984_v25 = vld [vmem:[%s8305_s4 + $0x1d8] sm:$0xff] }
 0x15c   :  { %v3233_v39 = vadd.f32 %v2977_v23, %v2721_v27  ;;  %v3361_v40 = vadd.f32 %v3105_v24, %v2849_v28  ;;  %v2460_v43 = vmul.f32 %v6503_v2, %v1390_v37  ;;  %v2588_v44 = vmul.f32 %v6503_v2, %v2030_v38  ;;  %v1410_v21 = vpop.f32.mrb[59].mxu0  ;;  %v2050_v22 = vpop.f32.mrb[59].mxu1  ;;  %v3112_v26 = vld [vmem:[%s8305_s4 + $0x5d8] sm:$0xff] }
 0x15d   :  { %v3490_v45 = vmax.f32 %v3234_v32, 0.0  ;;  %v3618_v46 = vmax.f32 %v3362_v33, 0.0  ;;  %v2724_v47 = vadd.f32 %v6517_v11, %v2461_v34  ;;  %v2852_v48 = vadd.f32 %v6517_v11, %v2589_v36  ;;  %v2983_v34 = vld [vmem:[%s8305_s4 + $0x1d0] sm:$0xff] }
 0x15e   :  { %v3489_v51 = vmax.f32 %v3233_v39, 0.0  ;;  %v3617_v52 = vmax.f32 %v3361_v40, 0.0  ;;  %v2723_v53 = vadd.f32 %v6517_v11, %v2460_v43  ;;  %v2851_v54 = vadd.f32 %v6517_v11, %v2588_v44  ;;  %v3111_v36 = vld [vmem:[%s8305_s4 + $0x5d0] sm:$0xff] }
 0x15f   :  { %3747 = vst.msk [vmem:[%s8306_s5 + $0x1a8] sm:$0xff] %vm3693_vm2, %v3490_v45  ;;  %3875 = vst.msk [vmem:[%s8306_s5 + $0x5a8] sm:$0xff] %vm3693_vm2, %v3618_v46  ;;  %v3236_v57 = vadd.f32 %v2980_v41, %v2724_v47  ;;  %v3364_v58 = vadd.f32 %v3108_v42, %v2852_v48  ;;  %v2463_v59 = vmul.f32 %v6503_v2, %v4570_v55  ;;  %v4576_v41 = vpop.f32.mrb[60].mxu0  ;;  %v4768_v42 = vpop.f32.mrb[60].mxu1 }
 0x160   :  { %v2591_v60 = vmul.f32 %v6503_v2, %v4762_v56  ;;  %3746 = vst.msk [vmem:[%s8306_s5 + $0x1a0] sm:$0xff] %vm3693_vm2, %v3489_v51  ;;  %3874 = vst.msk [vmem:[%s8306_s5 + $0x5a0] sm:$0xff] %vm3693_vm2, %v3617_v52  ;;  %v3235_v63 = vadd.f32 %v2979_v49, %v2723_v53  ;;  %v3363_v0 = vadd.f32 %v3107_v50, %v2851_v54  ;;  %v1420_v47 = vpop.f32.mrb[61].mxu0  ;;  %v2060_v48 = vpop.f32.mrb[61].mxu1  ;;  %v2986_v51 = vld [vmem:[%s8305_s4 + $0x1e8] sm:$0xff] }
 0x161   :  { %v2462_v4 = vmul.f32 %v6503_v2, %v1400_v61  ;;  %v2590_v5 = vmul.f32 %v6503_v2, %v2040_v62  ;;  %v3492_v6 = vmax.f32 %v3236_v57, 0.0  ;;  %v3620_v7 = vmax.f32 %v3364_v58, 0.0  ;;  %v3114_v52 = vld [vmem:[%s8305_s4 + $0x5e8] sm:$0xff] }
 0x162   :  { %v2726_v8 = vadd.f32 %v6517_v11, %v2463_v59  ;;  %v2854_v29 = vadd.f32 %v6517_v11, %v2591_v60  ;;  %v3491_v12 = vmax.f32 %v3235_v63, 0.0  ;;  %v3619_v13 = vmax.f32 %v3363_v0, 0.0  ;;  %v2985_v59 = vld [vmem:[%s8305_s4 + $0x1e0] sm:$0xff] }
 0x163   :  { %v2725_v35 = vadd.f32 %v6517_v11, %v2462_v4  ;;  %v2853_v14 = vadd.f32 %v6517_v11, %v2590_v5  ;;  %3749 = vst.msk [vmem:[%s8306_s5 + $0x1b8] sm:$0xff] %vm3693_vm2, %v3492_v6  ;;  %3877 = vst.msk [vmem:[%s8306_s5 + $0x5b8] sm:$0xff] %vm3693_vm2, %v3620_v7  ;;  %v2465_v19 = vmul.f32 %v6503_v2, %v4573_v15  ;;  %v3113_v60 = vld [vmem:[%s8305_s4 + $0x5e0] sm:$0xff] }
 0x164   :  { %v3238_v17 = vadd.f32 %v2982_v1, %v2726_v8  ;;  %v3366_v18 = vadd.f32 %v3110_v3, %v2854_v29  ;;  %v2593_v20 = vmul.f32 %v6503_v2, %v4765_v16  ;;  %3748 = vst.msk [vmem:[%s8306_s5 + $0x1b0] sm:$0xff] %vm3693_vm2, %v3491_v12  ;;  %3876 = vst.msk [vmem:[%s8306_s5 + $0x5b0] sm:$0xff] %vm3693_vm2, %v3619_v13  ;;  %v4579_v1 = vpop.f32.mrb[62].mxu0  ;;  %v4771_v3 = vpop.f32.mrb[62].mxu1  ;;  %v2988_v12 = vld [vmem:[%s8305_s4 + $0x1f8] sm:$0xff] }
 0x165   :  { %v3237_v23 = vadd.f32 %v2981_v9, %v2725_v35  ;;  %v3365_v24 = vadd.f32 %v3109_v10, %v2853_v14  ;;  %v2464_v27 = vmul.f32 %v6503_v2, %v1410_v21  ;;  %v2592_v28 = vmul.f32 %v6503_v2, %v2050_v22  ;;  %v1430_v8 = vpop.f32.mrb[63].mxu0  ;;  %v2070_v29 = vpop.f32.mrb[63].mxu1  ;;  %v3116_v13 = vld [vmem:[%s8305_s4 + $0x5f8] sm:$0xff] }
 0x166   :  { %v3494_v30 = vmax.f32 %v3238_v17, 0.0  ;;  %v3622_v31 = vmax.f32 %v3366_v18, 0.0  ;;  %v2728_v32 = vadd.f32 %v6517_v11, %v2465_v19  ;;  %v2856_v33 = vadd.f32 %v6517_v11, %v2593_v20  ;;  %v2987_v19 = vld [vmem:[%s8305_s4 + $0x1f0] sm:$0xff] }
 0x167   :  { %v3493_v37 = vmax.f32 %v3237_v23, 0.0  ;;  %v3621_v38 = vmax.f32 %v3365_v24, 0.0  ;;  %v2727_v39 = vadd.f32 %v6517_v11, %v2464_v27  ;;  %v2855_v40 = vadd.f32 %v6517_v11, %v2592_v28  ;;  %v3115_v20 = vld [vmem:[%s8305_s4 + $0x5f0] sm:$0xff] }
 0x168   :  { %3751 = vst.msk [vmem:[%s8306_s5 + $0x1c8] sm:$0xff] %vm3693_vm2, %v3494_v30  ;;  %3879 = vst.msk [vmem:[%s8306_s5 + $0x5c8] sm:$0xff] %vm3693_vm2, %v3622_v31  ;;  %v3240_v43 = vadd.f32 %v2984_v25, %v2728_v32  ;;  %v3368_v44 = vadd.f32 %v3112_v26, %v2856_v33  ;;  %v2467_v45 = vmul.f32 %v6503_v2, %v4576_v41  ;;  %v4582_v25 = vpop.f32.mrb[64].mxu0  ;;  %v4774_v26 = vpop.f32.mrb[64].mxu1 }
 0x169   :  { %v2595_v46 = vmul.f32 %v6503_v2, %v4768_v42  ;;  %3750 = vst.msk [vmem:[%s8306_s5 + $0x1c0] sm:$0xff] %vm3693_vm2, %v3493_v37  ;;  %3878 = vst.msk [vmem:[%s8306_s5 + $0x5c0] sm:$0xff] %vm3693_vm2, %v3621_v38  ;;  %v3239_v49 = vadd.f32 %v2983_v34, %v2727_v39  ;;  %v3367_v50 = vadd.f32 %v3111_v36, %v2855_v40  ;;  %v1440_v32 = vpop.f32.mrb[65].mxu0  ;;  %v2080_v33 = vpop.f32.mrb[65].mxu1  ;;  %v2990_v37 = vld [vmem:[%s8305_s4 + $0x208] sm:$0xff] }
 0x16a   :  { %v2466_v53 = vmul.f32 %v6503_v2, %v1420_v47  ;;  %v2594_v54 = vmul.f32 %v6503_v2, %v2060_v48  ;;  %v3496_v55 = vmax.f32 %v3240_v43, 0.0  ;;  %v3624_v56 = vmax.f32 %v3368_v44, 0.0  ;;  %v3118_v38 = vld [vmem:[%s8305_s4 + $0x608] sm:$0xff] }
 0x16b   :  { %v2730_v57 = vadd.f32 %v6517_v11, %v2467_v45  ;;  %v2858_v58 = vadd.f32 %v6517_v11, %v2595_v46  ;;  %v3495_v61 = vmax.f32 %v3239_v49, 0.0  ;;  %v3623_v62 = vmax.f32 %v3367_v50, 0.0  ;;  %v2989_v45 = vld [vmem:[%s8305_s4 + $0x200] sm:$0xff] }
 0x16c   :  { %v2729_v63 = vadd.f32 %v6517_v11, %v2466_v53  ;;  %v2857_v0 = vadd.f32 %v6517_v11, %v2594_v54  ;;  %3753 = vst.msk [vmem:[%s8306_s5 + $0x1d8] sm:$0xff] %vm3693_vm2, %v3496_v55  ;;  %3881 = vst.msk [vmem:[%s8306_s5 + $0x5d8] sm:$0xff] %vm3693_vm2, %v3624_v56  ;;  %v2469_v6 = vmul.f32 %v6503_v2, %v4579_v1  ;;  %v3117_v46 = vld [vmem:[%s8305_s4 + $0x600] sm:$0xff] }
 0x16d   :  { %v3242_v4 = vadd.f32 %v2986_v51, %v2730_v57  ;;  %v3370_v5 = vadd.f32 %v3114_v52, %v2858_v58  ;;  %v2597_v7 = vmul.f32 %v6503_v2, %v4771_v3  ;;  %3752 = vst.msk [vmem:[%s8306_s5 + $0x1d0] sm:$0xff] %vm3693_vm2, %v3495_v61  ;;  %3880 = vst.msk [vmem:[%s8306_s5 + $0x5d0] sm:$0xff] %vm3693_vm2, %v3623_v62  ;;  %v4585_v51 = vpop.f32.mrb[66].mxu0  ;;  %v4777_v52 = vpop.f32.mrb[66].mxu1  ;;  %v2992_v61 = vld [vmem:[%s8305_s4 + $0x218] sm:$0xff] }
 0x16e   :  { %v3241_v9 = vadd.f32 %v2985_v59, %v2729_v63  ;;  %v3369_v10 = vadd.f32 %v3113_v60, %v2857_v0  ;;  %v2468_v35 = vmul.f32 %v6503_v2, %v1430_v8  ;;  %v2596_v14 = vmul.f32 %v6503_v2, %v2070_v29  ;;  %v1450_v57 = vpop.f32.mrb[67].mxu0  ;;  %v2090_v58 = vpop.f32.mrb[67].mxu1  ;;  %v3120_v62 = vld [vmem:[%s8305_s4 + $0x618] sm:$0xff] }
 0x16f   :  { %v3498_v15 = vmax.f32 %v3242_v4, 0.0  ;;  %v3626_v16 = vmax.f32 %v3370_v5, 0.0  ;;  %v2732_v17 = vadd.f32 %v6517_v11, %v2469_v6  ;;  %v2860_v18 = vadd.f32 %v6517_v11, %v2597_v7  ;;  %v2991_v6 = vld [vmem:[%s8305_s4 + $0x210] sm:$0xff] }
 0x170   :  { %v3497_v21 = vmax.f32 %v3241_v9, 0.0  ;;  %v3625_v22 = vmax.f32 %v3369_v10, 0.0  ;;  %v2731_v23 = vadd.f32 %v6517_v11, %v2468_v35  ;;  %v2859_v24 = vadd.f32 %v6517_v11, %v2596_v14  ;;  %v3119_v7 = vld [vmem:[%s8305_s4 + $0x610] sm:$0xff]  ;;  %v4588_v10 = vpop.f32.mrb[68].mxu0  ;;  %v7180_v14 = vld [vmem:[%s8303_s2] ss:$0 sm:$0xff] }
 0x171   :  { %3755 = vst.msk [vmem:[%s8306_s5 + $0x1e8] sm:$0xff] %vm3693_vm2, %v3498_v15  ;;  %3883 = vst.msk [vmem:[%s8306_s5 + $0x5e8] sm:$0xff] %vm3693_vm2, %v3626_v16  ;;  %v3244_v27 = vadd.f32 %v2988_v12, %v2732_v17  ;;  %v3372_v28 = vadd.f32 %v3116_v13, %v2860_v18  ;;  %v2471_v30 = vmul.f32 %v6503_v2, %v4582_v25  ;;  %v4780_v12 = vpop.f32.mrb[68].mxu1  ;;  %v1460_v16 = vpop.f32.mrb[69].mxu0 }
 0x172   :  { %v2599_v31 = vmul.f32 %v6503_v2, %v4774_v26  ;;  %3754 = vst.msk [vmem:[%s8306_s5 + $0x1e0] sm:$0xff] %vm3693_vm2, %v3497_v21  ;;  %3882 = vst.msk [vmem:[%s8306_s5 + $0x5e0] sm:$0xff] %vm3693_vm2, %v3625_v22  ;;  %v3243_v34 = vadd.f32 %v2987_v19, %v2731_v23  ;;  %v3371_v36 = vadd.f32 %v3115_v20, %v2859_v24  ;;  %v2100_v17 = vpop.f32.mrb[69].mxu1  ;;  %v2994_v20 = vld [vmem:[%s8305_s4 + $0x228] sm:$0xff]  ;;  %v7203_v26 = vld [vmem:[%s8304_s3] ss:$0 sm:$0xff] }
 0x173   :  { %v2470_v39 = vmul.f32 %v6503_v2, %v1440_v32  ;;  %v2598_v40 = vmul.f32 %v6503_v2, %v2080_v33  ;;  %v3500_v41 = vmax.f32 %v3244_v27, 0.0  ;;  %v3628_v42 = vmax.f32 %v3372_v28, 0.0  ;;  %v3122_v21 = vld [vmem:[%s8305_s4 + $0x628] sm:$0xff] }
 0x174   :  { %v2734_v43 = vadd.f32 %v6517_v11, %v2471_v30  ;;  %v2862_v44 = vadd.f32 %v6517_v11, %v2599_v31  ;;  %v3499_v47 = vmax.f32 %v3243_v34, 0.0  ;;  %v3627_v48 = vmax.f32 %v3371_v36, 0.0  ;;  %v2993_v30 = vld [vmem:[%s8305_s4 + $0x220] sm:$0xff] }
 0x175   :  { %v2733_v49 = vadd.f32 %v6517_v11, %v2470_v39  ;;  %v2861_v50 = vadd.f32 %v6517_v11, %v2598_v40  ;;  %3757 = vst.msk [vmem:[%s8306_s5 + $0x1f8] sm:$0xff] %vm3693_vm2, %v3500_v41  ;;  %3885 = vst.msk [vmem:[%s8306_s5 + $0x5f8] sm:$0xff] %vm3693_vm2, %v3628_v42  ;;  %v2473_v55 = vmul.f32 %v6503_v2, %v4585_v51  ;;  %v3121_v31 = vld [vmem:[%s8305_s4 + $0x620] sm:$0xff] }
 0x176   :  { %v3246_v53 = vadd.f32 %v2990_v37, %v2734_v43  ;;  %v3374_v54 = vadd.f32 %v3118_v38, %v2862_v44  ;;  %v2601_v56 = vmul.f32 %v6503_v2, %v4777_v52  ;;  %3756 = vst.msk [vmem:[%s8306_s5 + $0x1f0] sm:$0xff] %vm3693_vm2, %v3499_v47  ;;  %3884 = vst.msk [vmem:[%s8306_s5 + $0x5f0] sm:$0xff] %vm3693_vm2, %v3627_v48  ;;  %v4591_v37 = vpop.f32.mrb[70].mxu0  ;;  %v4783_v38 = vpop.f32.mrb[70].mxu1  ;;  %v2996_v47 = vld [vmem:[%s8305_s4 + $0x238] sm:$0xff] }
 0x177   :  { %v3245_v59 = vadd.f32 %v2989_v45, %v2733_v49  ;;  %v3373_v60 = vadd.f32 %v3117_v46, %v2861_v50  ;;  %v2472_v63 = vmul.f32 %v6503_v2, %v1450_v57  ;;  %v2600_v0 = vmul.f32 %v6503_v2, %v2090_v58  ;;  %v1470_v43 = vpop.f32.mrb[71].mxu0  ;;  %v2110_v44 = vpop.f32.mrb[71].mxu1  ;;  %v3124_v48 = vld [vmem:[%s8305_s4 + $0x638] sm:$0xff] }
 0x178   :  { %v3502_v1 = vmax.f32 %v3246_v53, 0.0  ;;  %v3630_v3 = vmax.f32 %v3374_v54, 0.0  ;;  %v2736_v4 = vadd.f32 %v6517_v11, %v2473_v55  ;;  %v2864_v5 = vadd.f32 %v6517_v11, %v2601_v56  ;;  %v2995_v55 = vld [vmem:[%s8305_s4 + $0x230] sm:$0xff] }
 0x179   :  { %v3501_v8 = vmax.f32 %v3245_v59, 0.0  ;;  %v3629_v29 = vmax.f32 %v3373_v60, 0.0  ;;  %v2735_v9 = vadd.f32 %v6517_v11, %v2472_v63  ;;  %v2863_v2 = vadd.f32 %v6517_v11, %v2600_v0  ;;  %v3123_v56 = vld [vmem:[%s8305_s4 + $0x630] sm:$0xff] }
 0x17a   :  { %3759 = vst.msk [vmem:[%s8306_s5 + $0x208] sm:$0xff] %vm3693_vm2, %v3502_v1  ;;  %3887 = vst.msk [vmem:[%s8306_s5 + $0x608] sm:$0xff] %vm3693_vm2, %v3630_v3  ;;  %v3248_v13 = vadd.f32 %v2992_v61, %v2736_v4  ;;  %v3376_v35 = vadd.f32 %v3120_v62, %v2864_v5  ;;  %v2475_v11 = vmul.f32 %v7180_v14, %v4588_v10  ;;  %v4594_v61 = vpop.f32.mrb[72].mxu0  ;;  %v4786_v62 = vpop.f32.mrb[72].mxu1 }
 0x17b   :  { %v2603_v15 = vmul.f32 %v7180_v14, %v4780_v12  ;;  %3758 = vst.msk [vmem:[%s8306_s5 + $0x200] sm:$0xff] %vm3693_vm2, %v3501_v8  ;;  %3886 = vst.msk [vmem:[%s8306_s5 + $0x600] sm:$0xff] %vm3693_vm2, %v3629_v29  ;;  %v3247_v18 = vadd.f32 %v2991_v6, %v2735_v9  ;;  %v3375_v19 = vadd.f32 %v3119_v7, %v2863_v2  ;;  %v1480_v4 = vpop.f32.mrb[73].mxu0  ;;  %v2120_v5 = vpop.f32.mrb[73].mxu1  ;;  %v2998_v8 = vld [vmem:[%s8305_s4 + $0x248] sm:$0xff] }
 0x17c   :  { %v2474_v22 = vmul.f32 %v7180_v14, %v1460_v16  ;;  %v2602_v23 = vmul.f32 %v7180_v14, %v2100_v17  ;;  %v3504_v24 = vmax.f32 %v3248_v13, 0.0  ;;  %v3632_v25 = vmax.f32 %v3376_v35, 0.0  ;;  %v3126_v29 = vld [vmem:[%s8305_s4 + $0x648] sm:$0xff] }
 0x17d   :  { %v2738_v27 = vadd.f32 %v7203_v26, %v2475_v11  ;;  %v2866_v28 = vadd.f32 %v7203_v26, %v2603_v15  ;;  %v3503_v32 = vmax.f32 %v3247_v18, 0.0  ;;  %v3631_v33 = vmax.f32 %v3375_v19, 0.0  ;;  %v2997_v11 = vld [vmem:[%s8305_s4 + $0x240] sm:$0xff] }
 0x17e   :  { %v2737_v34 = vadd.f32 %v7203_v26, %v2474_v22  ;;  %v2865_v36 = vadd.f32 %v7203_v26, %v2602_v23  ;;  %3761 = vst.msk [vmem:[%s8306_s5 + $0x218] sm:$0xff] %vm3693_vm2, %v3504_v24  ;;  %3889 = vst.msk [vmem:[%s8306_s5 + $0x618] sm:$0xff] %vm3693_vm2, %v3632_v25  ;;  %v2477_v41 = vmul.f32 %v7180_v14, %v4591_v37  ;;  %v3125_v15 = vld [vmem:[%s8305_s4 + $0x640] sm:$0xff] }
 0x17f   :  { %v3250_v39 = vadd.f32 %v2994_v20, %v2738_v27  ;;  %v3378_v40 = vadd.f32 %v3122_v21, %v2866_v28  ;;  %v2605_v42 = vmul.f32 %v7180_v14, %v4783_v38  ;;  %3760 = vst.msk [vmem:[%s8306_s5 + $0x210] sm:$0xff] %vm3693_vm2, %v3503_v32  ;;  %3888 = vst.msk [vmem:[%s8306_s5 + $0x610] sm:$0xff] %vm3693_vm2, %v3631_v33  ;;  %v4597_v20 = vpop.f32.mrb[74].mxu0  ;;  %v4789_v21 = vpop.f32.mrb[74].mxu1  ;;  %v3000_v32 = vld [vmem:[%s8305_s4 + $0x258] sm:$0xff] }
 0x180   :  { %v3249_v45 = vadd.f32 %v2993_v30, %v2737_v34  ;;  %v3377_v46 = vadd.f32 %v3121_v31, %v2865_v36  ;;  %v2476_v49 = vmul.f32 %v7180_v14, %v1470_v43  ;;  %v2604_v50 = vmul.f32 %v7180_v14, %v2110_v44  ;;  %v1490_v27 = vpop.f32.mrb[75].mxu0  ;;  %v2130_v28 = vpop.f32.mrb[75].mxu1  ;;  %v3128_v33 = vld [vmem:[%s8305_s4 + $0x658] sm:$0xff] }
 0x181   :  { %v3506_v51 = vmax.f32 %v3250_v39, 0.0  ;;  %v3634_v52 = vmax.f32 %v3378_v40, 0.0  ;;  %v2740_v53 = vadd.f32 %v7203_v26, %v2477_v41  ;;  %v2868_v54 = vadd.f32 %v7203_v26, %v2605_v42  ;;  %v2999_v41 = vld [vmem:[%s8305_s4 + $0x250] sm:$0xff] }
 0x182   :  { %v3505_v57 = vmax.f32 %v3249_v45, 0.0  ;;  %v3633_v58 = vmax.f32 %v3377_v46, 0.0  ;;  %v2739_v59 = vadd.f32 %v7203_v26, %v2476_v49  ;;  %v2867_v60 = vadd.f32 %v7203_v26, %v2604_v50  ;;  %v3127_v42 = vld [vmem:[%s8305_s4 + $0x650] sm:$0xff] }
 0x183   :  { %3763 = vst.msk [vmem:[%s8306_s5 + $0x228] sm:$0xff] %vm3693_vm2, %v3506_v51  ;;  %3891 = vst.msk [vmem:[%s8306_s5 + $0x628] sm:$0xff] %vm3693_vm2, %v3634_v52  ;;  %v3252_v63 = vadd.f32 %v2996_v47, %v2740_v53  ;;  %v3380_v0 = vadd.f32 %v3124_v48, %v2868_v54  ;;  %v2479_v1 = vmul.f32 %v7180_v14, %v4594_v61  ;;  %v4600_v47 = vpop.f32.mrb[76].mxu0  ;;  %v4792_v48 = vpop.f32.mrb[76].mxu1 }
 0x184   :  { %v2607_v3 = vmul.f32 %v7180_v14, %v4786_v62  ;;  %3762 = vst.msk [vmem:[%s8306_s5 + $0x220] sm:$0xff] %vm3693_vm2, %v3505_v57  ;;  %3890 = vst.msk [vmem:[%s8306_s5 + $0x620] sm:$0xff] %vm3693_vm2, %v3633_v58  ;;  %v3251_v6 = vadd.f32 %v2995_v55, %v2739_v59  ;;  %v3379_v7 = vadd.f32 %v3123_v56, %v2867_v60  ;;  %v1500_v53 = vpop.f32.mrb[77].mxu0  ;;  %v2140_v54 = vpop.f32.mrb[77].mxu1  ;;  %v3002_v57 = vld [vmem:[%s8305_s4 + $0x268] sm:$0xff] }
 0x185   :  { %v2478_v9 = vmul.f32 %v7180_v14, %v1480_v4  ;;  %v2606_v2 = vmul.f32 %v7180_v14, %v2120_v5  ;;  %v3508_v10 = vmax.f32 %v3252_v63, 0.0  ;;  %v3636_v12 = vmax.f32 %v3380_v0, 0.0  ;;  %v3130_v58 = vld [vmem:[%s8305_s4 + $0x668] sm:$0xff] }
 0x186   :  { %v2742_v13 = vadd.f32 %v7203_v26, %v2479_v1  ;;  %v2870_v35 = vadd.f32 %v7203_v26, %v2607_v3  ;;  %v3507_v16 = vmax.f32 %v3251_v6, 0.0  ;;  %v3635_v17 = vmax.f32 %v3379_v7, 0.0  ;;  %v3001_v1 = vld [vmem:[%s8305_s4 + $0x260] sm:$0xff] }
 0x187   :  { %v2741_v18 = vadd.f32 %v7203_v26, %v2478_v9  ;;  %v2869_v19 = vadd.f32 %v7203_v26, %v2606_v2  ;;  %3765 = vst.msk [vmem:[%s8306_s5 + $0x238] sm:$0xff] %vm3693_vm2, %v3508_v10  ;;  %3893 = vst.msk [vmem:[%s8306_s5 + $0x638] sm:$0xff] %vm3693_vm2, %v3636_v12  ;;  %v2481_v24 = vmul.f32 %v7180_v14, %v4597_v20  ;;  %v3129_v3 = vld [vmem:[%s8305_s4 + $0x660] sm:$0xff] }
 0x188   :  { %v3254_v22 = vadd.f32 %v2998_v8, %v2742_v13  ;;  %v3382_v23 = vadd.f32 %v3126_v29, %v2870_v35  ;;  %v2609_v25 = vmul.f32 %v7180_v14, %v4789_v21  ;;  %3764 = vst.msk [vmem:[%s8306_s5 + $0x230] sm:$0xff] %vm3693_vm2, %v3507_v16  ;;  %3892 = vst.msk [vmem:[%s8306_s5 + $0x630] sm:$0xff] %vm3693_vm2, %v3635_v17  ;;  %v4603_v8 = vpop.f32.mrb[78].mxu0  ;;  %v4795_v29 = vpop.f32.mrb[78].mxu1  ;;  %v3004_v16 = vld [vmem:[%s8305_s4 + $0x278] sm:$0xff] }
 0x189   :  { %v3253_v30 = vadd.f32 %v2997_v11, %v2741_v18  ;;  %v3381_v31 = vadd.f32 %v3125_v15, %v2869_v19  ;;  %v2480_v34 = vmul.f32 %v7180_v14, %v1490_v27  ;;  %v2608_v36 = vmul.f32 %v7180_v14, %v2130_v28  ;;  %v1510_v13 = vpop.f32.mrb[79].mxu0  ;;  %v2150_v35 = vpop.f32.mrb[79].mxu1  ;;  %v3132_v17 = vld [vmem:[%s8305_s4 + $0x678] sm:$0xff] }
 0x18a   :  { %v3510_v37 = vmax.f32 %v3254_v22, 0.0  ;;  %v3638_v38 = vmax.f32 %v3382_v23, 0.0  ;;  %v2744_v39 = vadd.f32 %v7203_v26, %v2481_v24  ;;  %v2872_v40 = vadd.f32 %v7203_v26, %v2609_v25  ;;  %v3003_v24 = vld [vmem:[%s8305_s4 + $0x270] sm:$0xff] }
 0x18b   :  { %v3509_v43 = vmax.f32 %v3253_v30, 0.0  ;;  %v3637_v44 = vmax.f32 %v3381_v31, 0.0  ;;  %v2743_v45 = vadd.f32 %v7203_v26, %v2480_v34  ;;  %v2871_v46 = vadd.f32 %v7203_v26, %v2608_v36  ;;  %v3131_v25 = vld [vmem:[%s8305_s4 + $0x670] sm:$0xff] }
 0x18c   :  { %3767 = vst.msk [vmem:[%s8306_s5 + $0x248] sm:$0xff] %vm3693_vm2, %v3510_v37  ;;  %3895 = vst.msk [vmem:[%s8306_s5 + $0x648] sm:$0xff] %vm3693_vm2, %v3638_v38  ;;  %v3256_v49 = vadd.f32 %v3000_v32, %v2744_v39  ;;  %v3384_v50 = vadd.f32 %v3128_v33, %v2872_v40  ;;  %v2483_v51 = vmul.f32 %v7180_v14, %v4600_v47  ;;  %v4606_v32 = vpop.f32.mrb[80].mxu0  ;;  %v4798_v33 = vpop.f32.mrb[80].mxu1 }
 0x18d   :  { %v2611_v52 = vmul.f32 %v7180_v14, %v4792_v48  ;;  %3766 = vst.msk [vmem:[%s8306_s5 + $0x240] sm:$0xff] %vm3693_vm2, %v3509_v43  ;;  %3894 = vst.msk [vmem:[%s8306_s5 + $0x640] sm:$0xff] %vm3693_vm2, %v3637_v44  ;;  %v3255_v55 = vadd.f32 %v2999_v41, %v2743_v45  ;;  %v3383_v56 = vadd.f32 %v3127_v42, %v2871_v46  ;;  %v1520_v39 = vpop.f32.mrb[81].mxu0  ;;  %v2160_v40 = vpop.f32.mrb[81].mxu1  ;;  %v3006_v43 = vld [vmem:[%s8305_s4 + $0x288] sm:$0xff] }
 0x18e   :  { %v2482_v59 = vmul.f32 %v7180_v14, %v1500_v53  ;;  %v2610_v60 = vmul.f32 %v7180_v14, %v2140_v54  ;;  %v3512_v61 = vmax.f32 %v3256_v49, 0.0  ;;  %v3640_v62 = vmax.f32 %v3384_v50, 0.0  ;;  %v3134_v44 = vld [vmem:[%s8305_s4 + $0x688] sm:$0xff] }
 0x18f   :  { %v2746_v63 = vadd.f32 %v7203_v26, %v2483_v51  ;;  %v2874_v0 = vadd.f32 %v7203_v26, %v2611_v52  ;;  %v3511_v4 = vmax.f32 %v3255_v55, 0.0  ;;  %v3639_v5 = vmax.f32 %v3383_v56, 0.0  ;;  %v3005_v51 = vld [vmem:[%s8305_s4 + $0x280] sm:$0xff] }
 0x190   :  { %v2745_v6 = vadd.f32 %v7203_v26, %v2482_v59  ;;  %v2873_v7 = vadd.f32 %v7203_v26, %v2610_v60  ;;  %3769 = vst.msk [vmem:[%s8306_s5 + $0x258] sm:$0xff] %vm3693_vm2, %v3512_v61  ;;  %3897 = vst.msk [vmem:[%s8306_s5 + $0x658] sm:$0xff] %vm3693_vm2, %v3640_v62  ;;  %v2485_v10 = vmul.f32 %v7180_v14, %v4603_v8  ;;  %v3133_v52 = vld [vmem:[%s8305_s4 + $0x680] sm:$0xff] }
 0x191   :  { %v3258_v9 = vadd.f32 %v3002_v57, %v2746_v63  ;;  %v3386_v2 = vadd.f32 %v3130_v58, %v2874_v0  ;;  %v2613_v12 = vmul.f32 %v7180_v14, %v4795_v29  ;;  %3768 = vst.msk [vmem:[%s8306_s5 + $0x250] sm:$0xff] %vm3693_vm2, %v3511_v4  ;;  %3896 = vst.msk [vmem:[%s8306_s5 + $0x650] sm:$0xff] %vm3693_vm2, %v3639_v5  ;;  %v4609_v57 = vpop.f32.mrb[82].mxu0  ;;  %v4801_v58 = vpop.f32.mrb[82].mxu1  ;;  %v3008_v4 = vld [vmem:[%s8305_s4 + $0x298] sm:$0xff] }
 0x192   :  { %v3257_v11 = vadd.f32 %v3001_v1, %v2745_v6  ;;  %v3385_v15 = vadd.f32 %v3129_v3, %v2873_v7  ;;  %v2484_v18 = vmul.f32 %v7180_v14, %v1510_v13  ;;  %v2612_v19 = vmul.f32 %v7180_v14, %v2150_v35  ;;  %v1530_v63 = vpop.f32.mrb[83].mxu0  ;;  %v2170_v0 = vpop.f32.mrb[83].mxu1  ;;  %v3136_v5 = vld [vmem:[%s8305_s4 + $0x698] sm:$0xff] }
 0x193   :  { %v3514_v20 = vmax.f32 %v3258_v9, 0.0  ;;  %v3642_v21 = vmax.f32 %v3386_v2, 0.0  ;;  %v2748_v22 = vadd.f32 %v7203_v26, %v2485_v10  ;;  %v2876_v23 = vadd.f32 %v7203_v26, %v2613_v12  ;;  %v3007_v10 = vld [vmem:[%s8305_s4 + $0x290] sm:$0xff] }
 0x194   :  { %v3513_v27 = vmax.f32 %v3257_v11, 0.0  ;;  %v3641_v28 = vmax.f32 %v3385_v15, 0.0  ;;  %v2747_v30 = vadd.f32 %v7203_v26, %v2484_v18  ;;  %v2875_v31 = vadd.f32 %v7203_v26, %v2612_v19  ;;  %v3135_v12 = vld [vmem:[%s8305_s4 + $0x690] sm:$0xff] }
 0x195   :  { %3771 = vst.msk [vmem:[%s8306_s5 + $0x268] sm:$0xff] %vm3693_vm2, %v3514_v20  ;;  %3899 = vst.msk [vmem:[%s8306_s5 + $0x668] sm:$0xff] %vm3693_vm2, %v3642_v21  ;;  %v3260_v34 = vadd.f32 %v3004_v16, %v2748_v22  ;;  %v3388_v36 = vadd.f32 %v3132_v17, %v2876_v23  ;;  %v2487_v37 = vmul.f32 %v7180_v14, %v4606_v32  ;;  %v4612_v16 = vpop.f32.mrb[84].mxu0  ;;  %v4804_v17 = vpop.f32.mrb[84].mxu1 }
 0x196   :  { %v2615_v38 = vmul.f32 %v7180_v14, %v4798_v33  ;;  %3770 = vst.msk [vmem:[%s8306_s5 + $0x260] sm:$0xff] %vm3693_vm2, %v3513_v27  ;;  %3898 = vst.msk [vmem:[%s8306_s5 + $0x660] sm:$0xff] %vm3693_vm2, %v3641_v28  ;;  %v3259_v41 = vadd.f32 %v3003_v24, %v2747_v30  ;;  %v3387_v42 = vadd.f32 %v3131_v25, %v2875_v31  ;;  %v1540_v22 = vpop.f32.mrb[85].mxu0  ;;  %v2180_v23 = vpop.f32.mrb[85].mxu1  ;;  %v3010_v27 = vld [vmem:[%s8305_s4 + $0x2a8] sm:$0xff] }
 0x197   :  { %v2486_v45 = vmul.f32 %v7180_v14, %v1520_v39  ;;  %v2614_v46 = vmul.f32 %v7180_v14, %v2160_v40  ;;  %v3516_v47 = vmax.f32 %v3260_v34, 0.0  ;;  %v3644_v48 = vmax.f32 %v3388_v36, 0.0  ;;  %v3138_v28 = vld [vmem:[%s8305_s4 + $0x6a8] sm:$0xff] }
 0x198   :  { %v2750_v49 = vadd.f32 %v7203_v26, %v2487_v37  ;;  %v2878_v50 = vadd.f32 %v7203_v26, %v2615_v38  ;;  %v3515_v53 = vmax.f32 %v3259_v41, 0.0  ;;  %v3643_v54 = vmax.f32 %v3387_v42, 0.0  ;;  %v3009_v37 = vld [vmem:[%s8305_s4 + $0x2a0] sm:$0xff] }
 0x199   :  { %v2749_v55 = vadd.f32 %v7203_v26, %v2486_v45  ;;  %v2877_v56 = vadd.f32 %v7203_v26, %v2614_v46  ;;  %3773 = vst.msk [vmem:[%s8306_s5 + $0x278] sm:$0xff] %vm3693_vm2, %v3516_v47  ;;  %3901 = vst.msk [vmem:[%s8306_s5 + $0x678] sm:$0xff] %vm3693_vm2, %v3644_v48  ;;  %v2489_v61 = vmul.f32 %v7180_v14, %v4609_v57  ;;  %v3137_v38 = vld [vmem:[%s8305_s4 + $0x6a0] sm:$0xff] }
 0x19a   :  { %v3262_v59 = vadd.f32 %v3006_v43, %v2750_v49  ;;  %v3390_v60 = vadd.f32 %v3134_v44, %v2878_v50  ;;  %v2617_v62 = vmul.f32 %v7180_v14, %v4801_v58  ;;  %3772 = vst.msk [vmem:[%s8306_s5 + $0x270] sm:$0xff] %vm3693_vm2, %v3515_v53  ;;  %3900 = vst.msk [vmem:[%s8306_s5 + $0x670] sm:$0xff] %vm3693_vm2, %v3643_v54  ;;  %v4615_v43 = vpop.f32.mrb[86].mxu0  ;;  %v4807_v44 = vpop.f32.mrb[86].mxu1  ;;  %v3012_v53 = vld [vmem:[%s8305_s4 + $0x2b8] sm:$0xff] }
 0x19b   :  { %v3261_v1 = vadd.f32 %v3005_v51, %v2749_v55  ;;  %v3389_v3 = vadd.f32 %v3133_v52, %v2877_v56  ;;  %v2488_v6 = vmul.f32 %v7180_v14, %v1530_v63  ;;  %v2616_v7 = vmul.f32 %v7180_v14, %v2170_v0  ;;  %v1550_v49 = vpop.f32.mrb[87].mxu0  ;;  %v2190_v50 = vpop.f32.mrb[87].mxu1  ;;  %v3140_v54 = vld [vmem:[%s8305_s4 + $0x6b8] sm:$0xff] }
 0x19c   :  { %v3518_v8 = vmax.f32 %v3262_v59, 0.0  ;;  %v3646_v29 = vmax.f32 %v3390_v60, 0.0  ;;  %v2752_v9 = vadd.f32 %v7203_v26, %v2489_v61  ;;  %v2880_v2 = vadd.f32 %v7203_v26, %v2617_v62  ;;  %v3011_v61 = vld [vmem:[%s8305_s4 + $0x2b0] sm:$0xff] }
 0x19d   :  { %v3517_v13 = vmax.f32 %v3261_v1, 0.0  ;;  %v3645_v35 = vmax.f32 %v3389_v3, 0.0  ;;  %v2751_v11 = vadd.f32 %v7203_v26, %v2488_v6  ;;  %v2879_v15 = vadd.f32 %v7203_v26, %v2616_v7  ;;  %v3139_v62 = vld [vmem:[%s8305_s4 + $0x6b0] sm:$0xff] }
 0x19e   :  { %3775 = vst.msk [vmem:[%s8306_s5 + $0x288] sm:$0xff] %vm3693_vm2, %v3518_v8  ;;  %3903 = vst.msk [vmem:[%s8306_s5 + $0x688] sm:$0xff] %vm3693_vm2, %v3646_v29  ;;  %v3264_v18 = vadd.f32 %v3008_v4, %v2752_v9  ;;  %v3392_v19 = vadd.f32 %v3136_v5, %v2880_v2  ;;  %v2491_v20 = vmul.f32 %v7180_v14, %v4612_v16  ;;  %v4618_v4 = vpop.f32.mrb[88].mxu0  ;;  %v4810_v5 = vpop.f32.mrb[88].mxu1 }
 0x19f   :  { %v2619_v21 = vmul.f32 %v7180_v14, %v4804_v17  ;;  %3774 = vst.msk [vmem:[%s8306_s5 + $0x280] sm:$0xff] %vm3693_vm2, %v3517_v13  ;;  %3902 = vst.msk [vmem:[%s8306_s5 + $0x680] sm:$0xff] %vm3693_vm2, %v3645_v35  ;;  %v3263_v24 = vadd.f32 %v3007_v10, %v2751_v11  ;;  %v3391_v25 = vadd.f32 %v3135_v12, %v2879_v15  ;;  %v1560_v9 = vpop.f32.mrb[89].mxu0  ;;  %v2200_v2 = vpop.f32.mrb[89].mxu1  ;;  %v3014_v13 = vld [vmem:[%s8305_s4 + $0x2c8] sm:$0xff] }
 0x1a0   :  { %v2490_v30 = vmul.f32 %v7180_v14, %v1540_v22  ;;  %v2618_v31 = vmul.f32 %v7180_v14, %v2180_v23  ;;  %v3520_v32 = vmax.f32 %v3264_v18, 0.0  ;;  %v3648_v33 = vmax.f32 %v3392_v19, 0.0  ;;  %v3142_v35 = vld [vmem:[%s8305_s4 + $0x6c8] sm:$0xff] }
 0x1a1   :  { %v2754_v34 = vadd.f32 %v7203_v26, %v2491_v20  ;;  %v2882_v36 = vadd.f32 %v7203_v26, %v2619_v21  ;;  %v3519_v39 = vmax.f32 %v3263_v24, 0.0  ;;  %v3647_v40 = vmax.f32 %v3391_v25, 0.0  ;;  %v3013_v20 = vld [vmem:[%s8305_s4 + $0x2c0] sm:$0xff] }
 0x1a2   :  { %v2753_v41 = vadd.f32 %v7203_v26, %v2490_v30  ;;  %v2881_v42 = vadd.f32 %v7203_v26, %v2618_v31  ;;  %3777 = vst.msk [vmem:[%s8306_s5 + $0x298] sm:$0xff] %vm3693_vm2, %v3520_v32  ;;  %3905 = vst.msk [vmem:[%s8306_s5 + $0x698] sm:$0xff] %vm3693_vm2, %v3648_v33  ;;  %v2493_v47 = vmul.f32 %v7180_v14, %v4615_v43  ;;  %v3141_v21 = vld [vmem:[%s8305_s4 + $0x6c0] sm:$0xff] }
 0x1a3   :  { %v3266_v45 = vadd.f32 %v3010_v27, %v2754_v34  ;;  %v3394_v46 = vadd.f32 %v3138_v28, %v2882_v36  ;;  %v2621_v48 = vmul.f32 %v7180_v14, %v4807_v44  ;;  %3776 = vst.msk [vmem:[%s8306_s5 + $0x290] sm:$0xff] %vm3693_vm2, %v3519_v39  ;;  %3904 = vst.msk [vmem:[%s8306_s5 + $0x690] sm:$0xff] %vm3693_vm2, %v3647_v40  ;;  %v4621_v27 = vpop.f32.mrb[90].mxu0  ;;  %v4813_v28 = vpop.f32.mrb[90].mxu1  ;;  %v3016_v39 = vld [vmem:[%s8305_s4 + $0x2d8] sm:$0xff] }
 0x1a4   :  { %v3265_v51 = vadd.f32 %v3009_v37, %v2753_v41  ;;  %v3393_v52 = vadd.f32 %v3137_v38, %v2881_v42  ;;  %v2492_v55 = vmul.f32 %v7180_v14, %v1550_v49  ;;  %v2620_v56 = vmul.f32 %v7180_v14, %v2190_v50  ;;  %v1570_v34 = vpop.f32.mrb[91].mxu0  ;;  %v2210_v36 = vpop.f32.mrb[91].mxu1  ;;  %v3144_v40 = vld [vmem:[%s8305_s4 + $0x6d8] sm:$0xff] }
 0x1a5   :  { %v3522_v57 = vmax.f32 %v3266_v45, 0.0  ;;  %v3650_v58 = vmax.f32 %v3394_v46, 0.0  ;;  %v2756_v59 = vadd.f32 %v7203_v26, %v2493_v47  ;;  %v2884_v60 = vadd.f32 %v7203_v26, %v2621_v48  ;;  %v3015_v47 = vld [vmem:[%s8305_s4 + $0x2d0] sm:$0xff] }
 0x1a6   :  { %v3521_v63 = vmax.f32 %v3265_v51, 0.0  ;;  %v3649_v0 = vmax.f32 %v3393_v52, 0.0  ;;  %v2755_v1 = vadd.f32 %v7203_v26, %v2492_v55  ;;  %v2883_v3 = vadd.f32 %v7203_v26, %v2620_v56  ;;  %v3143_v48 = vld [vmem:[%s8305_s4 + $0x6d0] sm:$0xff] }
 0x1a7   :  { %3779 = vst.msk [vmem:[%s8306_s5 + $0x2a8] sm:$0xff] %vm3693_vm2, %v3522_v57  ;;  %3907 = vst.msk [vmem:[%s8306_s5 + $0x6a8] sm:$0xff] %vm3693_vm2, %v3650_v58  ;;  %v3268_v6 = vadd.f32 %v3012_v53, %v2756_v59  ;;  %v3396_v7 = vadd.f32 %v3140_v54, %v2884_v60  ;;  %v2495_v8 = vmul.f32 %v7180_v14, %v4618_v4  ;;  %v4624_v53 = vpop.f32.mrb[92].mxu0  ;;  %v4816_v54 = vpop.f32.mrb[92].mxu1 }
 0x1a8   :  { %v2623_v29 = vmul.f32 %v7180_v14, %v4810_v5  ;;  %3778 = vst.msk [vmem:[%s8306_s5 + $0x2a0] sm:$0xff] %vm3693_vm2, %v3521_v63  ;;  %3906 = vst.msk [vmem:[%s8306_s5 + $0x6a0] sm:$0xff] %vm3693_vm2, %v3649_v0  ;;  %v3267_v10 = vadd.f32 %v3011_v61, %v2755_v1  ;;  %v3395_v12 = vadd.f32 %v3139_v62, %v2883_v3  ;;  %v1580_v59 = vpop.f32.mrb[93].mxu0  ;;  %v2220_v60 = vpop.f32.mrb[93].mxu1  ;;  %v3018_v63 = vld [vmem:[%s8305_s4 + $0x2e8] sm:$0xff] }
 0x1a9   :  { %v2494_v11 = vmul.f32 %v7180_v14, %v1560_v9  ;;  %v2622_v15 = vmul.f32 %v7180_v14, %v2200_v2  ;;  %v3524_v16 = vmax.f32 %v3268_v6, 0.0  ;;  %v3652_v17 = vmax.f32 %v3396_v7, 0.0  ;;  %v3146_v0 = vld [vmem:[%s8305_s4 + $0x6e8] sm:$0xff] }
 0x1aa   :  { %v2758_v18 = vadd.f32 %v7203_v26, %v2495_v8  ;;  %v2886_v19 = vadd.f32 %v7203_v26, %v2623_v29  ;;  %v3523_v22 = vmax.f32 %v3267_v10, 0.0  ;;  %v3651_v23 = vmax.f32 %v3395_v12, 0.0  ;;  %v3017_v8 = vld [vmem:[%s8305_s4 + $0x2e0] sm:$0xff] }
 0x1ab   :  { %v2757_v24 = vadd.f32 %v7203_v26, %v2494_v11  ;;  %v2885_v25 = vadd.f32 %v7203_v26, %v2622_v15  ;;  %3781 = vst.msk [vmem:[%s8306_s5 + $0x2b8] sm:$0xff] %vm3693_vm2, %v3524_v16  ;;  %3909 = vst.msk [vmem:[%s8306_s5 + $0x6b8] sm:$0xff] %vm3693_vm2, %v3652_v17  ;;  %v2497_v32 = vmul.f32 %v7180_v14, %v4621_v27  ;;  %v3145_v29 = vld [vmem:[%s8305_s4 + $0x6e0] sm:$0xff] }
 0x1ac   :  { %v3270_v30 = vadd.f32 %v3014_v13, %v2758_v18  ;;  %v3398_v31 = vadd.f32 %v3142_v35, %v2886_v19  ;;  %v2625_v33 = vmul.f32 %v7180_v14, %v4813_v28  ;;  %3780 = vst.msk [vmem:[%s8306_s5 + $0x2b0] sm:$0xff] %vm3693_vm2, %v3523_v22  ;;  %3908 = vst.msk [vmem:[%s8306_s5 + $0x6b0] sm:$0xff] %vm3693_vm2, %v3651_v23  ;;  %v4627_v13 = vpop.f32.mrb[94].mxu0  ;;  %v4819_v35 = vpop.f32.mrb[94].mxu1  ;;  %v3020_v22 = vld [vmem:[%s8305_s4 + $0x2f8] sm:$0xff] }
 0x1ad   :  { %v3269_v37 = vadd.f32 %v3013_v20, %v2757_v24  ;;  %v3397_v38 = vadd.f32 %v3141_v21, %v2885_v25  ;;  %v2496_v41 = vmul.f32 %v7180_v14, %v1570_v34  ;;  %v2624_v42 = vmul.f32 %v7180_v14, %v2210_v36  ;;  %v1590_v18 = vpop.f32.mrb[95].mxu0  ;;  %v2230_v19 = vpop.f32.mrb[95].mxu1  ;;  %v3148_v23 = vld [vmem:[%s8305_s4 + $0x6f8] sm:$0xff] }
 0x1ae   :  { %v3526_v43 = vmax.f32 %v3270_v30, 0.0  ;;  %v3654_v44 = vmax.f32 %v3398_v31, 0.0  ;;  %v2760_v45 = vadd.f32 %v7203_v26, %v2497_v32  ;;  %v2888_v46 = vadd.f32 %v7203_v26, %v2625_v33  ;;  %v3019_v32 = vld [vmem:[%s8305_s4 + $0x2f0] sm:$0xff] }
 0x1af   :  { %v3525_v49 = vmax.f32 %v3269_v37, 0.0  ;;  %v3653_v50 = vmax.f32 %v3397_v38, 0.0  ;;  %v2759_v51 = vadd.f32 %v7203_v26, %v2496_v41  ;;  %v2887_v52 = vadd.f32 %v7203_v26, %v2624_v42  ;;  %v3147_v33 = vld [vmem:[%s8305_s4 + $0x6f0] sm:$0xff] }
 0x1b0   :  { %3783 = vst.msk [vmem:[%s8306_s5 + $0x2c8] sm:$0xff] %vm3693_vm2, %v3526_v43  ;;  %3911 = vst.msk [vmem:[%s8306_s5 + $0x6c8] sm:$0xff] %vm3693_vm2, %v3654_v44  ;;  %v3272_v55 = vadd.f32 %v3016_v39, %v2760_v45  ;;  %v3400_v56 = vadd.f32 %v3144_v40, %v2888_v46  ;;  %v2499_v57 = vmul.f32 %v7180_v14, %v4624_v53  ;;  %v4630_v39 = vpop.f32.mrb[96].mxu0  ;;  %v4822_v40 = vpop.f32.mrb[96].mxu1 }
 0x1b1   :  { %v2627_v58 = vmul.f32 %v7180_v14, %v4816_v54  ;;  %3782 = vst.msk [vmem:[%s8306_s5 + $0x2c0] sm:$0xff] %vm3693_vm2, %v3525_v49  ;;  %3910 = vst.msk [vmem:[%s8306_s5 + $0x6c0] sm:$0xff] %vm3693_vm2, %v3653_v50  ;;  %v3271_v61 = vadd.f32 %v3015_v47, %v2759_v51  ;;  %v3399_v62 = vadd.f32 %v3143_v48, %v2887_v52  ;;  %v1600_v45 = vpop.f32.mrb[97].mxu0  ;;  %v2240_v46 = vpop.f32.mrb[97].mxu1  ;;  %v3022_v49 = vld [vmem:[%s8305_s4 + $0x308] sm:$0xff] }
 0x1b2   :  { %v2498_v1 = vmul.f32 %v7180_v14, %v1580_v59  ;;  %v2626_v3 = vmul.f32 %v7180_v14, %v2220_v60  ;;  %v3528_v4 = vmax.f32 %v3272_v55, 0.0  ;;  %v3656_v5 = vmax.f32 %v3400_v56, 0.0  ;;  %v3150_v50 = vld [vmem:[%s8305_s4 + $0x708] sm:$0xff] }
 0x1b3   :  { %v2762_v6 = vadd.f32 %v7203_v26, %v2499_v57  ;;  %v2890_v7 = vadd.f32 %v7203_v26, %v2627_v58  ;;  %v3527_v9 = vmax.f32 %v3271_v61, 0.0  ;;  %v3655_v2 = vmax.f32 %v3399_v62, 0.0  ;;  %v3021_v57 = vld [vmem:[%s8305_s4 + $0x300] sm:$0xff] }
 0x1b4   :  { %v2761_v10 = vadd.f32 %v7203_v26, %v2498_v1  ;;  %v2889_v12 = vadd.f32 %v7203_v26, %v2626_v3  ;;  %3785 = vst.msk [vmem:[%s8306_s5 + $0x2d8] sm:$0xff] %vm3693_vm2, %v3528_v4  ;;  %3913 = vst.msk [vmem:[%s8306_s5 + $0x6d8] sm:$0xff] %vm3693_vm2, %v3656_v5  ;;  %v2501_v16 = vmul.f32 %v7180_v14, %v4627_v13  ;;  %v3149_v58 = vld [vmem:[%s8305_s4 + $0x700] sm:$0xff] }
 0x1b5   :  { %v3274_v11 = vadd.f32 %v3018_v63, %v2762_v6  ;;  %v3402_v15 = vadd.f32 %v3146_v0, %v2890_v7  ;;  %v2629_v17 = vmul.f32 %v7180_v14, %v4819_v35  ;;  %3784 = vst.msk [vmem:[%s8306_s5 + $0x2d0] sm:$0xff] %vm3693_vm2, %v3527_v9  ;;  %3912 = vst.msk [vmem:[%s8306_s5 + $0x6d0] sm:$0xff] %vm3693_vm2, %v3655_v2  ;;  %v4633_v63 = vpop.f32.mrb[98].mxu0  ;;  %v4825_v0 = vpop.f32.mrb[98].mxu1  ;;  %v3024_v9 = vld [vmem:[%s8305_s4 + $0x318] sm:$0xff] }
 0x1b6   :  { %v3273_v20 = vadd.f32 %v3017_v8, %v2761_v10  ;;  %v3401_v21 = vadd.f32 %v3145_v29, %v2889_v12  ;;  %v2500_v24 = vmul.f32 %v7180_v14, %v1590_v18  ;;  %v2628_v25 = vmul.f32 %v7180_v14, %v2230_v19  ;;  %v1610_v6 = vpop.f32.mrb[99].mxu0  ;;  %v2250_v7 = vpop.f32.mrb[99].mxu1  ;;  %v3152_v2 = vld [vmem:[%s8305_s4 + $0x718] sm:$0xff] }
 0x1b7   :  { %v3530_v27 = vmax.f32 %v3274_v11, 0.0  ;;  %v3658_v28 = vmax.f32 %v3402_v15, 0.0  ;;  %v2764_v30 = vadd.f32 %v7203_v26, %v2501_v16  ;;  %v2892_v31 = vadd.f32 %v7203_v26, %v2629_v17  ;;  %v3023_v16 = vld [vmem:[%s8305_s4 + $0x310] sm:$0xff] }
 0x1b8   :  { %v3529_v34 = vmax.f32 %v3273_v20, 0.0  ;;  %v3657_v36 = vmax.f32 %v3401_v21, 0.0  ;;  %v2763_v37 = vadd.f32 %v7203_v26, %v2500_v24  ;;  %v2891_v38 = vadd.f32 %v7203_v26, %v2628_v25  ;;  %v3151_v17 = vld [vmem:[%s8305_s4 + $0x710] sm:$0xff] }
 0x1b9   :  { %3787 = vst.msk [vmem:[%s8306_s5 + $0x2e8] sm:$0xff] %vm3693_vm2, %v3530_v27  ;;  %3915 = vst.msk [vmem:[%s8306_s5 + $0x6e8] sm:$0xff] %vm3693_vm2, %v3658_v28  ;;  %v3276_v41 = vadd.f32 %v3020_v22, %v2764_v30  ;;  %v3404_v42 = vadd.f32 %v3148_v23, %v2892_v31  ;;  %v2503_v43 = vmul.f32 %v7180_v14, %v4630_v39  ;;  %v4636_v22 = vpop.f32.mrb[100].mxu0  ;;  %v4828_v23 = vpop.f32.mrb[100].mxu1 }
 0x1ba   :  { %v2631_v44 = vmul.f32 %v7180_v14, %v4822_v40  ;;  %3786 = vst.msk [vmem:[%s8306_s5 + $0x2e0] sm:$0xff] %vm3693_vm2, %v3529_v34  ;;  %3914 = vst.msk [vmem:[%s8306_s5 + $0x6e0] sm:$0xff] %vm3693_vm2, %v3657_v36  ;;  %v3275_v47 = vadd.f32 %v3019_v32, %v2763_v37  ;;  %v3403_v48 = vadd.f32 %v3147_v33, %v2891_v38  ;;  %v1620_v30 = vpop.f32.mrb[101].mxu0  ;;  %v2260_v31 = vpop.f32.mrb[101].mxu1  ;;  %v3026_v34 = vld [vmem:[%s8305_s4 + $0x328] sm:$0xff] }
 0x1bb   :  { %v2502_v51 = vmul.f32 %v7180_v14, %v1600_v45  ;;  %v2630_v52 = vmul.f32 %v7180_v14, %v2240_v46  ;;  %v3532_v53 = vmax.f32 %v3276_v41, 0.0  ;;  %v3660_v54 = vmax.f32 %v3404_v42, 0.0  ;;  %v3154_v36 = vld [vmem:[%s8305_s4 + $0x728] sm:$0xff] }
 0x1bc   :  { %v2766_v55 = vadd.f32 %v7203_v26, %v2503_v43  ;;  %v2894_v56 = vadd.f32 %v7203_v26, %v2631_v44  ;;  %v3531_v59 = vmax.f32 %v3275_v47, 0.0  ;;  %v3659_v60 = vmax.f32 %v3403_v48, 0.0  ;;  %v3025_v43 = vld [vmem:[%s8305_s4 + $0x320] sm:$0xff] }
 0x1bd   :  { %v2765_v61 = vadd.f32 %v7203_v26, %v2502_v51  ;;  %v2893_v62 = vadd.f32 %v7203_v26, %v2630_v52  ;;  %3789 = vst.msk [vmem:[%s8306_s5 + $0x2f8] sm:$0xff] %vm3693_vm2, %v3532_v53  ;;  %3917 = vst.msk [vmem:[%s8306_s5 + $0x6f8] sm:$0xff] %vm3693_vm2, %v3660_v54  ;;  %v2505_v4 = vmul.f32 %v7180_v14, %v4633_v63  ;;  %v3153_v44 = vld [vmem:[%s8305_s4 + $0x720] sm:$0xff] }
 0x1be   :  { %v3278_v1 = vadd.f32 %v3022_v49, %v2766_v55  ;;  %v3406_v3 = vadd.f32 %v3150_v50, %v2894_v56  ;;  %v2633_v5 = vmul.f32 %v7180_v14, %v4825_v0  ;;  %3788 = vst.msk [vmem:[%s8306_s5 + $0x2f0] sm:$0xff] %vm3693_vm2, %v3531_v59  ;;  %3916 = vst.msk [vmem:[%s8306_s5 + $0x6f0] sm:$0xff] %vm3693_vm2, %v3659_v60  ;;  %v4639_v49 = vpop.f32.mrb[102].mxu0  ;;  %v4831_v50 = vpop.f32.mrb[102].mxu1  ;;  %v3028_v59 = vld [vmem:[%s8305_s4 + $0x338] sm:$0xff] }
 0x1bf   :  { %v3277_v8 = vadd.f32 %v3021_v57, %v2765_v61  ;;  %v3405_v29 = vadd.f32 %v3149_v58, %v2893_v62  ;;  %v2504_v10 = vmul.f32 %v7180_v14, %v1610_v6  ;;  %v2632_v12 = vmul.f32 %v7180_v14, %v2250_v7  ;;  %v1630_v55 = vpop.f32.mrb[103].mxu0  ;;  %v2270_v56 = vpop.f32.mrb[103].mxu1  ;;  %v3156_v60 = vld [vmem:[%s8305_s4 + $0x738] sm:$0xff] }
 0x1c0   :  { %v3534_v13 = vmax.f32 %v3278_v1, 0.0  ;;  %v3662_v35 = vmax.f32 %v3406_v3, 0.0  ;;  %v2768_v11 = vadd.f32 %v7203_v26, %v2505_v4  ;;  %v2896_v15 = vadd.f32 %v7203_v26, %v2633_v5  ;;  %v3027_v4 = vld [vmem:[%s8305_s4 + $0x330] sm:$0xff] }
 0x1c1   :  { %v3533_v18 = vmax.f32 %v3277_v8, 0.0  ;;  %v3661_v19 = vmax.f32 %v3405_v29, 0.0  ;;  %v2767_v20 = vadd.f32 %v7203_v26, %v2504_v10  ;;  %v2895_v21 = vadd.f32 %v7203_v26, %v2632_v12  ;;  %v3155_v5 = vld [vmem:[%s8305_s4 + $0x730] sm:$0xff] }
 0x1c2   :  { %3791 = vst.msk [vmem:[%s8306_s5 + $0x308] sm:$0xff] %vm3693_vm2, %v3534_v13  ;;  %3919 = vst.msk [vmem:[%s8306_s5 + $0x708] sm:$0xff] %vm3693_vm2, %v3662_v35  ;;  %v3280_v24 = vadd.f32 %v3024_v9, %v2768_v11  ;;  %v3408_v25 = vadd.f32 %v3152_v2, %v2896_v15  ;;  %v2507_v27 = vmul.f32 %v7180_v14, %v4636_v22  ;;  %v4642_v9 = vpop.f32.mrb[104].mxu0  ;;  %v4834_v2 = vpop.f32.mrb[104].mxu1 }
 0x1c3   :  { %v2635_v28 = vmul.f32 %v7180_v14, %v4828_v23  ;;  %3790 = vst.msk [vmem:[%s8306_s5 + $0x300] sm:$0xff] %vm3693_vm2, %v3533_v18  ;;  %3918 = vst.msk [vmem:[%s8306_s5 + $0x700] sm:$0xff] %vm3693_vm2, %v3661_v19  ;;  %v3279_v32 = vadd.f32 %v3023_v16, %v2767_v20  ;;  %v3407_v33 = vadd.f32 %v3151_v17, %v2895_v21  ;;  %v1640_v11 = vpop.f32.mrb[105].mxu0  ;;  %v2280_v15 = vpop.f32.mrb[105].mxu1  ;;  %v3030_v18 = vld [vmem:[%s8305_s4 + $0x348] sm:$0xff] }
 0x1c4   :  { %v2506_v37 = vmul.f32 %v7180_v14, %v1620_v30  ;;  %v2634_v38 = vmul.f32 %v7180_v14, %v2260_v31  ;;  %v3536_v39 = vmax.f32 %v3280_v24, 0.0  ;;  %v3664_v40 = vmax.f32 %v3408_v25, 0.0  ;;  %v7854_v19 = vld [vmem:[%s8303_s2] ss:$0 sm:$0xff] }
 0x1c5   :  { %v2770_v41 = vadd.f32 %v7203_v26, %v2507_v27  ;;  %v2898_v42 = vadd.f32 %v7203_v26, %v2635_v28  ;;  %v3535_v45 = vmax.f32 %v3279_v32, 0.0  ;;  %v3663_v46 = vmax.f32 %v3407_v33, 0.0  ;;  %v3029_v27 = vld [vmem:[%s8305_s4 + $0x340] sm:$0xff] }
 0x1c6   :  { %v2769_v47 = vadd.f32 %v7203_v26, %v2506_v37  ;;  %v2897_v48 = vadd.f32 %v7203_v26, %v2634_v38  ;;  %3793 = vst.msk [vmem:[%s8306_s5 + $0x318] sm:$0xff] %vm3693_vm2, %v3536_v39  ;;  %3921 = vst.msk [vmem:[%s8306_s5 + $0x718] sm:$0xff] %vm3693_vm2, %v3664_v40  ;;  %v2509_v53 = vmul.f32 %v7180_v14, %v4639_v49  ;;  %v3157_v28 = vld [vmem:[%s8305_s4 + $0x740] sm:$0xff] }
 0x1c7   :  { %v3282_v51 = vadd.f32 %v3026_v34, %v2770_v41  ;;  %v3410_v52 = vadd.f32 %v3154_v36, %v2898_v42  ;;  %v2637_v54 = vmul.f32 %v7180_v14, %v4831_v50  ;;  %3792 = vst.msk [vmem:[%s8306_s5 + $0x310] sm:$0xff] %vm3693_vm2, %v3535_v45  ;;  %3920 = vst.msk [vmem:[%s8306_s5 + $0x710] sm:$0xff] %vm3693_vm2, %v3663_v46  ;;  %v4645_v34 = vpop.f32.mrb[106].mxu0  ;;  %v4837_v36 = vpop.f32.mrb[106].mxu1  ;;  %v3160_v45 = vld [vmem:[%s8305_s4 + $0x758] sm:$0xff] }
 0x1c8   :  { %v3281_v57 = vadd.f32 %v3025_v43, %v2769_v47  ;;  %v3409_v58 = vadd.f32 %v3153_v44, %v2897_v48  ;;  %v2508_v61 = vmul.f32 %v7180_v14, %v1630_v55  ;;  %v2636_v62 = vmul.f32 %v7180_v14, %v2270_v56  ;;  %v1650_v41 = vpop.f32.mrb[107].mxu0  ;;  %v3032_v44 = vld [vmem:[%s8305_s4 + $0x358] sm:$0xff]  ;;  %v7897_v50 = vld [vmem:[%s8304_s3] ss:$0 sm:$0xff] }
 0x1c9   :  { %v3538_v63 = vmax.f32 %v3282_v51, 0.0  ;;  %v3666_v0 = vmax.f32 %v3410_v52, 0.0  ;;  %v2772_v1 = vadd.f32 %v7203_v26, %v2509_v53  ;;  %v2900_v3 = vadd.f32 %v7203_v26, %v2637_v54  ;;  %v3031_v53 = vld [vmem:[%s8305_s4 + $0x350] sm:$0xff] }
 0x1ca   :  { %v3537_v6 = vmax.f32 %v3281_v57, 0.0  ;;  %v3665_v7 = vmax.f32 %v3409_v58, 0.0  ;;  %v2771_v8 = vadd.f32 %v7203_v26, %v2508_v61  ;;  %v2899_v29 = vadd.f32 %v7203_v26, %v2636_v62  ;;  %v3159_v54 = vld [vmem:[%s8305_s4 + $0x750] sm:$0xff] }
 0x1cb   :  { %3795 = vst.msk [vmem:[%s8306_s5 + $0x328] sm:$0xff] %vm3693_vm2, %v3538_v63  ;;  %3923 = vst.msk [vmem:[%s8306_s5 + $0x728] sm:$0xff] %vm3693_vm2, %v3666_v0  ;;  %v3284_v10 = vadd.f32 %v3028_v59, %v2772_v1  ;;  %v3412_v12 = vadd.f32 %v3156_v60, %v2900_v3  ;;  %v2511_v13 = vmul.f32 %v7180_v14, %v4642_v9  ;;  %v4648_v59 = vpop.f32.mrb[108].mxu0 }
 0x1cc   :  { %v2639_v35 = vmul.f32 %v7180_v14, %v4834_v2  ;;  %3794 = vst.msk [vmem:[%s8306_s5 + $0x320] sm:$0xff] %vm3693_vm2, %v3537_v6  ;;  %3922 = vst.msk [vmem:[%s8306_s5 + $0x720] sm:$0xff] %vm3693_vm2, %v3665_v7  ;;  %v3283_v16 = vadd.f32 %v3027_v4, %v2771_v8  ;;  %v3411_v17 = vadd.f32 %v3155_v5, %v2899_v29  ;;  %v3158_v14 = vld [vmem:[%s8305_s4 + $0x748] sm:$0xff]  ;;  %v1660_v0 = vpop.f32.mrb[109].mxu0 }
 0x1cd   :  { %v2510_v20 = vmul.f32 %v7854_v19, %v1640_v11  ;;  %v2638_v21 = vmul.f32 %v7854_v19, %v2280_v15  ;;  %v3540_v22 = vmax.f32 %v3284_v10, 0.0  ;;  %v3668_v23 = vmax.f32 %v3412_v12, 0.0  ;;  %v3034_v4 = vld [vmem:[%s8305_s4 + $0x368] sm:$0xff]  ;;  %v3033_v10 = vld [vmem:[%s8305_s4 + $0x360] sm:$0xff] }
 0x1ce   :  { %v2774_v24 = vadd.f32 %v7203_v26, %v2511_v13  ;;  %v2902_v25 = vadd.f32 %v7203_v26, %v2639_v35  ;;  %v3539_v30 = vmax.f32 %v3283_v16, 0.0  ;;  %v3667_v31 = vmax.f32 %v3411_v17, 0.0  ;;  %v3162_v2 = vld [vmem:[%s8305_s4 + $0x768] sm:$0xff]  ;;  %v3161_v16 = vld [vmem:[%s8305_s4 + $0x760] sm:$0xff]  ;;  %v4651_v17 = vpop.f32.mrb[110].mxu0 }
 0x1cf   :  { %v2773_v32 = vadd.f32 %v7203_v26, %v2510_v20  ;;  %v2901_v33 = vadd.f32 %v7203_v26, %v2638_v21  ;;  %3797 = vst.msk [vmem:[%s8306_s5 + $0x338] sm:$0xff] %vm3693_vm2, %v3540_v22  ;;  %3925 = vst.msk [vmem:[%s8306_s5 + $0x738] sm:$0xff] %vm3693_vm2, %v3668_v23  ;;  %v2513_v39 = vmul.f32 %v7854_v19, %v4645_v34  ;;  %v2290_v26 = vpop.f32.mrb[107].mxu1  ;;  %v1670_v22 = vpop.f32.mrb[111].mxu0  ;;  %v3164_v34 = vld [vmem:[%s8305_s4 + $0x778] sm:$0xff] }
 0x1d0   :  { %v3286_v37 = vadd.f32 %v3030_v18, %v2774_v24  ;;  %v3414_v38 = vadd.f32 %v3158_v14, %v2902_v25  ;;  %v2641_v40 = vmul.f32 %v7854_v19, %v4837_v36  ;;  %3796 = vst.msk [vmem:[%s8306_s5 + $0x330] sm:$0xff] %vm3693_vm2, %v3539_v30  ;;  %3924 = vst.msk [vmem:[%s8306_s5 + $0x730] sm:$0xff] %vm3693_vm2, %v3667_v31  ;;  %v4840_v63 = vpop.f32.mrb[108].mxu1  ;;  %v3036_v25 = vld [vmem:[%s8305_s4 + $0x378] sm:$0xff]  ;;  %v3035_v36 = vld [vmem:[%s8305_s4 + $0x370] sm:$0xff] }
 0x1d1   :  { %v3285_v42 = vadd.f32 %v3029_v27, %v2773_v32  ;;  %v3413_v43 = vadd.f32 %v3157_v28, %v2901_v33  ;;  %v2512_v46 = vmul.f32 %v7854_v19, %v1650_v41  ;;  %v2640_v47 = vmul.f32 %v7854_v19, %v2290_v26  ;;  %v2300_v7 = vpop.f32.mrb[109].mxu1  ;;  %v3163_v26 = vld [vmem:[%s8305_s4 + $0x770] sm:$0xff] }
 0x1d2   :  { %v3542_v48 = vmax.f32 %v3286_v37, 0.0  ;;  %v3670_v49 = vmax.f32 %v3414_v38, 0.0  ;;  %v2776_v51 = vadd.f32 %v7897_v50, %v2513_v39  ;;  %v2904_v52 = vadd.f32 %v7897_v50, %v2641_v40  ;;  %v4843_v21 = vpop.f32.mrb[110].mxu1 }
 0x1d3   :  { %v3541_v55 = vmax.f32 %v3285_v42, 0.0  ;;  %v3669_v56 = vmax.f32 %v3413_v43, 0.0  ;;  %v2775_v57 = vadd.f32 %v7897_v50, %v2512_v46  ;;  %v2903_v58 = vadd.f32 %v7897_v50, %v2640_v47  ;;  %v2310_v30 = vpop.f32.mrb[111].mxu1  ;;  %v4654_v42 = vpop.f32.mrb[112].mxu0 }
 0x1d4   :  { %3799 = vst.msk [vmem:[%s8306_s5 + $0x348] sm:$0xff] %vm3693_vm2, %v3542_v48  ;;  %3927 = vst.msk [vmem:[%s8306_s5 + $0x748] sm:$0xff] %vm3693_vm2, %v3670_v49  ;;  %v3288_v60 = vadd.f32 %v3032_v44, %v2776_v51  ;;  %v3416_v61 = vadd.f32 %v3160_v45, %v2904_v52  ;;  %v2515_v62 = vmul.f32 %v7854_v19, %v4648_v59  ;;  %v4846_v47 = vpop.f32.mrb[112].mxu1  ;;  %v1680_v48 = vpop.f32.mrb[113].mxu0  ;;  %v3038_v52 = vld [vmem:[%s8305_s4 + $0x388] sm:$0xff] }
 0x1d5   :  { %3798 = vst.msk [vmem:[%s8306_s5 + $0x340] sm:$0xff] %vm3693_vm2, %v3541_v55  ;;  %3926 = vst.msk [vmem:[%s8306_s5 + $0x740] sm:$0xff] %vm3693_vm2, %v3669_v56  ;;  %v3287_v1 = vadd.f32 %v3031_v53, %v2775_v57  ;;  %v3415_v3 = vadd.f32 %v3159_v54, %v2903_v58  ;;  %v2643_v5 = vmul.f32 %v7854_v19, %v4840_v63  ;;  %v2320_v55 = vpop.f32.mrb[113].mxu1  ;;  %v3166_v59 = vld [vmem:[%s8305_s4 + $0x788] sm:$0xff] }
 0x1d6   :  { %v2514_v6 = vmul.f32 %v7854_v19, %v1660_v0  ;;  %v3544_v8 = vmax.f32 %v3288_v60, 0.0  ;;  %v3672_v29 = vmax.f32 %v3416_v61, 0.0  ;;  %v2778_v9 = vadd.f32 %v7897_v50, %v2515_v62  ;;  %v3037_v60 = vld [vmem:[%s8305_s4 + $0x380] sm:$0xff] }
 0x1d7   :  { %v2642_v12 = vmul.f32 %v7854_v19, %v2300_v7  ;;  %v3543_v13 = vmax.f32 %v3287_v1, 0.0  ;;  %v3671_v35 = vmax.f32 %v3415_v3, 0.0  ;;  %v2906_v11 = vadd.f32 %v7897_v50, %v2643_v5  ;;  %v3165_v3 = vld [vmem:[%s8305_s4 + $0x780] sm:$0xff] }
 0x1d8   :  { %v2777_v15 = vadd.f32 %v7897_v50, %v2514_v6  ;;  %3801 = vst.msk [vmem:[%s8306_s5 + $0x358] sm:$0xff] %vm3693_vm2, %v3544_v8  ;;  %3929 = vst.msk [vmem:[%s8306_s5 + $0x758] sm:$0xff] %vm3693_vm2, %v3672_v29  ;;  %v3290_v18 = vadd.f32 %v3034_v4, %v2778_v9  ;;  %v2517_v20 = vmul.f32 %v7854_v19, %v4651_v17  ;;  %v4657_v4 = vpop.f32.mrb[114].mxu0  ;;  %v4849_v29 = vpop.f32.mrb[114].mxu1 }
 0x1d9   :  { %v2905_v14 = vadd.f32 %v7897_v50, %v2642_v12  ;;  %3800 = vst.msk [vmem:[%s8306_s5 + $0x350] sm:$0xff] %vm3693_vm2, %v3543_v13  ;;  %3928 = vst.msk [vmem:[%s8306_s5 + $0x750] sm:$0xff] %vm3693_vm2, %v3671_v35  ;;  %v3418_v23 = vadd.f32 %v3162_v2, %v2906_v11  ;;  %v2645_v27 = vmul.f32 %v7854_v19, %v4843_v21  ;;  %v1690_v9 = vpop.f32.mrb[115].mxu0  ;;  %v3040_v12 = vld [vmem:[%s8305_s4 + $0x398] sm:$0xff]  ;;  %v2330_v11 = vpop.f32.mrb[115].mxu1 }
 0x1da   :  { %v3289_v24 = vadd.f32 %v3033_v10, %v2777_v15  ;;  %v2516_v28 = vmul.f32 %v7854_v19, %v1670_v22  ;;  %v3546_v31 = vmax.f32 %v3290_v18, 0.0  ;;  %v2780_v33 = vadd.f32 %v7897_v50, %v2517_v20  ;;  %v3168_v18 = vld [vmem:[%s8305_s4 + $0x798] sm:$0xff] }
 0x1db   :  { %v3417_v32 = vadd.f32 %v3161_v16, %v2905_v14  ;;  %v2644_v37 = vmul.f32 %v7854_v19, %v2310_v30  ;;  %v3674_v38 = vmax.f32 %v3418_v23, 0.0  ;;  %v2908_v40 = vadd.f32 %v7897_v50, %v2645_v27  ;;  %v3039_v14 = vld [vmem:[%s8305_s4 + $0x390] sm:$0xff]  ;;  %v4660_v27 = vpop.f32.mrb[116].mxu0 }
 0x1dc   :  { %v3545_v39 = vmax.f32 %v3289_v24, 0.0  ;;  %v2779_v41 = vadd.f32 %v7897_v50, %v2516_v28  ;;  %3803 = vst.msk [vmem:[%s8306_s5 + $0x368] sm:$0xff] %vm3693_vm2, %v3546_v31  ;;  %v3292_v44 = vadd.f32 %v3036_v25, %v2780_v33  ;;  %v2519_v46 = vmul.f32 %v7854_v19, %v4654_v42  ;;  %v3167_v25 = vld [vmem:[%s8305_s4 + $0x790] sm:$0xff]  ;;  %v4852_v33 = vpop.f32.mrb[116].mxu1 }
 0x1dd   :  { %v3673_v43 = vmax.f32 %v3417_v32, 0.0  ;;  %v2907_v45 = vadd.f32 %v7897_v50, %v2644_v37  ;;  %3931 = vst.msk [vmem:[%s8306_s5 + $0x768] sm:$0xff] %vm3693_vm2, %v3674_v38  ;;  %v3420_v49 = vadd.f32 %v3164_v34, %v2908_v40  ;;  %v2647_v53 = vmul.f32 %v7854_v19, %v4846_v47  ;;  %v1700_v34 = vpop.f32.mrb[117].mxu0  ;;  %v3042_v38 = vld [vmem:[%s8305_s4 + $0x3a8] sm:$0xff] }
 0x1de   :  { %3802 = vst.msk [vmem:[%s8306_s5 + $0x360] sm:$0xff] %vm3693_vm2, %v3545_v39  ;;  %v3291_v51 = vadd.f32 %v3035_v36, %v2779_v41  ;;  %v2518_v54 = vmul.f32 %v7854_v19, %v1680_v48  ;;  %v3548_v56 = vmax.f32 %v3292_v44, 0.0  ;;  %v2782_v58 = vadd.f32 %v7897_v50, %v2519_v46  ;;  %v2340_v41 = vpop.f32.mrb[117].mxu1  ;;  %v3170_v44 = vld [vmem:[%s8305_s4 + $0x7a8] sm:$0xff] }
 0x1df   :  { %3930 = vst.msk [vmem:[%s8306_s5 + $0x760] sm:$0xff] %vm3693_vm2, %v3673_v43  ;;  %v3419_v57 = vadd.f32 %v3163_v26, %v2907_v45  ;;  %v2646_v61 = vmul.f32 %v7854_v19, %v2320_v55  ;;  %v3676_v62 = vmax.f32 %v3420_v49, 0.0  ;;  %v2910_v0 = vadd.f32 %v7897_v50, %v2647_v53  ;;  %v3041_v45 = vld [vmem:[%s8305_s4 + $0x3a0] sm:$0xff]  ;;  %v4663_v53 = vpop.f32.mrb[118].mxu0 }
 0x1e0   :  { %v3547_v63 = vmax.f32 %v3291_v51, 0.0  ;;  %v2781_v1 = vadd.f32 %v7897_v50, %v2518_v54  ;;  %3805 = vst.msk [vmem:[%s8306_s5 + $0x378] sm:$0xff] %vm3693_vm2, %v3548_v56  ;;  %v3294_v6 = vadd.f32 %v3038_v52, %v2782_v58  ;;  %v2521_v8 = vmul.f32 %v7854_v19, %v4657_v4  ;;  %v3169_v52 = vld [vmem:[%s8305_s4 + $0x7a0] sm:$0xff]  ;;  %v4855_v58 = vpop.f32.mrb[118].mxu1 }
 0x1e1   :  { %v3675_v5 = vmax.f32 %v3419_v57, 0.0  ;;  %v2909_v7 = vadd.f32 %v7897_v50, %v2646_v61  ;;  %3933 = vst.msk [vmem:[%s8306_s5 + $0x778] sm:$0xff] %vm3693_vm2, %v3676_v62  ;;  %v3422_v2 = vadd.f32 %v3166_v59, %v2910_v0  ;;  %v2649_v13 = vmul.f32 %v7854_v19, %v4849_v29  ;;  %v1710_v59 = vpop.f32.mrb[119].mxu0  ;;  %v3044_v62 = vld [vmem:[%s8305_s4 + $0x3b8] sm:$0xff] }
 0x1e2   :  { %3804 = vst.msk [vmem:[%s8306_s5 + $0x370] sm:$0xff] %vm3693_vm2, %v3547_v63  ;;  %v3293_v10 = vadd.f32 %v3037_v60, %v2781_v1  ;;  %v2520_v35 = vmul.f32 %v7854_v19, %v1690_v9  ;;  %v3550_v15 = vmax.f32 %v3294_v6, 0.0  ;;  %v2784_v17 = vadd.f32 %v7897_v50, %v2521_v8  ;;  %v2350_v1 = vpop.f32.mrb[119].mxu1  ;;  %v3172_v6 = vld [vmem:[%s8305_s4 + $0x7b8] sm:$0xff] }
 0x1e3   :  { %3932 = vst.msk [vmem:[%s8306_s5 + $0x770] sm:$0xff] %vm3693_vm2, %v3675_v5  ;;  %v3421_v16 = vadd.f32 %v3165_v3, %v2909_v7  ;;  %v2648_v20 = vmul.f32 %v7854_v19, %v2330_v11  ;;  %v3678_v21 = vmax.f32 %v3422_v2, 0.0  ;;  %v2912_v23 = vadd.f32 %v7897_v50, %v2649_v13  ;;  %v3043_v7 = vld [vmem:[%s8305_s4 + $0x3b0] sm:$0xff]  ;;  %v4666_v13 = vpop.f32.mrb[120].mxu0 }
 0x1e4   :  { %v3549_v22 = vmax.f32 %v3293_v10, 0.0  ;;  %v2783_v24 = vadd.f32 %v7897_v50, %v2520_v35  ;;  %3807 = vst.msk [vmem:[%s8306_s5 + $0x388] sm:$0xff] %vm3693_vm2, %v3550_v15  ;;  %v3296_v30 = vadd.f32 %v3040_v12, %v2784_v17  ;;  %v2523_v32 = vmul.f32 %v7854_v19, %v4660_v27  ;;  %v3171_v12 = vld [vmem:[%s8305_s4 + $0x7b0] sm:$0xff]  ;;  %v4858_v17 = vpop.f32.mrb[120].mxu1 }
 0x1e5   :  { %v3677_v28 = vmax.f32 %v3421_v16, 0.0  ;;  %v2911_v31 = vadd.f32 %v7897_v50, %v2648_v20  ;;  %3935 = vst.msk [vmem:[%s8306_s5 + $0x788] sm:$0xff] %vm3693_vm2, %v3678_v21  ;;  %v3424_v36 = vadd.f32 %v3168_v18, %v2912_v23  ;;  %v2651_v39 = vmul.f32 %v7854_v19, %v4852_v33  ;;  %v1720_v18 = vpop.f32.mrb[121].mxu0  ;;  %v3046_v21 = vld [vmem:[%s8305_s4 + $0x3c8] sm:$0xff] }
 0x1e6   :  { %3806 = vst.msk [vmem:[%s8306_s5 + $0x380] sm:$0xff] %vm3693_vm2, %v3549_v22  ;;  %v3295_v37 = vadd.f32 %v3039_v14, %v2783_v24  ;;  %v2522_v40 = vmul.f32 %v7854_v19, %v1700_v34  ;;  %v3552_v26 = vmax.f32 %v3296_v30, 0.0  ;;  %v2786_v43 = vadd.f32 %v7897_v50, %v2523_v32  ;;  %v2360_v24 = vpop.f32.mrb[121].mxu1  ;;  %v3174_v30 = vld [vmem:[%s8305_s4 + $0x7c8] sm:$0xff] }
 0x1e7   :  { %3934 = vst.msk [vmem:[%s8306_s5 + $0x780] sm:$0xff] %vm3693_vm2, %v3677_v28  ;;  %v3423_v42 = vadd.f32 %v3167_v25, %v2911_v31  ;;  %v2650_v46 = vmul.f32 %v7854_v19, %v2340_v41  ;;  %v3680_v47 = vmax.f32 %v3424_v36, 0.0  ;;  %v2914_v49 = vadd.f32 %v7897_v50, %v2651_v39  ;;  %v3045_v31 = vld [vmem:[%s8305_s4 + $0x3c0] sm:$0xff]  ;;  %v4669_v39 = vpop.f32.mrb[122].mxu0 }
 0x1e8   :  { %v3551_v48 = vmax.f32 %v3295_v37, 0.0  ;;  %v2785_v51 = vadd.f32 %v7897_v50, %v2522_v40  ;;  %3809 = vst.msk [vmem:[%s8306_s5 + $0x398] sm:$0xff] %vm3693_vm2, %v3552_v26  ;;  %v3298_v55 = vadd.f32 %v3042_v38, %v2786_v43  ;;  %v2525_v57 = vmul.f32 %v7854_v19, %v4663_v53  ;;  %v3173_v38 = vld [vmem:[%s8305_s4 + $0x7c0] sm:$0xff]  ;;  %v4861_v43 = vpop.f32.mrb[122].mxu1 }
 0x1e9   :  { %v3679_v54 = vmax.f32 %v3423_v42, 0.0  ;;  %v2913_v56 = vadd.f32 %v7897_v50, %v2650_v46  ;;  %3937 = vst.msk [vmem:[%s8306_s5 + $0x798] sm:$0xff] %vm3693_vm2, %v3680_v47  ;;  %v3426_v60 = vadd.f32 %v3170_v44, %v2914_v49  ;;  %v2653_v63 = vmul.f32 %v7854_v19, %v4855_v58  ;;  %v1730_v44 = vpop.f32.mrb[123].mxu0  ;;  %v3048_v47 = vld [vmem:[%s8305_s4 + $0x3d8] sm:$0xff] }
 0x1ea   :  { %3808 = vst.msk [vmem:[%s8306_s5 + $0x390] sm:$0xff] %vm3693_vm2, %v3551_v48  ;;  %v3297_v61 = vadd.f32 %v3041_v45, %v2785_v51  ;;  %v2524_v0 = vmul.f32 %v7854_v19, %v1710_v59  ;;  %v3554_v3 = vmax.f32 %v3298_v55, 0.0  ;;  %v2788_v5 = vadd.f32 %v7897_v50, %v2525_v57  ;;  %v2370_v51 = vpop.f32.mrb[123].mxu1  ;;  %v3176_v55 = vld [vmem:[%s8305_s4 + $0x7d8] sm:$0xff] }
 0x1eb   :  { %3936 = vst.msk [vmem:[%s8306_s5 + $0x790] sm:$0xff] %vm3693_vm2, %v3679_v54  ;;  %v3425_v4 = vadd.f32 %v3169_v52, %v2913_v56  ;;  %v2652_v8 = vmul.f32 %v7854_v19, %v2350_v1  ;;  %v3682_v29 = vmax.f32 %v3426_v60, 0.0  ;;  %v2916_v2 = vadd.f32 %v7897_v50, %v2653_v63  ;;  %v3047_v56 = vld [vmem:[%s8305_s4 + $0x3d0] sm:$0xff]  ;;  %v4672_v63 = vpop.f32.mrb[124].mxu0 }
 0x1ec   :  { %v3553_v9 = vmax.f32 %v3297_v61, 0.0  ;;  %v2787_v10 = vadd.f32 %v7897_v50, %v2524_v0  ;;  %3811 = vst.msk [vmem:[%s8306_s5 + $0x3a8] sm:$0xff] %vm3693_vm2, %v3554_v3  ;;  %v3300_v11 = vadd.f32 %v3044_v62, %v2788_v5  ;;  %v2527_v16 = vmul.f32 %v7854_v19, %v4666_v13  ;;  %v3175_v62 = vld [vmem:[%s8305_s4 + $0x7d0] sm:$0xff]  ;;  %v4864_v5 = vpop.f32.mrb[124].mxu1 }
 0x1ed   :  { %v3681_v35 = vmax.f32 %v3425_v4, 0.0  ;;  %v2915_v15 = vadd.f32 %v7897_v50, %v2652_v8  ;;  %3939 = vst.msk [vmem:[%s8306_s5 + $0x7a8] sm:$0xff] %vm3693_vm2, %v3682_v29  ;;  %v3428_v14 = vadd.f32 %v3172_v6, %v2916_v2  ;;  %v2655_v22 = vmul.f32 %v7854_v19, %v4858_v17  ;;  %v1740_v6 = vpop.f32.mrb[125].mxu0  ;;  %v3050_v29 = vld [vmem:[%s8305_s4 + $0x3e8] sm:$0xff] }
 0x1ee   :  { %3810 = vst.msk [vmem:[%s8306_s5 + $0x3a0] sm:$0xff] %vm3693_vm2, %v3553_v9  ;;  %v3299_v20 = vadd.f32 %v3043_v7, %v2787_v10  ;;  %v2526_v23 = vmul.f32 %v7854_v19, %v1720_v18  ;;  %v3556_v25 = vmax.f32 %v3300_v11, 0.0  ;;  %v2790_v28 = vadd.f32 %v7897_v50, %v2527_v16  ;;  %v2380_v10 = vpop.f32.mrb[125].mxu1  ;;  %v3178_v11 = vld [vmem:[%s8305_s4 + $0x7e8] sm:$0xff] }
 0x1ef   :  { %3938 = vst.msk [vmem:[%s8306_s5 + $0x7a0] sm:$0xff] %vm3693_vm2, %v3681_v35  ;;  %v3427_v27 = vadd.f32 %v3171_v12, %v2915_v15  ;;  %v2654_v32 = vmul.f32 %v7854_v19, %v2360_v24  ;;  %v3684_v33 = vmax.f32 %v3428_v14, 0.0  ;;  %v2918_v36 = vadd.f32 %v7897_v50, %v2655_v22  ;;  %v3049_v15 = vld [vmem:[%s8305_s4 + $0x3e0] sm:$0xff]  ;;  %v4675_v22 = vpop.f32.mrb[126].mxu0 }
 0x1f0   :  { %v3555_v34 = vmax.f32 %v3299_v20, 0.0  ;;  %v2789_v37 = vadd.f32 %v7897_v50, %v2526_v23  ;;  %3813 = vst.msk [vmem:[%s8306_s5 + $0x3b8] sm:$0xff] %vm3693_vm2, %v3556_v25  ;;  %v3302_v41 = vadd.f32 %v3046_v21, %v2790_v28  ;;  %v2529_v42 = vmul.f32 %v7854_v19, %v4669_v39  ;;  %v3177_v21 = vld [vmem:[%s8305_s4 + $0x7e0] sm:$0xff]  ;;  %v4867_v28 = vpop.f32.mrb[126].mxu1 }
 0x1f1   :  { %v3683_v40 = vmax.f32 %v3427_v27, 0.0  ;;  %v2917_v26 = vadd.f32 %v7897_v50, %v2654_v32  ;;  %3941 = vst.msk [vmem:[%s8306_s5 + $0x7b8] sm:$0xff] %vm3693_vm2, %v3684_v33  ;;  %v3430_v45 = vadd.f32 %v3174_v30, %v2918_v36  ;;  %v2657_v48 = vmul.f32 %v7854_v19, %v4861_v43  ;;  %v1750_v30 = vpop.f32.mrb[127].mxu0  ;;  %v3052_v33 = vld [vmem:[%s8305_s4 + $0x3f8] sm:$0xff] }
 0x1f2   :  { %3812 = vst.msk [vmem:[%s8306_s5 + $0x3b0] sm:$0xff] %vm3693_vm2, %v3555_v34  ;;  %v3301_v46 = vadd.f32 %v3045_v31, %v2789_v37  ;;  %v2528_v49 = vmul.f32 %v7854_v19, %v1730_v44  ;;  %v3558_v52 = vmax.f32 %v3302_v41, 0.0  ;;  %v2792_v54 = vadd.f32 %v7897_v50, %v2529_v42  ;;  %v2390_v37 = vpop.f32.mrb[127].mxu1  ;;  %v3180_v41 = vld [vmem:[%s8305_s4 + $0x7f8] sm:$0xff] }
 0x1f3   :  { %3940 = vst.msk [vmem:[%s8306_s5 + $0x7b0] sm:$0xff] %vm3693_vm2, %v3683_v40  ;;  %v3429_v53 = vadd.f32 %v3173_v38, %v2917_v26  ;;  %v2656_v57 = vmul.f32 %v7854_v19, %v2370_v51  ;;  %v3686_v58 = vmax.f32 %v3430_v45, 0.0  ;;  %v2920_v60 = vadd.f32 %v7897_v50, %v2657_v48  ;;  %v3051_v26 = vld [vmem:[%s8305_s4 + $0x3f0] sm:$0xff] }
 0x1f4   :  { %v3557_v59 = vmax.f32 %v3301_v46, 0.0  ;;  %v2791_v61 = vadd.f32 %v7897_v50, %v2528_v49  ;;  %3815 = vst.msk [vmem:[%s8306_s5 + $0x3c8] sm:$0xff] %vm3693_vm2, %v3558_v52  ;;  %v3304_v1 = vadd.f32 %v3048_v47, %v2792_v54  ;;  %v2531_v4 = vmul.f32 %v7854_v19, %v4672_v63  ;;  %v3179_v47 = vld [vmem:[%s8305_s4 + $0x7f0] sm:$0xff] }
 0x1f5   :  { %v3685_v0 = vmax.f32 %v3429_v53, 0.0  ;;  %v2919_v3 = vadd.f32 %v7897_v50, %v2656_v57  ;;  %3943 = vst.msk [vmem:[%s8306_s5 + $0x7c8] sm:$0xff] %vm3693_vm2, %v3686_v58  ;;  %v3432_v7 = vadd.f32 %v3176_v55, %v2920_v60  ;;  %v2659_v9 = vmul.f32 %v7854_v19, %v4864_v5 }
 0x1f6   :  { %3814 = vst.msk [vmem:[%s8306_s5 + $0x3c0] sm:$0xff] %vm3693_vm2, %v3557_v59  ;;  %v3303_v8 = vadd.f32 %v3047_v56, %v2791_v61  ;;  %v2530_v2 = vmul.f32 %v7854_v19, %v1740_v6  ;;  %v3560_v12 = vmax.f32 %v3304_v1, 0.0  ;;  %v2794_v35 = vadd.f32 %v7897_v50, %v2531_v4 }
 0x1f7   :  { %3942 = vst.msk [vmem:[%s8306_s5 + $0x7c0] sm:$0xff] %vm3693_vm2, %v3685_v0  ;;  %v3431_v13 = vadd.f32 %v3175_v62, %v2919_v3  ;;  %v2658_v16 = vmul.f32 %v7854_v19, %v2380_v10  ;;  %v3688_v17 = vmax.f32 %v3432_v7, 0.0  ;;  %v2922_v14 = vadd.f32 %v7897_v50, %v2659_v9 }
 0x1f8   :  { %v3559_v18 = vmax.f32 %v3303_v8, 0.0  ;;  %v2793_v20 = vadd.f32 %v7897_v50, %v2530_v2  ;;  %3817 = vst.msk [vmem:[%s8306_s5 + $0x3d8] sm:$0xff] %vm3693_vm2, %v3560_v12  ;;  %v3306_v24 = vadd.f32 %v3050_v29, %v2794_v35  ;;  %v2533_v27 = vmul.f32 %v7854_v19, %v4675_v22 }
 0x1f9   :  { %v3687_v23 = vmax.f32 %v3431_v13, 0.0  ;;  %v2921_v25 = vadd.f32 %v7897_v50, %v2658_v16  ;;  %3945 = vst.msk [vmem:[%s8306_s5 + $0x7d8] sm:$0xff] %vm3693_vm2, %v3688_v17  ;;  %v3434_v31 = vadd.f32 %v3178_v11, %v2922_v14  ;;  %v2661_v34 = vmul.f32 %v7854_v19, %v4867_v28 }
 0x1fa   :  { %3816 = vst.msk [vmem:[%s8306_s5 + $0x3d0] sm:$0xff] %vm3693_vm2, %v3559_v18  ;;  %v3305_v32 = vadd.f32 %v3049_v15, %v2793_v20  ;;  %v2532_v36 = vmul.f32 %v7854_v19, %v1750_v30  ;;  %v3562_v38 = vmax.f32 %v3306_v24, 0.0  ;;  %v2796_v40 = vadd.f32 %v7897_v50, %v2533_v27 }
 0x1fb   :  { %3944 = vst.msk [vmem:[%s8306_s5 + $0x7d0] sm:$0xff] %vm3693_vm2, %v3687_v23  ;;  %v3433_v39 = vadd.f32 %v3177_v21, %v2921_v25  ;;  %v2660_v42 = vmul.f32 %v7854_v19, %v2390_v37  ;;  %v3690_v43 = vmax.f32 %v3434_v31, 0.0  ;;  %v2924_v45 = vadd.f32 %v7897_v50, %v2661_v34 }
 0x1fc   :  { %v3561_v44 = vmax.f32 %v3305_v32, 0.0  ;;  %v2795_v46 = vadd.f32 %v7897_v50, %v2532_v36  ;;  %3819 = vst.msk [vmem:[%s8306_s5 + $0x3e8] sm:$0xff] %vm3693_vm2, %v3562_v38  ;;  %v3308_v49 = vadd.f32 %v3052_v33, %v2796_v40 }
 0x1fd   :  { %v3689_v48 = vmax.f32 %v3433_v39, 0.0  ;;  %v2923_v51 = vadd.f32 %v7897_v50, %v2660_v42  ;;  %3947 = vst.msk [vmem:[%s8306_s5 + $0x7e8] sm:$0xff] %vm3693_vm2, %v3690_v43  ;;  %v3436_v19 = vadd.f32 %v3180_v41, %v2924_v45 }
 0x1fe   :  { %3818 = vst.msk [vmem:[%s8306_s5 + $0x3e0] sm:$0xff] %vm3693_vm2, %v3561_v44  ;;  %v3307_v52 = vadd.f32 %v3051_v26, %v2795_v46  ;;  %v3564_v53 = vmax.f32 %v3308_v49, 0.0 }
 0x1ff   :  { %3946 = vst.msk [vmem:[%s8306_s5 + $0x7e0] sm:$0xff] %vm3693_vm2, %v3689_v48  ;;  %v3435_v54 = vadd.f32 %v3179_v47, %v2923_v51  ;;  %v3692_v50 = vmax.f32 %v3436_v19, 0.0 }
 0x200   :  { %v3563_v55 = vmax.f32 %v3307_v52, 0.0  ;;  %3821 = vst.msk [vmem:[%s8306_s5 + $0x3f8] sm:$0xff] %vm3693_vm2, %v3564_v53 }
 0x201   :  { %v3691_v56 = vmax.f32 %v3435_v54, 0.0  ;;  %3949 = vst.msk [vmem:[%s8306_s5 + $0x7f8] sm:$0xff] %vm3693_vm2, %v3692_v50 }
 0x202   :  { %3820 = vst.msk [vmem:[%s8306_s5 + $0x3f0] sm:$0xff] %vm3693_vm2, %v3563_v55 }
 0x203   :  { %3948 = vst.msk [vmem:[%s8306_s5 + $0x7f0] sm:$0xff] %vm3693_vm2, %v3691_v56 }

// kernel: embedding_map_net_forward.11
= control target key start
LH: loop header
LB: loop body
LE: loop exit
PB: predicated region body
PF: predicated region fallthrough
CT: control target
= control target key end

     0   :  { %vm89_vm0 = vcmask 293888   ;;  %vm282_vm1 = vcmask 1043456   ;;  %vm949_vm4 = vcmask 130048   ;;  %s2105_s1 = inlined_call_operand.vmem [shape: f32[36,16], index: 1, kind: input, shape index: {}]   ;;  %s2106_s0 = inlined_call_operand.vmem [shape: f32[512,36], index: 0, kind: input, shape index: {}]   ;;  %s2107_s4 = inlined_call_operand.vmem [shape: f32[1,16], index: 4, kind: input, shape index: {}]   ;;  %s2108_s2 = inlined_call_operand.vmem [shape: f32[1,16], index: 2, kind: input, shape index: {}]   ;;  %s2109_s3 = inlined_call_operand.vmem [shape: f32[1,16], index: 3, kind: input, shape index: {}]   ;;  %s2110_s5 = inlined_call_operand.vmem [shape: f32[512,16], index: 5, kind: output, shape index: {}]  }
   0x1   :  { %v84_v0 = vld [vmem:[%s2105_s1] sm:$0xff]  ;;  %v85_v1 = vld [vmem:[%s2105_s1 + $0x8] sm:$0xff]  ;;  %v86_v2 = vld [vmem:[%s2105_s1 + $0x10] sm:$0xff] }
   0x2   :  { %v1260_v3 = vpack.c.bf16 %v85_v1, %v84_v0  ;;  %v87_v4 = vld [vmem:[%s2105_s1 + $0x18] sm:$0xff]  ;;  %v20_v5 = vld [vmem:[%s2106_s0] sm:$0xff]  ;;  %v21_v9 = vld [vmem:[%s2106_s0 + $0x8] sm:$0xff] }
   0x3   :  { %v1264_v6 = vpack.c.bf16 %v87_v4, %v86_v2  ;;  %1164 = vmatprep.mubr.msk.f32.mxu0 %vm89_vm0, %v20_v5  ;;  %v52_v7 = vld [vmem:[%s2106_s0 + $0x100] sm:$0xff]  ;;  %v53_v10 = vld [vmem:[%s2106_s0 + $0x108] sm:$0xff]  ;;  %v22_v11 = vld [vmem:[%s2106_s0 + $0x10] sm:$0xff] }
   0x4   :  { %1261 = vmatprep.subr.bf16.mxu0 %v1260_v3  ;;  %1268 = vmatprep.subr.bf16.mxu1 %v1260_v3  ;;  %v88_v8 = vld [vmem:[%s2105_s1 + $0x20] sm:$0xf]  ;;  %v54_v12 = vld [vmem:[%s2106_s0 + $0x110] sm:$0xff]  ;;  %v23_v13 = vld [vmem:[%s2106_s0 + $0x18] sm:$0xff] }
   0x5   :  { %1263 = vmatpush3.bf16.msra.mxu0 %v1260_v3  ;;  %1271 = vmatpush3.bf16.msra.mxu1 %v1260_v3  ;;  %v55_v14 = vld [vmem:[%s2106_s0 + $0x118] sm:$0xff]  ;;  %v24_v15 = vld [vmem:[%s2106_s0 + $0x20] sm:$0xff]  ;;  %v25_v17 = vld [vmem:[%s2106_s0 + $0x28] sm:$0xff] }
   0x6   :  { %1265 = vmatprep.subr.bf16.mxu0 %v1264_v6  ;;  %1269 = vmatprep.subr.bf16.mxu1 %v1264_v6  ;;  %v56_v16 = vld [vmem:[%s2106_s0 + $0x120] sm:$0xff]  ;;  %v57_v18 = vld [vmem:[%s2106_s0 + $0x128] sm:$0xff]  ;;  %v26_v19 = vld [vmem:[%s2106_s0 + $0x30] sm:$0xff] }
   0x7   :  { %1212 = vmatprep.mubr.msk.f32.mxu1 %vm89_vm0, %v52_v7  ;;  %v58_v20 = vld [vmem:[%s2106_s0 + $0x130] sm:$0xff]  ;;  %v27_v21 = vld [vmem:[%s2106_s0 + $0x38] sm:$0xff]  ;;  %v28_v23 = vld [vmem:[%s2106_s0 + $0x40] sm:$0xff]  ;;  %v880_v7 = vlaneseq }
   0x8   :  { %v59_v22 = vld [vmem:[%s2106_s0 + $0x138] sm:$0xff]  ;;  %v60_v24 = vld [vmem:[%s2106_s0 + $0x140] sm:$0xff]  ;;  %v29_v25 = vld [vmem:[%s2106_s0 + $0x48] sm:$0xff] }
   0x9   :  { %1267 = vmatpush3.bf16.msra.mxu0 %v1264_v6  ;;  %1272 = vmatpush3.bf16.msra.mxu1 %v1264_v6  ;;  %v61_v26 = vld [vmem:[%s2106_s0 + $0x148] sm:$0xff]  ;;  %v30_v27 = vld [vmem:[%s2106_s0 + $0x50] sm:$0xff]  ;;  %v31_v29 = vld [vmem:[%s2106_s0 + $0x58] sm:$0xff] }
   0xa   :  { %1162 = vmatprep.subr.msk.mxu0 %vm282_vm1, %v88_v8  ;;  %1270 = vmatprep.subr.msk.mxu1 %vm282_vm1, %v88_v8  ;;  %v62_v28 = vld [vmem:[%s2106_s0 + $0x150] sm:$0xff]  ;;  %v63_v30 = vld [vmem:[%s2106_s0 + $0x158] sm:$0xff]  ;;  %v32_v31 = vld [vmem:[%s2106_s0 + $0x60] sm:$0xff] }
   0xb   :  { %v64_v32 = vld [vmem:[%s2106_s0 + $0x160] sm:$0xff]  ;;  %v33_v33 = vld [vmem:[%s2106_s0 + $0x68] sm:$0xff]  ;;  %v34_v35 = vld [vmem:[%s2106_s0 + $0x70] sm:$0xff] }
   0xc   :  { %v65_v34 = vld [vmem:[%s2106_s0 + $0x168] sm:$0xff]  ;;  %v66_v36 = vld [vmem:[%s2106_s0 + $0x170] sm:$0xff]  ;;  %v35_v37 = vld [vmem:[%s2106_s0 + $0x78] sm:$0xff] }
   0xd   :  { %1163 = vmatpush3.msk.msra.mxu0 %vm282_vm1, %v88_v8  ;;  %1273 = vmatpush3.msk.msra.mxu1 %vm282_vm1, %v88_v8  ;;  %v67_v38 = vld [vmem:[%s2106_s0 + $0x178] sm:$0xff]  ;;  %v36_v39 = vld [vmem:[%s2106_s0 + $0x80] sm:$0xff]  ;;  %v37_v41 = vld [vmem:[%s2106_s0 + $0x88] sm:$0xff] }
   0xe   :  { %1165 = vmatmul.mubr.msk.f32.vlgmr.msra.gmra.mrb[0].mxu0 %vm89_vm0, %v21_v9  ;;  %1213 = vmatmul.mubr.msk.f32.vlgmr.msra.gmra.mrb[0].mxu1 %vm89_vm0, %v53_v10  ;;  %v68_v40 = vld [vmem:[%s2106_s0 + $0x180] sm:$0xff]  ;;  %v69_v42 = vld [vmem:[%s2106_s0 + $0x188] sm:$0xff]  ;;  %v38_v43 = vld [vmem:[%s2106_s0 + $0x90] sm:$0xff]  ;;  %v881_v9 = vshrl.u32 %v880_v7, 7 }
   0xf   :  { %1167 = vmatprep.mubr.msk.f32.mxu0 %vm89_vm0, %v22_v11  ;;  %1215 = vmatprep.mubr.msk.f32.mxu1 %vm89_vm0, %v54_v12  ;;  %v70_v44 = vld [vmem:[%s2106_s0 + $0x190] sm:$0xff]  ;;  %v39_v45 = vld [vmem:[%s2106_s0 + $0x98] sm:$0xff]  ;;  %v40_v47 = vld [vmem:[%s2106_s0 + $0xa0] sm:$0xff]  ;;  %v1275_v11 = vmov 0  }
  0x10   :  { %v71_v46 = vld [vmem:[%s2106_s0 + $0x198] sm:$0xff]  ;;  %v72_v48 = vld [vmem:[%s2106_s0 + $0x1a0] sm:$0xff]  ;;  %v41_v49 = vld [vmem:[%s2106_s0 + $0xa8] sm:$0xff]  ;;  %v882_v10 = vsub.s32 0, %v881_v9 }
  0x11   :  { %v73_v50 = vld [vmem:[%s2106_s0 + $0x1a8] sm:$0xff]  ;;  %v42_v51 = vld [vmem:[%s2106_s0 + $0xb0] sm:$0xff]  ;;  %v43_v53 = vld [vmem:[%s2106_s0 + $0xb8] sm:$0xff] }
  0x12   :  { %1168 = vmatmul.mubr.msk.f32.gmra.mrb[2].mxu0 %vm89_vm0, %v23_v13  ;;  %1216 = vmatmul.mubr.msk.f32.gmra.mrb[2].mxu1 %vm89_vm0, %v55_v14  ;;  %v74_v52 = vld [vmem:[%s2106_s0 + $0x1b0] sm:$0xff]  ;;  %v75_v54 = vld [vmem:[%s2106_s0 + $0x1b8] sm:$0xff]  ;;  %v44_v55 = vld [vmem:[%s2106_s0 + $0xc0] sm:$0xff] }
  0x13   :  { %1170 = vmatprep.mubr.msk.f32.mxu0 %vm89_vm0, %v24_v15  ;;  %1218 = vmatprep.mubr.msk.f32.mxu1 %vm89_vm0, %v56_v16  ;;  %v76_v56 = vld [vmem:[%s2106_s0 + $0x1c0] sm:$0xff]  ;;  %v45_v57 = vld [vmem:[%s2106_s0 + $0xc8] sm:$0xff]  ;;  %v46_v59 = vld [vmem:[%s2106_s0 + $0xd0] sm:$0xff] }
  0x14   :  { %v77_v58 = vld [vmem:[%s2106_s0 + $0x1c8] sm:$0xff]  ;;  %v78_v60 = vld [vmem:[%s2106_s0 + $0x1d0] sm:$0xff]  ;;  %v47_v61 = vld [vmem:[%s2106_s0 + $0xd8] sm:$0xff] }
  0x15   :  { %v79_v62 = vld [vmem:[%s2106_s0 + $0x1d8] sm:$0xff]  ;;  %v48_v63 = vld [vmem:[%s2106_s0 + $0xe0] sm:$0xff]  ;;  %v49_v1 = vld [vmem:[%s2106_s0 + $0xe8] sm:$0xff] }
  0x16   :  { %1171 = vmatmul.mubr.msk.f32.gmra.mrb[4].mxu0 %vm89_vm0, %v25_v17  ;;  %1219 = vmatmul.mubr.msk.f32.gmra.mrb[4].mxu1 %vm89_vm0, %v57_v18  ;;  %v80_v0 = vld [vmem:[%s2106_s0 + $0x1e0] sm:$0xff]  ;;  %v81_v2 = vld [vmem:[%s2106_s0 + $0x1e8] sm:$0xff]  ;;  %v50_v3 = vld [vmem:[%s2106_s0 + $0xf0] sm:$0xff] }
  0x17   :  { %1173 = vmatprep.mubr.msk.f32.mxu0 %vm89_vm0, %v26_v19  ;;  %1221 = vmatprep.mubr.msk.f32.mxu1 %vm89_vm0, %v58_v20  ;;  %v82_v4 = vld [vmem:[%s2106_s0 + $0x1f0] sm:$0xff]  ;;  %v51_v5 = vld [vmem:[%s2106_s0 + $0xf8] sm:$0xff]  ;;  %v813_v8 = vld [vmem:[%s2107_s4] sm:$0x1] }
  0x18   :  { %v83_v6 = vld [vmem:[%s2106_s0 + $0x1f8] sm:$0xff]  ;;  %vm814_vm2 = vcmp.gt.f32.partialorder %v813_v8, 0.0  ;;  %v1583_v13 = vld [vmem:[%s2108_s2] ss:$0 sm:$0xff] }
  0x19   :  { %v879_v12 = vsel %vm814_vm2, 1, %v1275_v11  ;;  %v1588_v15 = vld [vmem:[%s2109_s3] ss:$0 sm:$0xff] }
  0x1a   :  { %1174 = vmatmul.mubr.msk.f32.gmra.mrb[6].mxu0 %vm89_vm0, %v27_v21  ;;  %1222 = vmatmul.mubr.msk.f32.gmra.mrb[6].mxu1 %vm89_vm0, %v59_v22  ;;  %v1590_v16 = vrot.slane %v879_v12, %v882_v10 }
  0x1b   :  { %1176 = vmatprep.mubr.msk.f32.mxu0 %vm89_vm0, %v28_v23  ;;  %1224 = vmatprep.mubr.msk.f32.mxu1 %vm89_vm0, %v60_v24 }
  0x1c   :  { %vm884_vm3 = vcmp.eq.s32.totalorder %v1590_v16, 1 }
  0x1e   :  { %1177 = vmatmul.mubr.msk.f32.gmra.mrb[8].mxu0 %vm89_vm0, %v29_v25  ;;  %1225 = vmatmul.mubr.msk.f32.gmra.mrb[8].mxu1 %vm89_vm0, %v61_v26 }
  0x1f   :  { %1179 = vmatprep.mubr.msk.f32.mxu0 %vm89_vm0, %v30_v27  ;;  %1227 = vmatprep.mubr.msk.f32.mxu1 %vm89_vm0, %v62_v28 }
  0x22   :  { %1180 = vmatmul.mubr.msk.f32.gmra.mrb[10].mxu0 %vm89_vm0, %v31_v29  ;;  %1228 = vmatmul.mubr.msk.f32.gmra.mrb[10].mxu1 %vm89_vm0, %v63_v30 }
  0x23   :  { %1182 = vmatprep.mubr.msk.f32.mxu0 %vm89_vm0, %v32_v31  ;;  %1230 = vmatprep.mubr.msk.f32.mxu1 %vm89_vm0, %v64_v32 }
  0x26   :  { %1183 = vmatmul.mubr.msk.f32.gmra.mrb[12].mxu0 %vm89_vm0, %v33_v33  ;;  %1231 = vmatmul.mubr.msk.f32.gmra.mrb[12].mxu1 %vm89_vm0, %v65_v34 }
  0x27   :  { %1185 = vmatprep.mubr.msk.f32.mxu0 %vm89_vm0, %v34_v35  ;;  %1233 = vmatprep.mubr.msk.f32.mxu1 %vm89_vm0, %v66_v36 }
  0x2a   :  { %1186 = vmatmul.mubr.msk.f32.gmra.mrb[14].mxu0 %vm89_vm0, %v35_v37  ;;  %1234 = vmatmul.mubr.msk.f32.gmra.mrb[14].mxu1 %vm89_vm0, %v67_v38 }
  0x2b   :  { %1188 = vmatprep.mubr.msk.f32.mxu0 %vm89_vm0, %v36_v39  ;;  %1236 = vmatprep.mubr.msk.f32.mxu1 %vm89_vm0, %v68_v40 }
  0x2e   :  { %1189 = vmatmul.mubr.msk.f32.gmra.mrb[16].mxu0 %vm89_vm0, %v37_v41  ;;  %1237 = vmatmul.mubr.msk.f32.gmra.mrb[16].mxu1 %vm89_vm0, %v69_v42 }
  0x2f   :  { %1191 = vmatprep.mubr.msk.f32.mxu0 %vm89_vm0, %v38_v43  ;;  %1239 = vmatprep.mubr.msk.f32.mxu1 %vm89_vm0, %v70_v44 }
  0x32   :  { %1192 = vmatmul.mubr.msk.f32.gmra.mrb[18].mxu0 %vm89_vm0, %v39_v45  ;;  %1240 = vmatmul.mubr.msk.f32.gmra.mrb[18].mxu1 %vm89_vm0, %v71_v46 }
  0x33   :  { %1194 = vmatprep.mubr.msk.f32.mxu0 %vm89_vm0, %v40_v47  ;;  %1242 = vmatprep.mubr.msk.f32.mxu1 %vm89_vm0, %v72_v48 }
  0x36   :  { %1195 = vmatmul.mubr.msk.f32.gmra.mrb[20].mxu0 %vm89_vm0, %v41_v49  ;;  %1243 = vmatmul.mubr.msk.f32.gmra.mrb[20].mxu1 %vm89_vm0, %v73_v50 }
  0x37   :  { %1197 = vmatprep.mubr.msk.f32.mxu0 %vm89_vm0, %v42_v51  ;;  %1245 = vmatprep.mubr.msk.f32.mxu1 %vm89_vm0, %v74_v52 }
  0x3a   :  { %1198 = vmatmul.mubr.msk.f32.gmra.mrb[22].mxu0 %vm89_vm0, %v43_v53  ;;  %1246 = vmatmul.mubr.msk.f32.gmra.mrb[22].mxu1 %vm89_vm0, %v75_v54 }
  0x3b   :  { %1200 = vmatprep.mubr.msk.f32.mxu0 %vm89_vm0, %v44_v55  ;;  %1248 = vmatprep.mubr.msk.f32.mxu1 %vm89_vm0, %v76_v56 }
  0x3e   :  { %1201 = vmatmul.mubr.msk.f32.gmra.mrb[24].mxu0 %vm89_vm0, %v45_v57  ;;  %1249 = vmatmul.mubr.msk.f32.gmra.mrb[24].mxu1 %vm89_vm0, %v77_v58 }
  0x3f   :  { %1203 = vmatprep.mubr.msk.f32.mxu0 %vm89_vm0, %v46_v59  ;;  %1251 = vmatprep.mubr.msk.f32.mxu1 %vm89_vm0, %v78_v60 }
  0x42   :  { %1204 = vmatmul.mubr.msk.f32.gmra.mrb[26].mxu0 %vm89_vm0, %v47_v61  ;;  %1252 = vmatmul.mubr.msk.f32.gmra.mrb[26].mxu1 %vm89_vm0, %v79_v62 }
  0x43   :  { %1206 = vmatprep.mubr.msk.f32.mxu0 %vm89_vm0, %v48_v63  ;;  %1254 = vmatprep.mubr.msk.f32.mxu1 %vm89_vm0, %v80_v0 }
  0x46   :  { %1207 = vmatmul.mubr.msk.f32.gmra.mrb[28].mxu0 %vm89_vm0, %v49_v1  ;;  %1255 = vmatmul.mubr.msk.f32.gmra.mrb[28].mxu1 %vm89_vm0, %v81_v2 }
  0x47   :  { %1209 = vmatprep.mubr.msk.f32.mxu0 %vm89_vm0, %v50_v3  ;;  %1257 = vmatprep.mubr.msk.f32.mxu1 %vm89_vm0, %v82_v4 }
  0x4a   :  { %1210 = vmatmul.mubr.msk.f32.gmra.mrb[30].mxu0 %vm89_vm0, %v51_v5  ;;  %1258 = vmatmul.mubr.msk.f32.gmra.mrb[30].mxu1 %vm89_vm0, %v83_v6 }
  0xe1   :  { %v1166_v14 = vpop.f32.mrb[0].mxu0  ;;  %v1214_v17 = vpop.f32.mrb[0].mxu1 }
  0xe2   :  { %v679_v18 = vmul.f32 %v1166_v14, %v1583_v13  ;;  %v711_v19 = vmul.f32 %v1214_v17, %v1583_v13  ;;  %v352_v20 = vpop.f32.mrb[1].mxu0  ;;  %v512_v21 = vpop.f32.mrb[1].mxu1 }
  0xe3   :  { %v678_v22 = vmul.f32 %v1583_v13, %v352_v20  ;;  %v710_v23 = vmul.f32 %v1583_v13, %v512_v21 }
  0xe4   :  { %v750_v24 = vadd.f32 %v1588_v15, %v679_v18  ;;  %v782_v25 = vadd.f32 %v1588_v15, %v711_v19 }
  0xe5   :  { %v749_v26 = vadd.f32 %v1588_v15, %v678_v22  ;;  %v781_v27 = vadd.f32 %v1588_v15, %v710_v23  ;;  %v1169_v28 = vpop.f32.mrb[2].mxu0  ;;  %v1217_v29 = vpop.f32.mrb[2].mxu1 }
  0xe6   :  { %v816_v30 = vmax.f32 %v750_v24, 0.0  ;;  %v848_v31 = vmax.f32 %v782_v25, 0.0  ;;  %v681_v32 = vmul.f32 %v1169_v28, %v1583_v13  ;;  %v713_v33 = vmul.f32 %v1217_v29, %v1583_v13  ;;  %v362_v34 = vpop.f32.mrb[3].mxu0  ;;  %v522_v35 = vpop.f32.mrb[3].mxu1 }
  0xe7   :  { %v815_v36 = vmax.f32 %v749_v26, 0.0  ;;  %v847_v37 = vmax.f32 %v781_v27, 0.0  ;;  %v680_v38 = vmul.f32 %v1583_v13, %v362_v34  ;;  %v712_v39 = vmul.f32 %v1583_v13, %v522_v35 }
  0xe8   :  { %v886_v40 = vsel %vm884_vm3, %v816_v30, %v750_v24  ;;  %v918_v41 = vsel %vm884_vm3, %v848_v31, %v782_v25  ;;  %v752_v42 = vadd.f32 %v1588_v15, %v681_v32  ;;  %v784_v43 = vadd.f32 %v1588_v15, %v713_v33 }
  0xe9   :  { %951 = vst.msk [vmem:[%s2110_s5 + $0x8] sm:$0xff] %vm949_vm4, %v886_v40  ;;  %983 = vst.msk [vmem:[%s2110_s5 + $0x108] sm:$0xff] %vm949_vm4, %v918_v41  ;;  %v885_v44 = vsel %vm884_vm3, %v815_v36, %v749_v26  ;;  %v917_v45 = vsel %vm884_vm3, %v847_v37, %v781_v27  ;;  %v751_v46 = vadd.f32 %v1588_v15, %v680_v38  ;;  %v1172_v48 = vpop.f32.mrb[4].mxu0  ;;  %v1220_v49 = vpop.f32.mrb[4].mxu1 }
  0xea   :  { %v783_v47 = vadd.f32 %v1588_v15, %v712_v39  ;;  %950 = vst.msk [vmem:[%s2110_s5] sm:$0xff] %vm949_vm4, %v885_v44  ;;  %982 = vst.msk [vmem:[%s2110_s5 + $0x100] sm:$0xff] %vm949_vm4, %v917_v45  ;;  %v818_v50 = vmax.f32 %v752_v42, 0.0  ;;  %v850_v51 = vmax.f32 %v784_v43, 0.0  ;;  %v683_v52 = vmul.f32 %v1172_v48, %v1583_v13  ;;  %v372_v54 = vpop.f32.mrb[5].mxu0  ;;  %v532_v55 = vpop.f32.mrb[5].mxu1 }
  0xeb   :  { %v715_v53 = vmul.f32 %v1220_v49, %v1583_v13  ;;  %v817_v56 = vmax.f32 %v751_v46, 0.0  ;;  %v682_v58 = vmul.f32 %v1583_v13, %v372_v54  ;;  %v714_v59 = vmul.f32 %v1583_v13, %v532_v55 }
  0xec   :  { %v849_v57 = vmax.f32 %v783_v47, 0.0  ;;  %v888_v60 = vsel %vm884_vm3, %v818_v50, %v752_v42  ;;  %v920_v61 = vsel %vm884_vm3, %v850_v51, %v784_v43  ;;  %v754_v62 = vadd.f32 %v1588_v15, %v683_v52 }
  0xed   :  { %v786_v63 = vadd.f32 %v1588_v15, %v715_v53  ;;  %953 = vst.msk [vmem:[%s2110_s5 + $0x18] sm:$0xff] %vm949_vm4, %v888_v60  ;;  %985 = vst.msk [vmem:[%s2110_s5 + $0x118] sm:$0xff] %vm949_vm4, %v920_v61  ;;  %v887_v0 = vsel %vm884_vm3, %v817_v56, %v751_v46  ;;  %v753_v2 = vadd.f32 %v1588_v15, %v682_v58  ;;  %v1175_v4 = vpop.f32.mrb[6].mxu0  ;;  %v1223_v5 = vpop.f32.mrb[6].mxu1 }
  0xee   :  { %v919_v1 = vsel %vm884_vm3, %v849_v57, %v783_v47  ;;  %v785_v3 = vadd.f32 %v1588_v15, %v714_v59  ;;  %952 = vst.msk [vmem:[%s2110_s5 + $0x10] sm:$0xff] %vm949_vm4, %v887_v0  ;;  %v820_v6 = vmax.f32 %v754_v62, 0.0  ;;  %v685_v8 = vmul.f32 %v1175_v4, %v1583_v13  ;;  %v382_v10 = vpop.f32.mrb[7].mxu0  ;;  %v542_v11 = vpop.f32.mrb[7].mxu1 }
  0xef   :  { %984 = vst.msk [vmem:[%s2110_s5 + $0x110] sm:$0xff] %vm949_vm4, %v919_v1  ;;  %v852_v7 = vmax.f32 %v786_v63, 0.0  ;;  %v717_v9 = vmul.f32 %v1223_v5, %v1583_v13  ;;  %v819_v12 = vmax.f32 %v753_v2, 0.0  ;;  %v684_v17 = vmul.f32 %v1583_v13, %v382_v10 }
  0xf0   :  { %v851_v14 = vmax.f32 %v785_v3, 0.0  ;;  %v716_v18 = vmul.f32 %v1583_v13, %v542_v11  ;;  %v890_v19 = vsel %vm884_vm3, %v820_v6, %v754_v62  ;;  %v756_v21 = vadd.f32 %v1588_v15, %v685_v8 }
  0xf1   :  { %v922_v20 = vsel %vm884_vm3, %v852_v7, %v786_v63  ;;  %v788_v22 = vadd.f32 %v1588_v15, %v717_v9  ;;  %955 = vst.msk [vmem:[%s2110_s5 + $0x28] sm:$0xff] %vm949_vm4, %v890_v19  ;;  %v889_v23 = vsel %vm884_vm3, %v819_v12, %v753_v2  ;;  %v755_v25 = vadd.f32 %v1588_v15, %v684_v17  ;;  %v1178_v27 = vpop.f32.mrb[8].mxu0  ;;  %v1226_v28 = vpop.f32.mrb[8].mxu1 }
  0xf2   :  { %987 = vst.msk [vmem:[%s2110_s5 + $0x128] sm:$0xff] %vm949_vm4, %v922_v20  ;;  %v921_v24 = vsel %vm884_vm3, %v851_v14, %v785_v3  ;;  %v787_v26 = vadd.f32 %v1588_v15, %v716_v18  ;;  %954 = vst.msk [vmem:[%s2110_s5 + $0x20] sm:$0xff] %vm949_vm4, %v889_v23  ;;  %v822_v29 = vmax.f32 %v756_v21, 0.0  ;;  %v687_v31 = vmul.f32 %v1178_v27, %v1583_v13  ;;  %v392_v33 = vpop.f32.mrb[9].mxu0  ;;  %v552_v34 = vpop.f32.mrb[9].mxu1 }
  0xf3   :  { %986 = vst.msk [vmem:[%s2110_s5 + $0x120] sm:$0xff] %vm949_vm4, %v921_v24  ;;  %v854_v30 = vmax.f32 %v788_v22, 0.0  ;;  %v719_v32 = vmul.f32 %v1226_v28, %v1583_v13  ;;  %v821_v35 = vmax.f32 %v755_v25, 0.0  ;;  %v686_v37 = vmul.f32 %v1583_v13, %v392_v33 }
  0xf4   :  { %v853_v36 = vmax.f32 %v787_v26, 0.0  ;;  %v718_v38 = vmul.f32 %v1583_v13, %v552_v34  ;;  %v892_v39 = vsel %vm884_vm3, %v822_v29, %v756_v21  ;;  %v758_v41 = vadd.f32 %v1588_v15, %v687_v31 }
  0xf5   :  { %v924_v40 = vsel %vm884_vm3, %v854_v30, %v788_v22  ;;  %v790_v42 = vadd.f32 %v1588_v15, %v719_v32  ;;  %957 = vst.msk [vmem:[%s2110_s5 + $0x38] sm:$0xff] %vm949_vm4, %v892_v39  ;;  %v891_v43 = vsel %vm884_vm3, %v821_v35, %v755_v25  ;;  %v757_v45 = vadd.f32 %v1588_v15, %v686_v37  ;;  %v1181_v47 = vpop.f32.mrb[10].mxu0  ;;  %v1229_v48 = vpop.f32.mrb[10].mxu1 }
  0xf6   :  { %989 = vst.msk [vmem:[%s2110_s5 + $0x138] sm:$0xff] %vm949_vm4, %v924_v40  ;;  %v923_v44 = vsel %vm884_vm3, %v853_v36, %v787_v26  ;;  %v789_v46 = vadd.f32 %v1588_v15, %v718_v38  ;;  %956 = vst.msk [vmem:[%s2110_s5 + $0x30] sm:$0xff] %vm949_vm4, %v891_v43  ;;  %v824_v49 = vmax.f32 %v758_v41, 0.0  ;;  %v689_v51 = vmul.f32 %v1181_v47, %v1583_v13  ;;  %v402_v53 = vpop.f32.mrb[11].mxu0  ;;  %v562_v54 = vpop.f32.mrb[11].mxu1 }
  0xf7   :  { %988 = vst.msk [vmem:[%s2110_s5 + $0x130] sm:$0xff] %vm949_vm4, %v923_v44  ;;  %v856_v50 = vmax.f32 %v790_v42, 0.0  ;;  %v721_v52 = vmul.f32 %v1229_v48, %v1583_v13  ;;  %v823_v55 = vmax.f32 %v757_v45, 0.0  ;;  %v688_v57 = vmul.f32 %v1583_v13, %v402_v53 }
  0xf8   :  { %v855_v56 = vmax.f32 %v789_v46, 0.0  ;;  %v720_v58 = vmul.f32 %v1583_v13, %v562_v54  ;;  %v894_v59 = vsel %vm884_vm3, %v824_v49, %v758_v41  ;;  %v760_v61 = vadd.f32 %v1588_v15, %v689_v51 }
  0xf9   :  { %v926_v60 = vsel %vm884_vm3, %v856_v50, %v790_v42  ;;  %v792_v62 = vadd.f32 %v1588_v15, %v721_v52  ;;  %959 = vst.msk [vmem:[%s2110_s5 + $0x48] sm:$0xff] %vm949_vm4, %v894_v59  ;;  %v893_v63 = vsel %vm884_vm3, %v823_v55, %v757_v45  ;;  %v759_v1 = vadd.f32 %v1588_v15, %v688_v57  ;;  %v1184_v3 = vpop.f32.mrb[12].mxu0  ;;  %v1232_v4 = vpop.f32.mrb[12].mxu1 }
  0xfa   :  { %991 = vst.msk [vmem:[%s2110_s5 + $0x148] sm:$0xff] %vm949_vm4, %v926_v60  ;;  %v925_v0 = vsel %vm884_vm3, %v855_v56, %v789_v46  ;;  %v791_v2 = vadd.f32 %v1588_v15, %v720_v58  ;;  %958 = vst.msk [vmem:[%s2110_s5 + $0x40] sm:$0xff] %vm949_vm4, %v893_v63  ;;  %v826_v5 = vmax.f32 %v760_v61, 0.0  ;;  %v691_v7 = vmul.f32 %v1184_v3, %v1583_v13  ;;  %v412_v9 = vpop.f32.mrb[13].mxu0  ;;  %v572_v10 = vpop.f32.mrb[13].mxu1 }
  0xfb   :  { %990 = vst.msk [vmem:[%s2110_s5 + $0x140] sm:$0xff] %vm949_vm4, %v925_v0  ;;  %v858_v6 = vmax.f32 %v792_v62, 0.0  ;;  %v723_v8 = vmul.f32 %v1232_v4, %v1583_v13  ;;  %v825_v11 = vmax.f32 %v759_v1, 0.0  ;;  %v690_v14 = vmul.f32 %v1583_v13, %v412_v9 }
  0xfc   :  { %v857_v12 = vmax.f32 %v791_v2, 0.0  ;;  %v722_v17 = vmul.f32 %v1583_v13, %v572_v10  ;;  %v896_v18 = vsel %vm884_vm3, %v826_v5, %v760_v61  ;;  %v762_v20 = vadd.f32 %v1588_v15, %v691_v7 }
  0xfd   :  { %v928_v19 = vsel %vm884_vm3, %v858_v6, %v792_v62  ;;  %v794_v21 = vadd.f32 %v1588_v15, %v723_v8  ;;  %961 = vst.msk [vmem:[%s2110_s5 + $0x58] sm:$0xff] %vm949_vm4, %v896_v18  ;;  %v895_v22 = vsel %vm884_vm3, %v825_v11, %v759_v1  ;;  %v761_v24 = vadd.f32 %v1588_v15, %v690_v14  ;;  %v1187_v26 = vpop.f32.mrb[14].mxu0  ;;  %v1235_v27 = vpop.f32.mrb[14].mxu1 }
  0xfe   :  { %993 = vst.msk [vmem:[%s2110_s5 + $0x158] sm:$0xff] %vm949_vm4, %v928_v19  ;;  %v927_v23 = vsel %vm884_vm3, %v857_v12, %v791_v2  ;;  %v793_v25 = vadd.f32 %v1588_v15, %v722_v17  ;;  %960 = vst.msk [vmem:[%s2110_s5 + $0x50] sm:$0xff] %vm949_vm4, %v895_v22  ;;  %v828_v28 = vmax.f32 %v762_v20, 0.0  ;;  %v693_v30 = vmul.f32 %v1187_v26, %v1583_v13  ;;  %v422_v32 = vpop.f32.mrb[15].mxu0  ;;  %v582_v33 = vpop.f32.mrb[15].mxu1 }
  0xff   :  { %992 = vst.msk [vmem:[%s2110_s5 + $0x150] sm:$0xff] %vm949_vm4, %v927_v23  ;;  %v860_v29 = vmax.f32 %v794_v21, 0.0  ;;  %v725_v31 = vmul.f32 %v1235_v27, %v1583_v13  ;;  %v827_v34 = vmax.f32 %v761_v24, 0.0  ;;  %v692_v36 = vmul.f32 %v1583_v13, %v422_v32 }
 0x100   :  { %v859_v35 = vmax.f32 %v793_v25, 0.0  ;;  %v724_v37 = vmul.f32 %v1583_v13, %v582_v33  ;;  %v898_v38 = vsel %vm884_vm3, %v828_v28, %v762_v20  ;;  %v764_v40 = vadd.f32 %v1588_v15, %v693_v30 }
 0x101   :  { %v930_v39 = vsel %vm884_vm3, %v860_v29, %v794_v21  ;;  %v796_v41 = vadd.f32 %v1588_v15, %v725_v31  ;;  %963 = vst.msk [vmem:[%s2110_s5 + $0x68] sm:$0xff] %vm949_vm4, %v898_v38  ;;  %v897_v42 = vsel %vm884_vm3, %v827_v34, %v761_v24  ;;  %v763_v44 = vadd.f32 %v1588_v15, %v692_v36  ;;  %v1190_v46 = vpop.f32.mrb[16].mxu0  ;;  %v1238_v47 = vpop.f32.mrb[16].mxu1 }
 0x102   :  { %995 = vst.msk [vmem:[%s2110_s5 + $0x168] sm:$0xff] %vm949_vm4, %v930_v39  ;;  %v929_v43 = vsel %vm884_vm3, %v859_v35, %v793_v25  ;;  %v795_v45 = vadd.f32 %v1588_v15, %v724_v37  ;;  %962 = vst.msk [vmem:[%s2110_s5 + $0x60] sm:$0xff] %vm949_vm4, %v897_v42  ;;  %v830_v48 = vmax.f32 %v764_v40, 0.0  ;;  %v695_v50 = vmul.f32 %v1190_v46, %v1583_v13  ;;  %v432_v52 = vpop.f32.mrb[17].mxu0  ;;  %v592_v53 = vpop.f32.mrb[17].mxu1 }
 0x103   :  { %994 = vst.msk [vmem:[%s2110_s5 + $0x160] sm:$0xff] %vm949_vm4, %v929_v43  ;;  %v862_v49 = vmax.f32 %v796_v41, 0.0  ;;  %v727_v51 = vmul.f32 %v1238_v47, %v1583_v13  ;;  %v829_v54 = vmax.f32 %v763_v44, 0.0  ;;  %v694_v56 = vmul.f32 %v1583_v13, %v432_v52 }
 0x104   :  { %v861_v55 = vmax.f32 %v795_v45, 0.0  ;;  %v726_v57 = vmul.f32 %v1583_v13, %v592_v53  ;;  %v900_v58 = vsel %vm884_vm3, %v830_v48, %v764_v40  ;;  %v766_v60 = vadd.f32 %v1588_v15, %v695_v50 }
 0x105   :  { %v932_v59 = vsel %vm884_vm3, %v862_v49, %v796_v41  ;;  %v798_v61 = vadd.f32 %v1588_v15, %v727_v51  ;;  %965 = vst.msk [vmem:[%s2110_s5 + $0x78] sm:$0xff] %vm949_vm4, %v900_v58  ;;  %v899_v62 = vsel %vm884_vm3, %v829_v54, %v763_v44  ;;  %v765_v0 = vadd.f32 %v1588_v15, %v694_v56  ;;  %v1193_v2 = vpop.f32.mrb[18].mxu0  ;;  %v1241_v3 = vpop.f32.mrb[18].mxu1 }
 0x106   :  { %997 = vst.msk [vmem:[%s2110_s5 + $0x178] sm:$0xff] %vm949_vm4, %v932_v59  ;;  %v931_v63 = vsel %vm884_vm3, %v861_v55, %v795_v45  ;;  %v797_v1 = vadd.f32 %v1588_v15, %v726_v57  ;;  %964 = vst.msk [vmem:[%s2110_s5 + $0x70] sm:$0xff] %vm949_vm4, %v899_v62  ;;  %v832_v4 = vmax.f32 %v766_v60, 0.0  ;;  %v697_v6 = vmul.f32 %v1193_v2, %v1583_v13  ;;  %v442_v8 = vpop.f32.mrb[19].mxu0  ;;  %v602_v9 = vpop.f32.mrb[19].mxu1 }
 0x107   :  { %996 = vst.msk [vmem:[%s2110_s5 + $0x170] sm:$0xff] %vm949_vm4, %v931_v63  ;;  %v864_v5 = vmax.f32 %v798_v61, 0.0  ;;  %v729_v7 = vmul.f32 %v1241_v3, %v1583_v13  ;;  %v831_v10 = vmax.f32 %v765_v0, 0.0  ;;  %v696_v12 = vmul.f32 %v1583_v13, %v442_v8 }
 0x108   :  { %v863_v11 = vmax.f32 %v797_v1, 0.0  ;;  %v728_v14 = vmul.f32 %v1583_v13, %v602_v9  ;;  %v902_v17 = vsel %vm884_vm3, %v832_v4, %v766_v60  ;;  %v768_v19 = vadd.f32 %v1588_v15, %v697_v6 }
 0x109   :  { %v934_v18 = vsel %vm884_vm3, %v864_v5, %v798_v61  ;;  %v800_v20 = vadd.f32 %v1588_v15, %v729_v7  ;;  %967 = vst.msk [vmem:[%s2110_s5 + $0x88] sm:$0xff] %vm949_vm4, %v902_v17  ;;  %v901_v21 = vsel %vm884_vm3, %v831_v10, %v765_v0  ;;  %v767_v23 = vadd.f32 %v1588_v15, %v696_v12  ;;  %v1196_v25 = vpop.f32.mrb[20].mxu0  ;;  %v1244_v26 = vpop.f32.mrb[20].mxu1 }
 0x10a   :  { %999 = vst.msk [vmem:[%s2110_s5 + $0x188] sm:$0xff] %vm949_vm4, %v934_v18  ;;  %v933_v22 = vsel %vm884_vm3, %v863_v11, %v797_v1  ;;  %v799_v24 = vadd.f32 %v1588_v15, %v728_v14  ;;  %966 = vst.msk [vmem:[%s2110_s5 + $0x80] sm:$0xff] %vm949_vm4, %v901_v21  ;;  %v834_v27 = vmax.f32 %v768_v19, 0.0  ;;  %v699_v29 = vmul.f32 %v1196_v25, %v1583_v13  ;;  %v452_v31 = vpop.f32.mrb[21].mxu0  ;;  %v612_v32 = vpop.f32.mrb[21].mxu1 }
 0x10b   :  { %998 = vst.msk [vmem:[%s2110_s5 + $0x180] sm:$0xff] %vm949_vm4, %v933_v22  ;;  %v866_v28 = vmax.f32 %v800_v20, 0.0  ;;  %v731_v30 = vmul.f32 %v1244_v26, %v1583_v13  ;;  %v833_v33 = vmax.f32 %v767_v23, 0.0  ;;  %v698_v35 = vmul.f32 %v1583_v13, %v452_v31 }
 0x10c   :  { %v865_v34 = vmax.f32 %v799_v24, 0.0  ;;  %v730_v36 = vmul.f32 %v1583_v13, %v612_v32  ;;  %v904_v37 = vsel %vm884_vm3, %v834_v27, %v768_v19  ;;  %v770_v39 = vadd.f32 %v1588_v15, %v699_v29 }
 0x10d   :  { %v936_v38 = vsel %vm884_vm3, %v866_v28, %v800_v20  ;;  %v802_v40 = vadd.f32 %v1588_v15, %v731_v30  ;;  %969 = vst.msk [vmem:[%s2110_s5 + $0x98] sm:$0xff] %vm949_vm4, %v904_v37  ;;  %v903_v41 = vsel %vm884_vm3, %v833_v33, %v767_v23  ;;  %v769_v43 = vadd.f32 %v1588_v15, %v698_v35  ;;  %v1199_v45 = vpop.f32.mrb[22].mxu0  ;;  %v1247_v46 = vpop.f32.mrb[22].mxu1 }
 0x10e   :  { %1001 = vst.msk [vmem:[%s2110_s5 + $0x198] sm:$0xff] %vm949_vm4, %v936_v38  ;;  %v935_v42 = vsel %vm884_vm3, %v865_v34, %v799_v24  ;;  %v801_v44 = vadd.f32 %v1588_v15, %v730_v36  ;;  %968 = vst.msk [vmem:[%s2110_s5 + $0x90] sm:$0xff] %vm949_vm4, %v903_v41  ;;  %v836_v47 = vmax.f32 %v770_v39, 0.0  ;;  %v701_v49 = vmul.f32 %v1199_v45, %v1583_v13  ;;  %v462_v51 = vpop.f32.mrb[23].mxu0  ;;  %v622_v52 = vpop.f32.mrb[23].mxu1 }
 0x10f   :  { %1000 = vst.msk [vmem:[%s2110_s5 + $0x190] sm:$0xff] %vm949_vm4, %v935_v42  ;;  %v868_v48 = vmax.f32 %v802_v40, 0.0  ;;  %v733_v50 = vmul.f32 %v1247_v46, %v1583_v13  ;;  %v835_v53 = vmax.f32 %v769_v43, 0.0  ;;  %v700_v55 = vmul.f32 %v1583_v13, %v462_v51 }
 0x110   :  { %v867_v54 = vmax.f32 %v801_v44, 0.0  ;;  %v732_v56 = vmul.f32 %v1583_v13, %v622_v52  ;;  %v906_v57 = vsel %vm884_vm3, %v836_v47, %v770_v39  ;;  %v772_v59 = vadd.f32 %v1588_v15, %v701_v49 }
 0x111   :  { %v938_v58 = vsel %vm884_vm3, %v868_v48, %v802_v40  ;;  %v804_v60 = vadd.f32 %v1588_v15, %v733_v50  ;;  %971 = vst.msk [vmem:[%s2110_s5 + $0xa8] sm:$0xff] %vm949_vm4, %v906_v57  ;;  %v905_v61 = vsel %vm884_vm3, %v835_v53, %v769_v43  ;;  %v771_v63 = vadd.f32 %v1588_v15, %v700_v55  ;;  %v1202_v1 = vpop.f32.mrb[24].mxu0  ;;  %v1250_v2 = vpop.f32.mrb[24].mxu1 }
 0x112   :  { %1003 = vst.msk [vmem:[%s2110_s5 + $0x1a8] sm:$0xff] %vm949_vm4, %v938_v58  ;;  %v937_v62 = vsel %vm884_vm3, %v867_v54, %v801_v44  ;;  %v803_v0 = vadd.f32 %v1588_v15, %v732_v56  ;;  %970 = vst.msk [vmem:[%s2110_s5 + $0xa0] sm:$0xff] %vm949_vm4, %v905_v61  ;;  %v838_v3 = vmax.f32 %v772_v59, 0.0  ;;  %v703_v5 = vmul.f32 %v1202_v1, %v1583_v13  ;;  %v472_v7 = vpop.f32.mrb[25].mxu0  ;;  %v632_v8 = vpop.f32.mrb[25].mxu1 }
 0x113   :  { %1002 = vst.msk [vmem:[%s2110_s5 + $0x1a0] sm:$0xff] %vm949_vm4, %v937_v62  ;;  %v870_v4 = vmax.f32 %v804_v60, 0.0  ;;  %v735_v6 = vmul.f32 %v1250_v2, %v1583_v13  ;;  %v837_v9 = vmax.f32 %v771_v63, 0.0  ;;  %v702_v11 = vmul.f32 %v1583_v13, %v472_v7 }
 0x114   :  { %v869_v10 = vmax.f32 %v803_v0, 0.0  ;;  %v734_v12 = vmul.f32 %v1583_v13, %v632_v8  ;;  %v908_v14 = vsel %vm884_vm3, %v838_v3, %v772_v59  ;;  %v774_v18 = vadd.f32 %v1588_v15, %v703_v5 }
 0x115   :  { %v940_v17 = vsel %vm884_vm3, %v870_v4, %v804_v60  ;;  %v806_v19 = vadd.f32 %v1588_v15, %v735_v6  ;;  %973 = vst.msk [vmem:[%s2110_s5 + $0xb8] sm:$0xff] %vm949_vm4, %v908_v14  ;;  %v907_v20 = vsel %vm884_vm3, %v837_v9, %v771_v63  ;;  %v773_v22 = vadd.f32 %v1588_v15, %v702_v11  ;;  %v1205_v24 = vpop.f32.mrb[26].mxu0  ;;  %v1253_v25 = vpop.f32.mrb[26].mxu1 }
 0x116   :  { %1005 = vst.msk [vmem:[%s2110_s5 + $0x1b8] sm:$0xff] %vm949_vm4, %v940_v17  ;;  %v939_v21 = vsel %vm884_vm3, %v869_v10, %v803_v0  ;;  %v805_v23 = vadd.f32 %v1588_v15, %v734_v12  ;;  %972 = vst.msk [vmem:[%s2110_s5 + $0xb0] sm:$0xff] %vm949_vm4, %v907_v20  ;;  %v840_v26 = vmax.f32 %v774_v18, 0.0  ;;  %v705_v28 = vmul.f32 %v1205_v24, %v1583_v13  ;;  %v482_v30 = vpop.f32.mrb[27].mxu0  ;;  %v642_v31 = vpop.f32.mrb[27].mxu1 }
 0x117   :  { %1004 = vst.msk [vmem:[%s2110_s5 + $0x1b0] sm:$0xff] %vm949_vm4, %v939_v21  ;;  %v872_v27 = vmax.f32 %v806_v19, 0.0  ;;  %v737_v29 = vmul.f32 %v1253_v25, %v1583_v13  ;;  %v839_v32 = vmax.f32 %v773_v22, 0.0  ;;  %v704_v34 = vmul.f32 %v1583_v13, %v482_v30 }
 0x118   :  { %v871_v33 = vmax.f32 %v805_v23, 0.0  ;;  %v736_v35 = vmul.f32 %v1583_v13, %v642_v31  ;;  %v910_v36 = vsel %vm884_vm3, %v840_v26, %v774_v18  ;;  %v776_v38 = vadd.f32 %v1588_v15, %v705_v28 }
 0x119   :  { %v942_v37 = vsel %vm884_vm3, %v872_v27, %v806_v19  ;;  %v808_v39 = vadd.f32 %v1588_v15, %v737_v29  ;;  %975 = vst.msk [vmem:[%s2110_s5 + $0xc8] sm:$0xff] %vm949_vm4, %v910_v36  ;;  %v909_v40 = vsel %vm884_vm3, %v839_v32, %v773_v22  ;;  %v775_v42 = vadd.f32 %v1588_v15, %v704_v34  ;;  %v1208_v44 = vpop.f32.mrb[28].mxu0  ;;  %v1256_v45 = vpop.f32.mrb[28].mxu1 }
 0x11a   :  { %1007 = vst.msk [vmem:[%s2110_s5 + $0x1c8] sm:$0xff] %vm949_vm4, %v942_v37  ;;  %v941_v41 = vsel %vm884_vm3, %v871_v33, %v805_v23  ;;  %v807_v43 = vadd.f32 %v1588_v15, %v736_v35  ;;  %974 = vst.msk [vmem:[%s2110_s5 + $0xc0] sm:$0xff] %vm949_vm4, %v909_v40  ;;  %v842_v46 = vmax.f32 %v776_v38, 0.0  ;;  %v707_v48 = vmul.f32 %v1208_v44, %v1583_v13  ;;  %v492_v50 = vpop.f32.mrb[29].mxu0  ;;  %v652_v51 = vpop.f32.mrb[29].mxu1 }
 0x11b   :  { %1006 = vst.msk [vmem:[%s2110_s5 + $0x1c0] sm:$0xff] %vm949_vm4, %v941_v41  ;;  %v874_v47 = vmax.f32 %v808_v39, 0.0  ;;  %v739_v49 = vmul.f32 %v1256_v45, %v1583_v13  ;;  %v841_v52 = vmax.f32 %v775_v42, 0.0  ;;  %v706_v54 = vmul.f32 %v1583_v13, %v492_v50 }
 0x11c   :  { %v873_v53 = vmax.f32 %v807_v43, 0.0  ;;  %v738_v55 = vmul.f32 %v1583_v13, %v652_v51  ;;  %v912_v56 = vsel %vm884_vm3, %v842_v46, %v776_v38  ;;  %v778_v58 = vadd.f32 %v1588_v15, %v707_v48 }
 0x11d   :  { %v944_v57 = vsel %vm884_vm3, %v874_v47, %v808_v39  ;;  %v810_v59 = vadd.f32 %v1588_v15, %v739_v49  ;;  %977 = vst.msk [vmem:[%s2110_s5 + $0xd8] sm:$0xff] %vm949_vm4, %v912_v56  ;;  %v911_v60 = vsel %vm884_vm3, %v841_v52, %v775_v42  ;;  %v777_v62 = vadd.f32 %v1588_v15, %v706_v54  ;;  %v1211_v0 = vpop.f32.mrb[30].mxu0  ;;  %v1259_v1 = vpop.f32.mrb[30].mxu1 }
 0x11e   :  { %1009 = vst.msk [vmem:[%s2110_s5 + $0x1d8] sm:$0xff] %vm949_vm4, %v944_v57  ;;  %v943_v61 = vsel %vm884_vm3, %v873_v53, %v807_v43  ;;  %v809_v63 = vadd.f32 %v1588_v15, %v738_v55  ;;  %976 = vst.msk [vmem:[%s2110_s5 + $0xd0] sm:$0xff] %vm949_vm4, %v911_v60  ;;  %v844_v2 = vmax.f32 %v778_v58, 0.0  ;;  %v709_v4 = vmul.f32 %v1211_v0, %v1583_v13  ;;  %v502_v6 = vpop.f32.mrb[31].mxu0  ;;  %v662_v7 = vpop.f32.mrb[31].mxu1 }
 0x11f   :  { %1008 = vst.msk [vmem:[%s2110_s5 + $0x1d0] sm:$0xff] %vm949_vm4, %v943_v61  ;;  %v876_v3 = vmax.f32 %v810_v59, 0.0  ;;  %v741_v5 = vmul.f32 %v1259_v1, %v1583_v13  ;;  %v843_v8 = vmax.f32 %v777_v62, 0.0  ;;  %v708_v10 = vmul.f32 %v1583_v13, %v502_v6 }
 0x120   :  { %v875_v9 = vmax.f32 %v809_v63, 0.0  ;;  %v740_v11 = vmul.f32 %v1583_v13, %v662_v7  ;;  %v914_v12 = vsel %vm884_vm3, %v844_v2, %v778_v58  ;;  %v780_v17 = vadd.f32 %v1588_v15, %v709_v4 }
 0x121   :  { %v946_v14 = vsel %vm884_vm3, %v876_v3, %v810_v59  ;;  %v812_v18 = vadd.f32 %v1588_v15, %v741_v5  ;;  %979 = vst.msk [vmem:[%s2110_s5 + $0xe8] sm:$0xff] %vm949_vm4, %v914_v12  ;;  %v913_v13 = vsel %vm884_vm3, %v843_v8, %v777_v62  ;;  %v779_v20 = vadd.f32 %v1588_v15, %v708_v10 }
 0x122   :  { %1011 = vst.msk [vmem:[%s2110_s5 + $0x1e8] sm:$0xff] %vm949_vm4, %v946_v14  ;;  %v945_v19 = vsel %vm884_vm3, %v875_v9, %v809_v63  ;;  %v811_v21 = vadd.f32 %v1588_v15, %v740_v11  ;;  %978 = vst.msk [vmem:[%s2110_s5 + $0xe0] sm:$0xff] %vm949_vm4, %v913_v13  ;;  %v846_v22 = vmax.f32 %v780_v17, 0.0 }
 0x123   :  { %1010 = vst.msk [vmem:[%s2110_s5 + $0x1e0] sm:$0xff] %vm949_vm4, %v945_v19  ;;  %v878_v23 = vmax.f32 %v812_v18, 0.0  ;;  %v845_v24 = vmax.f32 %v779_v20, 0.0 }
 0x124   :  { %v877_v25 = vmax.f32 %v811_v21, 0.0  ;;  %v916_v26 = vsel %vm884_vm3, %v846_v22, %v780_v17 }
 0x125   :  { %v948_v15 = vsel %vm884_vm3, %v878_v23, %v812_v18  ;;  %981 = vst.msk [vmem:[%s2110_s5 + $0xf8] sm:$0xff] %vm949_vm4, %v916_v26  ;;  %v915_v27 = vsel %vm884_vm3, %v845_v24, %v779_v20 }
 0x126   :  { %1013 = vst.msk [vmem:[%s2110_s5 + $0x1f8] sm:$0xff] %vm949_vm4, %v948_v15  ;;  %v947_v28 = vsel %vm884_vm3, %v877_v25, %v811_v21  ;;  %980 = vst.msk [vmem:[%s2110_s5 + $0xf0] sm:$0xff] %vm949_vm4, %v915_v27 }
 0x127   :  { %1012 = vst.msk [vmem:[%s2110_s5 + $0x1f0] sm:$0xff] %vm949_vm4, %v947_v28 }

// kernel: embedding_map_net_forward.12
= control target key start
LH: loop header
LB: loop body
LE: loop exit
PB: predicated region body
PF: predicated region fallthrough
CT: control target
= control target key end

     0   :  { %vm93_vm0 = vcmask 588800   ;;  %vm1005_vm1 = vcmask 64512   ;;  %s2252_s1 = inlined_call_operand.vmem [shape: f32[72,8], index: 1, kind: input, shape index: {}]   ;;  %s2253_s0 = inlined_call_operand.vmem [shape: f32[512,72], index: 0, kind: input, shape index: {}]   ;;  %s2254_s2 = inlined_call_operand.vmem [shape: f32[1,8], index: 2, kind: input, shape index: {}]   ;;  %s2255_s3 = inlined_call_operand.vmem [shape: f32[1,8], index: 3, kind: input, shape index: {}]   ;;  %s2256_s4 = inlined_call_operand.vmem [shape: f32[512,8], index: 4, kind: input, shape index: {}]   ;;  %s2257_s5 = inlined_call_operand.vmem [shape: f32[512,8], index: 5, kind: output, shape index: {}]  }
   0x1   :  { %v84_v0 = vld [vmem:[%s2252_s1] sm:$0xff]  ;;  %v85_v1 = vld [vmem:[%s2252_s1 + $0x8] sm:$0xff]  ;;  %v86_v2 = vld [vmem:[%s2252_s1 + $0x10] sm:$0xff] }
   0x2   :  { %v1327_v3 = vpack.c.bf16 %v85_v1, %v84_v0  ;;  %v87_v4 = vld [vmem:[%s2252_s1 + $0x18] sm:$0xff]  ;;  %v88_v6 = vld [vmem:[%s2252_s1 + $0x20] sm:$0xff]  ;;  %v89_v7 = vld [vmem:[%s2252_s1 + $0x28] sm:$0xff] }
   0x3   :  { %v1331_v5 = vpack.c.bf16 %v87_v4, %v86_v2  ;;  %v20_v8 = vld [vmem:[%s2253_s0] sm:$0xff]  ;;  %v1335_v10 = vpack.c.bf16 %v89_v7, %v88_v6  ;;  %v90_v11 = vld [vmem:[%s2252_s1 + $0x30] sm:$0xff]  ;;  %v91_v12 = vld [vmem:[%s2252_s1 + $0x38] sm:$0xff] }
   0x4   :  { %1328 = vmatprep.subr.bf16.mxu0 %v1327_v3  ;;  %1343 = vmatprep.subr.bf16.mxu1 %v1327_v3  ;;  %v52_v9 = vld [vmem:[%s2253_s0 + $0x100] sm:$0xff]  ;;  %v1339_v13 = vpack.c.bf16 %v91_v12, %v90_v11  ;;  %v21_v15 = vld [vmem:[%s2253_s0 + $0x8] sm:$0xff]  ;;  %v22_v17 = vld [vmem:[%s2253_s0 + $0x10] sm:$0xff] }
   0x5   :  { %1330 = vmatpush3.bf16.msra.mxu0 %v1327_v3  ;;  %1348 = vmatpush3.bf16.msra.mxu1 %v1327_v3  ;;  %v92_v14 = vld [vmem:[%s2252_s1 + $0x40] sm:$0xff]  ;;  %v53_v16 = vld [vmem:[%s2253_s0 + $0x108] sm:$0xff]  ;;  %v54_v18 = vld [vmem:[%s2253_s0 + $0x110] sm:$0xff] }
   0x6   :  { %1332 = vmatprep.subr.bf16.mxu0 %v1331_v5  ;;  %1344 = vmatprep.subr.bf16.mxu1 %v1331_v5  ;;  %v23_v19 = vld [vmem:[%s2253_s0 + $0x18] sm:$0xff]  ;;  %v24_v21 = vld [vmem:[%s2253_s0 + $0x20] sm:$0xff]  ;;  %v25_v23 = vld [vmem:[%s2253_s0 + $0x28] sm:$0xff] }
   0x7   :  { %1231 = vmatprep.mubr.msk.f32.mxu0 %vm93_vm0, %v20_v8  ;;  %1279 = vmatprep.mubr.msk.f32.mxu1 %vm93_vm0, %v52_v9  ;;  %v55_v20 = vld [vmem:[%s2253_s0 + $0x118] sm:$0xff]  ;;  %v56_v22 = vld [vmem:[%s2253_s0 + $0x120] sm:$0xff]  ;;  %v57_v24 = vld [vmem:[%s2253_s0 + $0x128] sm:$0xff] }
   0x8   :  { %v26_v25 = vld [vmem:[%s2253_s0 + $0x30] sm:$0xff]  ;;  %v27_v27 = vld [vmem:[%s2253_s0 + $0x38] sm:$0xff]  ;;  %v28_v29 = vld [vmem:[%s2253_s0 + $0x40] sm:$0xff] }
   0x9   :  { %1334 = vmatpush3.bf16.msra.mxu0 %v1331_v5  ;;  %1349 = vmatpush3.bf16.msra.mxu1 %v1331_v5  ;;  %v58_v26 = vld [vmem:[%s2253_s0 + $0x130] sm:$0xff]  ;;  %v59_v28 = vld [vmem:[%s2253_s0 + $0x138] sm:$0xff]  ;;  %v60_v30 = vld [vmem:[%s2253_s0 + $0x140] sm:$0xff] }
   0xa   :  { %1336 = vmatprep.subr.bf16.mxu0 %v1335_v10  ;;  %1345 = vmatprep.subr.bf16.mxu1 %v1335_v10  ;;  %v29_v31 = vld [vmem:[%s2253_s0 + $0x48] sm:$0xff]  ;;  %v30_v33 = vld [vmem:[%s2253_s0 + $0x50] sm:$0xff]  ;;  %v31_v35 = vld [vmem:[%s2253_s0 + $0x58] sm:$0xff] }
   0xb   :  { %v61_v32 = vld [vmem:[%s2253_s0 + $0x148] sm:$0xff]  ;;  %v62_v34 = vld [vmem:[%s2253_s0 + $0x150] sm:$0xff]  ;;  %v63_v36 = vld [vmem:[%s2253_s0 + $0x158] sm:$0xff] }
   0xc   :  { %v32_v37 = vld [vmem:[%s2253_s0 + $0x60] sm:$0xff]  ;;  %v33_v39 = vld [vmem:[%s2253_s0 + $0x68] sm:$0xff]  ;;  %v34_v41 = vld [vmem:[%s2253_s0 + $0x70] sm:$0xff] }
   0xd   :  { %1338 = vmatpush3.bf16.msra.mxu0 %v1335_v10  ;;  %1350 = vmatpush3.bf16.msra.mxu1 %v1335_v10  ;;  %v64_v38 = vld [vmem:[%s2253_s0 + $0x160] sm:$0xff]  ;;  %v65_v40 = vld [vmem:[%s2253_s0 + $0x168] sm:$0xff]  ;;  %v66_v42 = vld [vmem:[%s2253_s0 + $0x170] sm:$0xff] }
   0xe   :  { %1340 = vmatprep.subr.bf16.mxu0 %v1339_v13  ;;  %1346 = vmatprep.subr.bf16.mxu1 %v1339_v13  ;;  %v35_v43 = vld [vmem:[%s2253_s0 + $0x78] sm:$0xff]  ;;  %v36_v45 = vld [vmem:[%s2253_s0 + $0x80] sm:$0xff]  ;;  %v37_v47 = vld [vmem:[%s2253_s0 + $0x88] sm:$0xff] }
   0xf   :  { %v67_v44 = vld [vmem:[%s2253_s0 + $0x178] sm:$0xff]  ;;  %v68_v46 = vld [vmem:[%s2253_s0 + $0x180] sm:$0xff]  ;;  %v69_v48 = vld [vmem:[%s2253_s0 + $0x188] sm:$0xff] }
  0x10   :  { %v38_v49 = vld [vmem:[%s2253_s0 + $0x90] sm:$0xff]  ;;  %v39_v51 = vld [vmem:[%s2253_s0 + $0x98] sm:$0xff]  ;;  %v40_v53 = vld [vmem:[%s2253_s0 + $0xa0] sm:$0xff] }
  0x11   :  { %1342 = vmatpush3.bf16.msra.mxu0 %v1339_v13  ;;  %1351 = vmatpush3.bf16.msra.mxu1 %v1339_v13  ;;  %v70_v50 = vld [vmem:[%s2253_s0 + $0x190] sm:$0xff]  ;;  %v71_v52 = vld [vmem:[%s2253_s0 + $0x198] sm:$0xff]  ;;  %v72_v54 = vld [vmem:[%s2253_s0 + $0x1a0] sm:$0xff] }
  0x12   :  { %1229 = vmatprep.subr.mxu0 %v92_v14  ;;  %1347 = vmatprep.subr.mxu1 %v92_v14  ;;  %v41_v55 = vld [vmem:[%s2253_s0 + $0xa8] sm:$0xff]  ;;  %v42_v57 = vld [vmem:[%s2253_s0 + $0xb0] sm:$0xff]  ;;  %v43_v59 = vld [vmem:[%s2253_s0 + $0xb8] sm:$0xff] }
  0x13   :  { %v73_v56 = vld [vmem:[%s2253_s0 + $0x1a8] sm:$0xff]  ;;  %v74_v58 = vld [vmem:[%s2253_s0 + $0x1b0] sm:$0xff]  ;;  %v75_v60 = vld [vmem:[%s2253_s0 + $0x1b8] sm:$0xff] }
  0x14   :  { %v44_v61 = vld [vmem:[%s2253_s0 + $0xc0] sm:$0xff]  ;;  %v45_v63 = vld [vmem:[%s2253_s0 + $0xc8] sm:$0xff]  ;;  %v46_v1 = vld [vmem:[%s2253_s0 + $0xd0] sm:$0xff] }
  0x15   :  { %1230 = vmatpush3.msra.mxu0 %v92_v14  ;;  %1352 = vmatpush3.msra.mxu1 %v92_v14  ;;  %v76_v62 = vld [vmem:[%s2253_s0 + $0x1c0] sm:$0xff]  ;;  %v77_v0 = vld [vmem:[%s2253_s0 + $0x1c8] sm:$0xff]  ;;  %v78_v2 = vld [vmem:[%s2253_s0 + $0x1d0] sm:$0xff] }
  0x16   :  { %1232 = vmatmul.mubr.msk.f32.vlgmr.msra.gmra.mrb[0].mxu0 %vm93_vm0, %v21_v15  ;;  %1280 = vmatmul.mubr.msk.f32.vlgmr.msra.gmra.mrb[0].mxu1 %vm93_vm0, %v53_v16  ;;  %v47_v3 = vld [vmem:[%s2253_s0 + $0xd8] sm:$0xff]  ;;  %v48_v5 = vld [vmem:[%s2253_s0 + $0xe0] sm:$0xff]  ;;  %v49_v7 = vld [vmem:[%s2253_s0 + $0xe8] sm:$0xff] }
  0x17   :  { %1234 = vmatprep.mubr.msk.f32.mxu0 %vm93_vm0, %v22_v17  ;;  %1282 = vmatprep.mubr.msk.f32.mxu1 %vm93_vm0, %v54_v18  ;;  %v79_v4 = vld [vmem:[%s2253_s0 + $0x1d8] sm:$0xff]  ;;  %v80_v6 = vld [vmem:[%s2253_s0 + $0x1e0] sm:$0xff]  ;;  %v81_v8 = vld [vmem:[%s2253_s0 + $0x1e8] sm:$0xff] }
  0x18   :  { %v50_v9 = vld [vmem:[%s2253_s0 + $0xf0] sm:$0xff]  ;;  %v51_v11 = vld [vmem:[%s2253_s0 + $0xf8] sm:$0xff]  ;;  %v1669_v13 = vld [vmem:[%s2254_s2] ss:$0 sm:$0xff] }
  0x19   :  { %v82_v10 = vld [vmem:[%s2253_s0 + $0x1f0] sm:$0xff]  ;;  %v83_v12 = vld [vmem:[%s2253_s0 + $0x1f8] sm:$0xff]  ;;  %v1674_v15 = vld [vmem:[%s2255_s3] ss:$0 sm:$0xff] }
  0x1a   :  { %1235 = vmatmul.mubr.msk.f32.gmra.mrb[2].mxu0 %vm93_vm0, %v23_v19  ;;  %1283 = vmatmul.mubr.msk.f32.gmra.mrb[2].mxu1 %vm93_vm0, %v55_v20 }
  0x1b   :  { %1237 = vmatprep.mubr.msk.f32.mxu0 %vm93_vm0, %v24_v21  ;;  %1285 = vmatprep.mubr.msk.f32.mxu1 %vm93_vm0, %v56_v22  ;;  %v814_v21 = vld [vmem:[%s2256_s4 + $0x8] sm:$0xff] }
  0x1c   :  { %v846_v22 = vld [vmem:[%s2256_s4 + $0x108] sm:$0xff] }
  0x1e   :  { %1238 = vmatmul.mubr.msk.f32.gmra.mrb[4].mxu0 %vm93_vm0, %v25_v23  ;;  %1286 = vmatmul.mubr.msk.f32.gmra.mrb[4].mxu1 %vm93_vm0, %v57_v24 }
  0x1f   :  { %1240 = vmatprep.mubr.msk.f32.mxu0 %vm93_vm0, %v26_v25  ;;  %1288 = vmatprep.mubr.msk.f32.mxu1 %vm93_vm0, %v58_v26 }
  0x22   :  { %1241 = vmatmul.mubr.msk.f32.gmra.mrb[6].mxu0 %vm93_vm0, %v27_v27  ;;  %1289 = vmatmul.mubr.msk.f32.gmra.mrb[6].mxu1 %vm93_vm0, %v59_v28  ;;  %v813_v27 = vld [vmem:[%s2256_s4] sm:$0xff] }
  0x23   :  { %1243 = vmatprep.mubr.msk.f32.mxu0 %vm93_vm0, %v28_v29  ;;  %1291 = vmatprep.mubr.msk.f32.mxu1 %vm93_vm0, %v60_v30  ;;  %v845_v28 = vld [vmem:[%s2256_s4 + $0x100] sm:$0xff] }
  0x26   :  { %1244 = vmatmul.mubr.msk.f32.gmra.mrb[8].mxu0 %vm93_vm0, %v29_v31  ;;  %1292 = vmatmul.mubr.msk.f32.gmra.mrb[8].mxu1 %vm93_vm0, %v61_v32 }
  0x27   :  { %1246 = vmatprep.mubr.msk.f32.mxu0 %vm93_vm0, %v30_v33  ;;  %1294 = vmatprep.mubr.msk.f32.mxu1 %vm93_vm0, %v62_v34 }
  0x2a   :  { %1247 = vmatmul.mubr.msk.f32.gmra.mrb[10].mxu0 %vm93_vm0, %v31_v35  ;;  %1295 = vmatmul.mubr.msk.f32.gmra.mrb[10].mxu1 %vm93_vm0, %v63_v36 }
  0x2b   :  { %1249 = vmatprep.mubr.msk.f32.mxu0 %vm93_vm0, %v32_v37  ;;  %1297 = vmatprep.mubr.msk.f32.mxu1 %vm93_vm0, %v64_v38 }
  0x2e   :  { %1250 = vmatmul.mubr.msk.f32.gmra.mrb[12].mxu0 %vm93_vm0, %v33_v39  ;;  %1298 = vmatmul.mubr.msk.f32.gmra.mrb[12].mxu1 %vm93_vm0, %v65_v40 }
  0x2f   :  { %1252 = vmatprep.mubr.msk.f32.mxu0 %vm93_vm0, %v34_v41  ;;  %1300 = vmatprep.mubr.msk.f32.mxu1 %vm93_vm0, %v66_v42  ;;  %v816_v41 = vld [vmem:[%s2256_s4 + $0x18] sm:$0xff] }
  0x30   :  { %v848_v42 = vld [vmem:[%s2256_s4 + $0x118] sm:$0xff] }
  0x32   :  { %1253 = vmatmul.mubr.msk.f32.gmra.mrb[14].mxu0 %vm93_vm0, %v35_v43  ;;  %1301 = vmatmul.mubr.msk.f32.gmra.mrb[14].mxu1 %vm93_vm0, %v67_v44 }
  0x33   :  { %1255 = vmatprep.mubr.msk.f32.mxu0 %vm93_vm0, %v36_v45  ;;  %1303 = vmatprep.mubr.msk.f32.mxu1 %vm93_vm0, %v68_v46 }
  0x36   :  { %1256 = vmatmul.mubr.msk.f32.gmra.mrb[16].mxu0 %vm93_vm0, %v37_v47  ;;  %1304 = vmatmul.mubr.msk.f32.gmra.mrb[16].mxu1 %vm93_vm0, %v69_v48 }
  0x37   :  { %1258 = vmatprep.mubr.msk.f32.mxu0 %vm93_vm0, %v38_v49  ;;  %1306 = vmatprep.mubr.msk.f32.mxu1 %vm93_vm0, %v70_v50  ;;  %v815_v49 = vld [vmem:[%s2256_s4 + $0x10] sm:$0xff] }
  0x38   :  { %v847_v50 = vld [vmem:[%s2256_s4 + $0x110] sm:$0xff] }
  0x3a   :  { %1259 = vmatmul.mubr.msk.f32.gmra.mrb[18].mxu0 %vm93_vm0, %v39_v51  ;;  %1307 = vmatmul.mubr.msk.f32.gmra.mrb[18].mxu1 %vm93_vm0, %v71_v52 }
  0x3b   :  { %1261 = vmatprep.mubr.msk.f32.mxu0 %vm93_vm0, %v40_v53  ;;  %1309 = vmatprep.mubr.msk.f32.mxu1 %vm93_vm0, %v72_v54 }
  0x3e   :  { %1262 = vmatmul.mubr.msk.f32.gmra.mrb[20].mxu0 %vm93_vm0, %v41_v55  ;;  %1310 = vmatmul.mubr.msk.f32.gmra.mrb[20].mxu1 %vm93_vm0, %v73_v56 }
  0x3f   :  { %1264 = vmatprep.mubr.msk.f32.mxu0 %vm93_vm0, %v42_v57  ;;  %1312 = vmatprep.mubr.msk.f32.mxu1 %vm93_vm0, %v74_v58 }
  0x42   :  { %1265 = vmatmul.mubr.msk.f32.gmra.mrb[22].mxu0 %vm93_vm0, %v43_v59  ;;  %1313 = vmatmul.mubr.msk.f32.gmra.mrb[22].mxu1 %vm93_vm0, %v75_v60 }
  0x43   :  { %1267 = vmatprep.mubr.msk.f32.mxu0 %vm93_vm0, %v44_v61  ;;  %1315 = vmatprep.mubr.msk.f32.mxu1 %vm93_vm0, %v76_v62 }
  0x46   :  { %1268 = vmatmul.mubr.msk.f32.gmra.mrb[24].mxu0 %vm93_vm0, %v45_v63  ;;  %1316 = vmatmul.mubr.msk.f32.gmra.mrb[24].mxu1 %vm93_vm0, %v77_v0 }
  0x47   :  { %1270 = vmatprep.mubr.msk.f32.mxu0 %vm93_vm0, %v46_v1  ;;  %1318 = vmatprep.mubr.msk.f32.mxu1 %vm93_vm0, %v78_v2  ;;  %v818_v1 = vld [vmem:[%s2256_s4 + $0x28] sm:$0xff] }
  0x48   :  { %v850_v2 = vld [vmem:[%s2256_s4 + $0x128] sm:$0xff] }
  0x4a   :  { %1271 = vmatmul.mubr.msk.f32.gmra.mrb[26].mxu0 %vm93_vm0, %v47_v3  ;;  %1319 = vmatmul.mubr.msk.f32.gmra.mrb[26].mxu1 %vm93_vm0, %v79_v4 }
  0x4b   :  { %1273 = vmatprep.mubr.msk.f32.mxu0 %vm93_vm0, %v48_v5  ;;  %1321 = vmatprep.mubr.msk.f32.mxu1 %vm93_vm0, %v80_v6 }
  0x4e   :  { %1274 = vmatmul.mubr.msk.f32.gmra.mrb[28].mxu0 %vm93_vm0, %v49_v7  ;;  %1322 = vmatmul.mubr.msk.f32.gmra.mrb[28].mxu1 %vm93_vm0, %v81_v8 }
  0x4f   :  { %1276 = vmatprep.mubr.msk.f32.mxu0 %vm93_vm0, %v50_v9  ;;  %1324 = vmatprep.mubr.msk.f32.mxu1 %vm93_vm0, %v82_v10  ;;  %v817_v9 = vld [vmem:[%s2256_s4 + $0x20] sm:$0xff] }
  0x50   :  { %v849_v10 = vld [vmem:[%s2256_s4 + $0x120] sm:$0xff] }
  0x52   :  { %1277 = vmatmul.mubr.msk.f32.gmra.mrb[30].mxu0 %vm93_vm0, %v51_v11  ;;  %1325 = vmatmul.mubr.msk.f32.gmra.mrb[30].mxu1 %vm93_vm0, %v83_v12 }
  0xe9   :  { %v1233_v14 = vpop.f32.mrb[0].mxu0  ;;  %v1281_v16 = vpop.f32.mrb[0].mxu1 }
  0xea   :  { %v679_v17 = vmul.f32 %v1233_v14, %v1669_v13  ;;  %v711_v18 = vmul.f32 %v1281_v16, %v1669_v13  ;;  %v352_v19 = vpop.f32.mrb[1].mxu0  ;;  %v512_v20 = vpop.f32.mrb[1].mxu1 }
  0xeb   :  { %v678_v23 = vmul.f32 %v1669_v13, %v352_v19  ;;  %v710_v24 = vmul.f32 %v1669_v13, %v512_v20 }
  0xec   :  { %v750_v25 = vadd.f32 %v1674_v15, %v679_v17  ;;  %v782_v26 = vadd.f32 %v1674_v15, %v711_v18 }
  0xed   :  { %v749_v29 = vadd.f32 %v1674_v15, %v678_v23  ;;  %v781_v30 = vadd.f32 %v1674_v15, %v710_v24  ;;  %v1236_v31 = vpop.f32.mrb[2].mxu0  ;;  %v1284_v32 = vpop.f32.mrb[2].mxu1 }
  0xee   :  { %v878_v33 = vadd.f32 %v814_v21, %v750_v25  ;;  %v910_v34 = vadd.f32 %v846_v22, %v782_v26  ;;  %v681_v35 = vmul.f32 %v1236_v31, %v1669_v13  ;;  %v713_v36 = vmul.f32 %v1284_v32, %v1669_v13  ;;  %v362_v37 = vpop.f32.mrb[3].mxu0  ;;  %v522_v38 = vpop.f32.mrb[3].mxu1 }
  0xef   :  { %v877_v39 = vadd.f32 %v813_v27, %v749_v29  ;;  %v909_v40 = vadd.f32 %v845_v28, %v781_v30  ;;  %v680_v43 = vmul.f32 %v1669_v13, %v362_v37  ;;  %v712_v44 = vmul.f32 %v1669_v13, %v522_v38  ;;  %v820_v27 = vld [vmem:[%s2256_s4 + $0x38] sm:$0xff] }
  0xf0   :  { %v942_v45 = vmax.f32 %v878_v33, 0.0  ;;  %v974_v46 = vmax.f32 %v910_v34, 0.0  ;;  %v752_v47 = vadd.f32 %v1674_v15, %v681_v35  ;;  %v784_v48 = vadd.f32 %v1674_v15, %v713_v36  ;;  %v852_v28 = vld [vmem:[%s2256_s4 + $0x138] sm:$0xff]  ;;  %v819_v35 = vld [vmem:[%s2256_s4 + $0x30] sm:$0xff] }
  0xf1   :  { %v941_v51 = vmax.f32 %v877_v39, 0.0  ;;  %v973_v52 = vmax.f32 %v909_v40, 0.0  ;;  %v751_v53 = vadd.f32 %v1674_v15, %v680_v43  ;;  %v783_v54 = vadd.f32 %v1674_v15, %v712_v44  ;;  %v1239_v55 = vpop.f32.mrb[4].mxu0  ;;  %v1287_v56 = vpop.f32.mrb[4].mxu1  ;;  %v851_v36 = vld [vmem:[%s2256_s4 + $0x130] sm:$0xff] }
  0xf2   :  { %1007 = vst.msk [vmem:[%s2257_s5 + $0x8] sm:$0xff] %vm1005_vm1, %v942_v45  ;;  %1039 = vst.msk [vmem:[%s2257_s5 + $0x108] sm:$0xff] %vm1005_vm1, %v974_v46  ;;  %v880_v57 = vadd.f32 %v816_v41, %v752_v47  ;;  %v912_v58 = vadd.f32 %v848_v42, %v784_v48  ;;  %v683_v59 = vmul.f32 %v1239_v55, %v1669_v13  ;;  %v372_v61 = vpop.f32.mrb[5].mxu0  ;;  %v532_v62 = vpop.f32.mrb[5].mxu1 }
  0xf3   :  { %v715_v60 = vmul.f32 %v1287_v56, %v1669_v13  ;;  %1006 = vst.msk [vmem:[%s2257_s5] sm:$0xff] %vm1005_vm1, %v941_v51  ;;  %1038 = vst.msk [vmem:[%s2257_s5 + $0x100] sm:$0xff] %vm1005_vm1, %v973_v52  ;;  %v879_v63 = vadd.f32 %v815_v49, %v751_v53  ;;  %v911_v0 = vadd.f32 %v847_v50, %v783_v54  ;;  %v822_v51 = vld [vmem:[%s2256_s4 + $0x48] sm:$0xff] }
  0xf4   :  { %v682_v3 = vmul.f32 %v1669_v13, %v372_v61  ;;  %v714_v4 = vmul.f32 %v1669_v13, %v532_v62  ;;  %v944_v5 = vmax.f32 %v880_v57, 0.0  ;;  %v976_v6 = vmax.f32 %v912_v58, 0.0  ;;  %v854_v52 = vld [vmem:[%s2256_s4 + $0x148] sm:$0xff] }
  0xf5   :  { %v754_v7 = vadd.f32 %v1674_v15, %v683_v59  ;;  %v786_v8 = vadd.f32 %v1674_v15, %v715_v60  ;;  %v943_v11 = vmax.f32 %v879_v63, 0.0  ;;  %v975_v12 = vmax.f32 %v911_v0, 0.0  ;;  %v1242_v17 = vpop.f32.mrb[6].mxu0  ;;  %v1290_v18 = vpop.f32.mrb[6].mxu1  ;;  %v821_v59 = vld [vmem:[%s2256_s4 + $0x40] sm:$0xff] }
  0xf6   :  { %v753_v14 = vadd.f32 %v1674_v15, %v682_v3  ;;  %v785_v16 = vadd.f32 %v1674_v15, %v714_v4  ;;  %1009 = vst.msk [vmem:[%s2257_s5 + $0x18] sm:$0xff] %vm1005_vm1, %v944_v5  ;;  %1041 = vst.msk [vmem:[%s2257_s5 + $0x118] sm:$0xff] %vm1005_vm1, %v976_v6  ;;  %v685_v21 = vmul.f32 %v1242_v17, %v1669_v13  ;;  %v382_v23 = vpop.f32.mrb[7].mxu0  ;;  %v542_v24 = vpop.f32.mrb[7].mxu1  ;;  %v853_v60 = vld [vmem:[%s2256_s4 + $0x140] sm:$0xff] }
  0xf7   :  { %v882_v19 = vadd.f32 %v818_v1, %v754_v7  ;;  %v914_v20 = vadd.f32 %v850_v2, %v786_v8  ;;  %v717_v22 = vmul.f32 %v1290_v18, %v1669_v13  ;;  %1008 = vst.msk [vmem:[%s2257_s5 + $0x10] sm:$0xff] %vm1005_vm1, %v943_v11  ;;  %1040 = vst.msk [vmem:[%s2257_s5 + $0x110] sm:$0xff] %vm1005_vm1, %v975_v12  ;;  %v824_v11 = vld [vmem:[%s2256_s4 + $0x58] sm:$0xff] }
  0xf8   :  { %v881_v25 = vadd.f32 %v817_v9, %v753_v14  ;;  %v913_v26 = vadd.f32 %v849_v10, %v785_v16  ;;  %v684_v29 = vmul.f32 %v1669_v13, %v382_v23  ;;  %v716_v30 = vmul.f32 %v1669_v13, %v542_v24  ;;  %v856_v12 = vld [vmem:[%s2256_s4 + $0x158] sm:$0xff] }
  0xf9   :  { %v946_v31 = vmax.f32 %v882_v19, 0.0  ;;  %v978_v32 = vmax.f32 %v914_v20, 0.0  ;;  %v756_v33 = vadd.f32 %v1674_v15, %v685_v21  ;;  %v788_v34 = vadd.f32 %v1674_v15, %v717_v22  ;;  %v1245_v41 = vpop.f32.mrb[8].mxu0  ;;  %v1293_v42 = vpop.f32.mrb[8].mxu1  ;;  %v823_v21 = vld [vmem:[%s2256_s4 + $0x50] sm:$0xff] }
  0xfa   :  { %v945_v37 = vmax.f32 %v881_v25, 0.0  ;;  %v977_v38 = vmax.f32 %v913_v26, 0.0  ;;  %v755_v39 = vadd.f32 %v1674_v15, %v684_v29  ;;  %v787_v40 = vadd.f32 %v1674_v15, %v716_v30  ;;  %v392_v47 = vpop.f32.mrb[9].mxu0  ;;  %v552_v48 = vpop.f32.mrb[9].mxu1  ;;  %v855_v22 = vld [vmem:[%s2256_s4 + $0x150] sm:$0xff] }
  0xfb   :  { %1011 = vst.msk [vmem:[%s2257_s5 + $0x28] sm:$0xff] %vm1005_vm1, %v946_v31  ;;  %1043 = vst.msk [vmem:[%s2257_s5 + $0x128] sm:$0xff] %vm1005_vm1, %v978_v32  ;;  %v884_v43 = vadd.f32 %v820_v27, %v756_v33  ;;  %v916_v44 = vadd.f32 %v852_v28, %v788_v34  ;;  %v687_v45 = vmul.f32 %v1245_v41, %v1669_v13 }
  0xfc   :  { %v719_v46 = vmul.f32 %v1293_v42, %v1669_v13  ;;  %1010 = vst.msk [vmem:[%s2257_s5 + $0x20] sm:$0xff] %vm1005_vm1, %v945_v37  ;;  %1042 = vst.msk [vmem:[%s2257_s5 + $0x120] sm:$0xff] %vm1005_vm1, %v977_v38  ;;  %v883_v49 = vadd.f32 %v819_v35, %v755_v39  ;;  %v915_v50 = vadd.f32 %v851_v36, %v787_v40  ;;  %v826_v37 = vld [vmem:[%s2256_s4 + $0x68] sm:$0xff] }
  0xfd   :  { %v686_v53 = vmul.f32 %v1669_v13, %v392_v47  ;;  %v718_v54 = vmul.f32 %v1669_v13, %v552_v48  ;;  %v948_v55 = vmax.f32 %v884_v43, 0.0  ;;  %v980_v56 = vmax.f32 %v916_v44, 0.0  ;;  %v1248_v1 = vpop.f32.mrb[10].mxu0  ;;  %v1296_v2 = vpop.f32.mrb[10].mxu1  ;;  %v858_v38 = vld [vmem:[%s2256_s4 + $0x168] sm:$0xff] }
  0xfe   :  { %v758_v57 = vadd.f32 %v1674_v15, %v687_v45  ;;  %v790_v58 = vadd.f32 %v1674_v15, %v719_v46  ;;  %v947_v61 = vmax.f32 %v883_v49, 0.0  ;;  %v979_v62 = vmax.f32 %v915_v50, 0.0  ;;  %v402_v7 = vpop.f32.mrb[11].mxu0  ;;  %v562_v8 = vpop.f32.mrb[11].mxu1  ;;  %v825_v45 = vld [vmem:[%s2256_s4 + $0x60] sm:$0xff] }
  0xff   :  { %v757_v63 = vadd.f32 %v1674_v15, %v686_v53  ;;  %v789_v0 = vadd.f32 %v1674_v15, %v718_v54  ;;  %1013 = vst.msk [vmem:[%s2257_s5 + $0x38] sm:$0xff] %vm1005_vm1, %v948_v55  ;;  %1045 = vst.msk [vmem:[%s2257_s5 + $0x138] sm:$0xff] %vm1005_vm1, %v980_v56  ;;  %v689_v5 = vmul.f32 %v1248_v1, %v1669_v13  ;;  %v857_v46 = vld [vmem:[%s2256_s4 + $0x160] sm:$0xff] }
 0x100   :  { %v886_v3 = vadd.f32 %v822_v51, %v758_v57  ;;  %v918_v4 = vadd.f32 %v854_v52, %v790_v58  ;;  %v721_v6 = vmul.f32 %v1296_v2, %v1669_v13  ;;  %1012 = vst.msk [vmem:[%s2257_s5 + $0x30] sm:$0xff] %vm1005_vm1, %v947_v61  ;;  %1044 = vst.msk [vmem:[%s2257_s5 + $0x130] sm:$0xff] %vm1005_vm1, %v979_v62  ;;  %v828_v61 = vld [vmem:[%s2256_s4 + $0x78] sm:$0xff] }
 0x101   :  { %v885_v9 = vadd.f32 %v821_v59, %v757_v63  ;;  %v917_v10 = vadd.f32 %v853_v60, %v789_v0  ;;  %v688_v14 = vmul.f32 %v1669_v13, %v402_v7  ;;  %v720_v16 = vmul.f32 %v1669_v13, %v562_v8  ;;  %v1251_v27 = vpop.f32.mrb[12].mxu0  ;;  %v1299_v28 = vpop.f32.mrb[12].mxu1  ;;  %v860_v62 = vld [vmem:[%s2256_s4 + $0x178] sm:$0xff] }
 0x102   :  { %v950_v17 = vmax.f32 %v886_v3, 0.0  ;;  %v982_v18 = vmax.f32 %v918_v4, 0.0  ;;  %v760_v19 = vadd.f32 %v1674_v15, %v689_v5  ;;  %v792_v20 = vadd.f32 %v1674_v15, %v721_v6  ;;  %v412_v33 = vpop.f32.mrb[13].mxu0  ;;  %v572_v34 = vpop.f32.mrb[13].mxu1  ;;  %v827_v5 = vld [vmem:[%s2256_s4 + $0x70] sm:$0xff] }
 0x103   :  { %v949_v23 = vmax.f32 %v885_v9, 0.0  ;;  %v981_v24 = vmax.f32 %v917_v10, 0.0  ;;  %v759_v25 = vadd.f32 %v1674_v15, %v688_v14  ;;  %v791_v26 = vadd.f32 %v1674_v15, %v720_v16  ;;  %v859_v6 = vld [vmem:[%s2256_s4 + $0x170] sm:$0xff] }
 0x104   :  { %1015 = vst.msk [vmem:[%s2257_s5 + $0x48] sm:$0xff] %vm1005_vm1, %v950_v17  ;;  %1047 = vst.msk [vmem:[%s2257_s5 + $0x148] sm:$0xff] %vm1005_vm1, %v982_v18  ;;  %v888_v29 = vadd.f32 %v824_v11, %v760_v19  ;;  %v920_v30 = vadd.f32 %v856_v12, %v792_v20  ;;  %v691_v31 = vmul.f32 %v1251_v27, %v1669_v13 }
 0x105   :  { %v723_v32 = vmul.f32 %v1299_v28, %v1669_v13  ;;  %1014 = vst.msk [vmem:[%s2257_s5 + $0x40] sm:$0xff] %vm1005_vm1, %v949_v23  ;;  %1046 = vst.msk [vmem:[%s2257_s5 + $0x140] sm:$0xff] %vm1005_vm1, %v981_v24  ;;  %v887_v35 = vadd.f32 %v823_v21, %v759_v25  ;;  %v919_v36 = vadd.f32 %v855_v22, %v791_v26  ;;  %v1254_v51 = vpop.f32.mrb[14].mxu0  ;;  %v1302_v52 = vpop.f32.mrb[14].mxu1  ;;  %v830_v23 = vld [vmem:[%s2256_s4 + $0x88] sm:$0xff] }
 0x106   :  { %v690_v39 = vmul.f32 %v1669_v13, %v412_v33  ;;  %v722_v40 = vmul.f32 %v1669_v13, %v572_v34  ;;  %v952_v41 = vmax.f32 %v888_v29, 0.0  ;;  %v984_v42 = vmax.f32 %v920_v30, 0.0  ;;  %v422_v57 = vpop.f32.mrb[15].mxu0  ;;  %v582_v58 = vpop.f32.mrb[15].mxu1  ;;  %v862_v24 = vld [vmem:[%s2256_s4 + $0x188] sm:$0xff] }
 0x107   :  { %v762_v43 = vadd.f32 %v1674_v15, %v691_v31  ;;  %v794_v44 = vadd.f32 %v1674_v15, %v723_v32  ;;  %v951_v47 = vmax.f32 %v887_v35, 0.0  ;;  %v983_v48 = vmax.f32 %v919_v36, 0.0  ;;  %v829_v31 = vld [vmem:[%s2256_s4 + $0x80] sm:$0xff] }
 0x108   :  { %v761_v49 = vadd.f32 %v1674_v15, %v690_v39  ;;  %v793_v50 = vadd.f32 %v1674_v15, %v722_v40  ;;  %1017 = vst.msk [vmem:[%s2257_s5 + $0x58] sm:$0xff] %vm1005_vm1, %v952_v41  ;;  %1049 = vst.msk [vmem:[%s2257_s5 + $0x158] sm:$0xff] %vm1005_vm1, %v984_v42  ;;  %v693_v55 = vmul.f32 %v1254_v51, %v1669_v13  ;;  %v861_v32 = vld [vmem:[%s2256_s4 + $0x180] sm:$0xff] }
 0x109   :  { %v890_v53 = vadd.f32 %v826_v37, %v762_v43  ;;  %v922_v54 = vadd.f32 %v858_v38, %v794_v44  ;;  %v725_v56 = vmul.f32 %v1302_v52, %v1669_v13  ;;  %1016 = vst.msk [vmem:[%s2257_s5 + $0x50] sm:$0xff] %vm1005_vm1, %v951_v47  ;;  %1048 = vst.msk [vmem:[%s2257_s5 + $0x150] sm:$0xff] %vm1005_vm1, %v983_v48  ;;  %v1257_v11 = vpop.f32.mrb[16].mxu0  ;;  %v1305_v12 = vpop.f32.mrb[16].mxu1  ;;  %v832_v47 = vld [vmem:[%s2256_s4 + $0x98] sm:$0xff] }
 0x10a   :  { %v889_v59 = vadd.f32 %v825_v45, %v761_v49  ;;  %v921_v60 = vadd.f32 %v857_v46, %v793_v50  ;;  %v692_v63 = vmul.f32 %v1669_v13, %v422_v57  ;;  %v724_v0 = vmul.f32 %v1669_v13, %v582_v58  ;;  %v432_v19 = vpop.f32.mrb[17].mxu0  ;;  %v592_v20 = vpop.f32.mrb[17].mxu1  ;;  %v864_v48 = vld [vmem:[%s2256_s4 + $0x198] sm:$0xff] }
 0x10b   :  { %v954_v1 = vmax.f32 %v890_v53, 0.0  ;;  %v986_v2 = vmax.f32 %v922_v54, 0.0  ;;  %v764_v3 = vadd.f32 %v1674_v15, %v693_v55  ;;  %v796_v4 = vadd.f32 %v1674_v15, %v725_v56  ;;  %v831_v55 = vld [vmem:[%s2256_s4 + $0x90] sm:$0xff] }
 0x10c   :  { %v953_v7 = vmax.f32 %v889_v59, 0.0  ;;  %v985_v8 = vmax.f32 %v921_v60, 0.0  ;;  %v763_v9 = vadd.f32 %v1674_v15, %v692_v63  ;;  %v795_v10 = vadd.f32 %v1674_v15, %v724_v0  ;;  %v863_v56 = vld [vmem:[%s2256_s4 + $0x190] sm:$0xff] }
 0x10d   :  { %1019 = vst.msk [vmem:[%s2257_s5 + $0x68] sm:$0xff] %vm1005_vm1, %v954_v1  ;;  %1051 = vst.msk [vmem:[%s2257_s5 + $0x168] sm:$0xff] %vm1005_vm1, %v986_v2  ;;  %v892_v14 = vadd.f32 %v828_v61, %v764_v3  ;;  %v924_v16 = vadd.f32 %v860_v62, %v796_v4  ;;  %v695_v17 = vmul.f32 %v1257_v11, %v1669_v13  ;;  %v1260_v37 = vpop.f32.mrb[18].mxu0  ;;  %v1308_v38 = vpop.f32.mrb[18].mxu1 }
 0x10e   :  { %v727_v18 = vmul.f32 %v1305_v12, %v1669_v13  ;;  %1018 = vst.msk [vmem:[%s2257_s5 + $0x60] sm:$0xff] %vm1005_vm1, %v953_v7  ;;  %1050 = vst.msk [vmem:[%s2257_s5 + $0x160] sm:$0xff] %vm1005_vm1, %v985_v8  ;;  %v891_v21 = vadd.f32 %v827_v5, %v763_v9  ;;  %v923_v22 = vadd.f32 %v859_v6, %v795_v10  ;;  %v442_v43 = vpop.f32.mrb[19].mxu0  ;;  %v602_v44 = vpop.f32.mrb[19].mxu1  ;;  %v834_v7 = vld [vmem:[%s2256_s4 + $0xa8] sm:$0xff] }
 0x10f   :  { %v694_v25 = vmul.f32 %v1669_v13, %v432_v19  ;;  %v726_v26 = vmul.f32 %v1669_v13, %v592_v20  ;;  %v956_v27 = vmax.f32 %v892_v14, 0.0  ;;  %v988_v28 = vmax.f32 %v924_v16, 0.0  ;;  %v866_v8 = vld [vmem:[%s2256_s4 + $0x1a8] sm:$0xff] }
 0x110   :  { %v766_v29 = vadd.f32 %v1674_v15, %v695_v17  ;;  %v798_v30 = vadd.f32 %v1674_v15, %v727_v18  ;;  %v955_v33 = vmax.f32 %v891_v21, 0.0  ;;  %v987_v34 = vmax.f32 %v923_v22, 0.0  ;;  %v833_v17 = vld [vmem:[%s2256_s4 + $0xa0] sm:$0xff] }
 0x111   :  { %v765_v35 = vadd.f32 %v1674_v15, %v694_v25  ;;  %v797_v36 = vadd.f32 %v1674_v15, %v726_v26  ;;  %1021 = vst.msk [vmem:[%s2257_s5 + $0x78] sm:$0xff] %vm1005_vm1, %v956_v27  ;;  %1053 = vst.msk [vmem:[%s2257_s5 + $0x178] sm:$0xff] %vm1005_vm1, %v988_v28  ;;  %v697_v41 = vmul.f32 %v1260_v37, %v1669_v13  ;;  %v1263_v61 = vpop.f32.mrb[20].mxu0  ;;  %v1311_v62 = vpop.f32.mrb[20].mxu1  ;;  %v865_v18 = vld [vmem:[%s2256_s4 + $0x1a0] sm:$0xff] }
 0x112   :  { %v894_v39 = vadd.f32 %v830_v23, %v766_v29  ;;  %v926_v40 = vadd.f32 %v862_v24, %v798_v30  ;;  %v729_v42 = vmul.f32 %v1308_v38, %v1669_v13  ;;  %1020 = vst.msk [vmem:[%s2257_s5 + $0x70] sm:$0xff] %vm1005_vm1, %v955_v33  ;;  %1052 = vst.msk [vmem:[%s2257_s5 + $0x170] sm:$0xff] %vm1005_vm1, %v987_v34  ;;  %v452_v3 = vpop.f32.mrb[21].mxu0  ;;  %v612_v4 = vpop.f32.mrb[21].mxu1  ;;  %v836_v33 = vld [vmem:[%s2256_s4 + $0xb8] sm:$0xff] }
 0x113   :  { %v893_v45 = vadd.f32 %v829_v31, %v765_v35  ;;  %v925_v46 = vadd.f32 %v861_v32, %v797_v36  ;;  %v696_v49 = vmul.f32 %v1669_v13, %v442_v43  ;;  %v728_v50 = vmul.f32 %v1669_v13, %v602_v44  ;;  %v868_v34 = vld [vmem:[%s2256_s4 + $0x1b8] sm:$0xff] }
 0x114   :  { %v958_v51 = vmax.f32 %v894_v39, 0.0  ;;  %v990_v52 = vmax.f32 %v926_v40, 0.0  ;;  %v768_v53 = vadd.f32 %v1674_v15, %v697_v41  ;;  %v800_v54 = vadd.f32 %v1674_v15, %v729_v42  ;;  %v835_v41 = vld [vmem:[%s2256_s4 + $0xb0] sm:$0xff] }
 0x115   :  { %v957_v57 = vmax.f32 %v893_v45, 0.0  ;;  %v989_v58 = vmax.f32 %v925_v46, 0.0  ;;  %v767_v59 = vadd.f32 %v1674_v15, %v696_v49  ;;  %v799_v60 = vadd.f32 %v1674_v15, %v728_v50  ;;  %v1266_v23 = vpop.f32.mrb[22].mxu0  ;;  %v1314_v24 = vpop.f32.mrb[22].mxu1  ;;  %v867_v42 = vld [vmem:[%s2256_s4 + $0x1b0] sm:$0xff] }
 0x116   :  { %1023 = vst.msk [vmem:[%s2257_s5 + $0x88] sm:$0xff] %vm1005_vm1, %v958_v51  ;;  %1055 = vst.msk [vmem:[%s2257_s5 + $0x188] sm:$0xff] %vm1005_vm1, %v990_v52  ;;  %v896_v63 = vadd.f32 %v832_v47, %v768_v53  ;;  %v928_v0 = vadd.f32 %v864_v48, %v800_v54  ;;  %v699_v1 = vmul.f32 %v1263_v61, %v1669_v13  ;;  %v462_v29 = vpop.f32.mrb[23].mxu0  ;;  %v622_v30 = vpop.f32.mrb[23].mxu1 }
 0x117   :  { %v731_v2 = vmul.f32 %v1311_v62, %v1669_v13  ;;  %1022 = vst.msk [vmem:[%s2257_s5 + $0x80] sm:$0xff] %vm1005_vm1, %v957_v57  ;;  %1054 = vst.msk [vmem:[%s2257_s5 + $0x180] sm:$0xff] %vm1005_vm1, %v989_v58  ;;  %v895_v5 = vadd.f32 %v831_v55, %v767_v59  ;;  %v927_v6 = vadd.f32 %v863_v56, %v799_v60  ;;  %v838_v57 = vld [vmem:[%s2256_s4 + $0xc8] sm:$0xff] }
 0x118   :  { %v698_v9 = vmul.f32 %v1669_v13, %v452_v3  ;;  %v730_v10 = vmul.f32 %v1669_v13, %v612_v4  ;;  %v960_v11 = vmax.f32 %v896_v63, 0.0  ;;  %v992_v12 = vmax.f32 %v928_v0, 0.0  ;;  %v870_v58 = vld [vmem:[%s2256_s4 + $0x1c8] sm:$0xff] }
 0x119   :  { %v770_v14 = vadd.f32 %v1674_v15, %v699_v1  ;;  %v802_v16 = vadd.f32 %v1674_v15, %v731_v2  ;;  %v959_v19 = vmax.f32 %v895_v5, 0.0  ;;  %v991_v20 = vmax.f32 %v927_v6, 0.0  ;;  %v1269_v47 = vpop.f32.mrb[24].mxu0  ;;  %v1317_v48 = vpop.f32.mrb[24].mxu1  ;;  %v837_v1 = vld [vmem:[%s2256_s4 + $0xc0] sm:$0xff] }
 0x11a   :  { %v769_v21 = vadd.f32 %v1674_v15, %v698_v9  ;;  %v801_v22 = vadd.f32 %v1674_v15, %v730_v10  ;;  %1025 = vst.msk [vmem:[%s2257_s5 + $0x98] sm:$0xff] %vm1005_vm1, %v960_v11  ;;  %1057 = vst.msk [vmem:[%s2257_s5 + $0x198] sm:$0xff] %vm1005_vm1, %v992_v12  ;;  %v701_v27 = vmul.f32 %v1266_v23, %v1669_v13  ;;  %v472_v53 = vpop.f32.mrb[25].mxu0  ;;  %v632_v54 = vpop.f32.mrb[25].mxu1  ;;  %v869_v2 = vld [vmem:[%s2256_s4 + $0x1c0] sm:$0xff] }
 0x11b   :  { %v898_v25 = vadd.f32 %v834_v7, %v770_v14  ;;  %v930_v26 = vadd.f32 %v866_v8, %v802_v16  ;;  %v733_v28 = vmul.f32 %v1314_v24, %v1669_v13  ;;  %1024 = vst.msk [vmem:[%s2257_s5 + $0x90] sm:$0xff] %vm1005_vm1, %v959_v19  ;;  %1056 = vst.msk [vmem:[%s2257_s5 + $0x190] sm:$0xff] %vm1005_vm1, %v991_v20  ;;  %v840_v19 = vld [vmem:[%s2256_s4 + $0xd8] sm:$0xff] }
 0x11c   :  { %v897_v31 = vadd.f32 %v833_v17, %v769_v21  ;;  %v929_v32 = vadd.f32 %v865_v18, %v801_v22  ;;  %v700_v35 = vmul.f32 %v1669_v13, %v462_v29  ;;  %v732_v36 = vmul.f32 %v1669_v13, %v622_v30  ;;  %v872_v20 = vld [vmem:[%s2256_s4 + $0x1d8] sm:$0xff] }
 0x11d   :  { %v962_v37 = vmax.f32 %v898_v25, 0.0  ;;  %v994_v38 = vmax.f32 %v930_v26, 0.0  ;;  %v772_v39 = vadd.f32 %v1674_v15, %v701_v27  ;;  %v804_v40 = vadd.f32 %v1674_v15, %v733_v28  ;;  %v1272_v7 = vpop.f32.mrb[26].mxu0  ;;  %v1320_v8 = vpop.f32.mrb[26].mxu1  ;;  %v839_v27 = vld [vmem:[%s2256_s4 + $0xd0] sm:$0xff] }
 0x11e   :  { %v961_v43 = vmax.f32 %v897_v31, 0.0  ;;  %v993_v44 = vmax.f32 %v929_v32, 0.0  ;;  %v771_v45 = vadd.f32 %v1674_v15, %v700_v35  ;;  %v803_v46 = vadd.f32 %v1674_v15, %v732_v36  ;;  %v482_v14 = vpop.f32.mrb[27].mxu0  ;;  %v642_v16 = vpop.f32.mrb[27].mxu1  ;;  %v871_v28 = vld [vmem:[%s2256_s4 + $0x1d0] sm:$0xff] }
 0x11f   :  { %1027 = vst.msk [vmem:[%s2257_s5 + $0xa8] sm:$0xff] %vm1005_vm1, %v962_v37  ;;  %1059 = vst.msk [vmem:[%s2257_s5 + $0x1a8] sm:$0xff] %vm1005_vm1, %v994_v38  ;;  %v900_v49 = vadd.f32 %v836_v33, %v772_v39  ;;  %v932_v50 = vadd.f32 %v868_v34, %v804_v40  ;;  %v703_v51 = vmul.f32 %v1269_v47, %v1669_v13 }
 0x120   :  { %v735_v52 = vmul.f32 %v1317_v48, %v1669_v13  ;;  %1026 = vst.msk [vmem:[%s2257_s5 + $0xa0] sm:$0xff] %vm1005_vm1, %v961_v43  ;;  %1058 = vst.msk [vmem:[%s2257_s5 + $0x1a0] sm:$0xff] %vm1005_vm1, %v993_v44  ;;  %v899_v55 = vadd.f32 %v835_v41, %v771_v45  ;;  %v931_v56 = vadd.f32 %v867_v42, %v803_v46  ;;  %v842_v43 = vld [vmem:[%s2256_s4 + $0xe8] sm:$0xff] }
 0x121   :  { %v702_v59 = vmul.f32 %v1669_v13, %v472_v53  ;;  %v734_v60 = vmul.f32 %v1669_v13, %v632_v54  ;;  %v964_v61 = vmax.f32 %v900_v49, 0.0  ;;  %v996_v62 = vmax.f32 %v932_v50, 0.0  ;;  %v1275_v33 = vpop.f32.mrb[28].mxu0  ;;  %v1323_v34 = vpop.f32.mrb[28].mxu1  ;;  %v874_v44 = vld [vmem:[%s2256_s4 + $0x1e8] sm:$0xff] }
 0x122   :  { %v774_v63 = vadd.f32 %v1674_v15, %v703_v51  ;;  %v806_v0 = vadd.f32 %v1674_v15, %v735_v52  ;;  %v963_v3 = vmax.f32 %v899_v55, 0.0  ;;  %v995_v4 = vmax.f32 %v931_v56, 0.0  ;;  %v492_v39 = vpop.f32.mrb[29].mxu0  ;;  %v652_v40 = vpop.f32.mrb[29].mxu1  ;;  %v841_v51 = vld [vmem:[%s2256_s4 + $0xe0] sm:$0xff] }
 0x123   :  { %v773_v5 = vadd.f32 %v1674_v15, %v702_v59  ;;  %v805_v6 = vadd.f32 %v1674_v15, %v734_v60  ;;  %1029 = vst.msk [vmem:[%s2257_s5 + $0xb8] sm:$0xff] %vm1005_vm1, %v964_v61  ;;  %1061 = vst.msk [vmem:[%s2257_s5 + $0x1b8] sm:$0xff] %vm1005_vm1, %v996_v62  ;;  %v705_v11 = vmul.f32 %v1272_v7, %v1669_v13  ;;  %v873_v52 = vld [vmem:[%s2256_s4 + $0x1e0] sm:$0xff] }
 0x124   :  { %v902_v9 = vadd.f32 %v838_v57, %v774_v63  ;;  %v934_v10 = vadd.f32 %v870_v58, %v806_v0  ;;  %v737_v12 = vmul.f32 %v1320_v8, %v1669_v13  ;;  %1028 = vst.msk [vmem:[%s2257_s5 + $0xb0] sm:$0xff] %vm1005_vm1, %v963_v3  ;;  %1060 = vst.msk [vmem:[%s2257_s5 + $0x1b0] sm:$0xff] %vm1005_vm1, %v995_v4  ;;  %v844_v3 = vld [vmem:[%s2256_s4 + $0xf8] sm:$0xff] }
 0x125   :  { %v901_v17 = vadd.f32 %v837_v1, %v773_v5  ;;  %v933_v18 = vadd.f32 %v869_v2, %v805_v6  ;;  %v704_v21 = vmul.f32 %v1669_v13, %v482_v14  ;;  %v736_v22 = vmul.f32 %v1669_v13, %v642_v16  ;;  %v1278_v57 = vpop.f32.mrb[30].mxu0  ;;  %v1326_v58 = vpop.f32.mrb[30].mxu1  ;;  %v876_v4 = vld [vmem:[%s2256_s4 + $0x1f8] sm:$0xff] }
 0x126   :  { %v966_v23 = vmax.f32 %v902_v9, 0.0  ;;  %v998_v24 = vmax.f32 %v934_v10, 0.0  ;;  %v776_v25 = vadd.f32 %v1674_v15, %v705_v11  ;;  %v808_v26 = vadd.f32 %v1674_v15, %v737_v12  ;;  %v502_v63 = vpop.f32.mrb[31].mxu0  ;;  %v662_v0 = vpop.f32.mrb[31].mxu1  ;;  %v843_v11 = vld [vmem:[%s2256_s4 + $0xf0] sm:$0xff] }
 0x127   :  { %v965_v29 = vmax.f32 %v901_v17, 0.0  ;;  %v997_v30 = vmax.f32 %v933_v18, 0.0  ;;  %v775_v31 = vadd.f32 %v1674_v15, %v704_v21  ;;  %v807_v32 = vadd.f32 %v1674_v15, %v736_v22  ;;  %v875_v12 = vld [vmem:[%s2256_s4 + $0x1f0] sm:$0xff] }
 0x128   :  { %1031 = vst.msk [vmem:[%s2257_s5 + $0xc8] sm:$0xff] %vm1005_vm1, %v966_v23  ;;  %1063 = vst.msk [vmem:[%s2257_s5 + $0x1c8] sm:$0xff] %vm1005_vm1, %v998_v24  ;;  %v904_v35 = vadd.f32 %v840_v19, %v776_v25  ;;  %v936_v36 = vadd.f32 %v872_v20, %v808_v26  ;;  %v707_v37 = vmul.f32 %v1275_v33, %v1669_v13 }
 0x129   :  { %v739_v38 = vmul.f32 %v1323_v34, %v1669_v13  ;;  %1030 = vst.msk [vmem:[%s2257_s5 + $0xc0] sm:$0xff] %vm1005_vm1, %v965_v29  ;;  %1062 = vst.msk [vmem:[%s2257_s5 + $0x1c0] sm:$0xff] %vm1005_vm1, %v997_v30  ;;  %v903_v41 = vadd.f32 %v839_v27, %v775_v31  ;;  %v935_v42 = vadd.f32 %v871_v28, %v807_v32 }
 0x12a   :  { %v706_v45 = vmul.f32 %v1669_v13, %v492_v39  ;;  %v738_v46 = vmul.f32 %v1669_v13, %v652_v40  ;;  %v968_v47 = vmax.f32 %v904_v35, 0.0  ;;  %v1000_v48 = vmax.f32 %v936_v36, 0.0 }
 0x12b   :  { %v778_v49 = vadd.f32 %v1674_v15, %v707_v37  ;;  %v810_v50 = vadd.f32 %v1674_v15, %v739_v38  ;;  %v967_v53 = vmax.f32 %v903_v41, 0.0  ;;  %v999_v54 = vmax.f32 %v935_v42, 0.0 }
 0x12c   :  { %v777_v55 = vadd.f32 %v1674_v15, %v706_v45  ;;  %v809_v56 = vadd.f32 %v1674_v15, %v738_v46  ;;  %1033 = vst.msk [vmem:[%s2257_s5 + $0xd8] sm:$0xff] %vm1005_vm1, %v968_v47  ;;  %1065 = vst.msk [vmem:[%s2257_s5 + $0x1d8] sm:$0xff] %vm1005_vm1, %v1000_v48  ;;  %v709_v61 = vmul.f32 %v1278_v57, %v1669_v13 }
 0x12d   :  { %v906_v59 = vadd.f32 %v842_v43, %v778_v49  ;;  %v938_v60 = vadd.f32 %v874_v44, %v810_v50  ;;  %v741_v62 = vmul.f32 %v1326_v58, %v1669_v13  ;;  %1032 = vst.msk [vmem:[%s2257_s5 + $0xd0] sm:$0xff] %vm1005_vm1, %v967_v53  ;;  %1064 = vst.msk [vmem:[%s2257_s5 + $0x1d0] sm:$0xff] %vm1005_vm1, %v999_v54 }
 0x12e   :  { %v905_v1 = vadd.f32 %v841_v51, %v777_v55  ;;  %v937_v2 = vadd.f32 %v873_v52, %v809_v56  ;;  %v708_v5 = vmul.f32 %v1669_v13, %v502_v63  ;;  %v740_v6 = vmul.f32 %v1669_v13, %v662_v0 }
 0x12f   :  { %v970_v7 = vmax.f32 %v906_v59, 0.0  ;;  %v1002_v8 = vmax.f32 %v938_v60, 0.0  ;;  %v780_v9 = vadd.f32 %v1674_v15, %v709_v61  ;;  %v812_v10 = vadd.f32 %v1674_v15, %v741_v62 }
 0x130   :  { %v969_v14 = vmax.f32 %v905_v1, 0.0  ;;  %v1001_v16 = vmax.f32 %v937_v2, 0.0  ;;  %v779_v17 = vadd.f32 %v1674_v15, %v708_v5  ;;  %v811_v13 = vadd.f32 %v1674_v15, %v740_v6 }
 0x131   :  { %1035 = vst.msk [vmem:[%s2257_s5 + $0xe8] sm:$0xff] %vm1005_vm1, %v970_v7  ;;  %1067 = vst.msk [vmem:[%s2257_s5 + $0x1e8] sm:$0xff] %vm1005_vm1, %v1002_v8  ;;  %v908_v18 = vadd.f32 %v844_v3, %v780_v9  ;;  %v940_v19 = vadd.f32 %v876_v4, %v812_v10 }
 0x132   :  { %1034 = vst.msk [vmem:[%s2257_s5 + $0xe0] sm:$0xff] %vm1005_vm1, %v969_v14  ;;  %1066 = vst.msk [vmem:[%s2257_s5 + $0x1e0] sm:$0xff] %vm1005_vm1, %v1001_v16  ;;  %v907_v15 = vadd.f32 %v843_v11, %v779_v17  ;;  %v939_v20 = vadd.f32 %v875_v12, %v811_v13 }
 0x133   :  { %v972_v21 = vmax.f32 %v908_v18, 0.0  ;;  %v1004_v22 = vmax.f32 %v940_v19, 0.0 }
 0x134   :  { %v971_v23 = vmax.f32 %v907_v15, 0.0  ;;  %v1003_v24 = vmax.f32 %v939_v20, 0.0 }
 0x135   :  { %1037 = vst.msk [vmem:[%s2257_s5 + $0xf8] sm:$0xff] %vm1005_vm1, %v972_v21  ;;  %1069 = vst.msk [vmem:[%s2257_s5 + $0x1f8] sm:$0xff] %vm1005_vm1, %v1004_v22 }
 0x136   :  { %1036 = vst.msk [vmem:[%s2257_s5 + $0xf0] sm:$0xff] %vm1005_vm1, %v971_v23  ;;  %1068 = vst.msk [vmem:[%s2257_s5 + $0x1f0] sm:$0xff] %vm1005_vm1, %v1003_v24 }

// kernel: embedding_map_net_forward.13
= control target key start
LH: loop header
LB: loop body
LE: loop exit
PB: predicated region body
PF: predicated region fallthrough
CT: control target
= control target key end

     0   :  { %vm45_vm0 = vcmask 588800   ;;  %v304_v29 = vlaneseq  ;;  %v458_v33 = vmov 0   ;;  %vm325_vm3 = vcmask 261120   ;;  %s724_s1 = inlined_call_operand.vmem [shape: f32[72,32], index: 1, kind: input, shape index: {}]   ;;  %s725_s0 = inlined_call_operand.vmem [shape: f32[128,72], index: 0, kind: input, shape index: {}]   ;;  %s726_s4 = inlined_call_operand.vmem [shape: f32[1,32], index: 4, kind: input, shape index: {}]   ;;  %s727_s2 = inlined_call_operand.vmem [shape: f32[1,32], index: 2, kind: input, shape index: {}]   ;;  %s728_s3 = inlined_call_operand.vmem [shape: f32[1,32], index: 3, kind: input, shape index: {}]   ;;  %s729_s5 = inlined_call_operand.vmem [shape: f32[128,32], index: 5, kind: output, shape index: {}]  }
   0x1   :  { %v36_v0 = vld [vmem:[%s724_s1] sm:$0xff]  ;;  %v37_v1 = vld [vmem:[%s724_s1 + $0x8] sm:$0xff]  ;;  %v38_v2 = vld [vmem:[%s724_s1 + $0x10] sm:$0xff] }
   0x2   :  { %v431_v3 = vpack.c.bf16 %v37_v1, %v36_v0  ;;  %v39_v4 = vld [vmem:[%s724_s1 + $0x18] sm:$0xff]  ;;  %v40_v6 = vld [vmem:[%s724_s1 + $0x20] sm:$0xff]  ;;  %v41_v7 = vld [vmem:[%s724_s1 + $0x28] sm:$0xff]  ;;  %v305_v31 = vshrl.u32 %v304_v29, 7 }
   0x3   :  { %v435_v5 = vpack.c.bf16 %v39_v4, %v38_v2  ;;  %v20_v8 = vld [vmem:[%s725_s0] sm:$0xff]  ;;  %v439_v10 = vpack.c.bf16 %v41_v7, %v40_v6  ;;  %v42_v11 = vld [vmem:[%s724_s1 + $0x30] sm:$0xff]  ;;  %v43_v12 = vld [vmem:[%s724_s1 + $0x38] sm:$0xff] }
   0x4   :  { %432 = vmatprep.subr.bf16.mxu0 %v431_v3  ;;  %447 = vmatprep.subr.bf16.mxu1 %v431_v3  ;;  %v28_v9 = vld [vmem:[%s725_s0 + $0x40] sm:$0xff]  ;;  %v443_v13 = vpack.c.bf16 %v43_v12, %v42_v11  ;;  %v21_v15 = vld [vmem:[%s725_s0 + $0x8] sm:$0xff]  ;;  %v22_v17 = vld [vmem:[%s725_s0 + $0x10] sm:$0xff]  ;;  %v306_v32 = vsub.s32 0, %v305_v31 }
   0x5   :  { %434 = vmatpush3.bf16.msra.mxu0 %v431_v3  ;;  %452 = vmatpush3.bf16.msra.mxu1 %v431_v3  ;;  %v44_v14 = vld [vmem:[%s724_s1 + $0x40] sm:$0xff]  ;;  %v29_v16 = vld [vmem:[%s725_s0 + $0x48] sm:$0xff]  ;;  %v30_v18 = vld [vmem:[%s725_s0 + $0x50] sm:$0xff] }
   0x6   :  { %436 = vmatprep.subr.bf16.mxu0 %v435_v5  ;;  %448 = vmatprep.subr.bf16.mxu1 %v435_v5  ;;  %v23_v19 = vld [vmem:[%s725_s0 + $0x18] sm:$0xff]  ;;  %v24_v21 = vld [vmem:[%s725_s0 + $0x20] sm:$0xff]  ;;  %v25_v23 = vld [vmem:[%s725_s0 + $0x28] sm:$0xff] }
   0x7   :  { %407 = vmatprep.mubr.msk.f32.mxu0 %vm45_vm0, %v20_v8  ;;  %419 = vmatprep.mubr.msk.f32.mxu1 %vm45_vm0, %v28_v9  ;;  %v31_v20 = vld [vmem:[%s725_s0 + $0x58] sm:$0xff]  ;;  %v32_v22 = vld [vmem:[%s725_s0 + $0x60] sm:$0xff]  ;;  %v33_v24 = vld [vmem:[%s725_s0 + $0x68] sm:$0xff] }
   0x8   :  { %v26_v25 = vld [vmem:[%s725_s0 + $0x30] sm:$0xff]  ;;  %v27_v27 = vld [vmem:[%s725_s0 + $0x38] sm:$0xff]  ;;  %v285_v30 = vld [vmem:[%s726_s4] sm:$0x1] }
   0x9   :  { %438 = vmatpush3.bf16.msra.mxu0 %v435_v5  ;;  %453 = vmatpush3.bf16.msra.mxu1 %v435_v5  ;;  %v34_v26 = vld [vmem:[%s725_s0 + $0x70] sm:$0xff]  ;;  %v35_v28 = vld [vmem:[%s725_s0 + $0x78] sm:$0xff]  ;;  %vm286_vm1 = vcmp.gt.f32.partialorder %v285_v30, 0.0  ;;  %v586_v35 = vld [vmem:[%s727_s2] ss:$0 sm:$0xff] }
   0xa   :  { %440 = vmatprep.subr.bf16.mxu0 %v439_v10  ;;  %449 = vmatprep.subr.bf16.mxu1 %v439_v10  ;;  %v303_v34 = vsel %vm286_vm1, 1, %v458_v33  ;;  %v591_v37 = vld [vmem:[%s728_s3] ss:$0 sm:$0xff] }
   0xb   :  { %v593_v38 = vrot.slane %v303_v34, %v306_v32 }
   0xd   :  { %442 = vmatpush3.bf16.msra.mxu0 %v439_v10  ;;  %454 = vmatpush3.bf16.msra.mxu1 %v439_v10  ;;  %vm308_vm2 = vcmp.eq.s32.totalorder %v593_v38, 1 }
   0xe   :  { %444 = vmatprep.subr.bf16.mxu0 %v443_v13  ;;  %450 = vmatprep.subr.bf16.mxu1 %v443_v13 }
  0x11   :  { %446 = vmatpush3.bf16.msra.mxu0 %v443_v13  ;;  %455 = vmatpush3.bf16.msra.mxu1 %v443_v13 }
  0x12   :  { %405 = vmatprep.subr.mxu0 %v44_v14  ;;  %451 = vmatprep.subr.mxu1 %v44_v14 }
  0x15   :  { %406 = vmatpush3.msra.mxu0 %v44_v14  ;;  %456 = vmatpush3.msra.mxu1 %v44_v14 }
  0x16   :  { %408 = vmatmul.mubr.msk.f32.vlgmr.msra.gmra.mrb[0].mxu0 %vm45_vm0, %v21_v15  ;;  %420 = vmatmul.mubr.msk.f32.vlgmr.msra.gmra.mrb[0].mxu1 %vm45_vm0, %v29_v16 }
  0x17   :  { %410 = vmatprep.mubr.msk.f32.mxu0 %vm45_vm0, %v22_v17  ;;  %422 = vmatprep.mubr.msk.f32.mxu1 %vm45_vm0, %v30_v18 }
  0x1a   :  { %411 = vmatmul.mubr.msk.f32.gmra.mrb[2].mxu0 %vm45_vm0, %v23_v19  ;;  %423 = vmatmul.mubr.msk.f32.gmra.mrb[2].mxu1 %vm45_vm0, %v31_v20 }
  0x1b   :  { %413 = vmatprep.mubr.msk.f32.mxu0 %vm45_vm0, %v24_v21  ;;  %425 = vmatprep.mubr.msk.f32.mxu1 %vm45_vm0, %v32_v22 }
  0x1e   :  { %414 = vmatmul.mubr.msk.f32.gmra.mrb[4].mxu0 %vm45_vm0, %v25_v23  ;;  %426 = vmatmul.mubr.msk.f32.gmra.mrb[4].mxu1 %vm45_vm0, %v33_v24 }
  0x1f   :  { %416 = vmatprep.mubr.msk.f32.mxu0 %vm45_vm0, %v26_v25  ;;  %428 = vmatprep.mubr.msk.f32.mxu1 %vm45_vm0, %v34_v26 }
  0x22   :  { %417 = vmatmul.mubr.msk.f32.gmra.mrb[6].mxu0 %vm45_vm0, %v27_v27  ;;  %429 = vmatmul.mubr.msk.f32.gmra.mrb[6].mxu1 %vm45_vm0, %v35_v28 }
  0xe9   :  { %v409_v36 = vpop.f32.mrb[0].mxu0  ;;  %v421_v39 = vpop.f32.mrb[0].mxu1 }
  0xea   :  { %v247_v40 = vmul.f32 %v409_v36, %v586_v35  ;;  %v255_v41 = vmul.f32 %v421_v39, %v586_v35  ;;  %v160_v42 = vpop.f32.mrb[1].mxu0  ;;  %v200_v43 = vpop.f32.mrb[1].mxu1 }
  0xeb   :  { %v246_v44 = vmul.f32 %v586_v35, %v160_v42  ;;  %v254_v45 = vmul.f32 %v586_v35, %v200_v43 }
  0xec   :  { %v270_v46 = vadd.f32 %v591_v37, %v247_v40  ;;  %v278_v47 = vadd.f32 %v591_v37, %v255_v41 }
  0xed   :  { %v269_v48 = vadd.f32 %v591_v37, %v246_v44  ;;  %v277_v49 = vadd.f32 %v591_v37, %v254_v45  ;;  %v412_v50 = vpop.f32.mrb[2].mxu0  ;;  %v424_v51 = vpop.f32.mrb[2].mxu1 }
  0xee   :  { %v288_v52 = vmax.f32 %v270_v46, 0.0  ;;  %v296_v53 = vmax.f32 %v278_v47, 0.0  ;;  %v249_v54 = vmul.f32 %v412_v50, %v586_v35  ;;  %v257_v55 = vmul.f32 %v424_v51, %v586_v35  ;;  %v170_v56 = vpop.f32.mrb[3].mxu0  ;;  %v210_v57 = vpop.f32.mrb[3].mxu1 }
  0xef   :  { %v287_v58 = vmax.f32 %v269_v48, 0.0  ;;  %v295_v59 = vmax.f32 %v277_v49, 0.0  ;;  %v248_v60 = vmul.f32 %v586_v35, %v170_v56  ;;  %v256_v61 = vmul.f32 %v586_v35, %v210_v57 }
  0xf0   :  { %v310_v62 = vsel %vm308_vm2, %v288_v52, %v270_v46  ;;  %v318_v63 = vsel %vm308_vm2, %v296_v53, %v278_v47  ;;  %v272_v0 = vadd.f32 %v591_v37, %v249_v54  ;;  %v280_v1 = vadd.f32 %v591_v37, %v257_v55 }
  0xf1   :  { %327 = vst.msk [vmem:[%s729_s5 + $0x8] sm:$0xff] %vm325_vm3, %v310_v62  ;;  %335 = vst.msk [vmem:[%s729_s5 + $0x48] sm:$0xff] %vm325_vm3, %v318_v63  ;;  %v309_v2 = vsel %vm308_vm2, %v287_v58, %v269_v48  ;;  %v317_v3 = vsel %vm308_vm2, %v295_v59, %v277_v49  ;;  %v271_v4 = vadd.f32 %v591_v37, %v248_v60  ;;  %v415_v6 = vpop.f32.mrb[4].mxu0  ;;  %v427_v7 = vpop.f32.mrb[4].mxu1 }
  0xf2   :  { %v279_v5 = vadd.f32 %v591_v37, %v256_v61  ;;  %326 = vst.msk [vmem:[%s729_s5] sm:$0xff] %vm325_vm3, %v309_v2  ;;  %334 = vst.msk [vmem:[%s729_s5 + $0x40] sm:$0xff] %vm325_vm3, %v317_v3  ;;  %v290_v8 = vmax.f32 %v272_v0, 0.0  ;;  %v298_v9 = vmax.f32 %v280_v1, 0.0  ;;  %v251_v10 = vmul.f32 %v415_v6, %v586_v35  ;;  %v180_v12 = vpop.f32.mrb[5].mxu0  ;;  %v220_v13 = vpop.f32.mrb[5].mxu1 }
  0xf3   :  { %v259_v11 = vmul.f32 %v427_v7, %v586_v35  ;;  %v289_v14 = vmax.f32 %v271_v4, 0.0  ;;  %v250_v16 = vmul.f32 %v586_v35, %v180_v12  ;;  %v258_v17 = vmul.f32 %v586_v35, %v220_v13 }
  0xf4   :  { %v297_v15 = vmax.f32 %v279_v5, 0.0  ;;  %v312_v18 = vsel %vm308_vm2, %v290_v8, %v272_v0  ;;  %v320_v19 = vsel %vm308_vm2, %v298_v9, %v280_v1  ;;  %v274_v20 = vadd.f32 %v591_v37, %v251_v10 }
  0xf5   :  { %v282_v21 = vadd.f32 %v591_v37, %v259_v11  ;;  %329 = vst.msk [vmem:[%s729_s5 + $0x18] sm:$0xff] %vm325_vm3, %v312_v18  ;;  %337 = vst.msk [vmem:[%s729_s5 + $0x58] sm:$0xff] %vm325_vm3, %v320_v19  ;;  %v311_v22 = vsel %vm308_vm2, %v289_v14, %v271_v4  ;;  %v273_v24 = vadd.f32 %v591_v37, %v250_v16  ;;  %v418_v26 = vpop.f32.mrb[6].mxu0  ;;  %v430_v27 = vpop.f32.mrb[6].mxu1 }
  0xf6   :  { %v319_v23 = vsel %vm308_vm2, %v297_v15, %v279_v5  ;;  %v281_v25 = vadd.f32 %v591_v37, %v258_v17  ;;  %328 = vst.msk [vmem:[%s729_s5 + $0x10] sm:$0xff] %vm325_vm3, %v311_v22  ;;  %v292_v28 = vmax.f32 %v274_v20, 0.0  ;;  %v253_v30 = vmul.f32 %v418_v26, %v586_v35  ;;  %v190_v32 = vpop.f32.mrb[7].mxu0  ;;  %v230_v33 = vpop.f32.mrb[7].mxu1 }
  0xf7   :  { %336 = vst.msk [vmem:[%s729_s5 + $0x50] sm:$0xff] %vm325_vm3, %v319_v23  ;;  %v300_v29 = vmax.f32 %v282_v21, 0.0  ;;  %v261_v31 = vmul.f32 %v430_v27, %v586_v35  ;;  %v291_v34 = vmax.f32 %v273_v24, 0.0  ;;  %v252_v39 = vmul.f32 %v586_v35, %v190_v32 }
  0xf8   :  { %v299_v36 = vmax.f32 %v281_v25, 0.0  ;;  %v260_v40 = vmul.f32 %v586_v35, %v230_v33  ;;  %v314_v41 = vsel %vm308_vm2, %v292_v28, %v274_v20  ;;  %v276_v43 = vadd.f32 %v591_v37, %v253_v30 }
  0xf9   :  { %v322_v42 = vsel %vm308_vm2, %v300_v29, %v282_v21  ;;  %v284_v44 = vadd.f32 %v591_v37, %v261_v31  ;;  %331 = vst.msk [vmem:[%s729_s5 + $0x28] sm:$0xff] %vm325_vm3, %v314_v41  ;;  %v313_v35 = vsel %vm308_vm2, %v291_v34, %v273_v24  ;;  %v275_v46 = vadd.f32 %v591_v37, %v252_v39 }
  0xfa   :  { %339 = vst.msk [vmem:[%s729_s5 + $0x68] sm:$0xff] %vm325_vm3, %v322_v42  ;;  %v321_v45 = vsel %vm308_vm2, %v299_v36, %v281_v25  ;;  %v283_v47 = vadd.f32 %v591_v37, %v260_v40  ;;  %330 = vst.msk [vmem:[%s729_s5 + $0x20] sm:$0xff] %vm325_vm3, %v313_v35  ;;  %v294_v48 = vmax.f32 %v276_v43, 0.0 }
  0xfb   :  { %338 = vst.msk [vmem:[%s729_s5 + $0x60] sm:$0xff] %vm325_vm3, %v321_v45  ;;  %v302_v49 = vmax.f32 %v284_v44, 0.0  ;;  %v293_v50 = vmax.f32 %v275_v46, 0.0 }
  0xfc   :  { %v301_v51 = vmax.f32 %v283_v47, 0.0  ;;  %v316_v52 = vsel %vm308_vm2, %v294_v48, %v276_v43 }
  0xfd   :  { %v324_v37 = vsel %vm308_vm2, %v302_v49, %v284_v44  ;;  %333 = vst.msk [vmem:[%s729_s5 + $0x38] sm:$0xff] %vm325_vm3, %v316_v52  ;;  %v315_v53 = vsel %vm308_vm2, %v293_v50, %v275_v46 }
  0xfe   :  { %341 = vst.msk [vmem:[%s729_s5 + $0x78] sm:$0xff] %vm325_vm3, %v324_v37  ;;  %v323_v54 = vsel %vm308_vm2, %v301_v51, %v283_v47  ;;  %332 = vst.msk [vmem:[%s729_s5 + $0x30] sm:$0xff] %vm325_vm3, %v315_v53 }
  0xff   :  { %340 = vst.msk [vmem:[%s729_s5 + $0x70] sm:$0xff] %vm325_vm3, %v323_v54 }

// kernel: embedding_map_net_forward.14
= control target key start
LH: loop header
LB: loop body
LE: loop exit
PB: predicated region body
PF: predicated region fallthrough
CT: control target
= control target key end

     0   :  { %v442_v0 = vmov 0.0|0.0   ;;  %vm70_vm0 = vcmask 130048   ;;  %s811_s1 = inlined_call_operand.vmem [shape: f32[144,16], index: 1, kind: input, shape index: {}]   ;;  %s812_s0 = inlined_call_operand.vmem [shape: f32[128,144], index: 0, kind: input, shape index: {}]   ;;  %s813_s2 = inlined_call_operand.vmem [shape: f32[1,16], index: 2, kind: input, shape index: {}]   ;;  %s814_s3 = inlined_call_operand.vmem [shape: f32[1,16], index: 3, kind: input, shape index: {}]   ;;  %s815_s4 = inlined_call_operand.vmem [shape: f32[128,16], index: 4, kind: input, shape index: {}]   ;;  %s816_s5 = inlined_call_operand.vmem [shape: f32[128,16], index: 5, kind: output, shape index: {}]  }
   0x1   :  { %396 = vmatprep.subr.bf16.mxu0 %v442_v0  ;;  %423 = vmatprep.subr.bf16.mxu1 %v442_v0  ;;  %v52_v1 = vld [vmem:[%s811_s1] sm:$0xff]  ;;  %v53_v2 = vld [vmem:[%s811_s1 + $0x8] sm:$0xff]  ;;  %v54_v3 = vld [vmem:[%s811_s1 + $0x10] sm:$0xff] }
   0x2   :  { %v397_v4 = vpack.c.bf16 %v53_v2, %v52_v1  ;;  %v55_v5 = vld [vmem:[%s811_s1 + $0x18] sm:$0xff]  ;;  %v56_v7 = vld [vmem:[%s811_s1 + $0x20] sm:$0xff]  ;;  %v57_v8 = vld [vmem:[%s811_s1 + $0x28] sm:$0xff] }
   0x3   :  { %v400_v6 = vpack.c.bf16 %v55_v5, %v54_v3  ;;  %v21_v9 = vld [vmem:[%s812_s0 + $0x8] sm:$0xff]  ;;  %v403_v11 = vpack.c.bf16 %v57_v8, %v56_v7  ;;  %v58_v12 = vld [vmem:[%s811_s1 + $0x30] sm:$0xff]  ;;  %v59_v13 = vld [vmem:[%s811_s1 + $0x38] sm:$0xff] }
   0x4   :  { %398 = vmatpush1.bf16.msra.mxu0 %v397_v4  ;;  %432 = vmatpush1.bf16.msra.mxu1 %v397_v4  ;;  %v37_v10 = vld [vmem:[%s812_s0 + $0x88] sm:$0xff]  ;;  %v406_v14 = vpack.c.bf16 %v59_v13, %v58_v12  ;;  %v60_v15 = vld [vmem:[%s811_s1 + $0x40] sm:$0xff]  ;;  %v62_v18 = vld [vmem:[%s811_s1 + $0x50] sm:$0xff] }
   0x5   :  { %399 = vmatprep.subr.bf16.mxu0 %v442_v0  ;;  %424 = vmatprep.subr.bf16.mxu1 %v442_v0  ;;  %v61_v16 = vld [vmem:[%s811_s1 + $0x48] sm:$0xff]  ;;  %v63_v19 = vld [vmem:[%s811_s1 + $0x58] sm:$0xff]  ;;  %v64_v21 = vld [vmem:[%s811_s1 + $0x60] sm:$0xff] }
   0x6   :  { %378 = vmatprep.mubr.msk.f32.mxu0 %vm70_vm0, %v21_v9  ;;  %386 = vmatprep.mubr.msk.f32.mxu1 %vm70_vm0, %v37_v10  ;;  %v409_v17 = vpack.c.bf16 %v61_v16, %v60_v15  ;;  %v412_v20 = vpack.c.bf16 %v63_v19, %v62_v18  ;;  %v65_v22 = vld [vmem:[%s811_s1 + $0x68] sm:$0xff]  ;;  %v66_v24 = vld [vmem:[%s811_s1 + $0x70] sm:$0xff]  ;;  %v67_v25 = vld [vmem:[%s811_s1 + $0x78] sm:$0xff] }
   0x7   :  { %v415_v23 = vpack.c.bf16 %v65_v22, %v64_v21  ;;  %v418_v26 = vpack.c.bf16 %v67_v25, %v66_v24  ;;  %v68_v27 = vld [vmem:[%s811_s1 + $0x80] sm:$0xff]  ;;  %v69_v28 = vld [vmem:[%s811_s1 + $0x88] sm:$0xff]  ;;  %v23_v32 = vld [vmem:[%s812_s0 + $0x18] sm:$0xff] }
   0x8   :  { %401 = vmatpush1.bf16.msra.mxu0 %v400_v6  ;;  %433 = vmatpush1.bf16.msra.mxu1 %v400_v6  ;;  %v421_v29 = vpack.c.bf16 %v69_v28, %v68_v27  ;;  %v20_v30 = vld [vmem:[%s812_s0] sm:$0xff]  ;;  %v39_v33 = vld [vmem:[%s812_s0 + $0x98] sm:$0xff]  ;;  %v22_v34 = vld [vmem:[%s812_s0 + $0x10] sm:$0xff] }
   0x9   :  { %402 = vmatprep.subr.bf16.mxu0 %v442_v0  ;;  %425 = vmatprep.subr.bf16.mxu1 %v442_v0  ;;  %v36_v31 = vld [vmem:[%s812_s0 + $0x80] sm:$0xff]  ;;  %v38_v35 = vld [vmem:[%s812_s0 + $0x90] sm:$0xff]  ;;  %v25_v36 = vld [vmem:[%s812_s0 + $0x28] sm:$0xff] }
   0xa   :  { %v41_v37 = vld [vmem:[%s812_s0 + $0xa8] sm:$0xff]  ;;  %v24_v38 = vld [vmem:[%s812_s0 + $0x20] sm:$0xff]  ;;  %v27_v40 = vld [vmem:[%s812_s0 + $0x38] sm:$0xff] }
   0xb   :  { %v40_v39 = vld [vmem:[%s812_s0 + $0xa0] sm:$0xff]  ;;  %v43_v41 = vld [vmem:[%s812_s0 + $0xb8] sm:$0xff]  ;;  %v26_v42 = vld [vmem:[%s812_s0 + $0x30] sm:$0xff] }
   0xc   :  { %404 = vmatpush1.bf16.msra.mxu0 %v403_v11  ;;  %434 = vmatpush1.bf16.msra.mxu1 %v403_v11  ;;  %v42_v43 = vld [vmem:[%s812_s0 + $0xb0] sm:$0xff]  ;;  %v29_v44 = vld [vmem:[%s812_s0 + $0x48] sm:$0xff]  ;;  %v28_v46 = vld [vmem:[%s812_s0 + $0x40] sm:$0xff] }
   0xd   :  { %405 = vmatprep.subr.bf16.mxu0 %v442_v0  ;;  %426 = vmatprep.subr.bf16.mxu1 %v442_v0  ;;  %v45_v45 = vld [vmem:[%s812_s0 + $0xc8] sm:$0xff]  ;;  %v44_v47 = vld [vmem:[%s812_s0 + $0xc0] sm:$0xff]  ;;  %v31_v48 = vld [vmem:[%s812_s0 + $0x58] sm:$0xff] }
   0xe   :  { %v47_v49 = vld [vmem:[%s812_s0 + $0xd8] sm:$0xff]  ;;  %v30_v50 = vld [vmem:[%s812_s0 + $0x50] sm:$0xff]  ;;  %v33_v52 = vld [vmem:[%s812_s0 + $0x68] sm:$0xff] }
   0xf   :  { %v46_v51 = vld [vmem:[%s812_s0 + $0xd0] sm:$0xff]  ;;  %v49_v53 = vld [vmem:[%s812_s0 + $0xe8] sm:$0xff]  ;;  %v32_v54 = vld [vmem:[%s812_s0 + $0x60] sm:$0xff] }
  0x10   :  { %407 = vmatpush1.bf16.msra.mxu0 %v406_v14  ;;  %435 = vmatpush1.bf16.msra.mxu1 %v406_v14  ;;  %v48_v55 = vld [vmem:[%s812_s0 + $0xe0] sm:$0xff]  ;;  %v35_v56 = vld [vmem:[%s812_s0 + $0x78] sm:$0xff]  ;;  %v34_v58 = vld [vmem:[%s812_s0 + $0x70] sm:$0xff] }
  0x11   :  { %408 = vmatprep.subr.bf16.mxu0 %v442_v0  ;;  %427 = vmatprep.subr.bf16.mxu1 %v442_v0  ;;  %v51_v57 = vld [vmem:[%s812_s0 + $0xf8] sm:$0xff]  ;;  %v50_v59 = vld [vmem:[%s812_s0 + $0xf0] sm:$0xff]  ;;  %v660_v60 = vld [vmem:[%s813_s2] ss:$0 sm:$0xff] }
  0x12   :  { %v665_v62 = vld [vmem:[%s814_s3] ss:$0 sm:$0xff]  ;;  %v311_v16 = vld [vmem:[%s815_s4 + $0x8] sm:$0xff] }
  0x13   :  { %v310_v4 = vld [vmem:[%s815_s4] sm:$0xff] }
  0x14   :  { %410 = vmatpush1.bf16.msra.mxu0 %v409_v17  ;;  %436 = vmatpush1.bf16.msra.mxu1 %v409_v17  ;;  %v318_v5 = vld [vmem:[%s815_s4 + $0x40] sm:$0xff]  ;;  %v319_v17 = vld [vmem:[%s815_s4 + $0x48] sm:$0xff] }
  0x15   :  { %411 = vmatprep.subr.bf16.mxu0 %v442_v0  ;;  %428 = vmatprep.subr.bf16.mxu1 %v442_v0 }
  0x18   :  { %413 = vmatpush1.bf16.msra.mxu0 %v412_v20  ;;  %437 = vmatpush1.bf16.msra.mxu1 %v412_v20 }
  0x19   :  { %414 = vmatprep.subr.bf16.mxu0 %v442_v0  ;;  %429 = vmatprep.subr.bf16.mxu1 %v442_v0 }
  0x1c   :  { %416 = vmatpush1.bf16.msra.mxu0 %v415_v23  ;;  %438 = vmatpush1.bf16.msra.mxu1 %v415_v23 }
  0x1d   :  { %417 = vmatprep.subr.bf16.mxu0 %v442_v0  ;;  %430 = vmatprep.subr.bf16.mxu1 %v442_v0 }
  0x20   :  { %419 = vmatpush1.bf16.msra.mxu0 %v418_v26  ;;  %439 = vmatpush1.bf16.msra.mxu1 %v418_v26 }
  0x21   :  { %420 = vmatprep.subr.bf16.mxu0 %v442_v0  ;;  %431 = vmatprep.subr.bf16.mxu1 %v442_v0 }
  0x24   :  { %422 = vmatpush1.bf16.msra.mxu0 %v421_v29  ;;  %440 = vmatpush1.bf16.msra.mxu1 %v421_v29 }
  0x27   :  { %184 = vmatmul.mubr.f32.vlgmr.msra.gmra.mrb[0].mxu0 %v20_v30  ;;  %224 = vmatmul.mubr.f32.vlgmr.msra.gmra.mrb[0].mxu1 %v36_v31  ;;  %v312_v30 = vld [vmem:[%s815_s4 + $0x10] sm:$0xff] }
  0x28   :  { %379 = vmatprep.mubr.msk.f32.mxu0 %vm70_vm0, %v23_v32  ;;  %387 = vmatprep.mubr.msk.f32.mxu1 %vm70_vm0, %v39_v33  ;;  %v320_v31 = vld [vmem:[%s815_s4 + $0x50] sm:$0xff] }
  0x2b   :  { %189 = vmatmul.mubr.f32.gmra.mrb[2].mxu0 %v22_v34  ;;  %229 = vmatmul.mubr.f32.gmra.mrb[2].mxu1 %v38_v35 }
  0x2c   :  { %380 = vmatprep.mubr.msk.f32.mxu0 %vm70_vm0, %v25_v36  ;;  %388 = vmatprep.mubr.msk.f32.mxu1 %vm70_vm0, %v41_v37 }
  0x2f   :  { %194 = vmatmul.mubr.f32.gmra.mrb[4].mxu0 %v24_v38  ;;  %234 = vmatmul.mubr.f32.gmra.mrb[4].mxu1 %v40_v39 }
  0x30   :  { %381 = vmatprep.mubr.msk.f32.mxu0 %vm70_vm0, %v27_v40  ;;  %389 = vmatprep.mubr.msk.f32.mxu1 %vm70_vm0, %v43_v41 }
  0x33   :  { %199 = vmatmul.mubr.f32.gmra.mrb[6].mxu0 %v26_v42  ;;  %239 = vmatmul.mubr.f32.gmra.mrb[6].mxu1 %v42_v43 }
  0x34   :  { %382 = vmatprep.mubr.msk.f32.mxu0 %vm70_vm0, %v29_v44  ;;  %390 = vmatprep.mubr.msk.f32.mxu1 %vm70_vm0, %v45_v45  ;;  %v313_v44 = vld [vmem:[%s815_s4 + $0x18] sm:$0xff] }
  0x35   :  { %v321_v45 = vld [vmem:[%s815_s4 + $0x58] sm:$0xff] }
  0x37   :  { %204 = vmatmul.mubr.f32.gmra.mrb[8].mxu0 %v28_v46  ;;  %244 = vmatmul.mubr.f32.gmra.mrb[8].mxu1 %v44_v47 }
  0x38   :  { %383 = vmatprep.mubr.msk.f32.mxu0 %vm70_vm0, %v31_v48  ;;  %391 = vmatprep.mubr.msk.f32.mxu1 %vm70_vm0, %v47_v49 }
  0x3b   :  { %209 = vmatmul.mubr.f32.gmra.mrb[10].mxu0 %v30_v50  ;;  %249 = vmatmul.mubr.f32.gmra.mrb[10].mxu1 %v46_v51 }
  0x3c   :  { %384 = vmatprep.mubr.msk.f32.mxu0 %vm70_vm0, %v33_v52  ;;  %392 = vmatprep.mubr.msk.f32.mxu1 %vm70_vm0, %v49_v53 }
  0x3f   :  { %214 = vmatmul.mubr.f32.gmra.mrb[12].mxu0 %v32_v54  ;;  %254 = vmatmul.mubr.f32.gmra.mrb[12].mxu1 %v48_v55 }
  0x40   :  { %385 = vmatprep.mubr.msk.f32.mxu0 %vm70_vm0, %v35_v56  ;;  %393 = vmatprep.mubr.msk.f32.mxu1 %vm70_vm0, %v51_v57 }
  0x43   :  { %219 = vmatmul.mubr.f32.gmra.mrb[14].mxu0 %v34_v58  ;;  %259 = vmatmul.mubr.f32.gmra.mrb[14].mxu1 %v50_v59  ;;  %v314_v58 = vld [vmem:[%s815_s4 + $0x20] sm:$0xff] }
  0x44   :  { %v322_v59 = vld [vmem:[%s815_s4 + $0x60] sm:$0xff] }
  0xfa   :  { %v185_v61 = vpop.f32.mrb[0].mxu0  ;;  %v225_v63 = vpop.f32.mrb[0].mxu1 }
  0xfb   :  { %v271_v0 = vmul.f32 %v660_v60, %v185_v61  ;;  %v279_v1 = vmul.f32 %v660_v60, %v225_v63  ;;  %v187_v2 = vpop.f32.mrb[1].mxu0  ;;  %v227_v3 = vpop.f32.mrb[1].mxu1 }
  0xfd   :  { %v294_v6 = vadd.f32 %v665_v62, %v271_v0  ;;  %v302_v7 = vadd.f32 %v665_v62, %v279_v1 }
  0xfe   :  { %v190_v8 = vpop.f32.mrb[2].mxu0  ;;  %v230_v9 = vpop.f32.mrb[2].mxu1 }
  0xff   :  { %v326_v10 = vadd.f32 %v310_v4, %v294_v6  ;;  %v334_v11 = vadd.f32 %v318_v5, %v302_v7  ;;  %v272_v12 = vmul.f32 %v660_v60, %v190_v8  ;;  %v280_v13 = vmul.f32 %v660_v60, %v230_v9  ;;  %v192_v14 = vpop.f32.mrb[3].mxu0  ;;  %v232_v15 = vpop.f32.mrb[3].mxu1 }
 0x101   :  { %v342_v18 = vmax.f32 %v326_v10, 0.0  ;;  %v350_v19 = vmax.f32 %v334_v11, 0.0  ;;  %v295_v20 = vadd.f32 %v665_v62, %v272_v12  ;;  %v303_v21 = vadd.f32 %v665_v62, %v280_v13  ;;  %v315_v10 = vld [vmem:[%s815_s4 + $0x28] sm:$0xff] }
 0x102   :  { %v195_v22 = vpop.f32.mrb[4].mxu0  ;;  %v235_v23 = vpop.f32.mrb[4].mxu1  ;;  %v323_v11 = vld [vmem:[%s815_s4 + $0x68] sm:$0xff] }
 0x103   :  { %358 = vst.msk [vmem:[%s816_s5] sm:$0xff] %vm70_vm0, %v342_v18  ;;  %366 = vst.msk [vmem:[%s816_s5 + $0x40] sm:$0xff] %vm70_vm0, %v350_v19  ;;  %v327_v24 = vadd.f32 %v311_v16, %v295_v20  ;;  %v335_v25 = vadd.f32 %v319_v17, %v303_v21  ;;  %v273_v26 = vmul.f32 %v660_v60, %v195_v22  ;;  %v197_v28 = vpop.f32.mrb[5].mxu0  ;;  %v237_v29 = vpop.f32.mrb[5].mxu1 }
 0x104   :  { %v281_v27 = vmul.f32 %v660_v60, %v235_v23 }
 0x105   :  { %v343_v32 = vmax.f32 %v327_v24, 0.0  ;;  %v351_v33 = vmax.f32 %v335_v25, 0.0  ;;  %v296_v34 = vadd.f32 %v665_v62, %v273_v26  ;;  %v316_v24 = vld [vmem:[%s815_s4 + $0x30] sm:$0xff] }
 0x106   :  { %v304_v35 = vadd.f32 %v665_v62, %v281_v27  ;;  %v200_v36 = vpop.f32.mrb[6].mxu0  ;;  %v240_v37 = vpop.f32.mrb[6].mxu1  ;;  %v324_v25 = vld [vmem:[%s815_s4 + $0x70] sm:$0xff] }
 0x107   :  { %359 = vst.msk [vmem:[%s816_s5 + $0x8] sm:$0xff] %vm70_vm0, %v343_v32  ;;  %367 = vst.msk [vmem:[%s816_s5 + $0x48] sm:$0xff] %vm70_vm0, %v351_v33  ;;  %v328_v38 = vadd.f32 %v312_v30, %v296_v34  ;;  %v274_v40 = vmul.f32 %v660_v60, %v200_v36  ;;  %v282_v41 = vmul.f32 %v660_v60, %v240_v37  ;;  %v202_v42 = vpop.f32.mrb[7].mxu0  ;;  %v242_v43 = vpop.f32.mrb[7].mxu1 }
 0x108   :  { %v336_v39 = vadd.f32 %v320_v31, %v304_v35 }
 0x109   :  { %v344_v46 = vmax.f32 %v328_v38, 0.0  ;;  %v297_v48 = vadd.f32 %v665_v62, %v274_v40  ;;  %v305_v49 = vadd.f32 %v665_v62, %v282_v41  ;;  %v317_v38 = vld [vmem:[%s815_s4 + $0x38] sm:$0xff] }
 0x10a   :  { %v352_v47 = vmax.f32 %v336_v39, 0.0  ;;  %v205_v50 = vpop.f32.mrb[8].mxu0  ;;  %v245_v51 = vpop.f32.mrb[8].mxu1  ;;  %v325_v39 = vld [vmem:[%s815_s4 + $0x78] sm:$0xff] }
 0x10b   :  { %360 = vst.msk [vmem:[%s816_s5 + $0x10] sm:$0xff] %vm70_vm0, %v344_v46  ;;  %v329_v52 = vadd.f32 %v313_v44, %v297_v48  ;;  %v337_v53 = vadd.f32 %v321_v45, %v305_v49  ;;  %v275_v54 = vmul.f32 %v660_v60, %v205_v50  ;;  %v283_v55 = vmul.f32 %v660_v60, %v245_v51  ;;  %v207_v56 = vpop.f32.mrb[9].mxu0  ;;  %v247_v57 = vpop.f32.mrb[9].mxu1 }
 0x10c   :  { %368 = vst.msk [vmem:[%s816_s5 + $0x50] sm:$0xff] %vm70_vm0, %v352_v47 }
 0x10d   :  { %v345_v61 = vmax.f32 %v329_v52, 0.0  ;;  %v353_v63 = vmax.f32 %v337_v53, 0.0  ;;  %v298_v0 = vadd.f32 %v665_v62, %v275_v54  ;;  %v306_v1 = vadd.f32 %v665_v62, %v283_v55 }
 0x10e   :  { %v210_v2 = vpop.f32.mrb[10].mxu0  ;;  %v250_v3 = vpop.f32.mrb[10].mxu1 }
 0x10f   :  { %361 = vst.msk [vmem:[%s816_s5 + $0x18] sm:$0xff] %vm70_vm0, %v345_v61  ;;  %369 = vst.msk [vmem:[%s816_s5 + $0x58] sm:$0xff] %vm70_vm0, %v353_v63  ;;  %v330_v4 = vadd.f32 %v314_v58, %v298_v0  ;;  %v338_v5 = vadd.f32 %v322_v59, %v306_v1  ;;  %v276_v6 = vmul.f32 %v660_v60, %v210_v2  ;;  %v212_v8 = vpop.f32.mrb[11].mxu0  ;;  %v252_v9 = vpop.f32.mrb[11].mxu1 }
 0x110   :  { %v284_v7 = vmul.f32 %v660_v60, %v250_v3 }
 0x111   :  { %v346_v12 = vmax.f32 %v330_v4, 0.0  ;;  %v354_v13 = vmax.f32 %v338_v5, 0.0  ;;  %v299_v14 = vadd.f32 %v665_v62, %v276_v6 }
 0x112   :  { %v307_v15 = vadd.f32 %v665_v62, %v284_v7  ;;  %v215_v16 = vpop.f32.mrb[12].mxu0  ;;  %v255_v17 = vpop.f32.mrb[12].mxu1 }
 0x113   :  { %362 = vst.msk [vmem:[%s816_s5 + $0x20] sm:$0xff] %vm70_vm0, %v346_v12  ;;  %370 = vst.msk [vmem:[%s816_s5 + $0x60] sm:$0xff] %vm70_vm0, %v354_v13  ;;  %v331_v18 = vadd.f32 %v315_v10, %v299_v14  ;;  %v277_v20 = vmul.f32 %v660_v60, %v215_v16  ;;  %v285_v21 = vmul.f32 %v660_v60, %v255_v17  ;;  %v217_v22 = vpop.f32.mrb[13].mxu0  ;;  %v257_v23 = vpop.f32.mrb[13].mxu1 }
 0x114   :  { %v339_v19 = vadd.f32 %v323_v11, %v307_v15 }
 0x115   :  { %v347_v26 = vmax.f32 %v331_v18, 0.0  ;;  %v300_v28 = vadd.f32 %v665_v62, %v277_v20  ;;  %v308_v29 = vadd.f32 %v665_v62, %v285_v21 }
 0x116   :  { %v355_v27 = vmax.f32 %v339_v19, 0.0  ;;  %v220_v30 = vpop.f32.mrb[14].mxu0  ;;  %v260_v31 = vpop.f32.mrb[14].mxu1 }
 0x117   :  { %363 = vst.msk [vmem:[%s816_s5 + $0x28] sm:$0xff] %vm70_vm0, %v347_v26  ;;  %v332_v32 = vadd.f32 %v316_v24, %v300_v28  ;;  %v340_v33 = vadd.f32 %v324_v25, %v308_v29  ;;  %v278_v34 = vmul.f32 %v660_v60, %v220_v30  ;;  %v286_v35 = vmul.f32 %v660_v60, %v260_v31  ;;  %v222_v36 = vpop.f32.mrb[15].mxu0  ;;  %v262_v37 = vpop.f32.mrb[15].mxu1 }
 0x118   :  { %371 = vst.msk [vmem:[%s816_s5 + $0x68] sm:$0xff] %vm70_vm0, %v355_v27 }
 0x119   :  { %v348_v40 = vmax.f32 %v332_v32, 0.0  ;;  %v356_v41 = vmax.f32 %v340_v33, 0.0  ;;  %v301_v42 = vadd.f32 %v665_v62, %v278_v34  ;;  %v309_v43 = vadd.f32 %v665_v62, %v286_v35 }
 0x11b   :  { %364 = vst.msk [vmem:[%s816_s5 + $0x30] sm:$0xff] %vm70_vm0, %v348_v40  ;;  %372 = vst.msk [vmem:[%s816_s5 + $0x70] sm:$0xff] %vm70_vm0, %v356_v41  ;;  %v333_v60 = vadd.f32 %v317_v38, %v301_v42  ;;  %v341_v44 = vadd.f32 %v325_v39, %v309_v43 }
 0x11d   :  { %v349_v45 = vmax.f32 %v333_v60, 0.0  ;;  %v357_v46 = vmax.f32 %v341_v44, 0.0 }
 0x11f   :  { %365 = vst.msk [vmem:[%s816_s5 + $0x38] sm:$0xff] %vm70_vm0, %v349_v45  ;;  %373 = vst.msk [vmem:[%s816_s5 + $0x78] sm:$0xff] %vm70_vm0, %v357_v46 }

// kernel: embedding_map_net_forward.15
= control target key start
LH: loop header
LB: loop body
LE: loop exit
PB: predicated region body
PF: predicated region fallthrough
CT: control target
= control target key end

     0   :  { %v244_v0 = vmov 0.0|0.0   ;;  %vm46_vm0 = vcmask 130048   ;;  %v173_v36 = vlaneseq  ;;  %v245_v40 = vmov 0   ;;  %s405_s1 = inlined_call_operand.vmem [shape: f32[144,64], index: 1, kind: input, shape index: {}]   ;;  %s406_s0 = inlined_call_operand.vmem [shape: f32[32,144], index: 0, kind: input, shape index: {}]   ;;  %s407_s4 = inlined_call_operand.vmem [shape: f32[1,64], index: 4, kind: input, shape index: {}]   ;;  %s408_s2 = inlined_call_operand.vmem [shape: f32[1,64], index: 2, kind: input, shape index: {}]   ;;  %s409_s3 = inlined_call_operand.vmem [shape: f32[1,64], index: 3, kind: input, shape index: {}]   ;;  %s410_s5 = inlined_call_operand.vmem [shape: f32[32,64], index: 5, kind: output, shape index: {}]  }
   0x1   :  { %197 = vmatprep.subr.bf16.mxu0 %v244_v0  ;;  %224 = vmatprep.subr.bf16.mxu1 %v244_v0  ;;  %v28_v1 = vld [vmem:[%s405_s1] sm:$0xff]  ;;  %v29_v2 = vld [vmem:[%s405_s1 + $0x8] sm:$0xff]  ;;  %v30_v3 = vld [vmem:[%s405_s1 + $0x10] sm:$0xff]  ;;  %vm182_vm3 = vcmask 523264  }
   0x2   :  { %v198_v4 = vpack.c.bf16 %v29_v2, %v28_v1  ;;  %v31_v5 = vld [vmem:[%s405_s1 + $0x18] sm:$0xff]  ;;  %v32_v7 = vld [vmem:[%s405_s1 + $0x20] sm:$0xff]  ;;  %v33_v8 = vld [vmem:[%s405_s1 + $0x28] sm:$0xff]  ;;  %v174_v38 = vshrl.u32 %v173_v36, 7 }
   0x3   :  { %v201_v6 = vpack.c.bf16 %v31_v5, %v30_v3  ;;  %v21_v9 = vld [vmem:[%s406_s0 + $0x8] sm:$0xff]  ;;  %v204_v11 = vpack.c.bf16 %v33_v8, %v32_v7  ;;  %v34_v12 = vld [vmem:[%s405_s1 + $0x30] sm:$0xff]  ;;  %v35_v13 = vld [vmem:[%s405_s1 + $0x38] sm:$0xff] }
   0x4   :  { %199 = vmatpush1.bf16.msra.mxu0 %v198_v4  ;;  %233 = vmatpush1.bf16.msra.mxu1 %v198_v4  ;;  %v25_v10 = vld [vmem:[%s406_s0 + $0x28] sm:$0xff]  ;;  %v207_v14 = vpack.c.bf16 %v35_v13, %v34_v12  ;;  %v36_v15 = vld [vmem:[%s405_s1 + $0x40] sm:$0xff]  ;;  %v38_v18 = vld [vmem:[%s405_s1 + $0x50] sm:$0xff]  ;;  %v175_v39 = vsub.s32 0, %v174_v38 }
   0x5   :  { %200 = vmatprep.subr.bf16.mxu0 %v244_v0  ;;  %225 = vmatprep.subr.bf16.mxu1 %v244_v0  ;;  %v37_v16 = vld [vmem:[%s405_s1 + $0x48] sm:$0xff]  ;;  %v39_v19 = vld [vmem:[%s405_s1 + $0x58] sm:$0xff]  ;;  %v40_v21 = vld [vmem:[%s405_s1 + $0x60] sm:$0xff] }
   0x6   :  { %191 = vmatprep.mubr.msk.f32.mxu0 %vm46_vm0, %v21_v9  ;;  %193 = vmatprep.mubr.msk.f32.mxu1 %vm46_vm0, %v25_v10  ;;  %v210_v17 = vpack.c.bf16 %v37_v16, %v36_v15  ;;  %v213_v20 = vpack.c.bf16 %v39_v19, %v38_v18  ;;  %v41_v22 = vld [vmem:[%s405_s1 + $0x68] sm:$0xff]  ;;  %v42_v24 = vld [vmem:[%s405_s1 + $0x70] sm:$0xff]  ;;  %v43_v25 = vld [vmem:[%s405_s1 + $0x78] sm:$0xff] }
   0x7   :  { %v216_v23 = vpack.c.bf16 %v41_v22, %v40_v21  ;;  %v219_v26 = vpack.c.bf16 %v43_v25, %v42_v24  ;;  %v44_v27 = vld [vmem:[%s405_s1 + $0x80] sm:$0xff]  ;;  %v45_v28 = vld [vmem:[%s405_s1 + $0x88] sm:$0xff]  ;;  %v23_v32 = vld [vmem:[%s406_s0 + $0x18] sm:$0xff] }
   0x8   :  { %202 = vmatpush1.bf16.msra.mxu0 %v201_v6  ;;  %234 = vmatpush1.bf16.msra.mxu1 %v201_v6  ;;  %v222_v29 = vpack.c.bf16 %v45_v28, %v44_v27  ;;  %v20_v30 = vld [vmem:[%s406_s0] sm:$0xff]  ;;  %v27_v33 = vld [vmem:[%s406_s0 + $0x38] sm:$0xff]  ;;  %v22_v34 = vld [vmem:[%s406_s0 + $0x10] sm:$0xff] }
   0x9   :  { %203 = vmatprep.subr.bf16.mxu0 %v244_v0  ;;  %226 = vmatprep.subr.bf16.mxu1 %v244_v0  ;;  %v24_v31 = vld [vmem:[%s406_s0 + $0x20] sm:$0xff]  ;;  %v26_v35 = vld [vmem:[%s406_s0 + $0x30] sm:$0xff] }
   0xa   :  { %v166_v37 = vld [vmem:[%s407_s4] sm:$0x1] }
   0xb   :  { %vm167_vm1 = vcmp.gt.f32.partialorder %v166_v37, 0.0  ;;  %v195_v42 = vld [vmem:[%s408_s2] ss:$0 sm:$0xff] }
   0xc   :  { %205 = vmatpush1.bf16.msra.mxu0 %v204_v11  ;;  %235 = vmatpush1.bf16.msra.mxu1 %v204_v11  ;;  %v172_v41 = vsel %vm167_vm1, 1, %v245_v40  ;;  %v196_v44 = vld [vmem:[%s409_s3] ss:$0 sm:$0xff] }
   0xd   :  { %206 = vmatprep.subr.bf16.mxu0 %v244_v0  ;;  %227 = vmatprep.subr.bf16.mxu1 %v244_v0  ;;  %v176_v45 = vrot.slane %v172_v41, %v175_v39 }
   0xf   :  { %vm177_vm2 = vcmp.eq.s32.totalorder %v176_v45, 1 }
  0x10   :  { %208 = vmatpush1.bf16.msra.mxu0 %v207_v14  ;;  %236 = vmatpush1.bf16.msra.mxu1 %v207_v14 }
  0x11   :  { %209 = vmatprep.subr.bf16.mxu0 %v244_v0  ;;  %228 = vmatprep.subr.bf16.mxu1 %v244_v0 }
  0x14   :  { %211 = vmatpush1.bf16.msra.mxu0 %v210_v17  ;;  %237 = vmatpush1.bf16.msra.mxu1 %v210_v17 }
  0x15   :  { %212 = vmatprep.subr.bf16.mxu0 %v244_v0  ;;  %229 = vmatprep.subr.bf16.mxu1 %v244_v0 }
  0x18   :  { %214 = vmatpush1.bf16.msra.mxu0 %v213_v20  ;;  %238 = vmatpush1.bf16.msra.mxu1 %v213_v20 }
  0x19   :  { %215 = vmatprep.subr.bf16.mxu0 %v244_v0  ;;  %230 = vmatprep.subr.bf16.mxu1 %v244_v0 }
  0x1c   :  { %217 = vmatpush1.bf16.msra.mxu0 %v216_v23  ;;  %239 = vmatpush1.bf16.msra.mxu1 %v216_v23 }
  0x1d   :  { %218 = vmatprep.subr.bf16.mxu0 %v244_v0  ;;  %231 = vmatprep.subr.bf16.mxu1 %v244_v0 }
  0x20   :  { %220 = vmatpush1.bf16.msra.mxu0 %v219_v26  ;;  %240 = vmatpush1.bf16.msra.mxu1 %v219_v26 }
  0x21   :  { %221 = vmatprep.subr.bf16.mxu0 %v244_v0  ;;  %232 = vmatprep.subr.bf16.mxu1 %v244_v0 }
  0x24   :  { %223 = vmatpush1.bf16.msra.mxu0 %v222_v29  ;;  %241 = vmatpush1.bf16.msra.mxu1 %v222_v29 }
  0x27   :  { %124 = vmatmul.mubr.f32.vlgmr.msra.gmra.mrb[0].mxu0 %v20_v30  ;;  %134 = vmatmul.mubr.f32.vlgmr.msra.gmra.mrb[0].mxu1 %v24_v31 }
  0x28   :  { %192 = vmatprep.mubr.msk.f32.mxu0 %vm46_vm0, %v23_v32  ;;  %194 = vmatprep.mubr.msk.f32.mxu1 %vm46_vm0, %v27_v33 }
  0x2b   :  { %129 = vmatmul.mubr.f32.gmra.mrb[2].mxu0 %v22_v34  ;;  %139 = vmatmul.mubr.f32.gmra.mrb[2].mxu1 %v26_v35 }
  0xfa   :  { %v125_v43 = vpop.f32.mrb[0].mxu0  ;;  %v135_v46 = vpop.f32.mrb[0].mxu1 }
  0xfb   :  { %v151_v47 = vmul.f32 %v195_v42, %v125_v43  ;;  %v153_v48 = vmul.f32 %v195_v42, %v135_v46  ;;  %v127_v49 = vpop.f32.mrb[1].mxu0  ;;  %v137_v50 = vpop.f32.mrb[1].mxu1 }
  0xfd   :  { %v162_v51 = vadd.f32 %v196_v44, %v151_v47  ;;  %v164_v52 = vadd.f32 %v196_v44, %v153_v48 }
  0xfe   :  { %v130_v53 = vpop.f32.mrb[2].mxu0  ;;  %v140_v54 = vpop.f32.mrb[2].mxu1 }
  0xff   :  { %v168_v55 = vmax.f32 %v162_v51, 0.0  ;;  %v170_v56 = vmax.f32 %v164_v52, 0.0  ;;  %v152_v57 = vmul.f32 %v195_v42, %v130_v53  ;;  %v154_v58 = vmul.f32 %v195_v42, %v140_v54  ;;  %v132_v59 = vpop.f32.mrb[3].mxu0  ;;  %v142_v60 = vpop.f32.mrb[3].mxu1 }
 0x101   :  { %v178_v61 = vsel %vm177_vm2, %v168_v55, %v162_v51  ;;  %v180_v62 = vsel %vm177_vm2, %v170_v56, %v164_v52  ;;  %v163_v63 = vadd.f32 %v196_v44, %v152_v57  ;;  %v165_v0 = vadd.f32 %v196_v44, %v154_v58 }
 0x102   :  { %183 = vst.msk [vmem:[%s410_s5] sm:$0xff] %vm182_vm3, %v178_v61  ;;  %185 = vst.msk [vmem:[%s410_s5 + $0x10] sm:$0xff] %vm182_vm3, %v180_v62 }
 0x103   :  { %v169_v1 = vmax.f32 %v163_v63, 0.0  ;;  %v171_v2 = vmax.f32 %v165_v0, 0.0 }
 0x105   :  { %v179_v3 = vsel %vm177_vm2, %v169_v1, %v163_v63  ;;  %v181_v4 = vsel %vm177_vm2, %v171_v2, %v165_v0 }
 0x106   :  { %184 = vst.msk [vmem:[%s410_s5 + $0x8] sm:$0xff] %vm182_vm3, %v179_v3  ;;  %186 = vst.msk [vmem:[%s410_s5 + $0x18] sm:$0xff] %vm182_vm3, %v181_v4 }

// kernel: embedding_map_net_forward.16
= control target key start
LH: loop header
LB: loop body
LE: loop exit
PB: predicated region body
PF: predicated region fallthrough
CT: control target
= control target key end

     0   :  { %vm68_vm0 = vcmask 261120   ;;  %s617_s1 = inlined_call_operand.vmem [shape: f32[288,32], index: 1, kind: input, shape index: {}]   ;;  %s618_s0 = inlined_call_operand.vmem [shape: f32[32,288], index: 0, kind: input, shape index: {}]   ;;  %s619_s2 = inlined_call_operand.vmem [shape: f32[1,32], index: 2, kind: input, shape index: {}]   ;;  %s620_s3 = inlined_call_operand.vmem [shape: f32[1,32], index: 3, kind: input, shape index: {}]   ;;  %s621_s4 = inlined_call_operand.vmem [shape: f32[32,32], index: 4, kind: input, shape index: {}]   ;;  %s622_s5 = inlined_call_operand.vmem [shape: f32[32,32], index: 5, kind: output, shape index: {}]  }
   0x1   :  { %v48_v0 = vld [vmem:[%s617_s1 + $0x80] sm:$0xff]  ;;  %v49_v1 = vld [vmem:[%s617_s1 + $0x88] sm:$0xff]  ;;  %v50_v5 = vld [vmem:[%s617_s1 + $0x90] sm:$0xff] }
   0x2   :  { %v32_v2 = vld [vmem:[%s617_s1] sm:$0xff]  ;;  %v365_v3 = vpack.c.bf16 %v49_v1, %v48_v0  ;;  %v33_v4 = vld [vmem:[%s617_s1 + $0x8] sm:$0xff]  ;;  %v51_v6 = vld [vmem:[%s617_s1 + $0x98] sm:$0xff] }
   0x3   :  { %v367_v7 = vpack.c.bf16 %v33_v4, %v32_v2  ;;  %v369_v8 = vpack.c.bf16 %v51_v6, %v50_v5  ;;  %v34_v9 = vld [vmem:[%s617_s1 + $0x10] sm:$0xff]  ;;  %v35_v10 = vld [vmem:[%s617_s1 + $0x18] sm:$0xff]  ;;  %v52_v11 = vld [vmem:[%s617_s1 + $0xa0] sm:$0xff] }
   0x4   :  { %366 = vmatprep.subr.bf16.mxu0 %v365_v3  ;;  %v53_v12 = vld [vmem:[%s617_s1 + $0xa8] sm:$0xff]  ;;  %v371_v13 = vpack.c.bf16 %v35_v10, %v34_v9  ;;  %v36_v15 = vld [vmem:[%s617_s1 + $0x20] sm:$0xff]  ;;  %v54_v17 = vld [vmem:[%s617_s1 + $0xb0] sm:$0xff] }
   0x5   :  { %368 = vmatpush3.bf16.msra.mxu0 %v367_v7  ;;  %v373_v14 = vpack.c.bf16 %v53_v12, %v52_v11  ;;  %v37_v16 = vld [vmem:[%s617_s1 + $0x28] sm:$0xff]  ;;  %v55_v18 = vld [vmem:[%s617_s1 + $0xb8] sm:$0xff]  ;;  %v38_v20 = vld [vmem:[%s617_s1 + $0x30] sm:$0xff] }
   0x6   :  { %370 = vmatprep.subr.bf16.mxu0 %v369_v8  ;;  %v375_v19 = vpack.c.bf16 %v37_v16, %v36_v15  ;;  %v377_v21 = vpack.c.bf16 %v55_v18, %v54_v17  ;;  %v39_v22 = vld [vmem:[%s617_s1 + $0x38] sm:$0xff]  ;;  %v64_v23 = vld [vmem:[%s617_s1 + $0x100] sm:$0xff]  ;;  %v65_v24 = vld [vmem:[%s617_s1 + $0x108] sm:$0xff] }
   0x7   :  { %v56_v25 = vld [vmem:[%s617_s1 + $0xc0] sm:$0xff]  ;;  %v57_v26 = vld [vmem:[%s617_s1 + $0xc8] sm:$0xff]  ;;  %v397_v27 = vpack.c.bf16 %v65_v24, %v64_v23  ;;  %v66_v28 = vld [vmem:[%s617_s1 + $0x110] sm:$0xff]  ;;  %v379_v30 = vpack.c.bf16 %v39_v22, %v38_v20 }
   0x8   :  { %v67_v29 = vld [vmem:[%s617_s1 + $0x118] sm:$0xff]  ;;  %v21_v32 = vld [vmem:[%s618_s0 + $0x8] sm:$0xff]  ;;  %v22_v33 = vld [vmem:[%s618_s0 + $0x10] sm:$0xff]  ;;  %v381_v34 = vpack.c.bf16 %v57_v26, %v56_v25 }
   0x9   :  { %372 = vmatpush3.bf16.msra.mxu0 %v371_v13  ;;  %398 = vmatprep.subr.bf16.mxu1 %v397_v27  ;;  %v401_v31 = vpack.c.bf16 %v67_v29, %v66_v28  ;;  %v40_v35 = vld [vmem:[%s617_s1 + $0x40] sm:$0xff]  ;;  %v41_v36 = vld [vmem:[%s617_s1 + $0x48] sm:$0xff]  ;;  %v58_v37 = vld [vmem:[%s617_s1 + $0xd0] sm:$0xff] }
   0xa   :  { %374 = vmatprep.subr.bf16.mxu0 %v373_v14  ;;  %400 = vmatpush3.bf16.msra.mxu1 %v397_v27  ;;  %v59_v38 = vld [vmem:[%s617_s1 + $0xd8] sm:$0xff]  ;;  %v383_v39 = vpack.c.bf16 %v41_v36, %v40_v35  ;;  %v42_v41 = vld [vmem:[%s617_s1 + $0x50] sm:$0xff]  ;;  %v25_v43 = vld [vmem:[%s618_s0 + $0x28] sm:$0xff] }
   0xb   :  { %402 = vmatprep.subr.bf16.mxu1 %v401_v31  ;;  %145 = vmatprep.mubr.f32.mxu0 %v21_v32  ;;  %v385_v40 = vpack.c.bf16 %v59_v38, %v58_v37  ;;  %v43_v42 = vld [vmem:[%s617_s1 + $0x58] sm:$0xff]  ;;  %v60_v44 = vld [vmem:[%s617_s1 + $0xe0] sm:$0xff]  ;;  %v61_v45 = vld [vmem:[%s617_s1 + $0xe8] sm:$0xff] }
   0xc   :  { %359 = vmatprep.mubr.msk.f32.mxu1 %vm68_vm0, %v22_v33  ;;  %v28_v46 = vld [vmem:[%s618_s0 + $0x40] sm:$0xff]  ;;  %v387_v47 = vpack.c.bf16 %v43_v42, %v42_v41  ;;  %v389_v48 = vpack.c.bf16 %v61_v45, %v60_v44  ;;  %v45_v50 = vld [vmem:[%s617_s1 + $0x68] sm:$0xff]  ;;  %v31_v51 = vld [vmem:[%s618_s0 + $0x58] sm:$0xff] }
   0xd   :  { %376 = vmatpush3.bf16.msra.mxu0 %v375_v19  ;;  %v44_v49 = vld [vmem:[%s617_s1 + $0x60] sm:$0xff]  ;;  %v62_v52 = vld [vmem:[%s617_s1 + $0xf0] sm:$0xff]  ;;  %v63_v53 = vld [vmem:[%s617_s1 + $0xf8] sm:$0xff] }
   0xe   :  { %378 = vmatprep.subr.bf16.mxu0 %v377_v21  ;;  %404 = vmatpush3.bf16.msra.mxu1 %v401_v31  ;;  %v391_v54 = vpack.c.bf16 %v45_v50, %v44_v49  ;;  %v393_v55 = vpack.c.bf16 %v63_v53, %v62_v52  ;;  %v46_v56 = vld [vmem:[%s617_s1 + $0x70] sm:$0xff]  ;;  %v47_v57 = vld [vmem:[%s617_s1 + $0x78] sm:$0xff]  ;;  %v20_v59 = vld [vmem:[%s618_s0] sm:$0xff] }
   0xf   :  { %v395_v58 = vpack.c.bf16 %v47_v57, %v46_v56  ;;  %v24_v60 = vld [vmem:[%s618_s0 + $0x20] sm:$0xff]  ;;  %v23_v61 = vld [vmem:[%s618_s0 + $0x18] sm:$0xff]  ;;  %v26_v63 = vld [vmem:[%s618_s0 + $0x30] sm:$0xff] }
  0x10   :  { %v27_v62 = vld [vmem:[%s618_s0 + $0x38] sm:$0xff]  ;;  %v30_v0 = vld [vmem:[%s618_s0 + $0x50] sm:$0xff]  ;;  %v29_v1 = vld [vmem:[%s618_s0 + $0x48] sm:$0xff] }
  0x11   :  { %380 = vmatpush3.bf16.msra.mxu0 %v379_v30  ;;  %360 = vmatmul.mubr.msk.f32.vlgmr.msra.gmra.mrb[0].mxu1 %vm68_vm0, %v25_v43  ;;  %v297_v9 = vld [vmem:[%s619_s2] ss:$0 sm:$0xff]  ;;  %v274_v24 = vld [vmem:[%s621_s4 + $0x8] sm:$0xff]  ;;  %v275_v33 = vld [vmem:[%s621_s4 + $0x10] sm:$0xff] }
  0x12   :  { %382 = vmatprep.subr.bf16.mxu0 %v381_v34  ;;  %362 = vmatprep.mubr.msk.f32.mxu1 %vm68_vm0, %v28_v46  ;;  %v298_v12 = vld [vmem:[%s620_s3] ss:$0 sm:$0xff] }
  0x13   :  { %v273_v16 = vld [vmem:[%s621_s4] sm:$0xff] }
  0x15   :  { %384 = vmatpush3.bf16.msra.mxu0 %v383_v39  ;;  %363 = vmatmul.mubr.msk.f32.gmra.mrb[2].mxu1 %vm68_vm0, %v31_v51  ;;  %v276_v39 = vld [vmem:[%s621_s4 + $0x18] sm:$0xff] }
  0x16   :  { %386 = vmatprep.subr.bf16.mxu0 %v385_v40 }
  0x19   :  { %388 = vmatpush3.bf16.msra.mxu0 %v387_v47 }
  0x1a   :  { %390 = vmatprep.subr.bf16.mxu0 %v389_v48 }
  0x1d   :  { %392 = vmatpush3.bf16.msra.mxu0 %v391_v54 }
  0x1e   :  { %394 = vmatprep.subr.bf16.mxu0 %v393_v55 }
  0x21   :  { %396 = vmatpush3.bf16.msra.mxu0 %v395_v58 }
  0x24   :  { %146 = vmatmul.mubr.f32.vlgmr.msra.gmra.mrb[0].mxu0 %v20_v59 }
  0x25   :  { %150 = vmatprep.mubr.f32.mxu0 %v24_v60 }
  0x28   :  { %151 = vmatmul.mubr.f32.gmra.mrb[2].mxu0 %v23_v61 }
  0x29   :  { %155 = vmatprep.mubr.f32.mxu0 %v27_v62 }
  0x2c   :  { %156 = vmatmul.mubr.f32.gmra.mrb[4].mxu0 %v26_v63 }
  0x2d   :  { %160 = vmatprep.mubr.f32.mxu0 %v30_v0 }
  0x30   :  { %161 = vmatmul.mubr.f32.gmra.mrb[6].mxu0 %v29_v1 }
  0xe4   :  { %v361_v2 = vpop.f32.mrb[0].mxu1 }
  0xe5   :  { %v232_v3 = vpop.f32.mrb[1].mxu1 }
  0xe8   :  { %v364_v4 = vpop.f32.mrb[2].mxu1 }
  0xe9   :  { %v242_v5 = vpop.f32.mrb[3].mxu1 }
  0xf7   :  { %v331_v6 = vpop.f32.mrb[0].mxu0 }
  0xf8   :  { %v332_v7 = vpop.f32.mrb[1].mxu0 }
  0xf9   :  { %v333_v8 = vadd.f32 %v332_v7, %v331_v6 }
  0xfb   :  { %v233_v10 = vadd.f32 %v333_v8, %v232_v3  ;;  %v334_v11 = vpop.f32.mrb[2].mxu0 }
  0xfc   :  { %v335_v13 = vpop.f32.mrb[3].mxu0 }
  0xfd   :  { %v258_v14 = vmul.f32 %v297_v9, %v233_v10  ;;  %v336_v15 = vadd.f32 %v335_v13, %v334_v11 }
  0xff   :  { %v269_v17 = vadd.f32 %v298_v12, %v258_v14  ;;  %v238_v18 = vadd.f32 %v361_v2, %v336_v15  ;;  %v337_v19 = vpop.f32.mrb[4].mxu0 }
 0x100   :  { %v338_v20 = vpop.f32.mrb[5].mxu0 }
 0x101   :  { %v277_v21 = vadd.f32 %v273_v16, %v269_v17  ;;  %v259_v22 = vmul.f32 %v297_v9, %v238_v18  ;;  %v339_v23 = vadd.f32 %v338_v20, %v337_v19 }
 0x103   :  { %v281_v25 = vmax.f32 %v277_v21, 0.0  ;;  %v270_v26 = vadd.f32 %v298_v12, %v259_v22  ;;  %v243_v27 = vadd.f32 %v339_v23, %v242_v5  ;;  %v340_v28 = vpop.f32.mrb[6].mxu0 }
 0x104   :  { %v341_v29 = vpop.f32.mrb[7].mxu0 }
 0x105   :  { %285 = vst.msk [vmem:[%s622_s5] sm:$0xff] %vm68_vm0, %v281_v25  ;;  %v278_v30 = vadd.f32 %v274_v24, %v270_v26  ;;  %v260_v31 = vmul.f32 %v297_v9, %v243_v27  ;;  %v342_v32 = vadd.f32 %v341_v29, %v340_v28 }
 0x107   :  { %v282_v34 = vmax.f32 %v278_v30, 0.0  ;;  %v271_v35 = vadd.f32 %v298_v12, %v260_v31  ;;  %v248_v36 = vadd.f32 %v364_v4, %v342_v32 }
 0x109   :  { %286 = vst.msk [vmem:[%s622_s5 + $0x8] sm:$0xff] %vm68_vm0, %v282_v34  ;;  %v279_v37 = vadd.f32 %v275_v33, %v271_v35  ;;  %v261_v38 = vmul.f32 %v297_v9, %v248_v36 }
 0x10b   :  { %v283_v40 = vmax.f32 %v279_v37, 0.0  ;;  %v272_v41 = vadd.f32 %v298_v12, %v261_v38 }
 0x10d   :  { %287 = vst.msk [vmem:[%s622_s5 + $0x10] sm:$0xff] %vm68_vm0, %v283_v40  ;;  %v280_v42 = vadd.f32 %v276_v39, %v272_v41 }
 0x10f   :  { %v284_v43 = vmax.f32 %v280_v42, 0.0 }
 0x111   :  { %288 = vst.msk [vmem:[%s622_s5 + $0x18] sm:$0xff] %vm68_vm0, %v284_v43 }

// kernel: embedding_map_net_forward.17
= control target key start
LH: loop header
LB: loop body
LE: loop exit
PB: predicated region body
PF: predicated region fallthrough
CT: control target
= control target key end

     0   :  { %v60_v3 = vlaneseq  ;;  %v449_v8 = vmov 0.0|0.0   ;;  %v450_v9 = vmov 1983009808   ;;  %vm451_vm0 = vmmov 0   ;;  %s613_s0 = inlined_call_operand.vmem [shape: f32[2,288], index: 0, kind: input, shape index: {}]   ;;  %s614_s1 = inlined_call_operand.vmem [shape: f32[288,64], index: 1, kind: input, shape index: {}]   ;;  %s615_s2 = inlined_call_operand.vmem [shape: f32[1,64], index: 2, kind: input, shape index: {}]   ;;  %s616_s3 = inlined_call_operand.vmem [shape: f32[2,2], index: 3, kind: input, shape index: {}]   ;;  %s617_s4 = inlined_call_operand.hbm [shape: f32[2,64], index: 4, kind: output, shape index: {}]  }
   0x1   :  { %v35_v0 = vld [vmem:[%s614_s1 + $0x80] sm:$0xff]  ;;  %v36_v1 = vld [vmem:[%s614_s1 + $0x88] sm:$0xff]  ;;  %v37_v6 = vld [vmem:[%s614_s1 + $0x90] sm:$0xff]  ;;  %413 = vmatprep.subr.bf16.mxu1 %v449_v8  ;;  %v58_v10 = vunpack.c.l.s4 %v450_v9  ;;  %v452_v16 = vmov 0.0  }
   0x2   :  { %v19_v2 = vld [vmem:[%s614_s1] sm:$0xff]  ;;  %v381_v4 = vpack.c.bf16 %v36_v1, %v35_v0  ;;  %v20_v5 = vld [vmem:[%s614_s1 + $0x8] sm:$0xff]  ;;  %v38_v7 = vld [vmem:[%s614_s1 + $0x98] sm:$0xff]  ;;  %373 = vmatprep.mubr.msk.f32.mxu1 %vm451_vm0, %v452_v16  ;;  %v61_v20 = vshrl.u32 %v60_v3, 7 }
   0x3   :  { %v383_v11 = vpack.c.bf16 %v20_v5, %v19_v2  ;;  %v385_v12 = vpack.c.bf16 %v38_v7, %v37_v6  ;;  %v21_v13 = vld [vmem:[%s614_s1 + $0x10] sm:$0xff]  ;;  %v22_v14 = vld [vmem:[%s614_s1 + $0x18] sm:$0xff]  ;;  %v39_v15 = vld [vmem:[%s614_s1 + $0xa0] sm:$0xff]  ;;  %v59_v19 = vunpack.c.0.s8 %v58_v10 }
   0x4   :  { %382 = vmatprep.subr.bf16.mxu0 %v381_v4  ;;  %v40_v17 = vld [vmem:[%s614_s1 + $0xa8] sm:$0xff]  ;;  %v387_v18 = vpack.c.bf16 %v22_v14, %v21_v13  ;;  %v23_v22 = vld [vmem:[%s614_s1 + $0x20] sm:$0xff]  ;;  %v41_v24 = vld [vmem:[%s614_s1 + $0xb0] sm:$0xff] }
   0x5   :  { %384 = vmatpush3.bf16.msra.mxu0 %v383_v11  ;;  %v389_v21 = vpack.c.bf16 %v40_v17, %v39_v15  ;;  %v24_v23 = vld [vmem:[%s614_s1 + $0x28] sm:$0xff]  ;;  %v42_v25 = vld [vmem:[%s614_s1 + $0xb8] sm:$0xff]  ;;  %v25_v27 = vld [vmem:[%s614_s1 + $0x30] sm:$0xff]  ;;  %v62_v28 = vsub.s32 %v59_v19, %v61_v20 }
   0x6   :  { %386 = vmatprep.subr.bf16.mxu0 %v385_v12  ;;  %v391_v26 = vpack.c.bf16 %v24_v23, %v23_v22  ;;  %v393_v29 = vpack.c.bf16 %v42_v25, %v41_v24  ;;  %v26_v30 = vld [vmem:[%s614_s1 + $0x38] sm:$0xff]  ;;  %v51_v31 = vld [vmem:[%s614_s1 + $0x100] sm:$0xff]  ;;  %v52_v32 = vld [vmem:[%s614_s1 + $0x108] sm:$0xff] }
   0x7   :  { %v43_v33 = vld [vmem:[%s614_s1 + $0xc0] sm:$0xff]  ;;  %v44_v34 = vld [vmem:[%s614_s1 + $0xc8] sm:$0xff]  ;;  %v414_v35 = vpack.c.bf16 %v52_v32, %v51_v31  ;;  %v53_v37 = vld [vmem:[%s614_s1 + $0x110] sm:$0xff]  ;;  %v395_v38 = vpack.c.bf16 %v26_v30, %v25_v27 }
   0x8   :  { %v18_v36 = vld [vmem:[%s613_s0] sm:$0x3f]  ;;  %v54_v41 = vld [vmem:[%s614_s1 + $0x118] sm:$0xff] }
   0x9   :  { %388 = vmatpush3.bf16.msra.mxu0 %v387_v18  ;;  %415 = vmatpush3.bf16.msra.mxu1 %v414_v35  ;;  %v56_v39 = vcombine.high %v18_v36, %v18_v36  ;;  %v63_v40 = vrot.slane %v18_v36, %v62_v28 }
   0xa   :  { %390 = vmatprep.subr.bf16.mxu0 %v389_v21 }
   0xd   :  { %392 = vmatpush3.bf16.msra.mxu0 %v391_v26 }
   0xe   :  { %9 = vsyncpa [#allocation3], 0  ;;  %394 = vmatprep.subr.bf16.mxu0 %v393_v29  ;;  %v397_v42 = vpack.c.bf16 %v44_v34, %v43_v33  ;;  %v27_v43 = vld [vmem:[%s614_s1 + $0x40] sm:$0xff]  ;;  %v28_v44 = vld [vmem:[%s614_s1 + $0x48] sm:$0xff]  ;;  %416 = vmatprep.subr.bf16.mxu1 %v449_v8  ;;  %v417_v45 = vpack.c.bf16 %v54_v41, %v53_v37  ;;  %v71_v48 = vcombine.high %v63_v40, %v63_v40  ;;  %vm74_vm1 = vcmask 261120   ;;  %s453_s12 = smov [#allocation2]  }
   0xf   :  { %v45_v46 = vld [vmem:[%s614_s1 + $0xd0] sm:$0xff]  ;;  %v46_v47 = vld [vmem:[%s614_s1 + $0xd8] sm:$0xff]  ;;  %v399_v49 = vpack.c.bf16 %v28_v44, %v27_v43  ;;  %v70_v50 = vrot.slane %v56_v39, %v62_v28  ;;  %v47_v54 = vld [vmem:[%s614_s1 + $0xe0] sm:$0xff]  ;;  %vm229_vm2 = vcmask 1041408   ;;  %vm225_vm3 = vcmask 15360   ;;  %s311_s13 = sshll.u32 %s453_s12, 4  ;;  %s312_s13 = int_to_ptr.vmem [resolvable:$true] %s311_s13 }
  0x10   :  { %141 = vmatprep.mubr.f32.mxu0 %v71_v48  ;;  %v401_v51 = vpack.c.bf16 %v46_v47, %v45_v46  ;;  %v29_v52 = vld [vmem:[%s614_s1 + $0x50] sm:$0xff]  ;;  %v30_v53 = vld [vmem:[%s614_s1 + $0x58] sm:$0xff]  ;;  %418 = vmatpush3.bf16.msra.mxu1 %v417_v45  ;;  %v48_v55 = vld [vmem:[%s614_s1 + $0xe8] sm:$0xff]  ;;  %vm303_vm4 = vcmask 517120   ;;  %s425_s14 = scalar_lea.vmem %s312_s13, 32  ;;  %p430_p1 = scmp.lt.s32.totalorder %s312_s13, %s312_s13 }
  0x11   :  { %396 = vmatpush3.bf16.msra.mxu0 %v395_v38  ;;  %376 = vmatprep.subr.mxu1 %v452_v16  ;;  %v403_v56 = vpack.c.bf16 %v30_v53, %v29_v52  ;;  %v405_v57 = vpack.c.bf16 %v48_v55, %v47_v54  ;;  %v31_v58 = vld [vmem:[%s614_s1 + $0x60] sm:$0xff]  ;;  %v32_v59 = vld [vmem:[%s614_s1 + $0x68] sm:$0xff]  ;;  %v49_v60 = vld [vmem:[%s614_s1 + $0xf0] sm:$0xff]  ;;  %p426_p0 = scmp.ne.s32.totalorder %s312_s13, %s425_s14  ;;  %p431_p2 = scmp.lt.s32.totalorder %s425_s14, %s425_s14 }
  0x12   :  { %398 = vmatprep.subr.bf16.mxu0 %v397_v42  ;;  %v50_v61 = vld [vmem:[%s614_s1 + $0xf8] sm:$0xff]  ;;  %v407_v62 = vpack.c.bf16 %v32_v59, %v31_v58  ;;  %v33_v0 = vld [vmem:[%s614_s1 + $0x70] sm:$0xff]  ;;  %v217_v9 = vld [vmem:[%s616_s3] sm:$0x3] }
  0x13   :  { %374 = vmatmul.mubr.msk.f32.vlgmr.msra.gmra.mrb[0].mxu1 %vm74_vm1, %v70_v50  ;;  %v409_v63 = vpack.c.bf16 %v50_v61, %v49_v60  ;;  %v34_v1 = vld [vmem:[%s614_s1 + $0x78] sm:$0xff]  ;;  %v320_v10 = vld [vmem:[%s615_s2] ss:$0 sm:$0xff]  ;;  %p432_p3 = por %p431_p2, %p430_p1 }
  0x14   :  { %378 = vmatprep.mubr.msk.f32.mxu1 %vm451_vm0, %v452_v16  ;;  %v411_v2 = vpack.c.bf16 %v34_v1, %v33_v0 }
  0x15   :  { %400 = vmatpush3.bf16.msra.mxu0 %v399_v49  ;;  %p433_p4 = pnand %p432_p3, %p426_p0 }
  0x16   :  { %402 = vmatprep.subr.bf16.mxu0 %v401_v51 }
  0x19   :  { %404 = vmatpush3.bf16.msra.mxu0 %v403_v56 }
  0x1a   :  { %406 = vmatprep.subr.bf16.mxu0 %v405_v57 }
  0x1d   :  { %408 = vmatpush3.bf16.msra.mxu0 %v407_v62 }
  0x1e   :  { %410 = vmatprep.subr.bf16.mxu0 %v409_v63 }
  0x21   :  { %412 = vmatpush3.bf16.msra.mxu0 %v411_v2 }
  0x24   :  { %142 = vmatmul.mubr.f32.vlgmr.msra.gmra.mrb[0].mxu0 %v63_v40 }
  0xe6   :  { %v213_v3 = vpop.f32.mrb[0].mxu1 }
  0xe7   :  { %v375_v4 = vpop.f32.mrb[1].mxu1 }
  0xf7   :  { %v355_v5 = vpop.f32.mrb[0].mxu0 }
  0xf8   :  { %v356_v6 = vpop.f32.mrb[1].mxu0 }
  0xf9   :  { %v357_v7 = vadd.f32 %v356_v6, %v355_v5 }
  0xfb   :  { %v214_v8 = vadd.f32 %v357_v7, %v213_v3 }
  0xfd   :  { %377 = vmatpush3.msk.msra.mxu1 %vm229_vm2, %v214_v8 }
  0xfe   :  { %379 = vmatmul.mubr.msk.f32.vlgmr.msra.gmra.mrb[2].mxu1 %vm225_vm3, %v217_v9 }
 0x1d1   :  { %v299_v11 = vpop.f32.mrb[2].mxu1 }
 0x1d2   :  { %v300_v12 = vadd.f32 %v320_v10, %v299_v11  ;;  %v380_v13 = vpop.f32.mrb[3].mxu1 }
 0x1d4   :  { %304 = vst.msk [vmem:[#allocation2] sm:$0x3] %vm303_vm4, %v300_v12 }
 0x1d5   :  { %436 = shalt.err (!%p433_p4)
}
 0x1d6   :  { %s437_s16 = scalar_lea.hbm %s617_s4, 32 }
 0x1d7   :  { %p438_p5 = scmp.ne.s32.totalorder %s617_s4, %s437_s16  ;;  %p441_p6 = scmp.lt.u32.totalorder %s437_s16, %s617_s4 }
 0x1d9   :  { %p443_p7 = pnand %p441_p6, %p438_p5 }
 0x1db   :  { %446 = shalt.err (!%p443_p7)
}
 0x1dc   :  { %314 = dma.vmem_to_hbm [thread:$0]  %s312_s13, 32, %s617_s4, [#allocation3]  }
 0x1dd   :  { %447 = dma.done.wait [#allocation3], 32  }
 0x1de   :  { %448 = vsyncadd [#allocation3], 4294967264 }
 0x1df   :  { %318 = vsyncpa [#allocation3], 1 }

</bundles_post_ra>
